<compile_context>
chip_gen: v6e
topology: v6e:2x2x1
jax: 0.10.0
libtpu: 0.0.40
codegen_flags: <defaults>
</compile_context>

<pallas_src>
import functools

import numpy as np

import jax
import jax.numpy as jnp
from jax.experimental import pallas as pl
from jax.experimental.pallas import tpu as pltpu


_VMEM_SPEC = pl.BlockSpec(memory_space=pltpu.MemorySpace.VMEM)
_SMEM_SPEC = pl.BlockSpec(memory_space=pltpu.MemorySpace.SMEM)


def _vmem_limit_bytes():
    # Re-derive the VMEM budget per generation (v7x: 64 MiB, v5e/v6e: 128 MiB).
    try:
        cap = int(pltpu.get_tpu_info().vmem_capacity_bytes)
    except Exception:
        cap = 64 * 1024 * 1024
    return int(max(32 * 1024 * 1024, min(100 * 1024 * 1024, (cap * 3) // 4)))


# ----------------------------------------------------------------------------
# host-side helpers (pure data rearrangement / constant builders)
# ----------------------------------------------------------------------------
def _conv_out(n):
    # Conv2d(kernel=3, stride=2, padding=1) output size
    return (n + 1) // 2


def _im2col_3x3_s2(x_nhwc):
    """Host-side (XLA) 3x3 / stride-2 / pad-1 im2col.
    x: (N, H, W, C) -> (N*Ho*Wo, 9*C); columns ordered (tap, channel)."""
    n, h, w, c = x_nhwc.shape
    ho, wo = _conv_out(h), _conv_out(w)
    xp = jnp.pad(x_nhwc, ((0, 0), (1, 2 * ho - h), (1, 2 * wo - w), (0, 0)))
    taps = [xp[:, kh:kh + 2 * ho:2, kw:kw + 2 * wo:2, :]
            for kh in range(3) for kw in range(3)]
    pat = jnp.concatenate(taps, axis=-1)                 # (N, Ho, Wo, 9C)
    return pat.reshape(n * ho * wo, 9 * c)


def _gather_spatial_3x3_s2(h, w):
    """(9*Ho*Wo, H*W) 0/1 spatial gather for the small inner convs.
    Rows ordered tap-major, output-position-minor."""
    ho, wo = _conv_out(h), _conv_out(w)
    g = np.zeros((9 * ho * wo, h * w), np.float32)
    for kh in range(3):
        for kw in range(3):
            k = kh * 3 + kw
            for oh in range(ho):
                ih = 2 * oh + kh - 1
                if not (0 <= ih < h):
                    continue
                for ow in range(wo):
                    iw = 2 * ow + kw - 1
                    if not (0 <= iw < w):
                        continue
                    g[k * ho * wo + oh * wo + ow, ih * w + iw] = 1.0
    return g


def _dense_conv_w(w):
    """torch (Cout, Cin, 3, 3) -> dense (9*Cin, Cout), rows ordered (tap, cin)."""
    w = np.asarray(w, np.float32)
    cout, cin = w.shape[0], w.shape[1]
    return np.transpose(w, (2, 3, 1, 0)).reshape(9 * cin, cout)


def _row(v):
    return np.asarray(v, np.float32)[None, :]


# ----------------------------------------------------------------------------
# in-kernel helpers
# ----------------------------------------------------------------------------
def _inner_patches(h, g, n_samples, s_in, s_out):
    """h: (n_samples*s_in, C) f32 activations; g: (9*s_out, s_in) f32 gather.
    Returns (n_samples*s_out, 9*C) f32 patches (columns ordered (tap, c))."""
    pieces = []
    for n in range(n_samples):
        p = jnp.dot(g, h[n * s_in:(n + 1) * s_in, :],
                    preferred_element_type=jnp.float32)          # (9*s_out, C)
        pieces.append(jnp.concatenate(
            [p[k * s_out:(k + 1) * s_out, :] for k in range(9)], axis=1))
    return jnp.concatenate(pieces, axis=0)


# ----------------------------------------------------------------------------
# Pallas kernels
# ----------------------------------------------------------------------------
def _loss_head_kernel(xi_ref, xr_ref, mu_ref, plv_ref, pat1_ref, g2_ref,
                      w1_ref, b1_ref, w2_ref, b2_ref, lin0_ref, lin1_ref,
                      rec_ref, kl_ref, *, pw, nb, s1, s2, s_in):
    xi = xi_ref[...]                                  # (B, S_in) lane-dense f32
    xr = xr_ref[...]
    abs_sum = jnp.sum(jnp.abs(xi - xr))               # exact f32 L1

    if pw > 0.0:
        # Synthetic LPAPS perceptual features (2 convs + relu); xi & xr batched.
        # TODO(synk): the real LPAPS uses a pretrained melception backbone.
        f1 = jnp.maximum(
            jnp.dot(pat1_ref[...].astype(jnp.bfloat16), w1_ref[...],
                    preferred_element_type=jnp.float32) + b1_ref[...], 0.0)
        # TODO(synk): the (9*S2, S1) spatial gather for conv2 still scales with
        # the full spectrogram; production T wants a tiled parity-split pipeline.
        pat2 = _inner_patches(f1, g2_ref[...], nb, s1, s2)
        f2 = jnp.maximum(
            jnp.dot(pat2.astype(jnp.bfloat16), w2_ref[...],
                    preferred_element_type=jnp.float32) + b2_ref[...], 0.0)

        def lpips(f, lin_row, s_sp):
            ss = jnp.sum(f * f, axis=1, keepdims=True)
            fn = f * jax.lax.rsqrt(ss + 1e-10)         # EUP rsqrt, not sqrt+div
            half = (nb // 2) * s_sp
            d = fn[:half, :] - fn[half:, :]
            return jnp.sum(d * d * lin_row) / float(s_sp)   # spatial-mean, batch-sum

        p_total = lpips(f1, lin0_ref[...], s1) + lpips(f2, lin1_ref[...], s2)
        rec_sum = abs_sum + (pw * s_in) * p_total
    else:
        rec_sum = abs_sum

    mu = mu_ref[...]
    plv = plv_ref[...]
    kl_sum = 0.5 * jnp.sum(mu * mu + jnp.exp(plv) - 1.0 - plv)

    rec_ref[0, 0] = rec_sum
    kl_ref[0, 0] = kl_sum


def _disc_kernel(pat1_ref, g2_ref, g3_ref,
                 w1_ref, b1_ref, gam1_ref, bet1_ref,
                 w2_ref, b2_ref, gam2_ref, bet2_ref,
                 w3_ref, b3_ref, advw_ref,
                 out_ref, *, b, s1, s2, s3, slope, bn_eps):
    def lrelu(x):
        return jnp.where(x >= 0.0, x, slope * x)

    def bnorm(h, gam, bet, cnt):
        # training-mode batch stats (biased var) over this real/fake group only
        inv = 1.0 / float(cnt)
        mean = jnp.sum(h, axis=0, keepdims=True) * inv
        xc = h - mean
        var = jnp.sum(xc * xc, axis=0, keepdims=True) * inv
        return xc * jax.lax.rsqrt(var + bn_eps) * gam + bet

    # conv1: fused K=9 GEMM on the host-prepared im2col slab
    h1 = lrelu(jnp.dot(pat1_ref[...].astype(jnp.bfloat16), w1_ref[...],
                       preferred_element_type=jnp.float32) + b1_ref[...])
    # TODO(synk): Dropout2d(0.25) in the reference is stochastic; identity here.
    h1 = bnorm(h1, gam1_ref[...], bet1_ref[...], b * s1)   # BatchNorm2d(h, 0.8) quirk

    # conv2 / conv3: small spatial gathers + fused K=9*C GEMMs
    pat2 = _inner_patches(h1, g2_ref[...], b, s1, s2)
    h2 = lrelu(jnp.dot(pat2.astype(jnp.bfloat16), w2_ref[...],
                       preferred_element_type=jnp.float32) + b2_ref[...])
    h2 = bnorm(h2, gam2_ref[...], bet2_ref[...], b * s2)

    pat3 = _inner_patches(h2, g3_ref[...], b, s2, s3)
    h3 = lrelu(jnp.dot(pat3.astype(jnp.bfloat16), w3_ref[...],
                       preferred_element_type=jnp.float32) + b3_ref[...])

    # adversarial head: per-sample dot with the (S3, C)-reordered Linear weight
    advw = advw_ref[...]
    lane = jax.lax.broadcasted_iota(jnp.int32, (8, 128), 1)
    row = jnp.zeros((8, 128), jnp.float32)
    for n in range(b):
        logit = jnp.sum(h3[n * s3:(n + 1) * s3, :] * advw)
        row = jnp.where(lane == n, logit, row)
    out_ref[...] = row                                      # lane-dense (8,128) block


# ----------------------------------------------------------------------------
# loss helper functions from the reference file
# ----------------------------------------------------------------------------
def adopt_weight(weight, global_step, threshold=0, value=0.0):
    return weight if global_step >= threshold else value


def hinge_d_loss(logits_real, logits_fake):
    loss_real = jnp.mean(jax.nn.relu(1.0 - logits_real))
    loss_fake = jnp.mean(jax.nn.relu(1.0 + logits_fake))
    return 0.5 * (loss_real + loss_fake)


def vanilla_d_loss(logits_real, logits_fake):
    return 0.5 * (jnp.mean(jax.nn.softplus(-logits_real)) +
                  jnp.mean(jax.nn.softplus(logits_fake)))


# ----------------------------------------------------------------------------
# Module
# ----------------------------------------------------------------------------
class LPAPSWithDiscriminatorPallas:
    def __init__(self, disc_start, key, logvar_init=0.0, kl_weight=1.0,
                 pixelloss_weight=1.0, time_lengths=(8, 16), freq_length=16,
                 hidden_size=32, disc_factor=1.0, disc_weight=1.0,
                 perceptual_weight=1.0, disc_conditional=False, disc_loss='hinge'):
        assert disc_loss in ['hinge', 'vanilla']
        self.kl_weight = kl_weight
        self.pixel_weight = pixelloss_weight
        self.perceptual_weight = perceptual_weight
        self.logvar = jnp.asarray(logvar_init, jnp.float32)
        self.discriminator_iter_start = disc_start
        self.disc_loss = hinge_d_loss if disc_loss == 'hinge' else vanilla_d_loss
        self.disc_factor = disc_factor
        self.discriminator_weight = disc_weight
        self.disc_conditional = disc_conditional
        self.time_lengths = tuple(time_lengths)
        self.freq_length = freq_length

        k_disc, k_perc = jax.random.split(key)
        self.d_params = self._init_disc_params(k_disc, self.time_lengths,
                                                freq_length, hidden_size)
        self.p_params = self._init_lpaps_params(k_perc)

        self._head_cache = {}
        self._disc_cache = {}

    # --- parameter init (weights_init-style) --------------------------------
    @staticmethod
    def _init_disc_params(key, time_lengths, freq_length, hidden):
        params = []
        for tl in time_lengths:
            keys = jax.random.split(key, 7)
            key = keys[-1]
            h3 = _conv_out(_conv_out(_conv_out(tl)))
            w3 = _conv_out(_conv_out(_conv_out(freq_length)))
            flat = hidden * h3 * w3
            params.append({
                'c1_w': 0.02 * jax.random.normal(keys[0], (hidden, 1, 3, 3), jnp.float32),
                'c1_b': jnp.zeros((hidden,), jnp.float32),
                'bn1_g': 1.0 + 0.02 * jax.random.normal(keys[1], (hidden,), jnp.float32),
                'bn1_b': jnp.zeros((hidden,), jnp.float32),
                'c2_w': 0.02 * jax.random.normal(keys[2], (hidden, hidden, 3, 3), jnp.float32),
                'c2_b': jnp.zeros((hidden,), jnp.float32),
                'bn2_g': 1.0 + 0.02 * jax.random.normal(keys[3], (hidden,), jnp.float32),
                'bn2_b': jnp.zeros((hidden,), jnp.float32),
                'c3_w': 0.02 * jax.random.normal(keys[4], (hidden, hidden, 3, 3), jnp.float32),
                'c3_b': jnp.zeros((hidden,), jnp.float32),
                'adv_w': 0.02 * jax.random.normal(keys[5], (1, flat), jnp.float32),
                'adv_b': jnp.zeros((1,), jnp.float32),
            })
        return params

    @staticmethod
    def _init_lpaps_params(key):
        k = jax.random.split(key, 4)
        return {
            'c1_w': 0.1 * jax.random.normal(k[0], (8, 1, 3, 3), jnp.float32),
            'c1_b': jnp.zeros((8,), jnp.float32),
            'c2_w': 0.1 * jax.random.normal(k[1], (16, 8, 3, 3), jnp.float32),
            'c2_b': jnp.zeros((16,), jnp.float32),
            'lin0_w': jnp.abs(0.1 * jax.random.normal(k[2], (8,), jnp.float32)),
            'lin1_w': jnp.abs(0.1 * jax.random.normal(k[3], (16,), jnp.float32)),
        }

    # --- cached prepared constants + pallas_call closures -------------------
    def _prepared_head(self, b, n_mel, t):
        key = (b, n_mel, t)
        hit = self._head_cache.get(key)
        if hit is not None:
            return hit
        pp = self.p_params
        h1, w1 = _conv_out(n_mel), _conv_out(t)
        h2, w2 = _conv_out(h1), _conv_out(w1)
        s1, s2 = h1 * w1, h2 * w2
        consts = (
            jnp.asarray(_gather_spatial_3x3_s2(h1, w1), jnp.float32),
            jnp.asarray(_dense_conv_w(pp['c1_w']), jnp.bfloat16),
            jnp.asarray(_row(pp['c1_b']), jnp.float32),
            jnp.asarray(_dense_conv_w(pp['c2_w']), jnp.bfloat16),
            jnp.asarray(_row(pp['c2_b']), jnp.float32),
            jnp.asarray(_row(pp['lin0_w']), jnp.float32),
            jnp.asarray(_row(pp['lin1_w']), jnp.float32),
        )
        kern = functools.partial(
            _loss_head_kernel, pw=float(self.perceptual_weight),
            nb=2 * b, s1=int(s1), s2=int(s2), s_in=float(n_mel * t))
        call = pl.pallas_call(
            kern,
            out_shape=(jax.ShapeDtypeStruct((1, 1), jnp.float32),) * 2,
            in_specs=[_VMEM_SPEC] * 12,
            out_specs=(_SMEM_SPEC, _SMEM_SPEC),
            compiler_params=pltpu.CompilerParams(
                vmem_limit_bytes=_vmem_limit_bytes()))
        entry = (call, consts)
        self._head_cache[key] = entry
        return entry

    def _prepared_disc(self, widx, n_groups, b, n_mel):
        key = (widx, n_groups, b, n_mel)
        hit = self._disc_cache.get(key)
        if hit is not None:
            return hit
        p = self.d_params[widx]
        tl = self.time_lengths[widx]
        hidden = int(np.asarray(p['c1_w']).shape[0])
        h1, w1 = _conv_out(tl), _conv_out(n_mel)
        h2, w2 = _conv_out(h1), _conv_out(w1)
        h3, w3 = _conv_out(h2), _conv_out(w2)
        s1, s2, s3 = h1 * w1, h2 * w2, h3 * w3
        assert int(np.asarray(p['adv_w']).shape[1]) == hidden * s3
        adv_sp = np.asarray(p['adv_w'], np.float32).reshape(hidden, s3).T    # (S3, C)
        consts = (
            jnp.asarray(_gather_spatial_3x3_s2(h1, w1), jnp.float32),
            jnp.asarray(_gather_spatial_3x3_s2(h2, w2), jnp.float32),
            jnp.asarray(_dense_conv_w(p['c1_w']), jnp.bfloat16),
            jnp.asarray(_row(p['c1_b']), jnp.float32),
            jnp.asarray(_row(p['bn1_g']), jnp.float32),
            jnp.asarray(_row(p['bn1_b']), jnp.float32),
            jnp.asarray(_dense_conv_w(p['c2_w']), jnp.bfloat16),
            jnp.asarray(_row(p['c2_b']), jnp.float32),
            jnp.asarray(_row(p['bn2_g']), jnp.float32),
            jnp.asarray(_row(p['bn2_b']), jnp.float32),
            jnp.asarray(_dense_conv_w(p['c3_w']), jnp.bfloat16),
            jnp.asarray(_row(p['c3_b']), jnp.float32),
            jnp.asarray(adv_sp, jnp.float32),
        )

        def _const_spec(arr):
            shape = tuple(int(d) for d in arr.shape)
            zeros = (0,) * len(shape)
            return pl.BlockSpec(shape, lambda g, _z=zeros: _z)

        pat_spec = pl.BlockSpec((None, b * s1, 9), lambda g: (g, 0, 0))
        out_spec = pl.BlockSpec((None, 8, 128), lambda g: (g, 0, 0))
        kern = functools.partial(
            _disc_kernel, b=int(b), s1=int(s1), s2=int(s2), s3=int(s3),
            slope=0.2, bn_eps=0.8)
        call = pl.pallas_call(
            kern,
            out_shape=jax.ShapeDtypeStruct((n_groups, 8, 128), jnp.float32),
            grid=(n_groups,),
            in_specs=[pat_spec] + [_const_spec(c) for c in consts],
            out_specs=out_spec,
            compiler_params=pltpu.CompilerParams(
                dimension_semantics=("parallel",),
                vmem_limit_bytes=_vmem_limit_bytes()))
        entry = (call, consts)
        self._disc_cache[key] = entry
        return entry

    def _disc_logits(self, groups, widx, b, n_mel):
        """groups: list of (B, n_mel, T) spectrograms -> (len(groups), B) logits.
        All groups go through one pallas_call with a parallel grid over groups."""
        tl = self.time_lengths[widx]
        pats = []
        for x in groups:
            # TODO(synk): window start pinned to 0 (reference uses np.random.randint).
            xw = jnp.transpose(x[:, :, :tl], (0, 2, 1))[..., None]    # (B, tl, n_mel, 1)
            pats.append(_im2col_3x3_s2(xw))                           # (B*S1, 9)
        pat = jnp.stack(pats, axis=0)                                 # (G, B*S1, 9)
        call, consts = self._prepared_disc(widx, len(groups), b, n_mel)
        out = call(pat, *consts)                                      # (G, 8, 128)
        return out[:, 0, :b] + self.d_params[widx]['adv_b'][0]        # (G, B)

    # --- forward -------------------------------------------------------------
    def __call__(self, inputs, reconstructions, posterior_mean, posterior_logvar,
                 optimizer_idx, global_step, last_layer=None, cond=None,
                 split='train', weights=None):
        if inputs.ndim == 3:
            inputs = inputs[:, None]
            reconstructions = reconstructions[:, None]
        # TODO(synk): per-element `weights` is not folded into the fused NLL reduction.
        assert weights is None
        b = int(inputs.shape[0])
        n_mel, t = int(inputs.shape[2]), int(inputs.shape[3])
        s_in = n_mel * t
        numel = b * 1 * s_in
        n_w = len(self.time_lengths)
        for tl in self.time_lengths:
            assert tl <= t, 'discriminator window longer than the spectrogram'

        # lane-dense (B, n_mel*T) layout, no host transpose of the full spectrogram
        xi2 = inputs[:, 0].reshape(b, s_in).astype(jnp.float32)
        xr2 = reconstructions[:, 0].reshape(b, s_in).astype(jnp.float32)
        xi_sp = inputs[:, 0].astype(jnp.float32)                     # (B, n_mel, T)
        xr_sp = reconstructions[:, 0].astype(jnp.float32)

        if optimizer_idx == 0:
            assert cond is None and not self.disc_conditional
            # perceptual feature path: xi & xr batched into one im2col slab
            x_both = jnp.concatenate([xi_sp, xr_sp], axis=0)[..., None]   # (2B, n_mel, T, 1)
            pat1 = _im2col_3x3_s2(x_both)                                 # (2B*S1, 9)
            head_call, head_consts = self._prepared_head(b, n_mel, t)
            rec_out, kl_out = head_call(
                xi2, xr2,
                posterior_mean.reshape(b, -1).astype(jnp.float32),
                posterior_logvar.reshape(b, -1).astype(jnp.float32),
                pat1, *head_consts)
            rec_sum = rec_out[0, 0]
            kl_sum = kl_out[0, 0]

            nll_sum = rec_sum / jnp.exp(self.logvar) + self.logvar * numel
            nll_loss = nll_sum / b
            weighted_nll_loss = nll_sum / b
            rec_loss_mean = rec_sum / numel
            kl_loss = kl_sum / b

            logits_fake = jnp.stack(
                [self._disc_logits([xr_sp], i, b, n_mel)[0] for i in range(n_w)],
                axis=-1)[:, None, :]                          # (B, 1, n_windows)
            g_loss = -jnp.mean(logits_fake)
            # TODO(synk): adaptive d_weight needs decoder-last-layer grads (unavailable
            # here); reproduce the reference's no-grad fallback of 0.0.
            d_weight = jnp.asarray(0.0, jnp.float32)
            disc_factor = adopt_weight(self.disc_factor, global_step,
                                       threshold=self.discriminator_iter_start)
            loss = (weighted_nll_loss + self.kl_weight * kl_loss
                    + d_weight * disc_factor * g_loss)
            log = {
                f'{split}/total_loss': loss,
                f'{split}/logvar': self.logvar,
                f'{split}/kl_loss': kl_loss,
                f'{split}/nll_loss': nll_loss,
                f'{split}/rec_loss': rec_loss_mean,
                f'{split}/d_weight': d_weight,
                f'{split}/disc_factor': jnp.asarray(disc_factor, jnp.float32),
                f'{split}/g_loss': g_loss,
            }
            return loss, log

        if optimizer_idx == 1:
            assert cond is None
            # real + fake batched into one pallas_call per window (parallel grid
            # over the two groups); BN stats stay per group -> same math as two
            # separate reference forwards.
            outs = [self._disc_logits([xi_sp, xr_sp], i, b, n_mel)
                    for i in range(n_w)]
            logits_real = jnp.stack([o[0] for o in outs], axis=-1)[:, None, :]
            logits_fake = jnp.stack([o[1] for o in outs], axis=-1)[:, None, :]
            disc_factor = adopt_weight(self.disc_factor, global_step,
                                       threshold=self.discriminator_iter_start)
            d_loss = disc_factor * self.disc_loss(logits_real, logits_fake)
            log = {
                f'{split}/disc_loss': d_loss,
                f'{split}/logits_real': jnp.mean(logits_real),
                f'{split}/logits_fake': jnp.mean(logits_fake),
            }
            return d_loss, log


# ----------------------------------------------------------------------------
if __name__ == "__main__":
    key = jax.random.PRNGKey(0)
    k_in, k_rec, k_mu, k_lv, k_mod = jax.random.split(key, 5)

    B, n_mel, T = 2, 16, 32
    inputs = jax.random.normal(k_in, (B, 1, n_mel, T), jnp.float32)
    reconstructions = inputs + 0.1 * jax.random.normal(k_rec, (B, 1, n_mel, T), jnp.float32)
    posterior_mean = jax.random.normal(k_mu, (B, 4, 4, 8), jnp.float32)
    posterior_logvar = 0.1 * jax.random.normal(k_lv, (B, 4, 4, 8), jnp.float32)

    loss_mod = LPAPSWithDiscriminatorPallas(
        disc_start=0, key=k_mod, time_lengths=(8, 16), freq_length=n_mel,
        hidden_size=32, kl_weight=1.0, disc_factor=1.0, perceptual_weight=1.0,
        disc_loss='hinge')

    gen_step = jax.jit(functools.partial(loss_mod, optimizer_idx=0,
                                         global_step=1, split='train'))
    disc_step = jax.jit(functools.partial(loss_mod, optimizer_idx=1,
                                          global_step=1, split='train'))

    g_total, g_log = gen_step(inputs, reconstructions, posterior_mean, posterior_logvar)
    d_total, d_log = disc_step(inputs, reconstructions, posterior_mean, posterior_logvar)

    jax.block_until_ready((g_total, d_total, g_log, d_log))
    print("KERNEL_OK")
</pallas_src>

<mosaic_0001>
module attributes {stable_mosaic.version = 11 : i64} {
  func.func @_disc_kernel(%arg0: i32, %arg1: memref<1x128x9xf32, #tpu.memory_space<vmem>>, %arg2: memref<144x64xf32, #tpu.memory_space<vmem>>, %arg3: memref<36x16xf32, #tpu.memory_space<vmem>>, %arg4: memref<9x32xbf16, #tpu.memory_space<vmem>>, %arg5: memref<1x32xf32, #tpu.memory_space<vmem>>, %arg6: memref<1x32xf32, #tpu.memory_space<vmem>>, %arg7: memref<1x32xf32, #tpu.memory_space<vmem>>, %arg8: memref<288x32xbf16, #tpu.memory_space<vmem>>, %arg9: memref<1x32xf32, #tpu.memory_space<vmem>>, %arg10: memref<1x32xf32, #tpu.memory_space<vmem>>, %arg11: memref<1x32xf32, #tpu.memory_space<vmem>>, %arg12: memref<288x32xbf16, #tpu.memory_space<vmem>>, %arg13: memref<1x32xf32, #tpu.memory_space<vmem>>, %arg14: memref<4x32xf32, #tpu.memory_space<vmem>>, %arg15: memref<1x8x128xf32, #tpu.memory_space<vmem>>) attributes {dimension_semantics = [#tpu.dimension_semantics<parallel>], iteration_bounds = array<i64: 1>, scalar_prefetch = 0 : i64, scratch_operands = 0 : i64, tpu.core_type = #tpu.core_type<tc>, window_params = [{transform_indices = @transform_0, window_bounds = array<i64: 1, 128, 9>}, {pipeline_mode = #tpu.pipeline_mode<synchronous>, transform_indices = @transform_1, window_bounds = array<i64: 144, 64>}, {pipeline_mode = #tpu.pipeline_mode<synchronous>, transform_indices = @transform_2, window_bounds = array<i64: 36, 16>}, {pipeline_mode = #tpu.pipeline_mode<synchronous>, transform_indices = @transform_3, window_bounds = array<i64: 9, 32>}, {pipeline_mode = #tpu.pipeline_mode<synchronous>, transform_indices = @transform_4, window_bounds = array<i64: 1, 32>}, {pipeline_mode = #tpu.pipeline_mode<synchronous>, transform_indices = @transform_5, window_bounds = array<i64: 1, 32>}, {pipeline_mode = #tpu.pipeline_mode<synchronous>, transform_indices = @transform_6, window_bounds = array<i64: 1, 32>}, {pipeline_mode = #tpu.pipeline_mode<synchronous>, transform_indices = @transform_7, window_bounds = array<i64: 288, 32>}, {pipeline_mode = #tpu.pipeline_mode<synchronous>, transform_indices = @transform_8, window_bounds = array<i64: 1, 32>}, {pipeline_mode = #tpu.pipeline_mode<synchronous>, transform_indices = @transform_9, window_bounds = array<i64: 1, 32>}, {pipeline_mode = #tpu.pipeline_mode<synchronous>, transform_indices = @transform_10, window_bounds = array<i64: 1, 32>}, {pipeline_mode = #tpu.pipeline_mode<synchronous>, transform_indices = @transform_11, window_bounds = array<i64: 288, 32>}, {pipeline_mode = #tpu.pipeline_mode<synchronous>, transform_indices = @transform_12, window_bounds = array<i64: 1, 32>}, {pipeline_mode = #tpu.pipeline_mode<synchronous>, transform_indices = @transform_13, window_bounds = array<i64: 4, 32>}, {transform_indices = @transform_14, window_bounds = array<i64: 1, 8, 128>}]} {
    %c0 = arith.constant 0 : index
    %c0_0 = arith.constant 0 : index
    %c0_1 = arith.constant 0 : index
    %0 = vector.load %arg1[%c0, %c0_0, %c0_1] : memref<1x128x9xf32, #tpu.memory_space<vmem>>, vector<1x128x9xf32>
    %1 = vector.shape_cast %0 : vector<1x128x9xf32> to vector<128x9xf32>
    %2 = arith.truncf %1 : vector<128x9xf32> to vector<128x9xbf16>
    %c0_2 = arith.constant 0 : index
    %c0_3 = arith.constant 0 : index
    %3 = vector.load %arg4[%c0_2, %c0_3] : memref<9x32xbf16, #tpu.memory_space<vmem>>, vector<9x32xbf16>
    %cst = arith.constant dense<0.000000e+00> : vector<128x32xf32>
    %4 = tpu.matmul %2, %3, %cst {dimension_numbers = #tpu.dot_dimension_numbers<[1], [0], [0], [1], [0, 0, 1, 1], [], []>} : vector<128x9xbf16>, vector<9x32xbf16>, vector<128x32xf32> -> vector<128x32xf32>
    %c0_4 = arith.constant 0 : index
    %c0_5 = arith.constant 0 : index
    %5 = vector.load %arg5[%c0_4, %c0_5] : memref<1x32xf32, #tpu.memory_space<vmem>>, vector<1x32xf32>
    %6 = vector.broadcast %5 : vector<1x32xf32> to vector<128x32xf32>
    %7 = arith.addf %4, %6 : vector<128x32xf32>
    %cst_6 = arith.constant 0.000000e+00 : f32
    %8 = vector.broadcast %cst_6 : f32 to vector<128x32xf32>
    %9 = arith.cmpf oge, %7, %8 : vector<128x32xf32>
    %cst_7 = arith.constant 2.000000e-01 : f32
    %10 = vector.broadcast %cst_7 : f32 to vector<128x32xf32>
    %11 = arith.mulf %10, %7 : vector<128x32xf32>
    %12 = arith.select %9, %7, %11 : vector<128x32xi1>, vector<128x32xf32>
    %c0_8 = arith.constant 0 : index
    %c0_9 = arith.constant 0 : index
    %13 = vector.load %arg6[%c0_8, %c0_9] : memref<1x32xf32, #tpu.memory_space<vmem>>, vector<1x32xf32>
    %c0_10 = arith.constant 0 : index
    %c0_11 = arith.constant 0 : index
    %14 = vector.load %arg7[%c0_10, %c0_11] : memref<1x32xf32, #tpu.memory_space<vmem>>, vector<1x32xf32>
    %cst_12 = arith.constant dense<0.000000e+00> : vector<32xf32>
    %15 = vector.multi_reduction <add>, %12, %cst_12 [0] : vector<128x32xf32> to vector<32xf32>
    %16 = vector.shape_cast %15 : vector<32xf32> to vector<1x32xf32>
    %cst_13 = arith.constant 7.812500e-03 : f32
    %17 = vector.broadcast %cst_13 : f32 to vector<1x32xf32>
    %18 = arith.mulf %16, %17 : vector<1x32xf32>
    %19 = vector.broadcast %18 : vector<1x32xf32> to vector<128x32xf32>
    %20 = arith.subf %12, %19 : vector<128x32xf32>
    %21 = arith.mulf %20, %20 : vector<128x32xf32>
    %cst_14 = arith.constant dense<0.000000e+00> : vector<32xf32>
    %22 = vector.multi_reduction <add>, %21, %cst_14 [0] : vector<128x32xf32> to vector<32xf32>
    %23 = vector.shape_cast %22 : vector<32xf32> to vector<1x32xf32>
    %cst_15 = arith.constant 7.812500e-03 : f32
    %24 = vector.broadcast %cst_15 : f32 to vector<1x32xf32>
    %25 = arith.mulf %23, %24 : vector<1x32xf32>
    %cst_16 = arith.constant 8.000000e-01 : f32
    %26 = vector.broadcast %cst_16 : f32 to vector<1x32xf32>
    %27 = arith.addf %25, %26 : vector<1x32xf32>
    %28 = math.rsqrt %27 : vector<1x32xf32>
    %29 = vector.broadcast %28 : vector<1x32xf32> to vector<128x32xf32>
    %30 = arith.mulf %20, %29 : vector<128x32xf32>
    %31 = vector.broadcast %13 : vector<1x32xf32> to vector<128x32xf32>
    %32 = arith.mulf %30, %31 : vector<128x32xf32>
    %33 = vector.broadcast %14 : vector<1x32xf32> to vector<128x32xf32>
    %34 = arith.addf %32, %33 : vector<128x32xf32>
    %c0_17 = arith.constant 0 : index
    %c0_18 = arith.constant 0 : index
    %35 = vector.load %arg2[%c0_17, %c0_18] : memref<144x64xf32, #tpu.memory_space<vmem>>, vector<144x64xf32>
    %36 = vector.extract_strided_slice %34 {offsets = [0, 0], sizes = [64, 32], strides = [1, 1]} : vector<128x32xf32> to vector<64x32xf32>
    %cst_19 = arith.constant dense<0.000000e+00> : vector<144x32xf32>
    %37 = tpu.matmul %35, %36, %cst_19 {dimension_numbers = #tpu.dot_dimension_numbers<[1], [0], [0], [1], [0, 0, 1, 1], [], []>} : vector<144x64xf32>, vector<64x32xf32>, vector<144x32xf32> -> vector<144x32xf32>
    %38 = vector.extract_strided_slice %37 {offsets = [0, 0], sizes = [16, 32], strides = [1, 1]} : vector<144x32xf32> to vector<16x32xf32>
    %39 = vector.extract_strided_slice %37 {offsets = [16, 0], sizes = [16, 32], strides = [1, 1]} : vector<144x32xf32> to vector<16x32xf32>
    %40 = vector.extract_strided_slice %37 {offsets = [32, 0], sizes = [16, 32], strides = [1, 1]} : vector<144x32xf32> to vector<16x32xf32>
    %41 = vector.extract_strided_slice %37 {offsets = [48, 0], sizes = [16, 32], strides = [1, 1]} : vector<144x32xf32> to vector<16x32xf32>
    %42 = vector.extract_strided_slice %37 {offsets = [64, 0], sizes = [16, 32], strides = [1, 1]} : vector<144x32xf32> to vector<16x32xf32>
    %43 = vector.extract_strided_slice %37 {offsets = [80, 0], sizes = [16, 32], strides = [1, 1]} : vector<144x32xf32> to vector<16x32xf32>
    %44 = vector.extract_strided_slice %37 {offsets = [96, 0], sizes = [16, 32], strides = [1, 1]} : vector<144x32xf32> to vector<16x32xf32>
    %45 = vector.extract_strided_slice %37 {offsets = [112, 0], sizes = [16, 32], strides = [1, 1]} : vector<144x32xf32> to vector<16x32xf32>
    %46 = vector.extract_strided_slice %37 {offsets = [128, 0], sizes = [16, 32], strides = [1, 1]} : vector<144x32xf32> to vector<16x32xf32>
    %47 = tpu.concatenate %38, %39, %40, %41, %42, %43, %44, %45, %46 in 1 : vector<16x32xf32>, vector<16x32xf32>, vector<16x32xf32>, vector<16x32xf32>, vector<16x32xf32>, vector<16x32xf32>, vector<16x32xf32>, vector<16x32xf32>, vector<16x32xf32> -> vector<16x288xf32>
    %48 = vector.extract_strided_slice %34 {offsets = [64, 0], sizes = [64, 32], strides = [1, 1]} : vector<128x32xf32> to vector<64x32xf32>
    %cst_20 = arith.constant dense<0.000000e+00> : vector<144x32xf32>
    %49 = tpu.matmul %35, %48, %cst_20 {dimension_numbers = #tpu.dot_dimension_numbers<[1], [0], [0], [1], [0, 0, 1, 1], [], []>} : vector<144x64xf32>, vector<64x32xf32>, vector<144x32xf32> -> vector<144x32xf32>
    %50 = vector.extract_strided_slice %49 {offsets = [0, 0], sizes = [16, 32], strides = [1, 1]} : vector<144x32xf32> to vector<16x32xf32>
    %51 = vector.extract_strided_slice %49 {offsets = [16, 0], sizes = [16, 32], strides = [1, 1]} : vector<144x32xf32> to vector<16x32xf32>
    %52 = vector.extract_strided_slice %49 {offsets = [32, 0], sizes = [16, 32], strides = [1, 1]} : vector<144x32xf32> to vector<16x32xf32>
    %53 = vector.extract_strided_slice %49 {offsets = [48, 0], sizes = [16, 32], strides = [1, 1]} : vector<144x32xf32> to vector<16x32xf32>
    %54 = vector.extract_strided_slice %49 {offsets = [64, 0], sizes = [16, 32], strides = [1, 1]} : vector<144x32xf32> to vector<16x32xf32>
    %55 = vector.extract_strided_slice %49 {offsets = [80, 0], sizes = [16, 32], strides = [1, 1]} : vector<144x32xf32> to vector<16x32xf32>
    %56 = vector.extract_strided_slice %49 {offsets = [96, 0], sizes = [16, 32], strides = [1, 1]} : vector<144x32xf32> to vector<16x32xf32>
    %57 = vector.extract_strided_slice %49 {offsets = [112, 0], sizes = [16, 32], strides = [1, 1]} : vector<144x32xf32> to vector<16x32xf32>
    %58 = vector.extract_strided_slice %49 {offsets = [128, 0], sizes = [16, 32], strides = [1, 1]} : vector<144x32xf32> to vector<16x32xf32>
    %59 = tpu.concatenate %50, %51, %52, %53, %54, %55, %56, %57, %58 in 1 : vector<16x32xf32>, vector<16x32xf32>, vector<16x32xf32>, vector<16x32xf32>, vector<16x32xf32>, vector<16x32xf32>, vector<16x32xf32>, vector<16x32xf32>, vector<16x32xf32> -> vector<16x288xf32>
    %60 = tpu.concatenate %47, %59 in 0 : vector<16x288xf32>, vector<16x288xf32> -> vector<32x288xf32>
    %61 = arith.truncf %60 : vector<32x288xf32> to vector<32x288xbf16>
    %c0_21 = arith.constant 0 : index
    %c0_22 = arith.constant 0 : index
    %62 = vector.load %arg8[%c0_21, %c0_22] : memref<288x32xbf16, #tpu.memory_space<vmem>>, vector<288x32xbf16>
    %cst_23 = arith.constant dense<0.000000e+00> : vector<32x32xf32>
    %63 = tpu.matmul %61, %62, %cst_23 {dimension_numbers = #tpu.dot_dimension_numbers<[1], [0], [0], [1], [0, 0, 1, 1], [], []>} : vector<32x288xbf16>, vector<288x32xbf16>, vector<32x32xf32> -> vector<32x32xf32>
    %c0_24 = arith.constant 0 : index
    %c0_25 = arith.constant 0 : index
    %64 = vector.load %arg9[%c0_24, %c0_25] : memref<1x32xf32, #tpu.memory_space<vmem>>, vector<1x32xf32>
    %65 = vector.broadcast %64 : vector<1x32xf32> to vector<32x32xf32>
    %66 = arith.addf %63, %65 : vector<32x32xf32>
    %cst_26 = arith.constant 0.000000e+00 : f32
    %67 = vector.broadcast %cst_26 : f32 to vector<32x32xf32>
    %68 = arith.cmpf oge, %66, %67 : vector<32x32xf32>
    %cst_27 = arith.constant 2.000000e-01 : f32
    %69 = vector.broadcast %cst_27 : f32 to vector<32x32xf32>
    %70 = arith.mulf %69, %66 : vector<32x32xf32>
    %71 = arith.select %68, %66, %70 : vector<32x32xi1>, vector<32x32xf32>
    %c0_28 = arith.constant 0 : index
    %c0_29 = arith.constant 0 : index
    %72 = vector.load %arg10[%c0_28, %c0_29] : memref<1x32xf32, #tpu.memory_space<vmem>>, vector<1x32xf32>
    %c0_30 = arith.constant 0 : index
    %c0_31 = arith.constant 0 : index
    %73 = vector.load %arg11[%c0_30, %c0_31] : memref<1x32xf32, #tpu.memory_space<vmem>>, vector<1x32xf32>
    %cst_32 = arith.constant dense<0.000000e+00> : vector<32xf32>
    %74 = vector.multi_reduction <add>, %71, %cst_32 [0] : vector<32x32xf32> to vector<32xf32>
    %75 = vector.shape_cast %74 : vector<32xf32> to vector<1x32xf32>
    %cst_33 = arith.constant 3.125000e-02 : f32
    %76 = vector.broadcast %cst_33 : f32 to vector<1x32xf32>
    %77 = arith.mulf %75, %76 : vector<1x32xf32>
    %78 = vector.broadcast %77 : vector<1x32xf32> to vector<32x32xf32>
    %79 = arith.subf %71, %78 : vector<32x32xf32>
    %80 = arith.mulf %79, %79 : vector<32x32xf32>
    %cst_34 = arith.constant dense<0.000000e+00> : vector<32xf32>
    %81 = vector.multi_reduction <add>, %80, %cst_34 [0] : vector<32x32xf32> to vector<32xf32>
    %82 = vector.shape_cast %81 : vector<32xf32> to vector<1x32xf32>
    %cst_35 = arith.constant 3.125000e-02 : f32
    %83 = vector.broadcast %cst_35 : f32 to vector<1x32xf32>
    %84 = arith.mulf %82, %83 : vector<1x32xf32>
    %cst_36 = arith.constant 8.000000e-01 : f32
    %85 = vector.broadcast %cst_36 : f32 to vector<1x32xf32>
    %86 = arith.addf %84, %85 : vector<1x32xf32>
    %87 = math.rsqrt %86 : vector<1x32xf32>
    %88 = vector.broadcast %87 : vector<1x32xf32> to vector<32x32xf32>
    %89 = arith.mulf %79, %88 : vector<32x32xf32>
    %90 = vector.broadcast %72 : vector<1x32xf32> to vector<32x32xf32>
    %91 = arith.mulf %89, %90 : vector<32x32xf32>
    %92 = vector.broadcast %73 : vector<1x32xf32> to vector<32x32xf32>
    %93 = arith.addf %91, %92 : vector<32x32xf32>
    %c0_37 = arith.constant 0 : index
    %c0_38 = arith.constant 0 : index
    %94 = vector.load %arg3[%c0_37, %c0_38] : memref<36x16xf32, #tpu.memory_space<vmem>>, vector<36x16xf32>
    %95 = vector.extract_strided_slice %93 {offsets = [0, 0], sizes = [16, 32], strides = [1, 1]} : vector<32x32xf32> to vector<16x32xf32>
    %cst_39 = arith.constant dense<0.000000e+00> : vector<36x32xf32>
    %96 = tpu.matmul %94, %95, %cst_39 {dimension_numbers = #tpu.dot_dimension_numbers<[1], [0], [0], [1], [0, 0, 1, 1], [], []>} : vector<36x16xf32>, vector<16x32xf32>, vector<36x32xf32> -> vector<36x32xf32>
    %97 = vector.extract_strided_slice %96 {offsets = [0, 0], sizes = [4, 32], strides = [1, 1]} : vector<36x32xf32> to vector<4x32xf32>
    %98 = vector.extract_strided_slice %96 {offsets = [4, 0], sizes = [4, 32], strides = [1, 1]} : vector<36x32xf32> to vector<4x32xf32>
    %99 = vector.extract_strided_slice %96 {offsets = [8, 0], sizes = [4, 32], strides = [1, 1]} : vector<36x32xf32> to vector<4x32xf32>
    %100 = vector.extract_strided_slice %96 {offsets = [12, 0], sizes = [4, 32], strides = [1, 1]} : vector<36x32xf32> to vector<4x32xf32>
    %101 = vector.extract_strided_slice %96 {offsets = [16, 0], sizes = [4, 32], strides = [1, 1]} : vector<36x32xf32> to vector<4x32xf32>
    %102 = vector.extract_strided_slice %96 {offsets = [20, 0], sizes = [4, 32], strides = [1, 1]} : vector<36x32xf32> to vector<4x32xf32>
    %103 = vector.extract_strided_slice %96 {offsets = [24, 0], sizes = [4, 32], strides = [1, 1]} : vector<36x32xf32> to vector<4x32xf32>
    %104 = vector.extract_strided_slice %96 {offsets = [28, 0], sizes = [4, 32], strides = [1, 1]} : vector<36x32xf32> to vector<4x32xf32>
    %105 = vector.extract_strided_slice %96 {offsets = [32, 0], sizes = [4, 32], strides = [1, 1]} : vector<36x32xf32> to vector<4x32xf32>
    %106 = tpu.concatenate %97, %98, %99, %100, %101, %102, %103, %104, %105 in 1 : vector<4x32xf32>, vector<4x32xf32>, vector<4x32xf32>, vector<4x32xf32>, vector<4x32xf32>, vector<4x32xf32>, vector<4x32xf32>, vector<4x32xf32>, vector<4x32xf32> -> vector<4x288xf32>
    %107 = vector.extract_strided_slice %93 {offsets = [16, 0], sizes = [16, 32], strides = [1, 1]} : vector<32x32xf32> to vector<16x32xf32>
    %cst_40 = arith.constant dense<0.000000e+00> : vector<36x32xf32>
    %108 = tpu.matmul %94, %107, %cst_40 {dimension_numbers = #tpu.dot_dimension_numbers<[1], [0], [0], [1], [0, 0, 1, 1], [], []>} : vector<36x16xf32>, vector<16x32xf32>, vector<36x32xf32> -> vector<36x32xf32>
    %109 = vector.extract_strided_slice %108 {offsets = [0, 0], sizes = [4, 32], strides = [1, 1]} : vector<36x32xf32> to vector<4x32xf32>
    %110 = vector.extract_strided_slice %108 {offsets = [4, 0], sizes = [4, 32], strides = [1, 1]} : vector<36x32xf32> to vector<4x32xf32>
    %111 = vector.extract_strided_slice %108 {offsets = [8, 0], sizes = [4, 32], strides = [1, 1]} : vector<36x32xf32> to vector<4x32xf32>
    %112 = vector.extract_strided_slice %108 {offsets = [12, 0], sizes = [4, 32], strides = [1, 1]} : vector<36x32xf32> to vector<4x32xf32>
    %113 = vector.extract_strided_slice %108 {offsets = [16, 0], sizes = [4, 32], strides = [1, 1]} : vector<36x32xf32> to vector<4x32xf32>
    %114 = vector.extract_strided_slice %108 {offsets = [20, 0], sizes = [4, 32], strides = [1, 1]} : vector<36x32xf32> to vector<4x32xf32>
    %115 = vector.extract_strided_slice %108 {offsets = [24, 0], sizes = [4, 32], strides = [1, 1]} : vector<36x32xf32> to vector<4x32xf32>
    %116 = vector.extract_strided_slice %108 {offsets = [28, 0], sizes = [4, 32], strides = [1, 1]} : vector<36x32xf32> to vector<4x32xf32>
    %117 = vector.extract_strided_slice %108 {offsets = [32, 0], sizes = [4, 32], strides = [1, 1]} : vector<36x32xf32> to vector<4x32xf32>
    %118 = tpu.concatenate %109, %110, %111, %112, %113, %114, %115, %116, %117 in 1 : vector<4x32xf32>, vector<4x32xf32>, vector<4x32xf32>, vector<4x32xf32>, vector<4x32xf32>, vector<4x32xf32>, vector<4x32xf32>, vector<4x32xf32>, vector<4x32xf32> -> vector<4x288xf32>
    %119 = tpu.concatenate %106, %118 in 0 : vector<4x288xf32>, vector<4x288xf32> -> vector<8x288xf32>
    %120 = arith.truncf %119 : vector<8x288xf32> to vector<8x288xbf16>
    %c0_41 = arith.constant 0 : index
    %c0_42 = arith.constant 0 : index
    %121 = vector.load %arg12[%c0_41, %c0_42] : memref<288x32xbf16, #tpu.memory_space<vmem>>, vector<288x32xbf16>
    %cst_43 = arith.constant dense<0.000000e+00> : vector<8x32xf32>
    %122 = tpu.matmul %120, %121, %cst_43 {dimension_numbers = #tpu.dot_dimension_numbers<[1], [0], [0], [1], [0, 0, 1, 1], [], []>} : vector<8x288xbf16>, vector<288x32xbf16>, vector<8x32xf32> -> vector<8x32xf32>
    %c0_44 = arith.constant 0 : index
    %c0_45 = arith.constant 0 : index
    %123 = vector.load %arg13[%c0_44, %c0_45] : memref<1x32xf32, #tpu.memory_space<vmem>>, vector<1x32xf32>
    %124 = vector.broadcast %123 : vector<1x32xf32> to vector<8x32xf32>
    %125 = arith.addf %122, %124 : vector<8x32xf32>
    %cst_46 = arith.constant 0.000000e+00 : f32
    %126 = vector.broadcast %cst_46 : f32 to vector<8x32xf32>
    %127 = arith.cmpf oge, %125, %126 : vector<8x32xf32>
    %cst_47 = arith.constant 2.000000e-01 : f32
    %128 = vector.broadcast %cst_47 : f32 to vector<8x32xf32>
    %129 = arith.mulf %128, %125 : vector<8x32xf32>
    %130 = arith.select %127, %125, %129 : vector<8x32xi1>, vector<8x32xf32>
    %c0_48 = arith.constant 0 : index
    %c0_49 = arith.constant 0 : index
    %131 = vector.load %arg14[%c0_48, %c0_49] : memref<4x32xf32, #tpu.memory_space<vmem>>, vector<4x32xf32>
    %132 = tpu.iota {dimensions = array<i32: 1>} : vector<8x128xi32>
    %cst_50 = arith.constant 0.000000e+00 : f32
    %133 = vector.broadcast %cst_50 : f32 to vector<8x128xf32>
    %134 = vector.extract_strided_slice %130 {offsets = [0, 0], sizes = [4, 32], strides = [1, 1]} : vector<8x32xf32> to vector<4x32xf32>
    %135 = arith.mulf %134, %131 : vector<4x32xf32>
    %136 = vector.shape_cast %135 : vector<4x32xf32> to vector<1x4x32xf32>
    %cst_51 = arith.constant dense<0.000000e+00> : vector<1xf32>
    %137 = vector.multi_reduction <add>, %136, %cst_51 [1, 2] : vector<1x4x32xf32> to vector<1xf32>
    %138 = vector.shape_cast %137 : vector<1xf32> to vector<1x1x1xf32>
    %139 = vector.extract %138[0, 0, 0] : f32 from vector<1x1x1xf32>
    %c0_i32 = arith.constant 0 : i32
    %140 = vector.broadcast %c0_i32 : i32 to vector<8x128xi32>
    %141 = arith.cmpi eq, %132, %140 : vector<8x128xi32>
    %142 = vector.broadcast %139 : f32 to vector<8x128xf32>
    %143 = arith.select %141, %142, %133 : vector<8x128xi1>, vector<8x128xf32>
    %144 = vector.extract_strided_slice %130 {offsets = [4, 0], sizes = [4, 32], strides = [1, 1]} : vector<8x32xf32> to vector<4x32xf32>
    %145 = arith.mulf %144, %131 : vector<4x32xf32>
    %146 = vector.shape_cast %145 : vector<4x32xf32> to vector<1x4x32xf32>
    %cst_52 = arith.constant dense<0.000000e+00> : vector<1xf32>
    %147 = vector.multi_reduction <add>, %146, %cst_52 [1, 2] : vector<1x4x32xf32> to vector<1xf32>
    %148 = vector.shape_cast %147 : vector<1xf32> to vector<1x1x1xf32>
    %149 = vector.extract %148[0, 0, 0] : f32 from vector<1x1x1xf32>
    %c1_i32 = arith.constant 1 : i32
    %150 = vector.broadcast %c1_i32 : i32 to vector<8x128xi32>
    %151 = arith.cmpi eq, %132, %150 : vector<8x128xi32>
    %152 = vector.broadcast %149 : f32 to vector<8x128xf32>
    %153 = arith.select %151, %152, %143 : vector<8x128xi1>, vector<8x128xf32>
    %c0_53 = arith.constant 0 : index
    %c0_54 = arith.constant 0 : index
    %c0_55 = arith.constant 0 : index
    %154 = vector.load %arg15[%c0_53, %c0_54, %c0_55] : memref<1x8x128xf32, #tpu.memory_space<vmem>>, vector<1x8x128xf32>
    %155 = vector.shape_cast %154 : vector<1x8x128xf32> to vector<8x128xf32>
    %156 = vector.shape_cast %153 : vector<8x128xf32> to vector<1x8x128xf32>
    tpu.vector_store %arg15[%c0_53, %c0_54, %c0_55], %156 {strides = array<i32>} : memref<1x8x128xf32, #tpu.memory_space<vmem>>, vector<1x8x128xf32>,
    return
  }
  func.func @transform_0(%arg0: i32) -> (i32, i32, i32) {
    %c0_i32 = arith.constant 0 : i32
    %c0_i32_0 = arith.constant 0 : i32
    %c0_i32_1 = arith.constant 0 : i32
    return %arg0, %c0_i32, %c0_i32_0 : i32, i32, i32
  }
  func.func @transform_1(%arg0: i32) -> (i32, i32) {
    %c0_i32 = arith.constant 0 : i32
    %c0_i32_0 = arith.constant 0 : i32
    %c0_i32_1 = arith.constant 0 : i32
    return %c0_i32, %c0_i32_0 : i32, i32
  }
  func.func @transform_2(%arg0: i32) -> (i32, i32) {
    %c0_i32 = arith.constant 0 : i32
    %c0_i32_0 = arith.constant 0 : i32
    %c0_i32_1 = arith.constant 0 : i32
    return %c0_i32, %c0_i32_0 : i32, i32
  }
  func.func @transform_3(%arg0: i32) -> (i32, i32) {
    %c0_i32 = arith.constant 0 : i32
    %c0_i32_0 = arith.constant 0 : i32
    %c0_i32_1 = arith.constant 0 : i32
    return %c0_i32, %c0_i32_0 : i32, i32
  }
  func.func @transform_4(%arg0: i32) -> (i32, i32) {
    %c0_i32 = arith.constant 0 : i32
    %c0_i32_0 = arith.constant 0 : i32
    %c0_i32_1 = arith.constant 0 : i32
    return %c0_i32, %c0_i32_0 : i32, i32
  }
  func.func @transform_5(%arg0: i32) -> (i32, i32) {
    %c0_i32 = arith.constant 0 : i32
    %c0_i32_0 = arith.constant 0 : i32
    %c0_i32_1 = arith.constant 0 : i32
    return %c0_i32, %c0_i32_0 : i32, i32
  }
  func.func @transform_6(%arg0: i32) -> (i32, i32) {
    %c0_i32 = arith.constant 0 : i32
    %c0_i32_0 = arith.constant 0 : i32
    %c0_i32_1 = arith.constant 0 : i32
    return %c0_i32, %c0_i32_0 : i32, i32
  }
  func.func @transform_7(%arg0: i32) -> (i32, i32) {
    %c0_i32 = arith.constant 0 : i32
    %c0_i32_0 = arith.constant 0 : i32
    %c0_i32_1 = arith.constant 0 : i32
    return %c0_i32, %c0_i32_0 : i32, i32
  }
  func.func @transform_8(%arg0: i32) -> (i32, i32) {
    %c0_i32 = arith.constant 0 : i32
    %c0_i32_0 = arith.constant 0 : i32
    %c0_i32_1 = arith.constant 0 : i32
    return %c0_i32, %c0_i32_0 : i32, i32
  }
  func.func @transform_9(%arg0: i32) -> (i32, i32) {
    %c0_i32 = arith.constant 0 : i32
    %c0_i32_0 = arith.constant 0 : i32
    %c0_i32_1 = arith.constant 0 : i32
    return %c0_i32, %c0_i32_0 : i32, i32
  }
  func.func @transform_10(%arg0: i32) -> (i32, i32) {
    %c0_i32 = arith.constant 0 : i32
    %c0_i32_0 = arith.constant 0 : i32
    %c0_i32_1 = arith.constant 0 : i32
    return %c0_i32, %c0_i32_0 : i32, i32
  }
  func.func @transform_11(%arg0: i32) -> (i32, i32) {
    %c0_i32 = arith.constant 0 : i32
    %c0_i32_0 = arith.constant 0 : i32
    %c0_i32_1 = arith.constant 0 : i32
    return %c0_i32, %c0_i32_0 : i32, i32
  }
  func.func @transform_12(%arg0: i32) -> (i32, i32) {
    %c0_i32 = arith.constant 0 : i32
    %c0_i32_0 = arith.constant 0 : i32
    %c0_i32_1 = arith.constant 0 : i32
    return %c0_i32, %c0_i32_0 : i32, i32
  }
  func.func @transform_13(%arg0: i32) -> (i32, i32) {
    %c0_i32 = arith.constant 0 : i32
    %c0_i32_0 = arith.constant 0 : i32
    %c0_i32_1 = arith.constant 0 : i32
    return %c0_i32, %c0_i32_0 : i32, i32
  }
  func.func @transform_14(%arg0: i32) -> (i32, i32, i32) {
    %c0_i32 = arith.constant 0 : i32
    %c0_i32_0 = arith.constant 0 : i32
    %c0_i32_1 = arith.constant 0 : i32
    return %arg0, %c0_i32, %c0_i32_0 : i32, i32, i32
  }
}

module attributes {stable_mosaic.version = 11 : i64} {
  func.func @_disc_kernel(%arg0: i32, %arg1: memref<1x64x9xf32, #tpu.memory_space<vmem>>, %arg2: memref<72x32xf32, #tpu.memory_space<vmem>>, %arg3: memref<18x8xf32, #tpu.memory_space<vmem>>, %arg4: memref<9x32xbf16, #tpu.memory_space<vmem>>, %arg5: memref<1x32xf32, #tpu.memory_space<vmem>>, %arg6: memref<1x32xf32, #tpu.memory_space<vmem>>, %arg7: memref<1x32xf32, #tpu.memory_space<vmem>>, %arg8: memref<288x32xbf16, #tpu.memory_space<vmem>>, %arg9: memref<1x32xf32, #tpu.memory_space<vmem>>, %arg10: memref<1x32xf32, #tpu.memory_space<vmem>>, %arg11: memref<1x32xf32, #tpu.memory_space<vmem>>, %arg12: memref<288x32xbf16, #tpu.memory_space<vmem>>, %arg13: memref<1x32xf32, #tpu.memory_space<vmem>>, %arg14: memref<2x32xf32, #tpu.memory_space<vmem>>, %arg15: memref<1x8x128xf32, #tpu.memory_space<vmem>>) attributes {dimension_semantics = [#tpu.dimension_semantics<parallel>], iteration_bounds = array<i64: 1>, scalar_prefetch = 0 : i64, scratch_operands = 0 : i64, tpu.core_type = #tpu.core_type<tc>, window_params = [{transform_indices = @transform_0, window_bounds = array<i64: 1, 64, 9>}, {pipeline_mode = #tpu.pipeline_mode<synchronous>, transform_indices = @transform_1, window_bounds = array<i64: 72, 32>}, {pipeline_mode = #tpu.pipeline_mode<synchronous>, transform_indices = @transform_2, window_bounds = array<i64: 18, 8>}, {pipeline_mode = #tpu.pipeline_mode<synchronous>, transform_indices = @transform_3, window_bounds = array<i64: 9, 32>}, {pipeline_mode = #tpu.pipeline_mode<synchronous>, transform_indices = @transform_4, window_bounds = array<i64: 1, 32>}, {pipeline_mode = #tpu.pipeline_mode<synchronous>, transform_indices = @transform_5, window_bounds = array<i64: 1, 32>}, {pipeline_mode = #tpu.pipeline_mode<synchronous>, transform_indices = @transform_6, window_bounds = array<i64: 1, 32>}, {pipeline_mode = #tpu.pipeline_mode<synchronous>, transform_indices = @transform_7, window_bounds = array<i64: 288, 32>}, {pipeline_mode = #tpu.pipeline_mode<synchronous>, transform_indices = @transform_8, window_bounds = array<i64: 1, 32>}, {pipeline_mode = #tpu.pipeline_mode<synchronous>, transform_indices = @transform_9, window_bounds = array<i64: 1, 32>}, {pipeline_mode = #tpu.pipeline_mode<synchronous>, transform_indices = @transform_10, window_bounds = array<i64: 1, 32>}, {pipeline_mode = #tpu.pipeline_mode<synchronous>, transform_indices = @transform_11, window_bounds = array<i64: 288, 32>}, {pipeline_mode = #tpu.pipeline_mode<synchronous>, transform_indices = @transform_12, window_bounds = array<i64: 1, 32>}, {pipeline_mode = #tpu.pipeline_mode<synchronous>, transform_indices = @transform_13, window_bounds = array<i64: 2, 32>}, {transform_indices = @transform_14, window_bounds = array<i64: 1, 8, 128>}]} {
    %c0 = arith.constant 0 : index
    %c0_0 = arith.constant 0 : index
    %c0_1 = arith.constant 0 : index
    %0 = vector.load %arg1[%c0, %c0_0, %c0_1] : memref<1x64x9xf32, #tpu.memory_space<vmem>>, vector<1x64x9xf32>
    %1 = vector.shape_cast %0 : vector<1x64x9xf32> to vector<64x9xf32>
    %2 = arith.truncf %1 : vector<64x9xf32> to vector<64x9xbf16>
    %c0_2 = arith.constant 0 : index
    %c0_3 = arith.constant 0 : index
    %3 = vector.load %arg4[%c0_2, %c0_3] : memref<9x32xbf16, #tpu.memory_space<vmem>>, vector<9x32xbf16>
    %cst = arith.constant dense<0.000000e+00> : vector<64x32xf32>
    %4 = tpu.matmul %2, %3, %cst {dimension_numbers = #tpu.dot_dimension_numbers<[1], [0], [0], [1], [0, 0, 1, 1], [], []>} : vector<64x9xbf16>, vector<9x32xbf16>, vector<64x32xf32> -> vector<64x32xf32>
    %c0_4 = arith.constant 0 : index
    %c0_5 = arith.constant 0 : index
    %5 = vector.load %arg5[%c0_4, %c0_5] : memref<1x32xf32, #tpu.memory_space<vmem>>, vector<1x32xf32>
    %6 = vector.broadcast %5 : vector<1x32xf32> to vector<64x32xf32>
    %7 = arith.addf %4, %6 : vector<64x32xf32>
    %cst_6 = arith.constant 0.000000e+00 : f32
    %8 = vector.broadcast %cst_6 : f32 to vector<64x32xf32>
    %9 = arith.cmpf oge, %7, %8 : vector<64x32xf32>
    %cst_7 = arith.constant 2.000000e-01 : f32
    %10 = vector.broadcast %cst_7 : f32 to vector<64x32xf32>
    %11 = arith.mulf %10, %7 : vector<64x32xf32>
    %12 = arith.select %9, %7, %11 : vector<64x32xi1>, vector<64x32xf32>
    %c0_8 = arith.constant 0 : index
    %c0_9 = arith.constant 0 : index
    %13 = vector.load %arg6[%c0_8, %c0_9] : memref<1x32xf32, #tpu.memory_space<vmem>>, vector<1x32xf32>
    %c0_10 = arith.constant 0 : index
    %c0_11 = arith.constant 0 : index
    %14 = vector.load %arg7[%c0_10, %c0_11] : memref<1x32xf32, #tpu.memory_space<vmem>>, vector<1x32xf32>
    %cst_12 = arith.constant dense<0.000000e+00> : vector<32xf32>
    %15 = vector.multi_reduction <add>, %12, %cst_12 [0] : vector<64x32xf32> to vector<32xf32>
    %16 = vector.shape_cast %15 : vector<32xf32> to vector<1x32xf32>
    %cst_13 = arith.constant 1.562500e-02 : f32
    %17 = vector.broadcast %cst_13 : f32 to vector<1x32xf32>
    %18 = arith.mulf %16, %17 : vector<1x32xf32>
    %19 = vector.broadcast %18 : vector<1x32xf32> to vector<64x32xf32>
    %20 = arith.subf %12, %19 : vector<64x32xf32>
    %21 = arith.mulf %20, %20 : vector<64x32xf32>
    %cst_14 = arith.constant dense<0.000000e+00> : vector<32xf32>
    %22 = vector.multi_reduction <add>, %21, %cst_14 [0] : vector<64x32xf32> to vector<32xf32>
    %23 = vector.shape_cast %22 : vector<32xf32> to vector<1x32xf32>
    %cst_15 = arith.constant 1.562500e-02 : f32
    %24 = vector.broadcast %cst_15 : f32 to vector<1x32xf32>
    %25 = arith.mulf %23, %24 : vector<1x32xf32>
    %cst_16 = arith.constant 8.000000e-01 : f32
    %26 = vector.broadcast %cst_16 : f32 to vector<1x32xf32>
    %27 = arith.addf %25, %26 : vector<1x32xf32>
    %28 = math.rsqrt %27 : vector<1x32xf32>
    %29 = vector.broadcast %28 : vector<1x32xf32> to vector<64x32xf32>
    %30 = arith.mulf %20, %29 : vector<64x32xf32>
    %31 = vector.broadcast %13 : vector<1x32xf32> to vector<64x32xf32>
    %32 = arith.mulf %30, %31 : vector<64x32xf32>
    %33 = vector.broadcast %14 : vector<1x32xf32> to vector<64x32xf32>
    %34 = arith.addf %32, %33 : vector<64x32xf32>
    %c0_17 = arith.constant 0 : index
    %c0_18 = arith.constant 0 : index
    %35 = vector.load %arg2[%c0_17, %c0_18] : memref<72x32xf32, #tpu.memory_space<vmem>>, vector<72x32xf32>
    %36 = vector.extract_strided_slice %34 {offsets = [0, 0], sizes = [32, 32], strides = [1, 1]} : vector<64x32xf32> to vector<32x32xf32>
    %cst_19 = arith.constant dense<0.000000e+00> : vector<72x32xf32>
    %37 = tpu.matmul %35, %36, %cst_19 {dimension_numbers = #tpu.dot_dimension_numbers<[1], [0], [0], [1], [0, 0, 1, 1], [], []>} : vector<72x32xf32>, vector<32x32xf32>, vector<72x32xf32> -> vector<72x32xf32>
    %38 = vector.extract_strided_slice %37 {offsets = [0, 0], sizes = [8, 32], strides = [1, 1]} : vector<72x32xf32> to vector<8x32xf32>
    %39 = vector.extract_strided_slice %37 {offsets = [8, 0], sizes = [8, 32], strides = [1, 1]} : vector<72x32xf32> to vector<8x32xf32>
    %40 = vector.extract_strided_slice %37 {offsets = [16, 0], sizes = [8, 32], strides = [1, 1]} : vector<72x32xf32> to vector<8x32xf32>
    %41 = vector.extract_strided_slice %37 {offsets = [24, 0], sizes = [8, 32], strides = [1, 1]} : vector<72x32xf32> to vector<8x32xf32>
    %42 = vector.extract_strided_slice %37 {offsets = [32, 0], sizes = [8, 32], strides = [1, 1]} : vector<72x32xf32> to vector<8x32xf32>
    %43 = vector.extract_strided_slice %37 {offsets = [40, 0], sizes = [8, 32], strides = [1, 1]} : vector<72x32xf32> to vector<8x32xf32>
    %44 = vector.extract_strided_slice %37 {offsets = [48, 0], sizes = [8, 32], strides = [1, 1]} : vector<72x32xf32> to vector<8x32xf32>
    %45 = vector.extract_strided_slice %37 {offsets = [56, 0], sizes = [8, 32], strides = [1, 1]} : vector<72x32xf32> to vector<8x32xf32>
    %46 = vector.extract_strided_slice %37 {offsets = [64, 0], sizes = [8, 32], strides = [1, 1]} : vector<72x32xf32> to vector<8x32xf32>
    %47 = tpu.concatenate %38, %39, %40, %41, %42, %43, %44, %45, %46 in 1 : vector<8x32xf32>, vector<8x32xf32>, vector<8x32xf32>, vector<8x32xf32>, vector<8x32xf32>, vector<8x32xf32>, vector<8x32xf32>, vector<8x32xf32>, vector<8x32xf32> -> vector<8x288xf32>
    %48 = vector.extract_strided_slice %34 {offsets = [32, 0], sizes = [32, 32], strides = [1, 1]} : vector<64x32xf32> to vector<32x32xf32>
    %cst_20 = arith.constant dense<0.000000e+00> : vector<72x32xf32>
    %49 = tpu.matmul %35, %48, %cst_20 {dimension_numbers = #tpu.dot_dimension_numbers<[1], [0], [0], [1], [0, 0, 1, 1], [], []>} : vector<72x32xf32>, vector<32x32xf32>, vector<72x32xf32> -> vector<72x32xf32>
    %50 = vector.extract_strided_slice %49 {offsets = [0, 0], sizes = [8, 32], strides = [1, 1]} : vector<72x32xf32> to vector<8x32xf32>
    %51 = vector.extract_strided_slice %49 {offsets = [8, 0], sizes = [8, 32], strides = [1, 1]} : vector<72x32xf32> to vector<8x32xf32>
    %52 = vector.extract_strided_slice %49 {offsets = [16, 0], sizes = [8, 32], strides = [1, 1]} : vector<72x32xf32> to vector<8x32xf32>
    %53 = vector.extract_strided_slice %49 {offsets = [24, 0], sizes = [8, 32], strides = [1, 1]} : vector<72x32xf32> to vector<8x32xf32>
    %54 = vector.extract_strided_slice %49 {offsets = [32, 0], sizes = [8, 32], strides = [1, 1]} : vector<72x32xf32> to vector<8x32xf32>
    %55 = vector.extract_strided_slice %49 {offsets = [40, 0], sizes = [8, 32], strides = [1, 1]} : vector<72x32xf32> to vector<8x32xf32>
    %56 = vector.extract_strided_slice %49 {offsets = [48, 0], sizes = [8, 32], strides = [1, 1]} : vector<72x32xf32> to vector<8x32xf32>
    %57 = vector.extract_strided_slice %49 {offsets = [56, 0], sizes = [8, 32], strides = [1, 1]} : vector<72x32xf32> to vector<8x32xf32>
    %58 = vector.extract_strided_slice %49 {offsets = [64, 0], sizes = [8, 32], strides = [1, 1]} : vector<72x32xf32> to vector<8x32xf32>
    %59 = tpu.concatenate %50, %51, %52, %53, %54, %55, %56, %57, %58 in 1 : vector<8x32xf32>, vector<8x32xf32>, vector<8x32xf32>, vector<8x32xf32>, vector<8x32xf32>, vector<8x32xf32>, vector<8x32xf32>, vector<8x32xf32>, vector<8x32xf32> -> vector<8x288xf32>
    %60 = tpu.concatenate %47, %59 in 0 : vector<8x288xf32>, vector<8x288xf32> -> vector<16x288xf32>
    %61 = arith.truncf %60 : vector<16x288xf32> to vector<16x288xbf16>
    %c0_21 = arith.constant 0 : index
    %c0_22 = arith.constant 0 : index
    %62 = vector.load %arg8[%c0_21, %c0_22] : memref<288x32xbf16, #tpu.memory_space<vmem>>, vector<288x32xbf16>
    %cst_23 = arith.constant dense<0.000000e+00> : vector<16x32xf32>
    %63 = tpu.matmul %61, %62, %cst_23 {dimension_numbers = #tpu.dot_dimension_numbers<[1], [0], [0], [1], [0, 0, 1, 1], [], []>} : vector<16x288xbf16>, vector<288x32xbf16>, vector<16x32xf32> -> vector<16x32xf32>
    %c0_24 = arith.constant 0 : index
    %c0_25 = arith.constant 0 : index
    %64 = vector.load %arg9[%c0_24, %c0_25] : memref<1x32xf32, #tpu.memory_space<vmem>>, vector<1x32xf32>
    %65 = vector.broadcast %64 : vector<1x32xf32> to vector<16x32xf32>
    %66 = arith.addf %63, %65 : vector<16x32xf32>
    %cst_26 = arith.constant 0.000000e+00 : f32
    %67 = vector.broadcast %cst_26 : f32 to vector<16x32xf32>
    %68 = arith.cmpf oge, %66, %67 : vector<16x32xf32>
    %cst_27 = arith.constant 2.000000e-01 : f32
    %69 = vector.broadcast %cst_27 : f32 to vector<16x32xf32>
    %70 = arith.mulf %69, %66 : vector<16x32xf32>
    %71 = arith.select %68, %66, %70 : vector<16x32xi1>, vector<16x32xf32>
    %c0_28 = arith.constant 0 : index
    %c0_29 = arith.constant 0 : index
    %72 = vector.load %arg10[%c0_28, %c0_29] : memref<1x32xf32, #tpu.memory_space<vmem>>, vector<1x32xf32>
    %c0_30 = arith.constant 0 : index
    %c0_31 = arith.constant 0 : index
    %73 = vector.load %arg11[%c0_30, %c0_31] : memref<1x32xf32, #tpu.memory_space<vmem>>, vector<1x32xf32>
    %cst_32 = arith.constant dense<0.000000e+00> : vector<32xf32>
    %74 = vector.multi_reduction <add>, %71, %cst_32 [0] : vector<16x32xf32> to vector<32xf32>
    %75 = vector.shape_cast %74 : vector<32xf32> to vector<1x32xf32>
    %cst_33 = arith.constant 6.250000e-02 : f32
    %76 = vector.broadcast %cst_33 : f32 to vector<1x32xf32>
    %77 = arith.mulf %75, %76 : vector<1x32xf32>
    %78 = vector.broadcast %77 : vector<1x32xf32> to vector<16x32xf32>
    %79 = arith.subf %71, %78 : vector<16x32xf32>
    %80 = arith.mulf %79, %79 : vector<16x32xf32>
    %cst_34 = arith.constant dense<0.000000e+00> : vector<32xf32>
    %81 = vector.multi_reduction <add>, %80, %cst_34 [0] : vector<16x32xf32> to vector<32xf32>
    %82 = vector.shape_cast %81 : vector<32xf32> to vector<1x32xf32>
    %cst_35 = arith.constant 6.250000e-02 : f32
    %83 = vector.broadcast %cst_35 : f32 to vector<1x32xf32>
    %84 = arith.mulf %82, %83 : vector<1x32xf32>
    %cst_36 = arith.constant 8.000000e-01 : f32
    %85 = vector.broadcast %cst_36 : f32 to vector<1x32xf32>
    %86 = arith.addf %84, %85 : vector<1x32xf32>
    %87 = math.rsqrt %86 : vector<1x32xf32>
    %88 = vector.broadcast %87 : vector<1x32xf32> to vector<16x32xf32>
    %89 = arith.mulf %79, %88 : vector<16x32xf32>
    %90 = vector.broadcast %72 : vector<1x32xf32> to vector<16x32xf32>
    %91 = arith.mulf %89, %90 : vector<16x32xf32>
    %92 = vector.broadcast %73 : vector<1x32xf32> to vector<16x32xf32>
    %93 = arith.addf %91, %92 : vector<16x32xf32>
    %c0_37 = arith.constant 0 : index
    %c0_38 = arith.constant 0 : index
    %94 = vector.load %arg3[%c0_37, %c0_38] : memref<18x8xf32, #tpu.memory_space<vmem>>, vector<18x8xf32>
    %95 = vector.extract_strided_slice %93 {offsets = [0, 0], sizes = [8, 32], strides = [1, 1]} : vector<16x32xf32> to vector<8x32xf32>
    %cst_39 = arith.constant dense<0.000000e+00> : vector<18x32xf32>
    %96 = tpu.matmul %94, %95, %cst_39 {dimension_numbers = #tpu.dot_dimension_numbers<[1], [0], [0], [1], [0, 0, 1, 1], [], []>} : vector<18x8xf32>, vector<8x32xf32>, vector<18x32xf32> -> vector<18x32xf32>
    %97 = vector.extract_strided_slice %96 {offsets = [0, 0], sizes = [2, 32], strides = [1, 1]} : vector<18x32xf32> to vector<2x32xf32>
    %98 = vector.extract_strided_slice %96 {offsets = [2, 0], sizes = [2, 32], strides = [1, 1]} : vector<18x32xf32> to vector<2x32xf32>
    %99 = vector.extract_strided_slice %96 {offsets = [4, 0], sizes = [2, 32], strides = [1, 1]} : vector<18x32xf32> to vector<2x32xf32>
    %100 = vector.extract_strided_slice %96 {offsets = [6, 0], sizes = [2, 32], strides = [1, 1]} : vector<18x32xf32> to vector<2x32xf32>
    %101 = vector.extract_strided_slice %96 {offsets = [8, 0], sizes = [2, 32], strides = [1, 1]} : vector<18x32xf32> to vector<2x32xf32>
    %102 = vector.extract_strided_slice %96 {offsets = [10, 0], sizes = [2, 32], strides = [1, 1]} : vector<18x32xf32> to vector<2x32xf32>
    %103 = vector.extract_strided_slice %96 {offsets = [12, 0], sizes = [2, 32], strides = [1, 1]} : vector<18x32xf32> to vector<2x32xf32>
    %104 = vector.extract_strided_slice %96 {offsets = [14, 0], sizes = [2, 32], strides = [1, 1]} : vector<18x32xf32> to vector<2x32xf32>
    %105 = vector.extract_strided_slice %96 {offsets = [16, 0], sizes = [2, 32], strides = [1, 1]} : vector<18x32xf32> to vector<2x32xf32>
    %106 = tpu.concatenate %97, %98, %99, %100, %101, %102, %103, %104, %105 in 1 : vector<2x32xf32>, vector<2x32xf32>, vector<2x32xf32>, vector<2x32xf32>, vector<2x32xf32>, vector<2x32xf32>, vector<2x32xf32>, vector<2x32xf32>, vector<2x32xf32> -> vector<2x288xf32>
    %107 = vector.extract_strided_slice %93 {offsets = [8, 0], sizes = [8, 32], strides = [1, 1]} : vector<16x32xf32> to vector<8x32xf32>
    %cst_40 = arith.constant dense<0.000000e+00> : vector<18x32xf32>
    %108 = tpu.matmul %94, %107, %cst_40 {dimension_numbers = #tpu.dot_dimension_numbers<[1], [0], [0], [1], [0, 0, 1, 1], [], []>} : vector<18x8xf32>, vector<8x32xf32>, vector<18x32xf32> -> vector<18x32xf32>
    %109 = vector.extract_strided_slice %108 {offsets = [0, 0], sizes = [2, 32], strides = [1, 1]} : vector<18x32xf32> to vector<2x32xf32>
    %110 = vector.extract_strided_slice %108 {offsets = [2, 0], sizes = [2, 32], strides = [1, 1]} : vector<18x32xf32> to vector<2x32xf32>
    %111 = vector.extract_strided_slice %108 {offsets = [4, 0], sizes = [2, 32], strides = [1, 1]} : vector<18x32xf32> to vector<2x32xf32>
    %112 = vector.extract_strided_slice %108 {offsets = [6, 0], sizes = [2, 32], strides = [1, 1]} : vector<18x32xf32> to vector<2x32xf32>
    %113 = vector.extract_strided_slice %108 {offsets = [8, 0], sizes = [2, 32], strides = [1, 1]} : vector<18x32xf32> to vector<2x32xf32>
    %114 = vector.extract_strided_slice %108 {offsets = [10, 0], sizes = [2, 32], strides = [1, 1]} : vector<18x32xf32> to vector<2x32xf32>
    %115 = vector.extract_strided_slice %108 {offsets = [12, 0], sizes = [2, 32], strides = [1, 1]} : vector<18x32xf32> to vector<2x32xf32>
    %116 = vector.extract_strided_slice %108 {offsets = [14, 0], sizes = [2, 32], strides = [1, 1]} : vector<18x32xf32> to vector<2x32xf32>
    %117 = vector.extract_strided_slice %108 {offsets = [16, 0], sizes = [2, 32], strides = [1, 1]} : vector<18x32xf32> to vector<2x32xf32>
    %118 = tpu.concatenate %109, %110, %111, %112, %113, %114, %115, %116, %117 in 1 : vector<2x32xf32>, vector<2x32xf32>, vector<2x32xf32>, vector<2x32xf32>, vector<2x32xf32>, vector<2x32xf32>, vector<2x32xf32>, vector<2x32xf32>, vector<2x32xf32> -> vector<2x288xf32>
    %119 = tpu.concatenate %106, %118 in 0 : vector<2x288xf32>, vector<2x288xf32> -> vector<4x288xf32>
    %120 = arith.truncf %119 : vector<4x288xf32> to vector<4x288xbf16>
    %c0_41 = arith.constant 0 : index
    %c0_42 = arith.constant 0 : index
    %121 = vector.load %arg12[%c0_41, %c0_42] : memref<288x32xbf16, #tpu.memory_space<vmem>>, vector<288x32xbf16>
    %cst_43 = arith.constant dense<0.000000e+00> : vector<4x32xf32>
    %122 = tpu.matmul %120, %121, %cst_43 {dimension_numbers = #tpu.dot_dimension_numbers<[1], [0], [0], [1], [0, 0, 1, 1], [], []>} : vector<4x288xbf16>, vector<288x32xbf16>, vector<4x32xf32> -> vector<4x32xf32>
    %c0_44 = arith.constant 0 : index
    %c0_45 = arith.constant 0 : index
    %123 = vector.load %arg13[%c0_44, %c0_45] : memref<1x32xf32, #tpu.memory_space<vmem>>, vector<1x32xf32>
    %124 = vector.broadcast %123 : vector<1x32xf32> to vector<4x32xf32>
    %125 = arith.addf %122, %124 : vector<4x32xf32>
    %cst_46 = arith.constant 0.000000e+00 : f32
    %126 = vector.broadcast %cst_46 : f32 to vector<4x32xf32>
    %127 = arith.cmpf oge, %125, %126 : vector<4x32xf32>
    %cst_47 = arith.constant 2.000000e-01 : f32
    %128 = vector.broadcast %cst_47 : f32 to vector<4x32xf32>
    %129 = arith.mulf %128, %125 : vector<4x32xf32>
    %130 = arith.select %127, %125, %129 : vector<4x32xi1>, vector<4x32xf32>
    %c0_48 = arith.constant 0 : index
    %c0_49 = arith.constant 0 : index
    %131 = vector.load %arg14[%c0_48, %c0_49] : memref<2x32xf32, #tpu.memory_space<vmem>>, vector<2x32xf32>
    %132 = tpu.iota {dimensions = array<i32: 1>} : vector<8x128xi32>
    %cst_50 = arith.constant 0.000000e+00 : f32
    %133 = vector.broadcast %cst_50 : f32 to vector<8x128xf32>
    %134 = vector.extract_strided_slice %130 {offsets = [0, 0], sizes = [2, 32], strides = [1, 1]} : vector<4x32xf32> to vector<2x32xf32>
    %135 = arith.mulf %134, %131 : vector<2x32xf32>
    %136 = vector.shape_cast %135 : vector<2x32xf32> to vector<1x2x32xf32>
    %cst_51 = arith.constant dense<0.000000e+00> : vector<1xf32>
    %137 = vector.multi_reduction <add>, %136, %cst_51 [1, 2] : vector<1x2x32xf32> to vector<1xf32>
    %138 = vector.shape_cast %137 : vector<1xf32> to vector<1x1x1xf32>
    %139 = vector.extract %138[0, 0, 0] : f32 from vector<1x1x1xf32>
    %c0_i32 = arith.constant 0 : i32
    %140 = vector.broadcast %c0_i32 : i32 to vector<8x128xi32>
    %141 = arith.cmpi eq, %132, %140 : vector<8x128xi32>
    %142 = vector.broadcast %139 : f32 to vector<8x128xf32>
    %143 = arith.select %141, %142, %133 : vector<8x128xi1>, vector<8x128xf32>
    %144 = vector.extract_strided_slice %130 {offsets = [2, 0], sizes = [2, 32], strides = [1, 1]} : vector<4x32xf32> to vector<2x32xf32>
    %145 = arith.mulf %144, %131 : vector<2x32xf32>
    %146 = vector.shape_cast %145 : vector<2x32xf32> to vector<1x2x32xf32>
    %cst_52 = arith.constant dense<0.000000e+00> : vector<1xf32>
    %147 = vector.multi_reduction <add>, %146, %cst_52 [1, 2] : vector<1x2x32xf32> to vector<1xf32>
    %148 = vector.shape_cast %147 : vector<1xf32> to vector<1x1x1xf32>
    %149 = vector.extract %148[0, 0, 0] : f32 from vector<1x1x1xf32>
    %c1_i32 = arith.constant 1 : i32
    %150 = vector.broadcast %c1_i32 : i32 to vector<8x128xi32>
    %151 = arith.cmpi eq, %132, %150 : vector<8x128xi32>
    %152 = vector.broadcast %149 : f32 to vector<8x128xf32>
    %153 = arith.select %151, %152, %143 : vector<8x128xi1>, vector<8x128xf32>
    %c0_53 = arith.constant 0 : index
    %c0_54 = arith.constant 0 : index
    %c0_55 = arith.constant 0 : index
    %154 = vector.load %arg15[%c0_53, %c0_54, %c0_55] : memref<1x8x128xf32, #tpu.memory_space<vmem>>, vector<1x8x128xf32>
    %155 = vector.shape_cast %154 : vector<1x8x128xf32> to vector<8x128xf32>
    %156 = vector.shape_cast %153 : vector<8x128xf32> to vector<1x8x128xf32>
    tpu.vector_store %arg15[%c0_53, %c0_54, %c0_55], %156 {strides = array<i32>} : memref<1x8x128xf32, #tpu.memory_space<vmem>>, vector<1x8x128xf32>,
    return
  }
  func.func @transform_0(%arg0: i32) -> (i32, i32, i32) {
    %c0_i32 = arith.constant 0 : i32
    %c0_i32_0 = arith.constant 0 : i32
    %c0_i32_1 = arith.constant 0 : i32
    return %arg0, %c0_i32, %c0_i32_0 : i32, i32, i32
  }
  func.func @transform_1(%arg0: i32) -> (i32, i32) {
    %c0_i32 = arith.constant 0 : i32
    %c0_i32_0 = arith.constant 0 : i32
    %c0_i32_1 = arith.constant 0 : i32
    return %c0_i32, %c0_i32_0 : i32, i32
  }
  func.func @transform_2(%arg0: i32) -> (i32, i32) {
    %c0_i32 = arith.constant 0 : i32
    %c0_i32_0 = arith.constant 0 : i32
    %c0_i32_1 = arith.constant 0 : i32
    return %c0_i32, %c0_i32_0 : i32, i32
  }
  func.func @transform_3(%arg0: i32) -> (i32, i32) {
    %c0_i32 = arith.constant 0 : i32
    %c0_i32_0 = arith.constant 0 : i32
    %c0_i32_1 = arith.constant 0 : i32
    return %c0_i32, %c0_i32_0 : i32, i32
  }
  func.func @transform_4(%arg0: i32) -> (i32, i32) {
    %c0_i32 = arith.constant 0 : i32
    %c0_i32_0 = arith.constant 0 : i32
    %c0_i32_1 = arith.constant 0 : i32
    return %c0_i32, %c0_i32_0 : i32, i32
  }
  func.func @transform_5(%arg0: i32) -> (i32, i32) {
    %c0_i32 = arith.constant 0 : i32
    %c0_i32_0 = arith.constant 0 : i32
    %c0_i32_1 = arith.constant 0 : i32
    return %c0_i32, %c0_i32_0 : i32, i32
  }
  func.func @transform_6(%arg0: i32) -> (i32, i32) {
    %c0_i32 = arith.constant 0 : i32
    %c0_i32_0 = arith.constant 0 : i32
    %c0_i32_1 = arith.constant 0 : i32
    return %c0_i32, %c0_i32_0 : i32, i32
  }
  func.func @transform_7(%arg0: i32) -> (i32, i32) {
    %c0_i32 = arith.constant 0 : i32
    %c0_i32_0 = arith.constant 0 : i32
    %c0_i32_1 = arith.constant 0 : i32
    return %c0_i32, %c0_i32_0 : i32, i32
  }
  func.func @transform_8(%arg0: i32) -> (i32, i32) {
    %c0_i32 = arith.constant 0 : i32
    %c0_i32_0 = arith.constant 0 : i32
    %c0_i32_1 = arith.constant 0 : i32
    return %c0_i32, %c0_i32_0 : i32, i32
  }
  func.func @transform_9(%arg0: i32) -> (i32, i32) {
    %c0_i32 = arith.constant 0 : i32
    %c0_i32_0 = arith.constant 0 : i32
    %c0_i32_1 = arith.constant 0 : i32
    return %c0_i32, %c0_i32_0 : i32, i32
  }
  func.func @transform_10(%arg0: i32) -> (i32, i32) {
    %c0_i32 = arith.constant 0 : i32
    %c0_i32_0 = arith.constant 0 : i32
    %c0_i32_1 = arith.constant 0 : i32
    return %c0_i32, %c0_i32_0 : i32, i32
  }
  func.func @transform_11(%arg0: i32) -> (i32, i32) {
    %c0_i32 = arith.constant 0 : i32
    %c0_i32_0 = arith.constant 0 : i32
    %c0_i32_1 = arith.constant 0 : i32
    return %c0_i32, %c0_i32_0 : i32, i32
  }
  func.func @transform_12(%arg0: i32) -> (i32, i32) {
    %c0_i32 = arith.constant 0 : i32
    %c0_i32_0 = arith.constant 0 : i32
    %c0_i32_1 = arith.constant 0 : i32
    return %c0_i32, %c0_i32_0 : i32, i32
  }
  func.func @transform_13(%arg0: i32) -> (i32, i32) {
    %c0_i32 = arith.constant 0 : i32
    %c0_i32_0 = arith.constant 0 : i32
    %c0_i32_1 = arith.constant 0 : i32
    return %c0_i32, %c0_i32_0 : i32, i32
  }
  func.func @transform_14(%arg0: i32) -> (i32, i32, i32) {
    %c0_i32 = arith.constant 0 : i32
    %c0_i32_0 = arith.constant 0 : i32
    %c0_i32_1 = arith.constant 0 : i32
    return %arg0, %c0_i32, %c0_i32_0 : i32, i32, i32
  }
}

module attributes {stable_mosaic.version = 11 : i64} {
  func.func @_loss_head_kernel(%arg0: memref<2x512xf32, #tpu.memory_space<vmem>>, %arg1: memref<2x512xf32, #tpu.memory_space<vmem>>, %arg2: memref<2x128xf32, #tpu.memory_space<vmem>>, %arg3: memref<2x128xf32, #tpu.memory_space<vmem>>, %arg4: memref<512x9xf32, #tpu.memory_space<vmem>>, %arg5: memref<288x128xf32, #tpu.memory_space<vmem>>, %arg6: memref<9x8xbf16, #tpu.memory_space<vmem>>, %arg7: memref<1x8xf32, #tpu.memory_space<vmem>>, %arg8: memref<72x16xbf16, #tpu.memory_space<vmem>>, %arg9: memref<1x16xf32, #tpu.memory_space<vmem>>, %arg10: memref<1x8xf32, #tpu.memory_space<vmem>>, %arg11: memref<1x16xf32, #tpu.memory_space<vmem>>, %arg12: memref<1x1xf32, #tpu.memory_space<smem>>, %arg13: memref<1x1xf32, #tpu.memory_space<smem>>) attributes {dimension_semantics = [], scalar_prefetch = 0 : i64, scratch_operands = 0 : i64, tpu.core_type = #tpu.core_type<tc>} {
    %c0 = arith.constant 0 : index
    %c0_0 = arith.constant 0 : index
    %0 = vector.load %arg0[%c0, %c0_0] : memref<2x512xf32, #tpu.memory_space<vmem>>, vector<2x512xf32>
    %c0_1 = arith.constant 0 : index
    %c0_2 = arith.constant 0 : index
    %1 = vector.load %arg1[%c0_1, %c0_2] : memref<2x512xf32, #tpu.memory_space<vmem>>, vector<2x512xf32>
    %2 = arith.subf %0, %1 : vector<2x512xf32>
    %3 = math.absf %2 : vector<2x512xf32>
    %4 = vector.shape_cast %3 : vector<2x512xf32> to vector<1x2x512xf32>
    %cst = arith.constant dense<0.000000e+00> : vector<1xf32>
    %5 = vector.multi_reduction <add>, %4, %cst [1, 2] : vector<1x2x512xf32> to vector<1xf32>
    %6 = vector.shape_cast %5 : vector<1xf32> to vector<1x1x1xf32>
    %7 = vector.extract %6[0, 0, 0] : f32 from vector<1x1x1xf32>
    %c0_3 = arith.constant 0 : index
    %c0_4 = arith.constant 0 : index
    %8 = vector.load %arg4[%c0_3, %c0_4] : memref<512x9xf32, #tpu.memory_space<vmem>>, vector<512x9xf32>
    %9 = arith.truncf %8 : vector<512x9xf32> to vector<512x9xbf16>
    %c0_5 = arith.constant 0 : index
    %c0_6 = arith.constant 0 : index
    %10 = vector.load %arg6[%c0_5, %c0_6] : memref<9x8xbf16, #tpu.memory_space<vmem>>, vector<9x8xbf16>
    %cst_7 = arith.constant dense<0.000000e+00> : vector<512x8xf32>
    %11 = tpu.matmul %9, %10, %cst_7 {dimension_numbers = #tpu.dot_dimension_numbers<[1], [0], [0], [1], [0, 0, 1, 1], [], []>} : vector<512x9xbf16>, vector<9x8xbf16>, vector<512x8xf32> -> vector<512x8xf32>
    %c0_8 = arith.constant 0 : index
    %c0_9 = arith.constant 0 : index
    %12 = vector.load %arg7[%c0_8, %c0_9] : memref<1x8xf32, #tpu.memory_space<vmem>>, vector<1x8xf32>
    %13 = vector.broadcast %12 : vector<1x8xf32> to vector<512x8xf32>
    %14 = arith.addf %11, %13 : vector<512x8xf32>
    %cst_10 = arith.constant 0.000000e+00 : f32
    %15 = vector.broadcast %cst_10 : f32 to vector<512x8xf32>
    %16 = arith.maximumf %14, %15 : vector<512x8xf32>
    %c0_11 = arith.constant 0 : index
    %c0_12 = arith.constant 0 : index
    %17 = vector.load %arg5[%c0_11, %c0_12] : memref<288x128xf32, #tpu.memory_space<vmem>>, vector<288x128xf32>
    %18 = vector.extract_strided_slice %16 {offsets = [0, 0], sizes = [128, 8], strides = [1, 1]} : vector<512x8xf32> to vector<128x8xf32>
    %cst_13 = arith.constant dense<0.000000e+00> : vector<288x8xf32>
    %19 = tpu.matmul %17, %18, %cst_13 {dimension_numbers = #tpu.dot_dimension_numbers<[1], [0], [0], [1], [0, 0, 1, 1], [], []>} : vector<288x128xf32>, vector<128x8xf32>, vector<288x8xf32> -> vector<288x8xf32>
    %20 = vector.extract_strided_slice %19 {offsets = [0, 0], sizes = [32, 8], strides = [1, 1]} : vector<288x8xf32> to vector<32x8xf32>
    %21 = vector.extract_strided_slice %19 {offsets = [32, 0], sizes = [32, 8], strides = [1, 1]} : vector<288x8xf32> to vector<32x8xf32>
    %22 = vector.extract_strided_slice %19 {offsets = [64, 0], sizes = [32, 8], strides = [1, 1]} : vector<288x8xf32> to vector<32x8xf32>
    %23 = vector.extract_strided_slice %19 {offsets = [96, 0], sizes = [32, 8], strides = [1, 1]} : vector<288x8xf32> to vector<32x8xf32>
    %24 = vector.extract_strided_slice %19 {offsets = [128, 0], sizes = [32, 8], strides = [1, 1]} : vector<288x8xf32> to vector<32x8xf32>
    %25 = vector.extract_strided_slice %19 {offsets = [160, 0], sizes = [32, 8], strides = [1, 1]} : vector<288x8xf32> to vector<32x8xf32>
    %26 = vector.extract_strided_slice %19 {offsets = [192, 0], sizes = [32, 8], strides = [1, 1]} : vector<288x8xf32> to vector<32x8xf32>
    %27 = vector.extract_strided_slice %19 {offsets = [224, 0], sizes = [32, 8], strides = [1, 1]} : vector<288x8xf32> to vector<32x8xf32>
    %28 = vector.extract_strided_slice %19 {offsets = [256, 0], sizes = [32, 8], strides = [1, 1]} : vector<288x8xf32> to vector<32x8xf32>
    %29 = tpu.concatenate %20, %21, %22, %23, %24, %25, %26, %27, %28 in 1 : vector<32x8xf32>, vector<32x8xf32>, vector<32x8xf32>, vector<32x8xf32>, vector<32x8xf32>, vector<32x8xf32>, vector<32x8xf32>, vector<32x8xf32>, vector<32x8xf32> -> vector<32x72xf32>
    %30 = vector.extract_strided_slice %16 {offsets = [128, 0], sizes = [128, 8], strides = [1, 1]} : vector<512x8xf32> to vector<128x8xf32>
    %cst_14 = arith.constant dense<0.000000e+00> : vector<288x8xf32>
    %31 = tpu.matmul %17, %30, %cst_14 {dimension_numbers = #tpu.dot_dimension_numbers<[1], [0], [0], [1], [0, 0, 1, 1], [], []>} : vector<288x128xf32>, vector<128x8xf32>, vector<288x8xf32> -> vector<288x8xf32>
    %32 = vector.extract_strided_slice %31 {offsets = [0, 0], sizes = [32, 8], strides = [1, 1]} : vector<288x8xf32> to vector<32x8xf32>
    %33 = vector.extract_strided_slice %31 {offsets = [32, 0], sizes = [32, 8], strides = [1, 1]} : vector<288x8xf32> to vector<32x8xf32>
    %34 = vector.extract_strided_slice %31 {offsets = [64, 0], sizes = [32, 8], strides = [1, 1]} : vector<288x8xf32> to vector<32x8xf32>
    %35 = vector.extract_strided_slice %31 {offsets = [96, 0], sizes = [32, 8], strides = [1, 1]} : vector<288x8xf32> to vector<32x8xf32>
    %36 = vector.extract_strided_slice %31 {offsets = [128, 0], sizes = [32, 8], strides = [1, 1]} : vector<288x8xf32> to vector<32x8xf32>
    %37 = vector.extract_strided_slice %31 {offsets = [160, 0], sizes = [32, 8], strides = [1, 1]} : vector<288x8xf32> to vector<32x8xf32>
    %38 = vector.extract_strided_slice %31 {offsets = [192, 0], sizes = [32, 8], strides = [1, 1]} : vector<288x8xf32> to vector<32x8xf32>
    %39 = vector.extract_strided_slice %31 {offsets = [224, 0], sizes = [32, 8], strides = [1, 1]} : vector<288x8xf32> to vector<32x8xf32>
    %40 = vector.extract_strided_slice %31 {offsets = [256, 0], sizes = [32, 8], strides = [1, 1]} : vector<288x8xf32> to vector<32x8xf32>
    %41 = tpu.concatenate %32, %33, %34, %35, %36, %37, %38, %39, %40 in 1 : vector<32x8xf32>, vector<32x8xf32>, vector<32x8xf32>, vector<32x8xf32>, vector<32x8xf32>, vector<32x8xf32>, vector<32x8xf32>, vector<32x8xf32>, vector<32x8xf32> -> vector<32x72xf32>
    %42 = vector.extract_strided_slice %16 {offsets = [256, 0], sizes = [128, 8], strides = [1, 1]} : vector<512x8xf32> to vector<128x8xf32>
    %cst_15 = arith.constant dense<0.000000e+00> : vector<288x8xf32>
    %43 = tpu.matmul %17, %42, %cst_15 {dimension_numbers = #tpu.dot_dimension_numbers<[1], [0], [0], [1], [0, 0, 1, 1], [], []>} : vector<288x128xf32>, vector<128x8xf32>, vector<288x8xf32> -> vector<288x8xf32>
    %44 = vector.extract_strided_slice %43 {offsets = [0, 0], sizes = [32, 8], strides = [1, 1]} : vector<288x8xf32> to vector<32x8xf32>
    %45 = vector.extract_strided_slice %43 {offsets = [32, 0], sizes = [32, 8], strides = [1, 1]} : vector<288x8xf32> to vector<32x8xf32>
    %46 = vector.extract_strided_slice %43 {offsets = [64, 0], sizes = [32, 8], strides = [1, 1]} : vector<288x8xf32> to vector<32x8xf32>
    %47 = vector.extract_strided_slice %43 {offsets = [96, 0], sizes = [32, 8], strides = [1, 1]} : vector<288x8xf32> to vector<32x8xf32>
    %48 = vector.extract_strided_slice %43 {offsets = [128, 0], sizes = [32, 8], strides = [1, 1]} : vector<288x8xf32> to vector<32x8xf32>
    %49 = vector.extract_strided_slice %43 {offsets = [160, 0], sizes = [32, 8], strides = [1, 1]} : vector<288x8xf32> to vector<32x8xf32>
    %50 = vector.extract_strided_slice %43 {offsets = [192, 0], sizes = [32, 8], strides = [1, 1]} : vector<288x8xf32> to vector<32x8xf32>
    %51 = vector.extract_strided_slice %43 {offsets = [224, 0], sizes = [32, 8], strides = [1, 1]} : vector<288x8xf32> to vector<32x8xf32>
    %52 = vector.extract_strided_slice %43 {offsets = [256, 0], sizes = [32, 8], strides = [1, 1]} : vector<288x8xf32> to vector<32x8xf32>
    %53 = tpu.concatenate %44, %45, %46, %47, %48, %49, %50, %51, %52 in 1 : vector<32x8xf32>, vector<32x8xf32>, vector<32x8xf32>, vector<32x8xf32>, vector<32x8xf32>, vector<32x8xf32>, vector<32x8xf32>, vector<32x8xf32>, vector<32x8xf32> -> vector<32x72xf32>
    %54 = vector.extract_strided_slice %16 {offsets = [384, 0], sizes = [128, 8], strides = [1, 1]} : vector<512x8xf32> to vector<128x8xf32>
    %cst_16 = arith.constant dense<0.000000e+00> : vector<288x8xf32>
    %55 = tpu.matmul %17, %54, %cst_16 {dimension_numbers = #tpu.dot_dimension_numbers<[1], [0], [0], [1], [0, 0, 1, 1], [], []>} : vector<288x128xf32>, vector<128x8xf32>, vector<288x8xf32> -> vector<288x8xf32>
    %56 = vector.extract_strided_slice %55 {offsets = [0, 0], sizes = [32, 8], strides = [1, 1]} : vector<288x8xf32> to vector<32x8xf32>
    %57 = vector.extract_strided_slice %55 {offsets = [32, 0], sizes = [32, 8], strides = [1, 1]} : vector<288x8xf32> to vector<32x8xf32>
    %58 = vector.extract_strided_slice %55 {offsets = [64, 0], sizes = [32, 8], strides = [1, 1]} : vector<288x8xf32> to vector<32x8xf32>
    %59 = vector.extract_strided_slice %55 {offsets = [96, 0], sizes = [32, 8], strides = [1, 1]} : vector<288x8xf32> to vector<32x8xf32>
    %60 = vector.extract_strided_slice %55 {offsets = [128, 0], sizes = [32, 8], strides = [1, 1]} : vector<288x8xf32> to vector<32x8xf32>
    %61 = vector.extract_strided_slice %55 {offsets = [160, 0], sizes = [32, 8], strides = [1, 1]} : vector<288x8xf32> to vector<32x8xf32>
    %62 = vector.extract_strided_slice %55 {offsets = [192, 0], sizes = [32, 8], strides = [1, 1]} : vector<288x8xf32> to vector<32x8xf32>
    %63 = vector.extract_strided_slice %55 {offsets = [224, 0], sizes = [32, 8], strides = [1, 1]} : vector<288x8xf32> to vector<32x8xf32>
    %64 = vector.extract_strided_slice %55 {offsets = [256, 0], sizes = [32, 8], strides = [1, 1]} : vector<288x8xf32> to vector<32x8xf32>
    %65 = tpu.concatenate %56, %57, %58, %59, %60, %61, %62, %63, %64 in 1 : vector<32x8xf32>, vector<32x8xf32>, vector<32x8xf32>, vector<32x8xf32>, vector<32x8xf32>, vector<32x8xf32>, vector<32x8xf32>, vector<32x8xf32>, vector<32x8xf32> -> vector<32x72xf32>
    %66 = tpu.concatenate %29, %41, %53, %65 in 0 : vector<32x72xf32>, vector<32x72xf32>, vector<32x72xf32>, vector<32x72xf32> -> vector<128x72xf32>
    %67 = arith.truncf %66 : vector<128x72xf32> to vector<128x72xbf16>
    %c0_17 = arith.constant 0 : index
    %c0_18 = arith.constant 0 : index
    %68 = vector.load %arg8[%c0_17, %c0_18] : memref<72x16xbf16, #tpu.memory_space<vmem>>, vector<72x16xbf16>
    %cst_19 = arith.constant dense<0.000000e+00> : vector<128x16xf32>
    %69 = tpu.matmul %67, %68, %cst_19 {dimension_numbers = #tpu.dot_dimension_numbers<[1], [0], [0], [1], [0, 0, 1, 1], [], []>} : vector<128x72xbf16>, vector<72x16xbf16>, vector<128x16xf32> -> vector<128x16xf32>
    %c0_20 = arith.constant 0 : index
    %c0_21 = arith.constant 0 : index
    %70 = vector.load %arg9[%c0_20, %c0_21] : memref<1x16xf32, #tpu.memory_space<vmem>>, vector<1x16xf32>
    %71 = vector.broadcast %70 : vector<1x16xf32> to vector<128x16xf32>
    %72 = arith.addf %69, %71 : vector<128x16xf32>
    %cst_22 = arith.constant 0.000000e+00 : f32
    %73 = vector.broadcast %cst_22 : f32 to vector<128x16xf32>
    %74 = arith.maximumf %72, %73 : vector<128x16xf32>
    %c0_23 = arith.constant 0 : index
    %c0_24 = arith.constant 0 : index
    %75 = vector.load %arg10[%c0_23, %c0_24] : memref<1x8xf32, #tpu.memory_space<vmem>>, vector<1x8xf32>
    %76 = arith.mulf %16, %16 : vector<512x8xf32>
    %cst_25 = arith.constant dense<0.000000e+00> : vector<512xf32>
    %77 = vector.multi_reduction <add>, %76, %cst_25 [1] : vector<512x8xf32> to vector<512xf32>
    %78 = vector.shape_cast %77 : vector<512xf32> to vector<512x1xf32>
    %cst_26 = arith.constant 1.000000e-10 : f32
    %79 = vector.broadcast %cst_26 : f32 to vector<512x1xf32>
    %80 = arith.addf %78, %79 : vector<512x1xf32>
    %81 = math.rsqrt %80 : vector<512x1xf32>
    %82 = vector.broadcast %81 : vector<512x1xf32> to vector<512x8xf32>
    %83 = arith.mulf %16, %82 : vector<512x8xf32>
    %84 = vector.extract_strided_slice %83 {offsets = [0, 0], sizes = [256, 8], strides = [1, 1]} : vector<512x8xf32> to vector<256x8xf32>
    %85 = vector.extract_strided_slice %83 {offsets = [256, 0], sizes = [256, 8], strides = [1, 1]} : vector<512x8xf32> to vector<256x8xf32>
    %86 = arith.subf %84, %85 : vector<256x8xf32>
    %87 = arith.mulf %86, %86 : vector<256x8xf32>
    %88 = vector.broadcast %75 : vector<1x8xf32> to vector<256x8xf32>
    %89 = arith.mulf %87, %88 : vector<256x8xf32>
    %90 = vector.shape_cast %89 : vector<256x8xf32> to vector<1x256x8xf32>
    %cst_27 = arith.constant dense<0.000000e+00> : vector<1xf32>
    %91 = vector.multi_reduction <add>, %90, %cst_27 [1, 2] : vector<1x256x8xf32> to vector<1xf32>
    %92 = vector.shape_cast %91 : vector<1xf32> to vector<1x1x1xf32>
    %93 = vector.extract %92[0, 0, 0] : f32 from vector<1x1x1xf32>
    %cst_28 = arith.constant 1.280000e+02 : f32
    %94 = arith.divf %93, %cst_28 : f32
    %c0_29 = arith.constant 0 : index
    %c0_30 = arith.constant 0 : index
    %95 = vector.load %arg11[%c0_29, %c0_30] : memref<1x16xf32, #tpu.memory_space<vmem>>, vector<1x16xf32>
    %96 = arith.mulf %74, %74 : vector<128x16xf32>
    %cst_31 = arith.constant dense<0.000000e+00> : vector<128xf32>
    %97 = vector.multi_reduction <add>, %96, %cst_31 [1] : vector<128x16xf32> to vector<128xf32>
    %98 = vector.shape_cast %97 : vector<128xf32> to vector<128x1xf32>
    %cst_32 = arith.constant 1.000000e-10 : f32
    %99 = vector.broadcast %cst_32 : f32 to vector<128x1xf32>
    %100 = arith.addf %98, %99 : vector<128x1xf32>
    %101 = math.rsqrt %100 : vector<128x1xf32>
    %102 = vector.broadcast %101 : vector<128x1xf32> to vector<128x16xf32>
    %103 = arith.mulf %74, %102 : vector<128x16xf32>
    %104 = vector.extract_strided_slice %103 {offsets = [0, 0], sizes = [64, 16], strides = [1, 1]} : vector<128x16xf32> to vector<64x16xf32>
    %105 = vector.extract_strided_slice %103 {offsets = [64, 0], sizes = [64, 16], strides = [1, 1]} : vector<128x16xf32> to vector<64x16xf32>
    %106 = arith.subf %104, %105 : vector<64x16xf32>
    %107 = arith.mulf %106, %106 : vector<64x16xf32>
    %108 = vector.broadcast %95 : vector<1x16xf32> to vector<64x16xf32>
    %109 = arith.mulf %107, %108 : vector<64x16xf32>
    %110 = vector.shape_cast %109 : vector<64x16xf32> to vector<1x64x16xf32>
    %cst_33 = arith.constant dense<0.000000e+00> : vector<1xf32>
    %111 = vector.multi_reduction <add>, %110, %cst_33 [1, 2] : vector<1x64x16xf32> to vector<1xf32>
    %112 = vector.shape_cast %111 : vector<1xf32> to vector<1x1x1xf32>
    %113 = vector.extract %112[0, 0, 0] : f32 from vector<1x1x1xf32>
    %cst_34 = arith.constant 3.200000e+01 : f32
    %114 = arith.divf %113, %cst_34 : f32
    %115 = arith.addf %94, %114 : f32
    %cst_35 = arith.constant 5.120000e+02 : f32
    %116 = arith.mulf %cst_35, %115 : f32
    %117 = arith.addf %7, %116 : f32
    %c0_36 = arith.constant 0 : index
    %c0_37 = arith.constant 0 : index
    %118 = vector.load %arg2[%c0_36, %c0_37] : memref<2x128xf32, #tpu.memory_space<vmem>>, vector<2x128xf32>
    %c0_38 = arith.constant 0 : index
    %c0_39 = arith.constant 0 : index
    %119 = vector.load %arg3[%c0_38, %c0_39] : memref<2x128xf32, #tpu.memory_space<vmem>>, vector<2x128xf32>
    %120 = arith.mulf %118, %118 : vector<2x128xf32>
    %121 = math.exp %119 : vector<2x128xf32>
    %122 = arith.addf %120, %121 : vector<2x128xf32>
    %cst_40 = arith.constant 1.000000e+00 : f32
    %123 = vector.broadcast %cst_40 : f32 to vector<2x128xf32>
    %124 = arith.subf %122, %123 : vector<2x128xf32>
    %125 = arith.subf %124, %119 : vector<2x128xf32>
    %126 = vector.shape_cast %125 : vector<2x128xf32> to vector<1x2x128xf32>
    %cst_41 = arith.constant dense<0.000000e+00> : vector<1xf32>
    %127 = vector.multi_reduction <add>, %126, %cst_41 [1, 2] : vector<1x2x128xf32> to vector<1xf32>
    %128 = vector.shape_cast %127 : vector<1xf32> to vector<1x1x1xf32>
    %129 = vector.extract %128[0, 0, 0] : f32 from vector<1x1x1xf32>
    %cst_42 = arith.constant 5.000000e-01 : f32
    %130 = arith.mulf %cst_42, %129 : f32
    %c0_43 = arith.constant 0 : index
    %c0_44 = arith.constant 0 : index
    %131 = memref.load %arg12[%c0_43, %c0_44] : memref<1x1xf32, #tpu.memory_space<smem>>
    memref.store %117, %arg12[%c0_43, %c0_44] : memref<1x1xf32, #tpu.memory_space<smem>>
    %c0_45 = arith.constant 0 : index
    %c0_46 = arith.constant 0 : index
    %132 = memref.load %arg13[%c0_45, %c0_46] : memref<1x1xf32, #tpu.memory_space<smem>>
    memref.store %130, %arg13[%c0_45, %c0_46] : memref<1x1xf32, #tpu.memory_space<smem>>
    return
  }
}

</mosaic_0001>

<bundles_post_ra>
// kernel: _unnamed_function_.5
= control target key start
LH: loop header
LB: loop body
LE: loop exit
PB: predicated region body
PF: predicated region fallthrough
CT: control target
= control target key end

     0   :  { %vm111_vm0 = vcmask 1043456   ;;  %vm112_vm1 = vcmask 1044480   ;;  %v2387_v1 = vmov 65535   ;;  %vm86_vm2 = vcmask 72704   ;;  %s2389_s22 = smov 64   ;;  %s2390_s29 = smov 96   ;;  %s3122_s3 = inlined_call_operand.vmem [shape: bf16[9,32], index: 3, kind: input, shape index: {}]   ;;  %s3123_s0 = inlined_call_operand.vmem [shape: f32[1,128,9], index: 0, kind: input, shape index: {}]   ;;  %s3124_s4 = inlined_call_operand.vmem [shape: f32[1,32], index: 4, kind: input, shape index: {}, may-alias: {4,6,8,10,12}]   ;;  %s3125_s1 = inlined_call_operand.vmem [shape: f32[144,64], index: 1, kind: input, shape index: {}]   ;;  %s3126_s5 = inlined_call_operand.vmem [shape: f32[1,32], index: 5, kind: input, shape index: {}]   ;;  %s3127_s6 = inlined_call_operand.vmem [shape: f32[1,32], index: 6, kind: input, shape index: {}, may-alias: {4,6,8,10,12}]   ;;  %s3128_s7 = inlined_call_operand.vmem [shape: bf16[288,32], index: 7, kind: input, shape index: {}]   ;;  %s3129_s8 = inlined_call_operand.vmem [shape: f32[1,32], index: 8, kind: input, shape index: {}, may-alias: {4,6,8,10,12}]   ;;  %s3130_s9 = inlined_call_operand.vmem [shape: f32[1,32], index: 9, kind: input, shape index: {}]   ;;  %s3131_s10 = inlined_call_operand.vmem [shape: f32[1,32], index: 10, kind: input, shape index: {}, may-alias: {4,6,8,10,12}]   ;;  %s3132_s2 = inlined_call_operand.vmem [shape: f32[36,16], index: 2, kind: input, shape index: {}]   ;;  %s3133_s11 = inlined_call_operand.vmem [shape: bf16[288,32], index: 11, kind: input, shape index: {}]   ;;  %s3134_s12 = inlined_call_operand.vmem [shape: f32[1,32], index: 12, kind: input, shape index: {}, may-alias: {4,6,8,10,12}]   ;;  %s3135_s13 = inlined_call_operand.vmem [shape: f32[4,32], index: 13, kind: input, shape index: {}]   ;;  %s3136_s14 = inlined_call_operand.vmem [shape: f32[1,8,128], index: 14, kind: output, shape index: {}]  }
   0x1   :  { %v2346_v0 = vld [vmem:[%s3122_s3] sm:$0x1f]   ;;  %v113_v2 = vsel %vm111_vm0, 4294967295, %v2387_v1  ;;  %v49_v4 = vld [vmem:[%s3123_s0 + $0x8] sm:$0xff]  ;;  %v50_v7 = vld [vmem:[%s3123_s0 + $0x10] sm:$0xff]  ;;  %vm265_vm6 = vcmask 261120  }
   0x2   :  { %v48_v3 = vld [vmem:[%s3123_s0] sm:$0xff]  ;;  %v114_v5 = vsel %vm112_vm1, %v113_v2, 0  ;;  %v51_v8 = vld [vmem:[%s3123_s0 + $0x18] sm:$0xff]  ;;  %v53_v11 = vld [vmem:[%s3123_s0 + $0x28] sm:$0xff]  ;;  %vm454_vm14 = vcmask 523264   ;;  %s2388_s3 = smov 32  }
   0x3   :  { %v64_v6 = vpack.c.bf16 %v49_v4, %v48_v3  ;;  %v52_v9 = vld [vmem:[%s3123_s0 + $0x20] sm:$0xff]  ;;  %v116_v10 = vand.u32 %v2346_v0, %v114_v5  ;;  %v57_v13 = vld [vmem:[%s3123_s0 + $0x48] sm:$0xff]  ;;  %v58_v15 = vld [vmem:[%s3123_s0 + $0x50] sm:$0xff]  ;;  %v65_v17 = vpack.c.bf16 %v51_v8, %v50_v7 }
   0x4   :  { %v56_v12 = vld [vmem:[%s3123_s0 + $0x40] sm:$0xff]  ;;  %v59_v16 = vld [vmem:[%s3123_s0 + $0x58] sm:$0xff]  ;;  %v61_v20 = vld [vmem:[%s3123_s0 + $0x68] sm:$0xff]  ;;  %v66_v21 = vpack.c.bf16 %v53_v11, %v52_v9 }
   0x5   :  { %2072 = vmatprep.mubr.msk.bf16.mxu0 %vm86_vm2, %v64_v6  ;;  %v68_v14 = vpack.c.bf16 %v57_v13, %v56_v12  ;;  %2070 = vmatprep.subr.bf16.mxu0 %v116_v10  ;;  %v69_v18 = vpack.c.bf16 %v59_v16, %v58_v15  ;;  %v60_v19 = vld [vmem:[%s3123_s0 + $0x60] sm:$0xff]  ;;  %v54_v23 = vld [vmem:[%s3123_s0 + $0x30] sm:$0xff]  ;;  %v55_v24 = vld [vmem:[%s3123_s0 + $0x38] sm:$0xff] }
   0x6   :  { %2228 = vmatprep.subr.bf16.mxu1 %v116_v10  ;;  %2071 = vmatpush3.bf16.msra.mxu0 %v116_v10  ;;  %v70_v22 = vpack.c.bf16 %v61_v20, %v60_v19  ;;  %v62_v25 = vld [vmem:[%s3123_s0 + $0x70] sm:$0xff]  ;;  %v63_v26 = vld [vmem:[%s3123_s0 + $0x78] sm:$0xff]  ;;  %v67_v27 = vpack.c.bf16 %v55_v24, %v54_v23  ;;  %v2531_v30 = vld [vmem:[%s3124_s4] ss:$0 sm:$0xff] }
   0x7   :  { %2229 = vmatpush3.bf16.msra.mxu1 %v116_v10  ;;  %2080 = vmatprep.mubr.msk.bf16.mxu1 %vm86_vm2, %v68_v14  ;;  %v71_v28 = vpack.c.bf16 %v63_v26, %v62_v25 }
   0x9   :  { %2073 = vmatmul.mubr.msk.bf16.vlgmr.msra.gmra.mxu0 %vm86_vm2, %v65_v17 }
   0xa   :  { %2081 = vmatmul.mubr.msk.bf16.vlgmr.msra.gmra.mxu1 %vm86_vm2, %v69_v18  ;;  %2076 = vmatprep.mubr.msk.bf16.mxu0 %vm86_vm2, %v66_v21  ;;  %v436_v18 = vld [vmem:[%s3125_s1] sm:$0xff] }
   0xb   :  { %2084 = vmatprep.mubr.msk.bf16.mxu1 %vm86_vm2, %v70_v22 }
  0x11   :  { %2077 = vmatmul.mubr.msk.bf16.gmra.mxu0 %vm86_vm2, %v67_v27 }
  0x12   :  { %2085 = vmatmul.mubr.msk.bf16.gmra.mxu1 %vm86_vm2, %v71_v28  ;;  %2147 = vmatprep.mubr.msk.f32.mxu0 %vm454_vm14, %v436_v18 }
  0x13   :  { %2104 = vmatprep.mubr.msk.f32.mxu1 %vm454_vm14, %v436_v18 }
  0xc9   :  { %v2074_v29 = vpop.f32.mrf.mxu0 }
  0xca   :  { %v2082_v31 = vpop.f32.mrf.mxu1  ;;  %v161_v34 = vadd.f32 %v2074_v29, %v2531_v30 }
  0xcb   :  { %v152_v32 = vpop.f32.mrf.mxu0  ;;  %v193_v10 = vadd.f32 %v2082_v31, %v2531_v30 }
  0xcc   :  { %v184_v33 = vpop.f32.mrf.mxu1  ;;  %v153_v35 = vadd.f32 %v2531_v30, %v152_v32  ;;  %v233_v42 = vmul.f32 0.2, %v161_v34  ;;  %vm217_vm4 = vcmp.ge.f32.partialorder %v161_v34, 0.0 }
  0xcd   :  { %v2075_v36 = vpop.f32.mrf.mxu0  ;;  %v185_v61 = vadd.f32 %v2531_v30, %v184_v33  ;;  %v241_v25 = vmul.f32 0.2, %v193_v10  ;;  %vm225_vm15 = vcmp.ge.f32.partialorder %v193_v10, 0.0 }
  0xce   :  { %v2083_v37 = vpop.f32.mrf.mxu1  ;;  %v231_v38 = vmul.f32 0.2, %v153_v35  ;;  %v164_v39 = vadd.f32 %v2075_v36, %v2531_v30  ;;  %vm215_vm3 = vcmp.ge.f32.partialorder %v153_v35, 0.0  ;;  %v2541_v50 = vsel %vm217_vm4, %v161_v34, %v233_v42 }
  0xcf   :  { %v155_v40 = vpop.f32.mrf.mxu0  ;;  %v269_v60 = vsel %vm265_vm6, %v2541_v50, 0.0  ;;  %v239_v15 = vmul.f32 0.2, %v185_v61  ;;  %vm223_vm12 = vcmp.ge.f32.partialorder %v185_v61, 0.0  ;;  %v196_v20 = vadd.f32 %v2083_v37, %v2531_v30 }
  0xd0   :  { %v187_v41 = vpop.f32.mrf.mxu1  ;;  %v156_v43 = vadd.f32 %v2531_v30, %v155_v40  ;;  %v2537_v45 = vsel %vm215_vm3, %v153_v35, %v231_v38  ;;  %v234_v46 = vmul.f32 0.2, %v164_v39  ;;  %vm218_vm7 = vcmp.ge.f32.partialorder %v164_v39, 0.0 }
  0xd1   :  { %v2078_v44 = vpop.f32.mrf.mxu0  ;;  %v266_v54 = vsel %vm265_vm6, %v2537_v45, 0.0  ;;  %v188_v6 = vadd.f32 %v2531_v30, %v187_v41  ;;  %v2580_v26 = vsel %vm223_vm12, %v185_v61, %v239_v15  ;;  %v242_v31 = vmul.f32 0.2, %v196_v20 }
  0xd2   :  { %vm216_vm5 = vcmp.ge.f32.partialorder %v156_v43, 0.0  ;;  %v232_v47 = vmul.f32 0.2, %v156_v43  ;;  %v2539_v49 = vpop.f32.mrf.mxu1  ;;  %v177_v52 = vadd.f32 %v2078_v44, %v2531_v30  ;;  %v2551_v57 = vsel %vm218_vm7, %v164_v39, %v234_v46 }
  0xd3   :  { %v168_v48 = vpop.f32.mrf.mxu0  ;;  %v271_v5 = vsel %vm265_vm6, %v2551_v57, 0.0  ;;  %v240_v22 = vmul.f32 0.2, %v188_v6  ;;  %vm224_vm13 = vcmp.ge.f32.partialorder %v188_v6, 0.0  ;;  %v281_v35 = vsel %vm265_vm6, %v2580_v26, 0.0 }
  0xd4   :  { %v2543_v51 = vsel %vm216_vm5, %v156_v43, %v232_v47  ;;  %v169_v53 = vadd.f32 %v2531_v30, %v168_v48  ;;  %v200_v0 = vpop.f32.mrf.mxu1  ;;  %v237_v2 = vmul.f32 0.2, %v177_v52  ;;  %vm221_vm9 = vcmp.ge.f32.partialorder %v177_v52, 0.0 }
  0xd5   :  { %v267_v55 = vsel %vm265_vm6, %v2543_v51, 0.0  ;;  %v2079_v56 = vpop.f32.mrf.mxu0  ;;  %v201_v28 = vadd.f32 %v2531_v30, %v200_v0  ;;  %v2587_v32 = vsel %vm224_vm13, %v188_v6, %v240_v22  ;;  %vm226_vm1 = vcmp.ge.f32.partialorder %v196_v20, 0.0 }
  0xd6   :  { %v268_v58 = vadd.f32 %v267_v55, %v266_v54  ;;  %vm219_vm8 = vcmp.ge.f32.partialorder %v169_v53, 0.0  ;;  %v235_v59 = vmul.f32 0.2, %v169_v53  ;;  %v180_v62 = vadd.f32 %v2079_v56, %v2531_v30  ;;  %v2087_v12 = vpop.f32.mrf.mxu1 }
  0xd7   :  { %v171_v63 = vpop.f32.mrf.mxu0  ;;  %v2566_v13 = vsel %vm221_vm9, %v177_v52, %v237_v2  ;;  %v2592_v36 = vsel %vm225_vm15, %v193_v10, %v241_v25  ;;  %v209_v38 = vadd.f32 %v2539_v49, %v2531_v30  ;;  %v243_v39 = vmul.f32 0.2, %v201_v28 }
  0xd8   :  { %v270_v1 = vadd.f32 %v269_v60, %v268_v58  ;;  %v2557_v3 = vsel %vm219_vm8, %v169_v53, %v235_v59  ;;  %v172_v4 = vadd.f32 %v2531_v30, %v171_v63  ;;  %v238_v8 = vmul.f32 0.2, %v180_v62  ;;  %v203_v24 = vpop.f32.mrf.mxu1 }
  0xd9   :  { %v273_v11 = vsel %vm265_vm6, %v2557_v3, 0.0  ;;  %vm222_vm11 = vcmp.ge.f32.partialorder %v180_v62, 0.0  ;;  %v277_v23 = vsel %vm265_vm6, %v2566_v13, 0.0  ;;  %v204_v34 = vadd.f32 %v2531_v30, %v203_v24 }
  0xda   :  { %v272_v7 = vadd.f32 %v271_v5, %v270_v1  ;;  %vm220_vm10 = vcmp.ge.f32.partialorder %v172_v4, 0.0  ;;  %v236_v9 = vmul.f32 0.2, %v172_v4  ;;  %v2575_v19 = vsel %vm222_vm11, %v180_v62, %v238_v8 }
  0xdb   :  { %v279_v29 = vsel %vm265_vm6, %v2575_v19, 0.0  ;;  %v283_v40 = vsel %vm265_vm6, %v2587_v32, 0.0  ;;  %vm227_vm2 = vcmp.ge.f32.partialorder %v201_v28, 0.0  ;;  %v2598_v41 = vsel %vm226_vm1, %v196_v20, %v242_v31 }
  0xdc   :  { %v274_v14 = vadd.f32 %v273_v11, %v272_v7  ;;  %v2568_v16 = vsel %vm220_vm10, %v172_v4, %v236_v9  ;;  %v212_v43 = vadd.f32 %v2087_v12, %v2531_v30  ;;  %v244_v44 = vmul.f32 0.2, %v204_v34 }
  0xdd   :  { %v275_v17 = vsel %vm265_vm6, %v2568_v16, 0.0  ;;  %v285_v46 = vsel %vm265_vm6, %v2592_v36, 0.0  ;;  %vm228_vm3 = vcmp.ge.f32.partialorder %v204_v34, 0.0  ;;  %v245_v48 = vmul.f32 0.2, %v209_v38 }
  0xde   :  { %v276_v21 = vadd.f32 %v275_v17, %v274_v14  ;;  %v259_v52 = vsel %vm227_vm2, %v201_v28, %v243_v39  ;;  %v287_v49 = vsel %vm265_vm6, %v2598_v41, 0.0  ;;  %vm229_vm4 = vcmp.ge.f32.partialorder %v209_v38, 0.0 }
  0xdf   :  { %v246_v54 = vmul.f32 0.2, %v212_v43  ;;  %v260_v55 = vsel %vm228_vm3, %v204_v34, %v244_v44  ;;  %v289_v56 = vsel %vm265_vm6, %v259_v52, 0.0  ;;  %vm230_vm5 = vcmp.ge.f32.partialorder %v212_v43, 0.0 }
  0xe0   :  { %v278_v27 = vadd.f32 %v277_v23, %v276_v21  ;;  %v261_v58 = vsel %vm229_vm4, %v209_v38, %v245_v48  ;;  %v291_v59 = vsel %vm265_vm6, %v260_v55, 0.0  ;;  %vm716_vm7 = vcmask 785408  }
  0xe1   :  { %v2607_v60 = vsel %vm230_vm5, %v212_v43, %v246_v54  ;;  %v293_v62 = vsel %vm265_vm6, %v261_v58, 0.0  ;;  %vm2392_vm8 = vmmov 0   ;;  %vm1282_vm13 = vcmask 130048  }
  0xe2   :  { %v280_v33 = vadd.f32 %v279_v29, %v278_v27  ;;  %v295_v0 = vsel %vm265_vm6, %v2607_v60, 0.0 }
  0xe4   :  { %v282_v37 = vadd.f32 %v281_v35, %v280_v33 }
  0xe6   :  { %v284_v42 = vadd.f32 %v283_v40, %v282_v37 }
  0xe8   :  { %v286_v47 = vadd.f32 %v285_v46, %v284_v42 }
  0xea   :  { %v288_v53 = vadd.f32 %v287_v49, %v286_v47 }
  0xec   :  { %v290_v30 = vadd.f32 %v289_v56, %v288_v53 }
  0xee   :  { %v292_v61 = vadd.f32 %v291_v59, %v290_v30 }
  0xf0   :  { %v294_v63 = vadd.f32 %v293_v62, %v292_v61 }
  0xf2   :  { %v296_v1 = vadd.f32 %v295_v0, %v294_v63 }
  0xf4   :  { %v297_v2 = vrot.slane %v296_v1, 4 }
  0xf6   :  { %v298_v4 = vadd.f32 %v297_v2, %v296_v1 }
  0xf8   :  { %v299_v5 = vrot.slane %v298_v4, 2 }
  0xfa   :  { %v300_v6 = vadd.f32 %v299_v5, %v298_v4 }
  0xfc   :  { %v301_v7 = vrot.slane %v300_v6, 1 }
  0xfe   :  { %v302_v8 = vadd.f32 %v301_v7, %v300_v6 }
 0x100   :  { %v303_v9 = vmul.f32 0.0078125, %v302_v8 }
 0x102   :  { %v2613_v10 = vsub.f32 %v2537_v45, %v303_v9  ;;  %v2616_v11 = vsub.f32 %v2543_v51, %v303_v9  ;;  %v2619_v12 = vsub.f32 %v2541_v50, %v303_v9  ;;  %v2622_v14 = vsub.f32 %v2551_v57, %v303_v9 }
 0x103   :  { %v2629_v18 = vsub.f32 %v2557_v3, %v303_v9  ;;  %v2634_v51 = vsub.f32 %v2568_v16, %v303_v9  ;;  %v2641_v22 = vsub.f32 %v2566_v13, %v303_v9  ;;  %v311_v16 = vsub.f32 %v2575_v19, %v303_v9 }
 0x104   :  { %v320_v15 = vmul.f32 %v2613_v10, %v2613_v10  ;;  %v321_v17 = vmul.f32 %v2616_v11, %v2616_v11  ;;  %v322_v45 = vmul.f32 %v2619_v12, %v2619_v12  ;;  %v323_v50 = vmul.f32 %v2622_v14, %v2622_v14 }
 0x105   :  { %v324_v3 = vmul.f32 %v2629_v18, %v2629_v18  ;;  %v325_v25 = vmul.f32 %v2634_v51, %v2634_v51  ;;  %v2651_v29 = vsub.f32 %v2580_v26, %v303_v9  ;;  %v326_v13 = vmul.f32 %v2641_v22, %v2641_v22 }
 0x106   :  { %v336_v57 = vsel %vm265_vm6, %v320_v15, 0.0  ;;  %v337_v20 = vsel %vm265_vm6, %v321_v17, 0.0  ;;  %v339_v23 = vsel %vm265_vm6, %v322_v45, 0.0  ;;  %v341_v27 = vsel %vm265_vm6, %v323_v50, 0.0 }
 0x107   :  { %v338_v21 = vadd.f32 %v337_v20, %v336_v57  ;;  %v343_v31 = vsel %vm265_vm6, %v324_v3, 0.0  ;;  %v2657_v34 = vsub.f32 %v2587_v32, %v303_v9  ;;  %v327_v35 = vmul.f32 %v311_v16, %v311_v16 }
 0x108   :  { %v345_v19 = vsel %vm265_vm6, %v325_v25, 0.0  ;;  %v2661_v38 = vsub.f32 %v2592_v36, %v303_v9  ;;  %v328_v26 = vmul.f32 %v2651_v29, %v2651_v29  ;;  %v347_v39 = vsel %vm265_vm6, %v326_v13, 0.0  ;;  %v2694_v13 = vld [vmem:[%s3127_s6] ss:$0 sm:$0xff] }
 0x109   :  { %v340_v24 = vadd.f32 %v339_v23, %v338_v21  ;;  %v2667_v42 = vsub.f32 %v2598_v41, %v303_v9  ;;  %v329_v32 = vmul.f32 %v2657_v34, %v2657_v34  ;;  %v349_v43 = vsel %vm265_vm6, %v327_v35, 0.0  ;;  %v2688_v23 = vld [vmem:[%s3126_s5] ss:$0 sm:$0xff] }
 0x10a   :  { %v316_v46 = vsub.f32 %v259_v52, %v303_v9  ;;  %v330_v36 = vmul.f32 %v2661_v38, %v2661_v38  ;;  %v351_v47 = vsel %vm265_vm6, %v328_v26, 0.0  ;;  %v317_v49 = vsub.f32 %v260_v55, %v303_v9 }
 0x10b   :  { %v342_v28 = vadd.f32 %v341_v27, %v340_v24  ;;  %v331_v53 = vmul.f32 %v2667_v42, %v2667_v42  ;;  %v353_v41 = vsel %vm265_vm6, %v329_v32, 0.0  ;;  %v318_v56 = vsub.f32 %v261_v58, %v303_v9 }
 0x10c   :  { %v332_v30 = vmul.f32 %v316_v46, %v316_v46  ;;  %v355_v59 = vsel %vm265_vm6, %v330_v36, 0.0  ;;  %v333_v62 = vmul.f32 %v317_v49, %v317_v49  ;;  %v319_v52 = vsub.f32 %v2607_v60, %v303_v9 }
 0x10d   :  { %v344_v33 = vadd.f32 %v343_v31, %v342_v28  ;;  %v357_v63 = vsel %vm265_vm6, %v331_v53, 0.0  ;;  %v334_v1 = vmul.f32 %v318_v56, %v318_v56 }
 0x10e   :  { %v359_v55 = vsel %vm265_vm6, %v332_v30, 0.0  ;;  %v361_v4 = vsel %vm265_vm6, %v333_v62, 0.0  ;;  %v335_v5 = vmul.f32 %v319_v52, %v319_v52 }
 0x10f   :  { %v346_v37 = vadd.f32 %v345_v19, %v344_v33  ;;  %v363_v58 = vsel %vm265_vm6, %v334_v1, 0.0 }
 0x110   :  { %v365_v8 = vsel %vm265_vm6, %v335_v5, 0.0 }
 0x111   :  { %v348_v40 = vadd.f32 %v347_v39, %v346_v37 }
 0x113   :  { %v350_v44 = vadd.f32 %v349_v43, %v348_v40 }
 0x115   :  { %v352_v48 = vadd.f32 %v351_v47, %v350_v44 }
 0x117   :  { %v354_v54 = vadd.f32 %v353_v41, %v352_v48 }
 0x119   :  { %v356_v61 = vadd.f32 %v355_v59, %v354_v54 }
 0x11b   :  { %v358_v0 = vadd.f32 %v357_v63, %v356_v61 }
 0x11d   :  { %v360_v2 = vadd.f32 %v359_v55, %v358_v0 }
 0x11f   :  { %v362_v6 = vadd.f32 %v361_v4, %v360_v2 }
 0x121   :  { %v364_v7 = vadd.f32 %v363_v58, %v362_v6  ;;  %v437_v6 = vld [vmem:[%s3125_s1 + $0x8] sm:$0xff]  ;;  %v438_v58 = vld [vmem:[%s3125_s1 + $0x10] sm:$0xff] }
 0x123   :  { %v366_v15 = vadd.f32 %v365_v8, %v364_v7  ;;  %v439_v7 = vld [vmem:[%s3125_s1 + $0x18] sm:$0xff]  ;;  %v440_v8 = vld [vmem:[%s3125_s1 + $0x20] sm:$0xff] }
 0x125   :  { %v367_v17 = vrot.slane %v366_v15, 4 }
 0x127   :  { %v368_v45 = vadd.f32 %v367_v17, %v366_v15  ;;  %v441_v15 = vld [vmem:[%s3125_s1 + $0x28] sm:$0xff]  ;;  %v442_v17 = vld [vmem:[%s3125_s1 + $0x30] sm:$0xff] }
 0x129   :  { %v369_v60 = vrot.slane %v368_v45, 2 }
 0x12b   :  { %v370_v9 = vadd.f32 %v369_v60, %v368_v45  ;;  %v443_v45 = vld [vmem:[%s3125_s1 + $0x38] sm:$0xff]  ;;  %v444_v60 = vld [vmem:[%s3125_s1 + $0x40] sm:$0xff] }
 0x12d   :  { %v371_v50 = vrot.slane %v370_v9, 1 }
 0x12f   :  { %v372_v57 = vadd.f32 %v371_v50, %v370_v9  ;;  %v445_v9 = vld [vmem:[%s3125_s1 + $0x48] sm:$0xff]  ;;  %v446_v50 = vld [vmem:[%s3125_s1 + $0x50] sm:$0xff] }
 0x131   :  { %v373_v20 = vmul.f32 0.0078125, %v372_v57  ;;  %v447_v57 = vld [vmem:[%s3125_s1 + $0x58] sm:$0xff] }
 0x133   :  { %v374_v21 = vadd.f32 0.8, %v373_v20  ;;  %v448_v20 = vld [vmem:[%s3125_s1 + $0x60] sm:$0xff] }
 0x135   :  { %2383 = vrsqrt.f32 %v374_v21  ;;  %v449_v21 = vld [vmem:[%s3125_s1 + $0x68] sm:$0xff] }
 0x142   :  { %v2384_v3 = vpop.eup %2383 }
 0x143   :  { %v383_v24 = vmul.f32 %v2384_v3, %v311_v16  ;;  %v391_v25 = vmul.f32 %v2384_v3, %v319_v52  ;;  %v382_v27 = vmul.f32 %v2384_v3, %v2641_v22  ;;  %v390_v28 = vmul.f32 %v2384_v3, %v318_v56 }
 0x144   :  { %v381_v31 = vmul.f32 %v2384_v3, %v2634_v51  ;;  %v389_v33 = vmul.f32 %v2384_v3, %v317_v49  ;;  %v380_v35 = vmul.f32 %v2384_v3, %v2629_v18  ;;  %v388_v19 = vmul.f32 %v2384_v3, %v316_v46 }
 0x145   :  { %v405_v37 = vmul.f32 %v2688_v23, %v383_v24  ;;  %v413_v26 = vmul.f32 %v2688_v23, %v391_v25  ;;  %v404_v16 = vmul.f32 %v2688_v23, %v382_v27  ;;  %v412_v22 = vmul.f32 %v2688_v23, %v390_v28  ;;  %v452_v24 = vld [vmem:[%s3125_s1 + $0x80] sm:$0xff]  ;;  %v453_v25 = vld [vmem:[%s3125_s1 + $0x88] sm:$0xff]  ;;  %v2347_v27 = vld [vmem:[%s3128_s7 + $0x78] sm:$0xff]  }
 0x146   :  { %v403_v39 = vmul.f32 %v2688_v23, %v381_v31  ;;  %v411_v51 = vmul.f32 %v2688_v23, %v389_v33  ;;  %v402_v43 = vmul.f32 %v2688_v23, %v380_v35  ;;  %v410_v36 = vmul.f32 %v2688_v23, %v388_v19  ;;  %v2348_v31 = vld [vmem:[%s3128_s7 + $0x38] sm:$0xff]   ;;  %v2349_v19 = vld [vmem:[%s3128_s7 + $0x70] sm:$0xff]  }
 0x147   :  { %v427_v40 = vadd.f32 %v2694_v13, %v405_v37  ;;  %v435_v32 = vadd.f32 %v2694_v13, %v413_v26  ;;  %v426_v18 = vadd.f32 %v2694_v13, %v404_v16  ;;  %v434_v44 = vadd.f32 %v2694_v13, %v412_v22  ;;  %v2350_v37 = vld [vmem:[%s3128_s7 + $0x30] sm:$0xff]  }
 0x148   :  { %v425_v46 = vadd.f32 %v2694_v13, %v403_v39  ;;  %v379_v47 = vmul.f32 %v2384_v3, %v2622_v14  ;;  %v387_v48 = vmul.f32 %v2384_v3, %v2667_v42  ;;  %v378_v49 = vmul.f32 %v2384_v3, %v2619_v12 }
 0x149   :  { %2088 = vmatprep.subr.mxu1 %v427_v40  ;;  %2131 = vmatprep.subr.mxu0 %v435_v32  ;;  %v386_v53 = vmul.f32 %v2384_v3, %v2661_v38  ;;  %v377_v41 = vmul.f32 %v2384_v3, %v2616_v11  ;;  %v385_v54 = vmul.f32 %v2384_v3, %v2657_v34 }
 0x14a   :  { %2089 = vmatpush3.msra.mxu1 %v427_v40  ;;  %2132 = vmatpush3.msra.mxu0 %v435_v32  ;;  %v433_v56 = vadd.f32 %v2694_v13, %v411_v51  ;;  %v401_v30 = vmul.f32 %v2688_v23, %v379_v47  ;;  %v409_v14 = vmul.f32 %v2688_v23, %v387_v48  ;;  %v2351_v51 = vld [vmem:[%s3128_s7 + $0x68] sm:$0xff]  }
 0x14b   :  { %2090 = vmatprep.subr.mxu1 %v426_v18  ;;  %2133 = vmatprep.subr.mxu0 %v434_v44  ;;  %v400_v12 = vmul.f32 %v2688_v23, %v378_v49  ;;  %v424_v38 = vadd.f32 %v2694_v13, %v402_v43  ;;  %v432_v11 = vadd.f32 %v2694_v13, %v410_v36  ;;  %v2352_v43 = vld [vmem:[%s3128_s7 + $0x28] sm:$0xff]  }
 0x14c   :  { %2091 = vmatpush3.msra.mxu1 %v426_v18  ;;  %2134 = vmatpush3.msra.mxu0 %v434_v44  ;;  %v408_v34 = vmul.f32 %v2688_v23, %v386_v53  ;;  %v423_v42 = vadd.f32 %v2694_v13, %v401_v30  ;;  %v399_v59 = vmul.f32 %v2688_v23, %v377_v41  ;;  %v2353_v18 = vld [vmem:[%s3128_s7 + $0x60] sm:$0xff]   ;;  %v2355_v30 = vld [vmem:[%s3128_s7 + $0x58] sm:$0xff]  }
 0x14d   :  { %2092 = vmatprep.subr.mxu1 %v425_v46  ;;  %2135 = vmatprep.subr.mxu0 %v433_v56  ;;  %v407_v61 = vmul.f32 %v2688_v23, %v385_v54  ;;  %v431_v62 = vadd.f32 %v2694_v13, %v409_v14  ;;  %v376_v52 = vmul.f32 %v2384_v3, %v2613_v10 }
 0x14e   :  { %2093 = vmatpush3.msra.mxu1 %v425_v46  ;;  %2136 = vmatpush3.msra.mxu0 %v433_v56  ;;  %v384_v63 = vmul.f32 %v2384_v3, %v2651_v29  ;;  %v422_v0 = vadd.f32 %v2694_v13, %v400_v12  ;;  %v430_v1 = vadd.f32 %v2694_v13, %v408_v34  ;;  %v450_v3 = vld [vmem:[%s3125_s1 + $0x70] sm:$0xff]  ;;  %v2354_v56 = vld [vmem:[%s3128_s7 + $0x20] sm:$0xff]  }
 0x14f   :  { %2094 = vmatprep.subr.mxu1 %v424_v38  ;;  %2137 = vmatprep.subr.mxu0 %v432_v11  ;;  %v398_v55 = vmul.f32 %v2688_v23, %v376_v52  ;;  %v421_v10 = vadd.f32 %v2694_v13, %v399_v59  ;;  %v429_v29 = vadd.f32 %v2694_v13, %v407_v61  ;;  %v2357_v59 = vld [vmem:[%s3128_s7 + $0x50] sm:$0xff]  }
 0x150   :  { %2095 = vmatpush3.msra.mxu1 %v424_v38  ;;  %2138 = vmatpush3.msra.mxu0 %v432_v11  ;;  %v406_v2 = vmul.f32 %v2688_v23, %v384_v63  ;;  %v451_v23 = vld [vmem:[%s3125_s1 + $0x78] sm:$0xff]  ;;  %v2358_v52 = vld [vmem:[%s3128_s7 + $0x10] sm:$0xff]  }
 0x151   :  { %2096 = vmatprep.subr.mxu1 %v423_v42  ;;  %2139 = vmatprep.subr.mxu0 %v431_v62  ;;  %v420_v4 = vadd.f32 %v2694_v13, %v398_v55  ;;  %v2356_v11 = vld [vmem:[%s3128_s7 + $0x18] sm:$0xff]  }
 0x152   :  { %2097 = vmatpush3.msra.mxu1 %v423_v42  ;;  %2140 = vmatpush3.msra.mxu0 %v431_v62  ;;  %v428_v5 = vadd.f32 %v2694_v13, %v406_v2 }
 0x153   :  { %2098 = vmatprep.subr.mxu1 %v422_v0  ;;  %2141 = vmatprep.subr.mxu0 %v430_v1 }
 0x154   :  { %2099 = vmatpush3.msra.mxu1 %v422_v0  ;;  %2142 = vmatpush3.msra.mxu0 %v430_v1  ;;  %v2359_v1 = vld [vmem:[%s3128_s7 + $0x48] sm:$0xff]  }
 0x155   :  { %2100 = vmatprep.subr.mxu1 %v421_v10  ;;  %2143 = vmatprep.subr.mxu0 %v429_v29 }
 0x156   :  { %2101 = vmatpush3.msra.mxu1 %v421_v10  ;;  %2144 = vmatpush3.msra.mxu0 %v429_v29  ;;  %v2360_v29 = vld [vmem:[%s3128_s7 + $0x8] sm:$0xff]  }
 0x157   :  { %2102 = vmatprep.subr.mxu1 %v420_v4  ;;  %2145 = vmatprep.subr.mxu0 %v428_v5 }
 0x158   :  { %2103 = vmatpush3.msra.mxu1 %v420_v4  ;;  %2146 = vmatpush3.msra.mxu0 %v428_v5 }
 0x159   :  { %2105 = vmatmul.mubr.msk.f32.vlgmr.msra.gmra.mxu1 %vm454_vm14, %v437_v6  ;;  %2148 = vmatmul.mubr.msk.f32.vlgmr.msra.gmra.mxu0 %vm454_vm14, %v437_v6 }
 0x15a   :  { %2107 = vmatprep.mubr.msk.f32.mxu1 %vm454_vm14, %v438_v58  ;;  %2150 = vmatprep.mubr.msk.f32.mxu0 %vm454_vm14, %v438_v58  ;;  %v2361_v58 = vld [vmem:[%s3128_s7 + $0x40] sm:$0xff]  }
 0x15b   :  { %2230 = vmatprep.subr.bf16.mxu1 %v2347_v27  ;;  %1999 = vmatprep.subr.bf16.mxu0 %v2347_v27 }
 0x15c   :  { %2238 = vmatpush3.bf16.msra.mxu1 %v2348_v31  ;;  %2000 = vmatpush3.bf16.msra.mxu0 %v2348_v31 }
 0x15d   :  { %2108 = vmatmul.mubr.msk.f32.gmra.mxu1 %vm454_vm14, %v439_v7  ;;  %2151 = vmatmul.mubr.msk.f32.gmra.mxu0 %vm454_vm14, %v439_v7 }
 0x15e   :  { %2153 = vmatprep.mubr.msk.f32.mxu0 %vm454_vm14, %v440_v8  ;;  %2110 = vmatprep.mubr.msk.f32.mxu1 %vm454_vm14, %v440_v8 }
 0x15f   :  { %2231 = vmatprep.subr.bf16.mxu1 %v2349_v19  ;;  %2001 = vmatprep.subr.bf16.mxu0 %v2349_v19 }
 0x160   :  { %2239 = vmatpush3.bf16.msra.mxu1 %v2350_v37  ;;  %2002 = vmatpush3.bf16.msra.mxu0 %v2350_v37 }
 0x161   :  { %2154 = vmatmul.mubr.msk.f32.gmra.mxu0 %vm454_vm14, %v441_v15  ;;  %2111 = vmatmul.mubr.msk.f32.gmra.mxu1 %vm454_vm14, %v441_v15  ;;  %v2362_v15 = vld [vmem:[%s3128_s7] sm:$0xff]  }
 0x162   :  { %2156 = vmatprep.mubr.msk.f32.mxu0 %vm454_vm14, %v442_v17  ;;  %2113 = vmatprep.mubr.msk.f32.mxu1 %vm454_vm14, %v442_v17  ;;  %v2903_v17 = vld [vmem:[%s3128_s7 + $0x88] sm:$0xff]  }
 0x163   :  { %2232 = vmatprep.subr.bf16.mxu1 %v2351_v51  ;;  %2003 = vmatprep.subr.bf16.mxu0 %v2351_v51 }
 0x164   :  { %2240 = vmatpush3.bf16.msra.mxu1 %v2352_v43  ;;  %2004 = vmatpush3.bf16.msra.mxu0 %v2352_v43 }
 0x165   :  { %2157 = vmatmul.mubr.msk.f32.gmra.mxu0 %vm454_vm14, %v443_v45  ;;  %2114 = vmatmul.mubr.msk.f32.gmra.mxu1 %vm454_vm14, %v443_v45 }
 0x166   :  { %2159 = vmatprep.mubr.msk.f32.mxu0 %vm454_vm14, %v444_v60  ;;  %2116 = vmatprep.mubr.msk.f32.mxu1 %vm454_vm14, %v444_v60 }
 0x167   :  { %2233 = vmatprep.subr.bf16.mxu1 %v2353_v18  ;;  %2005 = vmatprep.subr.bf16.mxu0 %v2353_v18 }
 0x168   :  { %2241 = vmatpush3.bf16.msra.mxu1 %v2354_v56  ;;  %2006 = vmatpush3.bf16.msra.mxu0 %v2354_v56 }
 0x169   :  { %2160 = vmatmul.mubr.msk.f32.gmra.mxu0 %vm454_vm14, %v445_v9  ;;  %2117 = vmatmul.mubr.msk.f32.gmra.mxu1 %vm454_vm14, %v445_v9 }
 0x16a   :  { %2162 = vmatprep.mubr.msk.f32.mxu0 %vm454_vm14, %v446_v50  ;;  %2119 = vmatprep.mubr.msk.f32.mxu1 %vm454_vm14, %v446_v50 }
 0x16b   :  { %2234 = vmatprep.subr.bf16.mxu1 %v2355_v30  ;;  %2007 = vmatprep.subr.bf16.mxu0 %v2355_v30 }
 0x16c   :  { %2242 = vmatpush3.bf16.msra.mxu1 %v2356_v11  ;;  %2008 = vmatpush3.bf16.msra.mxu0 %v2356_v11 }
 0x16d   :  { %2163 = vmatmul.mubr.msk.f32.gmra.mxu0 %vm454_vm14, %v447_v57  ;;  %2120 = vmatmul.mubr.msk.f32.gmra.mxu1 %vm454_vm14, %v447_v57 }
 0x16e   :  { %2165 = vmatprep.mubr.msk.f32.mxu0 %vm454_vm14, %v448_v20  ;;  %2122 = vmatprep.mubr.msk.f32.mxu1 %vm454_vm14, %v448_v20 }
 0x16f   :  { %2235 = vmatprep.subr.bf16.mxu1 %v2357_v59  ;;  %2009 = vmatprep.subr.bf16.mxu0 %v2357_v59 }
 0x170   :  { %2243 = vmatpush3.bf16.msra.mxu1 %v2358_v52  ;;  %2010 = vmatpush3.bf16.msra.mxu0 %v2358_v52 }
 0x171   :  { %2166 = vmatmul.mubr.msk.f32.gmra.mxu0 %vm454_vm14, %v449_v21  ;;  %2123 = vmatmul.mubr.msk.f32.gmra.mxu1 %vm454_vm14, %v449_v21 }
 0x172   :  { %2168 = vmatprep.mubr.msk.f32.mxu0 %vm454_vm14, %v450_v3  ;;  %2125 = vmatprep.mubr.msk.f32.mxu1 %vm454_vm14, %v450_v3 }
 0x173   :  { %2236 = vmatprep.subr.bf16.mxu1 %v2359_v1  ;;  %2011 = vmatprep.subr.bf16.mxu0 %v2359_v1 }
 0x174   :  { %2244 = vmatpush3.bf16.msra.mxu1 %v2360_v29  ;;  %2012 = vmatpush3.bf16.msra.mxu0 %v2360_v29 }
 0x175   :  { %2169 = vmatmul.mubr.msk.f32.gmra.mxu0 %vm454_vm14, %v451_v23  ;;  %2126 = vmatmul.mubr.msk.f32.gmra.mxu1 %vm454_vm14, %v451_v23 }
 0x176   :  { %2128 = vmatprep.mubr.msk.f32.mxu1 %vm454_vm14, %v452_v24  ;;  %2171 = vmatprep.mubr.msk.f32.mxu0 %vm454_vm14, %v452_v24 }
 0x177   :  { %2237 = vmatprep.subr.bf16.mxu1 %v2361_v58  ;;  %2013 = vmatprep.subr.bf16.mxu0 %v2361_v58 }
 0x178   :  { %2245 = vmatpush3.bf16.msra.mxu1 %v2362_v15  ;;  %2014 = vmatpush3.bf16.msra.mxu0 %v2362_v15 }
 0x179   :  { %2129 = vmatmul.mubr.msk.f32.gmra.mxu1 %vm454_vm14, %v453_v25  ;;  %2172 = vmatmul.mubr.msk.f32.gmra.mxu0 %vm454_vm14, %v453_v25 }
 0x17a   :  { %2174 = vmatprep.subr.bf16.mxu1 %v2903_v17 }
 0x219   :  { %v2826_v28 = vpop.f32.mrf.mxu1  ;;  %v2828_v13 = vpop.f32.mrf.mxu0 }
 0x21b   :  { %v2833_v33 = vpop.f32.mrf.mxu1  ;;  %v2835_v35 = vpop.f32.mrf.mxu0 }
 0x21d   :  { %v2109_v26 = vpop.f32.mrf.mxu1  ;;  %v2152_v16 = vpop.f32.mrf.mxu0 }
 0x21f   :  { %v585_v22 = vpop.f32.mrf.mxu1  ;;  %v801_v39 = vpop.f32.mrf.mxu0 }
 0x220   :  { %v2261_v40 = vpack.i.bf16 %v2109_v26, %v585_v22  ;;  %v2256_v32 = vpack.i.bf16 %v2152_v16, %v801_v39 }
 0x221   :  { %v2155_v44 = vpop.f32.mrf.mxu0  ;;  %v2852_v46 = vpop.f32.mrf.mxu1 }
 0x222   :  { %2257 = vrot.lane.b32.xlu0 %v2256_v32, %s2388_s3  ;;  %2262 = vrot.lane.b32.xlu1 %v2261_v40, %s2388_s3 }
 0x223   :  { %v811_v36 = vpop.f32.mrf.mxu0  ;;  %v2856_v47 = vpop.f32.mrf.mxu1 }
 0x224   :  { %v2266_v48 = vpack.i.bf16 %v2155_v44, %v811_v36  ;;  %v2291_v45 = vpack.i.bf16 %v2852_v46, %v2856_v47 }
 0x225   :  { %v2158_v49 = vpop.f32.mrf.mxu0  ;;  %v2858_v53 = vpop.f32.mrf.mxu1 }
 0x226   :  { %2267 = vrot.lane.b32.xlu1 %v2266_v48, %s2389_s22 }
 0x227   :  { %v821_v41 = vpop.f32.mrf.mxu0  ;;  %v605_v54 = vpop.f32.mrf.mxu1 }
 0x228   :  { %v2271_v14 = vpack.i.bf16 %v2158_v49, %v821_v41  ;;  %v2311_v57 = vpack.i.bf16 %v2858_v53, %v605_v54 }
 0x229   :  { %v2867_v12 = vpop.f32.mrf.mxu0  ;;  %v2869_v38 = vpop.f32.mrf.mxu1 }
 0x22a   :  { %2272 = vrot.lane.b32.xlu1 %v2271_v14, %s2390_s29 }
 0x22b   :  { %v2875_v34 = vpop.f32.mrf.mxu0  ;;  %v2877_v42 = vpop.f32.mrf.mxu1 }
 0x22d   :  { %v2164_v61 = vpop.f32.mrf.mxu0  ;;  %v2121_v62 = vpop.f32.mrf.mxu1 }
 0x22f   :  { %v841_v63 = vpop.f32.mrf.mxu0  ;;  %v625_v0 = vpop.f32.mrf.mxu1 }
 0x230   :  { %v2276_v55 = vpack.i.bf16 %v2164_v61, %v841_v63  ;;  %v2281_v5 = vpack.i.bf16 %v2121_v62, %v625_v0 }
 0x231   :  { %v2167_v2 = vpop.f32.mrf.mxu0  ;;  %v2124_v10 = vpop.f32.mrf.mxu1 }
 0x232   :  { %2277 = vrot.lane.b32.xlu0 %v2276_v55, %s2388_s3 }
 0x233   :  { %v851_v4 = vpop.f32.mrf.mxu0  ;;  %v635_v7 = vpop.f32.mrf.mxu1 }
 0x234   :  { %v2286_v6 = vpack.i.bf16 %v2167_v2, %v851_v4  ;;  %v2296_v60 = vpack.i.bf16 %v2124_v10, %v635_v7 }
 0x235   :  { %v2170_v8 = vpop.f32.mrf.mxu0  ;;  %v2127_v50 = vpop.f32.mrf.mxu1 }
 0x236   :  { %2287 = vrot.lane.b32.xlu1 %v2286_v6, %s2389_s22  ;;  %2282 = vrot.lane.b32.xlu0 %v2281_v5, %s2388_s3 }
 0x237   :  { %v861_v9 = vpop.f32.mrf.mxu0  ;;  %v645_v21 = vpop.f32.mrf.mxu1 }
 0x238   :  { %v2301_v20 = vpack.i.bf16 %v2170_v8, %v861_v9  ;;  %v2306_v3 = vpack.i.bf16 %v2127_v50, %v645_v21 }
 0x239   :  { %v2914_v19 = vpop.f32.mrf.mxu1 }
 0x23a   :  { %2292 = vrot.lane.b32.xlu1 %v2291_v45, %s2389_s22  ;;  %2297 = vrot.lane.b32.xlu0 %v2296_v60, %s2389_s22 }
 0x23b   :  { %v655_v32 = vpop.f32.mrf.mxu1 }
 0x23c   :  { %v942_v41 = vpack.c.bf16 %v2914_v19, %v655_v32 }
 0x23e   :  { %2312 = vrot.lane.b32.xlu1 %v2311_v57, %s2390_s29  ;;  %2302 = vrot.lane.b32.xlu0 %v2301_v20, %s2390_s29 }
 0x242   :  { %2307 = vrot.lane.b32.xlu0 %v2306_v3, %s2390_s29 }
 0x294   :  { %v2263_v23 = vpop.permute.xlu1 %2262  ;;  %v2258_v25 = vpop.permute.xlu0 %2257 }
 0x295   :  { %v2260_v16 = vunpack.i.h.bf16 %v2258_v25  ;;  %v2259_v22 = vunpack.i.l.bf16 %v2258_v25  ;;  %v2265_v54 = vunpack.i.h.bf16 %v2263_v23  ;;  %v2264_v56 = vunpack.i.l.bf16 %v2263_v23 }
 0x297   :  { %v929_v49 = vsel %vm265_vm6, %v2828_v13, %v2260_v16  ;;  %v928_v53 = vsel %vm265_vm6, %v2835_v35, %v2259_v22  ;;  %v2391_v16 = vmov 0.0  }
 0x298   :  { %v2268_v24 = vpop.permute.xlu1 %2267  ;;  %2182 = vmatprep.subr.mxu0 %v2391_v16 }
 0x299   :  { %v2270_v39 = vunpack.i.h.bf16 %v2268_v24  ;;  %v2269_v40 = vunpack.i.l.bf16 %v2268_v24  ;;  %v2173_v24 = vpop.f32.mrf.mxu0 }
 0x29b   :  { %v931_v30 = vsel %vm454_vm14, %v929_v49, %v2270_v39  ;;  %v930_v14 = vsel %vm454_vm14, %v928_v53, %v2269_v40 }
 0x29c   :  { %v2273_v27 = vpop.permute.xlu1 %2272 }
 0x29d   :  { %v2275_v51 = vunpack.i.h.bf16 %v2273_v27  ;;  %v2274_v43 = vunpack.i.l.bf16 %v2273_v27 }
 0x29f   :  { %v932_v11 = vsel %vm716_vm7, %v930_v14, %v2274_v43  ;;  %v933_v59 = vsel %vm716_vm7, %v931_v30, %v2275_v51 }
 0x2a0   :  { %v943_v15 = vpack.c.bf16 %v933_v59, %v932_v11 }
 0x2a4   :  { %v2278_v31 = vpop.permute.xlu0 %2277 }
 0x2a5   :  { %v2280_v18 = vunpack.i.h.bf16 %v2278_v31  ;;  %v2279_v44 = vunpack.i.l.bf16 %v2278_v31 }
 0x2a7   :  { %v935_v61 = vsel %vm265_vm6, %v2867_v12, %v2280_v18  ;;  %v934_v13 = vsel %vm265_vm6, %v2875_v34, %v2279_v44  ;;  %v713_v12 = vsel %vm265_vm6, %v2826_v28, %v2265_v54  ;;  %v712_v34 = vsel %vm265_vm6, %v2833_v33, %v2264_v56  ;;  %v2364_v33 = vld [vmem:[%s3128_s7 + $0x80] sm:$0xff]  }
 0x2a8   :  { %v2288_v37 = vpop.permute.xlu1 %2287  ;;  %v2283_v26 = vpop.permute.xlu0 %2282  ;;  %v1885_v44 = vld [vmem:[%s3129_s8] ss:$0 sm:$0xff] }
 0x2a9   :  { %v2290_v46 = vunpack.i.h.bf16 %v2288_v37  ;;  %v2289_v36 = vunpack.i.l.bf16 %v2288_v37  ;;  %v2285_v52 = vunpack.i.h.bf16 %v2283_v26  ;;  %v2284_v63 = vunpack.i.l.bf16 %v2283_v26  ;;  %v871_v37 = vpop.f32.mrf.mxu0 }
 0x2aa   :  { %v945_v26 = vpack.c.bf16 %v2173_v24, %v871_v37 }
 0x2ab   :  { %v937_v35 = vsel %vm454_vm14, %v935_v61, %v2290_v46  ;;  %v936_v62 = vsel %vm454_vm14, %v934_v13, %v2289_v36  ;;  %v720_v45 = vsel %vm265_vm6, %v2869_v38, %v2285_v52  ;;  %v719_v60 = vsel %vm265_vm6, %v2877_v42, %v2284_v63 }
 0x2ac   :  { %v2293_v47 = vpop.permute.xlu1 %2292  ;;  %v2298_v48 = vpop.permute.xlu0 %2297 }
 0x2ad   :  { %v2295_v55 = vunpack.i.h.bf16 %v2293_v47  ;;  %v2294_v2 = vunpack.i.l.bf16 %v2293_v47  ;;  %v2300_v4 = vunpack.i.h.bf16 %v2298_v48  ;;  %v2299_v5 = vunpack.i.l.bf16 %v2298_v48 }
 0x2af   :  { %v715_v57 = vsel %vm454_vm14, %v713_v12, %v2295_v55  ;;  %v714_v28 = vsel %vm454_vm14, %v712_v34, %v2294_v2  ;;  %v722_v3 = vsel %vm454_vm14, %v720_v45, %v2300_v4  ;;  %v721_v23 = vsel %vm454_vm14, %v719_v60, %v2299_v5 }
 0x2b0   :  { %v2313_v0 = vpop.permute.xlu1 %2312  ;;  %v2303_v1 = vpop.permute.xlu0 %2302 }
 0x2b1   :  { %v2305_v10 = vunpack.i.h.bf16 %v2303_v1  ;;  %v2304_v29 = vunpack.i.l.bf16 %v2303_v1  ;;  %v2315_v6 = vunpack.i.h.bf16 %v2313_v0  ;;  %v2314_v58 = vunpack.i.l.bf16 %v2313_v0 }
 0x2b3   :  { %v938_v7 = vsel %vm716_vm7, %v936_v62, %v2304_v29  ;;  %v939_v8 = vsel %vm716_vm7, %v937_v35, %v2305_v10  ;;  %v718_v38 = vsel %vm716_vm7, %v715_v57, %v2315_v6  ;;  %v717_v42 = vsel %vm716_vm7, %v714_v28, %v2314_v58 }
 0x2b4   :  { %v2308_v9 = vpop.permute.xlu0 %2307  ;;  %v944_v50 = vpack.c.bf16 %v939_v8, %v938_v7  ;;  %v940_v19 = vpack.c.bf16 %v718_v38, %v717_v42 }
 0x2b5   :  { %v2310_v20 = vunpack.i.h.bf16 %v2308_v9  ;;  %v2309_v21 = vunpack.i.l.bf16 %v2308_v9 }
 0x2b6   :  { %1143 = vmatprep.mubr.bf16.mxu1 %v944_v50 }
 0x2b7   :  { %1144 = vmatmul.mubr.bf16.vlgmr.msra.gmra.mxu1 %v943_v15  ;;  %v723_v25 = vsel %vm716_vm7, %v721_v23, %v2309_v21  ;;  %v724_v27 = vsel %vm716_vm7, %v722_v3, %v2310_v20 }
 0x2b8   :  { %2175 = vmatpush3.bf16.msra.mxu1 %v2903_v17  ;;  %v941_v31 = vpack.c.bf16 %v724_v27, %v723_v25  ;;  %2178 = vmatprep.mubr.msk.bf16.mxu1 %vm265_vm6, %v942_v41 }
 0x2b9   :  { %2176 = vmatprep.subr.bf16.mxu1 %v2364_v33 }
 0x2ba   :  { %1135 = vmatprep.mubr.bf16.mxu0 %v941_v31 }
 0x2bb   :  { %1136 = vmatmul.mubr.bf16.vlgmr.msra.gmra.mxu0 %v940_v19 }
 0x2bc   :  { %2177 = vmatpush3.bf16.msra.mxu1 %v2364_v33  ;;  %2186 = vmatprep.mubr.msk.f32.mxu0 %vm2392_vm8, %v2391_v16 }
 0x2bd   :  { %2201 = vmatprep.subr.mxu1 %v2391_v16 }
 0x2bf   :  { %2179 = vmatmul.mubr.msk.bf16.vlgmr.msra.gmra.mxu1 %vm265_vm6, %v945_v26 }
 0x2c0   :  { %2205 = vmatprep.mubr.msk.f32.mxu1 %vm2392_vm8, %v2391_v16 }
 0x377   :  { %v2021_v17 = vpop.f32.mrf.mxu1 }
 0x379   :  { %v2022_v22 = vpop.f32.mrf.mxu1 }
 0x37a   :  { %v2023_v32 = vadd.f32 %v2022_v22, %v2021_v17 }
 0x37b   :  { %v2015_v39 = vpop.f32.mrf.mxu0  ;;  %v2024_v40 = vpop.f32.mrf.mxu1 }
 0x37c   :  { %v1146_v49 = vadd.f32 %v2023_v32, %v1885_v44 }
 0x37d   :  { %v2016_v51 = vpop.f32.mrf.mxu0  ;;  %v2025_v43 = vpop.f32.mrf.mxu1 }
 0x37e   :  { %v2017_v18 = vadd.f32 %v2016_v51, %v2015_v39  ;;  %v2026_v46 = vadd.f32 %v2025_v43, %v2024_v40 }
 0x37f   :  { %v2018_v36 = vpop.f32.mrf.mxu0  ;;  %v2180_v47 = vpop.f32.mrf.mxu1 }
 0x380   :  { %v1138_v48 = vadd.f32 %v2017_v18, %v1885_v44  ;;  %v1195_v30 = vadd.f32 %v2180_v47, %v1146_v49  ;;  %v1149_v14 = vadd.f32 %v2026_v46, %v1885_v44  ;;  %v1907_v49 = vld [vmem:[%s3131_s10] ss:$0 sm:$0xff] }
 0x381   :  { %v2019_v53 = vpop.f32.mrf.mxu0  ;;  %v1186_v41 = vpop.f32.mrf.mxu1 }
 0x382   :  { %v2020_v54 = vadd.f32 %v2019_v53, %v2018_v36  ;;  %v1187_v56 = vadd.f32 %v1186_v41, %v1138_v48  ;;  %v1207_v62 = vmul.f32 0.2, %v1195_v30  ;;  %vm1203_vm10 = vcmp.ge.f32.partialorder %v1195_v30, 0.0 }
 0x383   :  { %v2181_v11 = vpop.f32.mrf.mxu1 }
 0x384   :  { %v1205_v59 = vmul.f32 0.2, %v1187_v56  ;;  %v1198_v61 = vadd.f32 %v2181_v11, %v1149_v14  ;;  %v1141_v13 = vadd.f32 %v2020_v54, %v1885_v44  ;;  %vm1201_vm9 = vcmp.ge.f32.partialorder %v1187_v56, 0.0  ;;  %v1906_v44 = vld [vmem:[%s3130_s9] ss:$0 sm:$0xff] }
 0x385   :  { %v1189_v35 = vpop.f32.mrf.mxu1  ;;  %v1211_v55 = vsel %vm1203_vm10, %v1195_v30, %v1207_v62  ;;  %v1280_v62 = vld [vmem:[%s3132_s2 + $0x18] sm:$0xff] }
 0x386   :  { %v1190_v52 = vadd.f32 %v1189_v35, %v1141_v13  ;;  %v1209_v63 = vsel %vm1201_vm9, %v1187_v56, %v1205_v59  ;;  %v1208_v0 = vmul.f32 0.2, %v1198_v61  ;;  %vm1204_vm12 = vcmp.ge.f32.partialorder %v1198_v61, 0.0  ;;  %v1278_v13 = vld [vmem:[%s3132_s2 + $0x8] sm:$0xff]  ;;  %v1279_v35 = vld [vmem:[%s3132_s2 + $0x10] sm:$0xff] }
 0x387   :  { %v1215_v10 = vsel %vm265_vm6, %v1209_v63, 0.0  ;;  %v1218_v6 = vsel %vm265_vm6, %v1211_v55, 0.0 }
 0x388   :  { %vm1202_vm11 = vcmp.ge.f32.partialorder %v1190_v52, 0.0  ;;  %v1206_v1 = vmul.f32 0.2, %v1190_v52  ;;  %v1212_v4 = vsel %vm1204_vm12, %v1198_v61, %v1208_v0  ;;  %v1277_v61 = vld [vmem:[%s3132_s2] sm:$0xff]  ;;  %v2366_v0 = vld [vmem:[%s3133_s11 + $0x38] sm:$0xff]  }
 0x389   :  { %v1220_v12 = vsel %vm265_vm6, %v1212_v4, 0.0 }
 0x38a   :  { %v1210_v2 = vsel %vm1202_vm11, %v1190_v52, %v1206_v1  ;;  %v1281_v52 = vld [vmem:[%s3132_s2 + $0x20] sm:$0xf]  ;;  %v2367_v1 = vld [vmem:[%s3133_s11 + $0x70] sm:$0xff]  }
 0x38b   :  { %v1216_v29 = vsel %vm265_vm6, %v1210_v2, 0.0 }
 0x38c   :  { %v1217_v5 = vadd.f32 %v1216_v29, %v1215_v10  ;;  %v2370_v10 = vld [vmem:[%s3133_s11 + $0x28] sm:$0xff]   ;;  %v2371_v29 = vld [vmem:[%s3133_s11 + $0x60] sm:$0xff]  }
 0x38e   :  { %v1219_v58 = vadd.f32 %v1218_v6, %v1217_v5 }
 0x390   :  { %v1221_v34 = vadd.f32 %v1220_v12, %v1219_v58 }
 0x392   :  { %v1222_v7 = vrot.slane %v1221_v34, 4 }
 0x394   :  { %v1223_v8 = vadd.f32 %v1222_v7, %v1221_v34 }
 0x396   :  { %v1224_v15 = vrot.slane %v1223_v8, 2 }
 0x398   :  { %v1225_v45 = vadd.f32 %v1224_v15, %v1223_v8  ;;  %v2373_v8 = vld [vmem:[%s3133_s11 + $0x58] sm:$0xff]  }
 0x399   :  { %v2374_v15 = vld [vmem:[%s3133_s11 + $0x18] sm:$0xff]  }
 0x39a   :  { %v1226_v60 = vrot.slane %v1225_v45, 1 }
 0x39c   :  { %v1227_v9 = vadd.f32 %v1226_v60, %v1225_v45 }
 0x39e   :  { %v1228_v50 = vmul.f32 0.03125, %v1227_v9 }
 0x3a0   :  { %v1229_v57 = vsub.f32 %v1209_v63, %v1228_v50  ;;  %v1230_v28 = vsub.f32 %v1210_v2, %v1228_v50  ;;  %v1231_v20 = vsub.f32 %v1211_v55, %v1228_v50  ;;  %v1232_v21 = vsub.f32 %v1212_v4, %v1228_v50  ;;  %v2365_v63 = vld [vmem:[%s3133_s11 + $0x78] sm:$0xff]   ;;  %v2368_v55 = vld [vmem:[%s3133_s11 + $0x30] sm:$0xff]   ;;  %v2369_v2 = vld [vmem:[%s3133_s11 + $0x68] sm:$0xff]  }
 0x3a1   :  { %v2372_v4 = vld [vmem:[%s3133_s11 + $0x20] sm:$0xff]  }
 0x3a2   :  { %v1233_v33 = vmul.f32 %v1229_v57, %v1229_v57  ;;  %v1234_v3 = vmul.f32 %v1230_v28, %v1230_v28  ;;  %v1235_v23 = vmul.f32 %v1231_v20, %v1231_v20  ;;  %v1236_v38 = vmul.f32 %v1232_v21, %v1232_v21 }
 0x3a4   :  { %v1237_v42 = vsel %vm265_vm6, %v1233_v33, 0.0  ;;  %v1238_v24 = vsel %vm265_vm6, %v1234_v3, 0.0  ;;  %v1240_v27 = vsel %vm265_vm6, %v1235_v23, 0.0  ;;  %v1242_v19 = vsel %vm265_vm6, %v1236_v38, 0.0  ;;  %v2377_v23 = vld [vmem:[%s3133_s11 + $0x88] sm:$0xff]  }
 0x3a5   :  { %v1239_v25 = vadd.f32 %v1238_v24, %v1237_v42  ;;  %v2378_v38 = vld [vmem:[%s3133_s11 + $0x48] sm:$0xff]  }
 0x3a7   :  { %v1241_v31 = vadd.f32 %v1240_v27, %v1239_v25 }
 0x3a9   :  { %v1243_v37 = vadd.f32 %v1242_v19, %v1241_v31 }
 0x3ab   :  { %v1244_v26 = vrot.slane %v1243_v37, 4 }
 0x3ad   :  { %v1245_v17 = vadd.f32 %v1244_v26, %v1243_v37 }
 0x3af   :  { %v1246_v22 = vrot.slane %v1245_v17, 2 }
 0x3b1   :  { %v1247_v39 = vadd.f32 %v1246_v22, %v1245_v17  ;;  %v2379_v22 = vld [vmem:[%s3133_s11 + $0x8] sm:$0xff]  }
 0x3b3   :  { %v1248_v40 = vrot.slane %v1247_v39, 1 }
 0x3b5   :  { %v1249_v32 = vadd.f32 %v1248_v40, %v1247_v39  ;;  %v2380_v39 = vld [vmem:[%s3133_s11 + $0x40] sm:$0xff]  }
 0x3b7   :  { %v1250_v51 = vmul.f32 0.03125, %v1249_v32 }
 0x3b9   :  { %v1251_v43 = vadd.f32 0.8, %v1250_v51  ;;  %v2381_v51 = vld [vmem:[%s3133_s11] sm:$0xff]  }
 0x3bb   :  { %2385 = vrsqrt.f32 %v1251_v43 }
 0x3c8   :  { %v2386_v18 = vpop.eup %2385 }
 0x3c9   :  { %v1254_v46 = vmul.f32 %v2386_v18, %v1230_v28  ;;  %v1256_v36 = vmul.f32 %v2386_v18, %v1232_v21  ;;  %v1253_v47 = vmul.f32 %v2386_v18, %v1229_v57  ;;  %v1255_v48 = vmul.f32 %v2386_v18, %v1231_v20  ;;  %v2375_v20 = vld [vmem:[%s3133_s11 + $0x50] sm:$0xff]  }
 0x3ca   :  { %v2376_v21 = vld [vmem:[%s3133_s11 + $0x10] sm:$0xff]  }
 0x3cb   :  { %v1264_v53 = vmul.f32 %v1906_v44, %v1254_v46  ;;  %v1266_v41 = vmul.f32 %v1906_v44, %v1256_v36  ;;  %v1263_v54 = vmul.f32 %v1906_v44, %v1253_v47  ;;  %v1265_v56 = vmul.f32 %v1906_v44, %v1255_v48 }
 0x3cd   :  { %v1274_v30 = vadd.f32 %v1907_v49, %v1264_v53  ;;  %v1276_v14 = vadd.f32 %v1907_v49, %v1266_v41  ;;  %v1273_v11 = vadd.f32 %v1907_v49, %v1263_v54  ;;  %v1275_v59 = vadd.f32 %v1907_v49, %v1265_v56 }
 0x3cf   :  { %2183 = vmatpush3.msra.mxu0 %v1274_v30  ;;  %2202 = vmatpush3.msra.mxu1 %v1276_v14 }
 0x3d0   :  { %2184 = vmatprep.subr.mxu0 %v2391_v16  ;;  %2203 = vmatprep.subr.mxu1 %v2391_v16 }
 0x3d1   :  { %2185 = vmatpush3.msra.mxu0 %v1273_v11  ;;  %2204 = vmatpush3.msra.mxu1 %v1275_v59 }
 0x3d2   :  { %2206 = vmatmul.mubr.msk.f32.vlgmr.msra.gmra.mxu1 %vm1282_vm13, %v1277_v61  ;;  %2187 = vmatmul.mubr.msk.f32.vlgmr.msra.gmra.mxu0 %vm1282_vm13, %v1277_v61 }
 0x3d3   :  { %2208 = vmatprep.mubr.msk.f32.mxu1 %vm2392_vm8, %v2391_v16  ;;  %2189 = vmatprep.mubr.msk.f32.mxu0 %vm2392_vm8, %v2391_v16 }
 0x3d4   :  { %2220 = vmatprep.subr.bf16.mxu1 %v2391_v16  ;;  %2045 = vmatprep.subr.bf16.mxu0 %v2365_v63 }
 0x3d5   :  { %2046 = vmatpush3.bf16.msra.mxu0 %v2366_v0  ;;  %2221 = vmatpush3.bf16.msra.mxu1 %v2377_v23 }
 0x3d6   :  { %2209 = vmatmul.mubr.msk.f32.gmra.mxu1 %vm1282_vm13, %v1278_v13  ;;  %2190 = vmatmul.mubr.msk.f32.gmra.mxu0 %vm1282_vm13, %v1278_v13 }
 0x3d7   :  { %2211 = vmatprep.mubr.msk.f32.mxu1 %vm2392_vm8, %v2391_v16  ;;  %2192 = vmatprep.mubr.msk.f32.mxu0 %vm2392_vm8, %v2391_v16 }
 0x3d8   :  { %2047 = vmatprep.subr.bf16.mxu0 %v2367_v1  ;;  %2222 = vmatprep.subr.bf16.mxu1 %v2391_v16 }
 0x3d9   :  { %2048 = vmatpush3.bf16.msra.mxu0 %v2368_v55 }
 0x3da   :  { %2212 = vmatmul.mubr.msk.f32.gmra.mxu1 %vm1282_vm13, %v1279_v35  ;;  %2193 = vmatmul.mubr.msk.f32.gmra.mxu0 %vm1282_vm13, %v1279_v35 }
 0x3db   :  { %2214 = vmatprep.mubr.msk.f32.mxu1 %vm2392_vm8, %v2391_v16  ;;  %2195 = vmatprep.mubr.msk.f32.mxu0 %vm2392_vm8, %v2391_v16 }
 0x3dc   :  { %2049 = vmatprep.subr.bf16.mxu0 %v2369_v2 }
 0x3dd   :  { %2050 = vmatpush3.bf16.msra.mxu0 %v2370_v10 }
 0x3de   :  { %2215 = vmatmul.mubr.msk.f32.gmra.mxu1 %vm1282_vm13, %v1280_v62  ;;  %2196 = vmatmul.mubr.msk.f32.gmra.mxu0 %vm1282_vm13, %v1280_v62 }
 0x3df   :  { %2217 = vmatprep.mubr.msk.f32.mxu1 %vm2392_vm8, %v2391_v16  ;;  %2198 = vmatprep.mubr.msk.f32.mxu0 %vm2392_vm8, %v2391_v16 }
 0x3e0   :  { %2051 = vmatprep.subr.bf16.mxu0 %v2371_v29 }
 0x3e1   :  { %2052 = vmatpush3.bf16.msra.mxu0 %v2372_v4 }
 0x3e2   :  { %2218 = vmatmul.mubr.msk.f32.gmra.mxu1 %vm1282_vm13, %v1281_v52  ;;  %2199 = vmatmul.mubr.msk.f32.gmra.mxu0 %vm1282_vm13, %v1281_v52 }
 0x3e3   :  { %2224 = vmatprep.mubr.msk.bf16.mxu1 %vm2392_vm8, %v2391_v16  ;;  %2053 = vmatprep.subr.bf16.mxu0 %v2373_v8  ;;  %v2382_v16 = vld [vmem:[%s3133_s11 + $0x80] sm:$0xff]  }
 0x3e4   :  { %2223 = vmatpush3.bf16.msra.mxu1 %v2382_v16 }
 0x3e5   :  { %2054 = vmatpush3.bf16.msra.mxu0 %v2374_v15 }
 0x3e6   :  { %2055 = vmatprep.subr.bf16.mxu0 %v2375_v20 }
 0x3e9   :  { %2056 = vmatpush3.bf16.msra.mxu0 %v2376_v21 }
 0x3ea   :  { %2057 = vmatprep.subr.bf16.mxu0 %v2378_v38 }
 0x3ed   :  { %2058 = vmatpush3.bf16.msra.mxu0 %v2379_v22  ;;  %v1794_v22 = vld [vmem:[%s3135_s13] sm:$0xf] }
 0x3ee   :  { %2059 = vmatprep.subr.bf16.mxu0 %v2380_v39 }
 0x3f1   :  { %2060 = vmatpush3.bf16.msra.mxu0 %v2381_v51 }
 0x492   :  { %v3048_v5 = vpop.f32.mrf.mxu1  ;;  %v3050_v6 = vpop.f32.mrf.mxu0 }
 0x493   :  { %v1511_v57 = vrot.slane %v3048_v5, 4  ;;  %v1389_v31 = vrot.slane %v3050_v6, 4 }
 0x494   :  { %v2207_v58 = vpop.f32.mrf.mxu1  ;;  %v2188_v12 = vpop.f32.mrf.mxu0 }
 0x496   :  { %v1491_v34 = vpop.f32.mrf.mxu1  ;;  %v1369_v7 = vpop.f32.mrf.mxu0 }
 0x497   :  { %v1519_v40 = vrot.slane %v1491_v34, 4  ;;  %v1397_v48 = vrot.slane %v1369_v7, 4 }
 0x498   :  { %v2210_v45 = vpop.f32.mrf.mxu1  ;;  %v2191_v60 = vpop.f32.mrf.mxu0 }
 0x49a   :  { %v1496_v9 = vpop.f32.mrf.mxu1  ;;  %v3058_v50 = vpop.f32.mrf.mxu0 }
 0x49b   :  { %v1524_v28 = vrot.slane %v1496_v9, 4  ;;  %v1402_v24 = vrot.slane %v3058_v50, 4 }
 0x49c   :  { %v2213_v33 = vpop.f32.mrf.mxu1  ;;  %v2194_v3 = vpop.f32.mrf.mxu0 }
 0x49d   :  { %v2316_v42 = vpack.i.bf16 %v1511_v57, %v1524_v28  ;;  %v2321_v32 = vpack.i.bf16 %v1389_v31, %v1402_v24 }
 0x49e   :  { %v1501_v25 = vpop.f32.mrf.mxu1  ;;  %v1379_v27 = vpop.f32.mrf.mxu0 }
 0x49f   :  { %v2326_v19 = vpack.i.bf16 %v1491_v34, %v1501_v25  ;;  %v1532_v37 = vrot.slane %v1501_v25, 4  ;;  %2317 = vrot.lane.b32.xlu0 %v2316_v42, %s2388_s3  ;;  %v1410_v44 = vrot.slane %v1379_v27, 4  ;;  %v2331_v49 = vpack.i.bf16 %v1369_v7, %v1379_v27 }
 0x4a0   :  { %v2216_v26 = vpop.f32.mrf.mxu1  ;;  %v2197_v17 = vpop.f32.mrf.mxu0 }
 0x4a1   :  { %2327 = vrot.lane.b32.xlu1 %v2326_v19, %s2389_s22  ;;  %v2336_v18 = vpack.i.bf16 %v1519_v40, %v1532_v37  ;;  %v2341_v56 = vpack.i.bf16 %v1397_v48, %v1410_v44  ;;  %v1918_v19 = vld [vmem:[%s3134_s12] ss:$0 sm:$0xff] }
 0x4a2   :  { %v1506_v43 = vpop.f32.mrf.mxu1  ;;  %v1384_v36 = vpop.f32.mrf.mxu0 }
 0x4a3   :  { %2322 = vrot.lane.b32.xlu0 %v2321_v32, %s2388_s3  ;;  %v1547_v46 = vrot.slane %v1506_v43, 4  ;;  %v1813_v32 = vrot.slane %v1794_v22, 4 }
 0x4a4   :  { %v2219_v47 = vpop.f32.mrf.mxu1  ;;  %v2200_v41 = vpop.f32.mrf.mxu0 }
 0x4a5   :  { %2337 = vrot.lane.b32.xlu1 %v2336_v18, %s2390_s29  ;;  %v1553_v53 = vsel %vm111_vm0, %v1384_v36, %v1547_v46 }
 0x4a6   :  { %v1556_v54 = vpack.c.bf16 %v1553_v53, %v1553_v53 }
 0x4a7   :  { %2332 = vrot.lane.b32.xlu0 %v2331_v49, %s2389_s22 }
 0x4a8   :  { %2225 = vmatmul.mubr.msk.bf16.vlgmr.msra.gmra.mxu1 %vm265_vm6, %v1556_v54 }
 0x4a9   :  { %2342 = vrot.lane.b32.xlu1 %v2341_v56, %s2390_s29 }
 0x511   :  { %v2318_v30 = vpop.permute.xlu0 %2317 }
 0x512   :  { %v2320_v14 = vunpack.i.h.bf16 %v2318_v30  ;;  %v2319_v11 = vunpack.i.l.bf16 %v2318_v30 }
 0x513   :  { %v2328_v59 = vpop.permute.xlu1 %2327 }
 0x514   :  { %v2330_v61 = vunpack.i.h.bf16 %v2328_v59  ;;  %v2329_v13 = vunpack.i.l.bf16 %v2328_v59  ;;  %v1536_v62 = vsel %vm265_vm6, %v3048_v5, %v2320_v14  ;;  %v1539_v52 = vsel %vm265_vm6, %v1496_v9, %v2319_v11 }
 0x515   :  { %v2323_v35 = vpop.permute.xlu0 %2322 }
 0x516   :  { %v2325_v63 = vunpack.i.h.bf16 %v2323_v35  ;;  %v2324_v0 = vunpack.i.l.bf16 %v2323_v35  ;;  %v1537_v10 = vsel %vm454_vm14, %v1536_v62, %v2330_v61  ;;  %v1540_v29 = vsel %vm454_vm14, %v1539_v52, %v2329_v13 }
 0x517   :  { %v2338_v1 = vpop.permute.xlu1 %2337  ;;  %v1795_v62 = vlaneseq }
 0x518   :  { %v2340_v55 = vunpack.i.h.bf16 %v2338_v1  ;;  %v2339_v2 = vunpack.i.l.bf16 %v2338_v1  ;;  %v1414_v5 = vsel %vm265_vm6, %v3050_v6, %v2325_v63  ;;  %v1417_v8 = vsel %vm265_vm6, %v3058_v50, %v2324_v0 }
 0x519   :  { %v2333_v4 = vpop.permute.xlu0 %2332  ;;  %vm1798_vm6 = vcmask 257024   ;;  %v1796_v52 = vand.u32 127, %v1795_v62 }
 0x51a   :  { %v1538_v58 = vsel %vm716_vm7, %v1537_v10, %v2340_v55  ;;  %v1541_v12 = vsel %vm716_vm7, %v1540_v29, %v2339_v2  ;;  %v2335_v34 = vunpack.i.h.bf16 %v2333_v4  ;;  %v2334_v7 = vunpack.i.l.bf16 %v2333_v4 }
 0x51b   :  { %v2343_v15 = vpop.permute.xlu1 %2342  ;;  %v1545_v28 = vrot.slane %v1538_v58, 4  ;;  %v1546_v20 = vrot.slane %v1541_v12, 4  ;;  %vm1829_vm15 = vcmp.eq.s32.totalorder %v1796_v52, 1 }
 0x51c   :  { %v1415_v45 = vsel %vm454_vm14, %v1414_v5, %v2335_v34  ;;  %v1418_v60 = vsel %vm454_vm14, %v1417_v8, %v2334_v7  ;;  %v2345_v9 = vunpack.i.h.bf16 %v2343_v15  ;;  %v2344_v57 = vunpack.i.l.bf16 %v2343_v15 }
 0x51d   :  { %vm1809_vm14 = vcmp.eq.s32.totalorder %v1796_v52, 0 }
 0x51e   :  { %v1416_v21 = vsel %vm716_vm7, %v1415_v45, %v2345_v9  ;;  %v1419_v33 = vsel %vm716_vm7, %v1418_v60, %v2344_v57 }
 0x51f   :  { %v1551_v3 = vsel %vm111_vm0, %v1416_v21, %v1545_v28  ;;  %v1552_v6 = vsel %vm111_vm0, %v1419_v33, %v1546_v20 }
 0x520   :  { %v1554_v23 = vpack.c.bf16 %v1551_v3, %v1551_v3  ;;  %v1555_v38 = vpack.c.bf16 %v1552_v6, %v1552_v6 }
 0x522   :  { %1743 = vmatprep.mubr.bf16.mxu0 %v1555_v38 }
 0x523   :  { %1744 = vmatmul.mubr.bf16.vlgmr.msra.gmra.mxu0 %v1554_v23 }
 0x568   :  { %v1785_v50 = vpop.f32.mrf.mxu1 }
 0x56a   :  { %v2226_v42 = vpop.f32.mrf.mxu1 }
 0x56c   :  { %v1788_v24 = vpop.f32.mrf.mxu1 }
 0x56e   :  { %v2227_v25 = vpop.f32.mrf.mxu1 }
 0x5e3   :  { %v2061_v27 = vpop.f32.mrf.mxu0 }
 0x5e5   :  { %v2062_v31 = vpop.f32.mrf.mxu0 }
 0x5e6   :  { %v2063_v37 = vadd.f32 %v2062_v31, %v2061_v27 }
 0x5e7   :  { %v2064_v26 = vpop.f32.mrf.mxu0 }
 0x5e8   :  { %v1746_v17 = vadd.f32 %v2063_v37, %v1918_v19 }
 0x5e9   :  { %v2065_v39 = vpop.f32.mrf.mxu0 }
 0x5ea   :  { %v1786_v40 = vadd.f32 %v1785_v50, %v1746_v17 }
 0x5ec   :  { %vm1791_vm0 = vcmp.ge.f32.partialorder %v1786_v40, 0.0  ;;  %v1792_v51 = vmul.f32 0.2, %v1786_v40 }
 0x5ee   :  { %v1793_v43 = vsel %vm1791_vm0, %v1786_v40, %v1792_v51 }
 0x5ef   :  { %v1797_v18 = vmul.f32 %v1794_v22, %v1793_v43  ;;  %v1815_v44 = vmul.f32 %v1813_v32, %v1793_v43 }
 0x5f1   :  { %v1799_v46 = vsel %vm1798_vm6, %v1797_v18, 0.0  ;;  %v1817_v36 = vrot.slane %v1815_v44, 4 }
 0x5f2   :  { %1800 = vadd.xlane.f32.xlu0 %v1799_v46 }
 0x5f3   :  { %v1819_v16 = vsel %vm1798_vm6, %v1817_v36, 0.0 }
 0x5f4   :  { %1820 = vadd.xlane.f32.xlu1 %v1819_v16 }
 0x67b   :  { %v1801_v47 = vpop.xlane.xlu0 %1800 }
 0x67c   :  { %v1802_v48 = vrot.slane %v1801_v47, 4 }
 0x67d   :  { %v1821_v49 = vpop.xlane.xlu1 %1820 }
 0x67e   :  { %v1803_v53 = vadd.f32 %v1802_v48, %v1801_v47  ;;  %v1822_v41 = vrot.slane %v1821_v49, 4 }
 0x680   :  { %v1804_v54 = vrot.slane %v1803_v53, 2  ;;  %v1823_v56 = vadd.f32 %v1822_v41, %v1821_v49 }
 0x682   :  { %v1824_v30 = vrot.slane %v1823_v56, 2  ;;  %v1805_v14 = vadd.f32 %v1804_v54, %v1803_v53 }
 0x684   :  { %v1825_v11 = vadd.f32 %v1824_v30, %v1823_v56  ;;  %v1806_v59 = vrot.slane %v1805_v14, 1 }
 0x686   :  { %v1807_v61 = vadd.f32 %v1806_v59, %v1805_v14  ;;  %v1826_v13 = vrot.slane %v1825_v11, 1 }
 0x688   :  { %2246 = vpush %v1807_v61  ;;  %v1827_v35 = vadd.f32 %v1826_v13, %v1825_v11 }
 0x68a   :  { %2248 = vpush %v1827_v35 }
 0x6b9   :  { %s2247_s12 = spop %2246 }
 0x6ba   :  { %v1810_v63 = vstv %s2247_s12 }
 0x6bb   :  { %v1811_v0 = vsel %vm1809_vm14, %v1810_v63, 0.0  ;;  %s2249_s13 = spop %2248 }
 0x6bc   :  { %v1830_v1 = vstv %s2249_s13 }
 0x6bd   :  { %v1831_v55 = vsel %vm1829_vm15, %v1830_v1, %v1811_v0 }
 0x6be   :  { %1832 = vst [vmem:[%s3136_s14] sm:$0xff] %v1831_v55 }

// kernel: _unnamed_function_.4
= control target key start
LH: loop header
LB: loop body
LE: loop exit
PB: predicated region body
PF: predicated region fallthrough
CT: control target
= control target key end

     0   :  { %vm87_vm0 = vcmask 1043456   ;;  %vm88_vm1 = vcmask 1044480   ;;  %v1820_v1 = vmov 65535   ;;  %vm74_vm2 = vcmask 72704   ;;  %s1823_s29 = smov 32   ;;  %s1825_s23 = smov 96   ;;  %s2272_s3 = inlined_call_operand.vmem [shape: bf16[9,32], index: 3, kind: input, shape index: {}]   ;;  %s2273_s0 = inlined_call_operand.vmem [shape: f32[1,64,9], index: 0, kind: input, shape index: {}]   ;;  %s2274_s4 = inlined_call_operand.vmem [shape: f32[1,32], index: 4, kind: input, shape index: {}, may-alias: {4,6,8,10,12}]   ;;  %s2275_s5 = inlined_call_operand.vmem [shape: f32[1,32], index: 5, kind: input, shape index: {}]   ;;  %s2276_s6 = inlined_call_operand.vmem [shape: f32[1,32], index: 6, kind: input, shape index: {}, may-alias: {4,6,8,10,12}]   ;;  %s2277_s1 = inlined_call_operand.vmem [shape: f32[72,32], index: 1, kind: input, shape index: {}]   ;;  %s2278_s7 = inlined_call_operand.vmem [shape: bf16[288,32], index: 7, kind: input, shape index: {}]   ;;  %s2279_s8 = inlined_call_operand.vmem [shape: f32[1,32], index: 8, kind: input, shape index: {}, may-alias: {4,6,8,10,12}]   ;;  %s2280_s9 = inlined_call_operand.vmem [shape: f32[1,32], index: 9, kind: input, shape index: {}]   ;;  %s2281_s10 = inlined_call_operand.vmem [shape: f32[1,32], index: 10, kind: input, shape index: {}, may-alias: {4,6,8,10,12}]   ;;  %s2282_s2 = inlined_call_operand.vmem [shape: f32[18,8], index: 2, kind: input, shape index: {}]   ;;  %s2283_s11 = inlined_call_operand.vmem [shape: bf16[288,32], index: 11, kind: input, shape index: {}]   ;;  %s2284_s12 = inlined_call_operand.vmem [shape: f32[1,32], index: 12, kind: input, shape index: {}, may-alias: {4,6,8,10,12}]   ;;  %s2285_s13 = inlined_call_operand.vmem [shape: f32[2,32], index: 13, kind: input, shape index: {}]   ;;  %s2286_s14 = inlined_call_operand.vmem [shape: f32[1,8,128], index: 14, kind: output, shape index: {}]  }
   0x1   :  { %v1779_v0 = vld [vmem:[%s2272_s3] sm:$0x1f]   ;;  %v89_v2 = vsel %vm87_vm0, 4294967295, %v1820_v1  ;;  %v49_v4 = vld [vmem:[%s2273_s0 + $0x8] sm:$0xff]  ;;  %v50_v9 = vld [vmem:[%s2273_s0 + $0x10] sm:$0xff]  ;;  %v1821_v17 = vmov 0.0  }
   0x2   :  { %v48_v3 = vld [vmem:[%s2273_s0] sm:$0xff]  ;;  %v90_v6 = vsel %vm88_vm1, %v89_v2, 0  ;;  %v53_v8 = vld [vmem:[%s2273_s0 + $0x28] sm:$0xff]  ;;  %v51_v10 = vld [vmem:[%s2273_s0 + $0x18] sm:$0xff]  ;;  %vm1822_vm3 = vmmov 0   ;;  %vm185_vm7 = vcmask 261120  }
   0x3   :  { %v52_v5 = vld [vmem:[%s2273_s0 + $0x20] sm:$0xff]  ;;  %v56_v7 = vpack.c.bf16 %v49_v4, %v48_v3  ;;  %v92_v11 = vand.u32 %v1779_v0, %v90_v6  ;;  %v54_v13 = vld [vmem:[%s2273_s0 + $0x30] sm:$0xff]  ;;  %v55_v14 = vld [vmem:[%s2273_s0 + $0x38] sm:$0xff]  ;;  %v57_v15 = vpack.c.bf16 %v51_v10, %v50_v9  ;;  %vm455_vm13 = vcmask 523264  }
   0x4   :  { %v58_v12 = vpack.c.bf16 %v53_v8, %v52_v5  ;;  %v59_v16 = vpack.c.bf16 %v55_v14, %v54_v13  ;;  %v1426_v20 = vld [vmem:[%s2274_s4] ss:$0 sm:$0xff]  ;;  %s1824_s4 = smov 64   ;;  %vm457_vm14 = vcmask 785408   ;;  %vm896_vm1 = vcmask 64512  }
   0x5   :  { %1591 = vmatprep.mubr.msk.bf16.mxu0 %vm74_vm2, %v56_v7  ;;  %1589 = vmatprep.subr.bf16.mxu0 %v92_v11 }
   0x6   :  { %1707 = vmatprep.subr.bf16.mxu1 %v92_v11  ;;  %1590 = vmatpush3.bf16.msra.mxu0 %v92_v11 }
   0x7   :  { %1708 = vmatpush3.bf16.msra.mxu1 %v92_v11  ;;  %1595 = vmatprep.mubr.msk.bf16.mxu1 %vm74_vm2, %v58_v12 }
   0x8   :  { %1599 = vmatprep.subr.mxu1 %v1821_v17  ;;  %1634 = vmatprep.subr.mxu0 %v1821_v17 }
   0x9   :  { %1592 = vmatmul.mubr.msk.bf16.vlgmr.msra.gmra.mxu0 %vm74_vm2, %v57_v15 }
   0xa   :  { %1596 = vmatmul.mubr.msk.bf16.vlgmr.msra.gmra.mxu1 %vm74_vm2, %v59_v16  ;;  %1642 = vmatprep.mubr.msk.f32.mxu0 %vm1822_vm3, %v1821_v17  ;;  %vm1139_vm2 = vcmask 1041408  }
   0xb   :  { %1607 = vmatprep.mubr.msk.f32.mxu1 %vm1822_vm3, %v1821_v17 }
  0xc9   :  { %v1593_v18 = vpop.f32.mrf.mxu0 }
  0xca   :  { %v1597_v19 = vpop.f32.mrf.mxu1  ;;  %v137_v26 = vadd.f32 %v1593_v18, %v1426_v20 }
  0xcb   :  { %v128_v21 = vpop.f32.mrf.mxu0  ;;  %v153_v39 = vadd.f32 %v1597_v19, %v1426_v20 }
  0xcc   :  { %v144_v22 = vpop.f32.mrf.mxu1  ;;  %v129_v23 = vadd.f32 %v1426_v20, %v128_v21  ;;  %v169_v32 = vmul.f32 0.2, %v137_v26  ;;  %vm161_vm5 = vcmp.ge.f32.partialorder %v137_v26, 0.0 }
  0xcd   :  { %v1594_v24 = vpop.f32.mrf.mxu0  ;;  %v145_v33 = vadd.f32 %v1426_v20, %v144_v22  ;;  %v173_v49 = vmul.f32 0.2, %v153_v39  ;;  %vm165_vm11 = vcmp.ge.f32.partialorder %v153_v39, 0.0 }
  0xce   :  { %v1598_v25 = vpop.f32.mrf.mxu1  ;;  %v167_v28 = vmul.f32 0.2, %v129_v23  ;;  %v140_v29 = vadd.f32 %v1594_v24, %v1426_v20  ;;  %vm159_vm4 = vcmp.ge.f32.partialorder %v129_v23, 0.0  ;;  %v177_v38 = vsel %vm161_vm5, %v137_v26, %v169_v32 }
  0xcf   :  { %v131_v27 = vpop.f32.mrf.mxu0  ;;  %v171_v40 = vmul.f32 0.2, %v145_v33  ;;  %vm163_vm9 = vcmp.ge.f32.partialorder %v145_v33, 0.0  ;;  %v156_v45 = vadd.f32 %v1598_v25, %v1426_v20  ;;  %v189_v48 = vsel %vm185_vm7, %v177_v38, 0.0 }
  0xd0   :  { %v132_v30 = vadd.f32 %v1426_v20, %v131_v27  ;;  %v147_v31 = vpop.f32.mrf.mxu1  ;;  %v175_v34 = vsel %vm159_vm4, %v129_v23, %v167_v28  ;;  %v170_v35 = vmul.f32 0.2, %v140_v29  ;;  %vm162_vm8 = vcmp.ge.f32.partialorder %v140_v29, 0.0 }
  0xd1   :  { %v148_v37 = vadd.f32 %v1426_v20, %v147_v31  ;;  %v186_v42 = vsel %vm185_vm7, %v175_v34, 0.0  ;;  %v179_v50 = vsel %vm163_vm9, %v145_v33, %v171_v40  ;;  %v174_v53 = vmul.f32 0.2, %v156_v45 }
  0xd2   :  { %vm160_vm6 = vcmp.ge.f32.partialorder %v132_v30, 0.0  ;;  %v168_v36 = vmul.f32 0.2, %v132_v30  ;;  %v178_v44 = vsel %vm162_vm8, %v140_v29, %v170_v35  ;;  %v193_v56 = vsel %vm185_vm7, %v179_v50, 0.0 }
  0xd3   :  { %v172_v47 = vmul.f32 0.2, %v148_v37  ;;  %vm164_vm10 = vcmp.ge.f32.partialorder %v148_v37, 0.0  ;;  %v191_v52 = vsel %vm185_vm7, %v178_v44, 0.0  ;;  %vm166_vm12 = vcmp.ge.f32.partialorder %v156_v45, 0.0 }
  0xd4   :  { %v176_v41 = vsel %vm160_vm6, %v132_v30, %v168_v36  ;;  %v181_v57 = vsel %vm165_vm11, %v153_v39, %v173_v49  ;;  %v182_v60 = vsel %vm166_vm12, %v156_v45, %v174_v53  ;;  %vm1387_vm4 = vcmask 254976  }
  0xd5   :  { %v187_v43 = vsel %vm185_vm7, %v176_v41, 0.0  ;;  %v180_v54 = vsel %vm164_vm10, %v148_v37, %v172_v47  ;;  %v197_v62 = vsel %vm185_vm7, %v181_v57, 0.0  ;;  %v199_v0 = vsel %vm185_vm7, %v182_v60, 0.0 }
  0xd6   :  { %v188_v46 = vadd.f32 %v187_v43, %v186_v42  ;;  %v195_v59 = vsel %vm185_vm7, %v180_v54, 0.0 }
  0xd8   :  { %v190_v51 = vadd.f32 %v189_v48, %v188_v46 }
  0xda   :  { %v192_v55 = vadd.f32 %v191_v52, %v190_v51 }
  0xdc   :  { %v194_v58 = vadd.f32 %v193_v56, %v192_v55  ;;  %v1433_v55 = vld [vmem:[%s2276_s6] ss:$0 sm:$0xff] }
  0xde   :  { %v196_v61 = vadd.f32 %v195_v59, %v194_v58 }
  0xe0   :  { %v198_v63 = vadd.f32 %v197_v62, %v196_v61 }
  0xe2   :  { %v200_v1 = vadd.f32 %v199_v0, %v198_v63 }
  0xe4   :  { %v201_v2 = vrot.slane %v200_v1, 4 }
  0xe6   :  { %v202_v3 = vadd.f32 %v201_v2, %v200_v1 }
  0xe8   :  { %v203_v4 = vrot.slane %v202_v3, 2 }
  0xea   :  { %v204_v5 = vadd.f32 %v203_v4, %v202_v3 }
  0xec   :  { %v205_v6 = vrot.slane %v204_v5, 1 }
  0xee   :  { %v206_v7 = vadd.f32 %v205_v6, %v204_v5 }
  0xf0   :  { %v207_v8 = vmul.f32 0.015625, %v206_v7 }
  0xf2   :  { %v208_v9 = vsub.f32 %v175_v34, %v207_v8  ;;  %v209_v10 = vsub.f32 %v176_v41, %v207_v8  ;;  %v210_v11 = vsub.f32 %v177_v38, %v207_v8  ;;  %v211_v12 = vsub.f32 %v178_v44, %v207_v8 }
  0xf3   :  { %v212_v13 = vsub.f32 %v179_v50, %v207_v8  ;;  %v213_v18 = vsub.f32 %v180_v54, %v207_v8  ;;  %v214_v23 = vsub.f32 %v181_v57, %v207_v8  ;;  %v215_v27 = vsub.f32 %v182_v60, %v207_v8  ;;  %v1432_v50 = vld [vmem:[%s2275_s5] ss:$0 sm:$0xff] }
  0xf4   :  { %v216_v14 = vmul.f32 %v208_v9, %v208_v9  ;;  %v217_v15 = vmul.f32 %v209_v10, %v209_v10  ;;  %v218_v16 = vmul.f32 %v210_v11, %v210_v11  ;;  %v219_v19 = vmul.f32 %v211_v12, %v211_v12 }
  0xf5   :  { %v220_v24 = vmul.f32 %v212_v13, %v212_v13  ;;  %v221_v28 = vmul.f32 %v213_v18, %v213_v18  ;;  %v222_v31 = vmul.f32 %v214_v23, %v214_v23  ;;  %v223_v34 = vmul.f32 %v215_v27, %v215_v27 }
  0xf6   :  { %v224_v20 = vsel %vm185_vm7, %v216_v14, 0.0  ;;  %v225_v21 = vsel %vm185_vm7, %v217_v15, 0.0  ;;  %v227_v25 = vsel %vm185_vm7, %v218_v16, 0.0  ;;  %v229_v29 = vsel %vm185_vm7, %v219_v19, 0.0  ;;  %v286_v14 = vld [vmem:[%s2277_s1 + $0x10] sm:$0xff]  ;;  %v287_v15 = vld [vmem:[%s2277_s1 + $0x18] sm:$0xff] }
  0xf7   :  { %v226_v22 = vadd.f32 %v225_v21, %v224_v20  ;;  %v231_v32 = vsel %vm185_vm7, %v220_v24, 0.0  ;;  %v233_v35 = vsel %vm185_vm7, %v221_v28, 0.0  ;;  %v235_v37 = vsel %vm185_vm7, %v222_v31, 0.0  ;;  %v288_v16 = vld [vmem:[%s2277_s1 + $0x20] sm:$0xff]  ;;  %v290_v19 = vld [vmem:[%s2277_s1 + $0x30] sm:$0xff]  ;;  %v291_v20 = vld [vmem:[%s2277_s1 + $0x38] sm:$0xff] }
  0xf8   :  { %v237_v39 = vsel %vm185_vm7, %v223_v34, 0.0  ;;  %v292_v21 = vld [vmem:[%s2277_s1 + $0x40] sm:$0xff]  ;;  %v1782_v24 = vld [vmem:[%s2278_s7 + $0x70] sm:$0xff]   ;;  %v1784_v28 = vld [vmem:[%s2278_s7 + $0x68] sm:$0xff]  }
  0xf9   :  { %v228_v26 = vadd.f32 %v227_v25, %v226_v22  ;;  %v1780_v22 = vld [vmem:[%s2278_s7 + $0x78] sm:$0xff]   ;;  %v1783_v25 = vld [vmem:[%s2278_s7 + $0x30] sm:$0xff]  }
  0xfb   :  { %v230_v30 = vadd.f32 %v229_v29, %v228_v26  ;;  %v1785_v29 = vld [vmem:[%s2278_s7 + $0x28] sm:$0xff]  }
  0xfd   :  { %v232_v33 = vadd.f32 %v231_v32, %v230_v30  ;;  %v1786_v30 = vld [vmem:[%s2278_s7 + $0x60] sm:$0xff]  }
  0xff   :  { %v234_v36 = vadd.f32 %v233_v35, %v232_v33  ;;  %v1787_v33 = vld [vmem:[%s2278_s7 + $0x20] sm:$0xff]  }
 0x101   :  { %v236_v38 = vadd.f32 %v235_v37, %v234_v36  ;;  %v1788_v36 = vld [vmem:[%s2278_s7 + $0x58] sm:$0xff]  }
 0x103   :  { %v238_v40 = vadd.f32 %v237_v39, %v236_v38 }
 0x105   :  { %v239_v41 = vrot.slane %v238_v40, 4 }
 0x107   :  { %v240_v42 = vadd.f32 %v239_v41, %v238_v40  ;;  %v1789_v40 = vld [vmem:[%s2278_s7 + $0x18] sm:$0xff]  }
 0x109   :  { %v241_v43 = vrot.slane %v240_v42, 2 }
 0x10b   :  { %v242_v44 = vadd.f32 %v241_v43, %v240_v42 }
 0x10d   :  { %v243_v45 = vrot.slane %v242_v44, 1 }
 0x10f   :  { %v244_v46 = vadd.f32 %v243_v45, %v242_v44 }
 0x111   :  { %v245_v47 = vmul.f32 0.015625, %v244_v46 }
 0x113   :  { %v246_v48 = vadd.f32 0.8, %v245_v47 }
 0x115   :  { %1816 = vrsqrt.f32 %v246_v48  ;;  %v1790_v48 = vld [vmem:[%s2278_s7 + $0x50] sm:$0xff]  }
 0x122   :  { %v1817_v49 = vpop.eup %1816 }
 0x123   :  { %v253_v51 = vmul.f32 %v1817_v49, %v213_v18  ;;  %v251_v52 = vmul.f32 %v1817_v49, %v211_v12  ;;  %v255_v53 = vmul.f32 %v1817_v49, %v215_v27  ;;  %v250_v54 = vmul.f32 %v1817_v49, %v210_v11  ;;  %v284_v12 = vld [vmem:[%s2277_s1] sm:$0xff]  ;;  %v289_v18 = vld [vmem:[%s2277_s1 + $0x28] sm:$0xff] }
 0x124   :  { %v254_v56 = vmul.f32 %v1817_v49, %v214_v23  ;;  %v249_v57 = vmul.f32 %v1817_v49, %v209_v10  ;;  %v248_v58 = vmul.f32 %v1817_v49, %v208_v9  ;;  %v252_v62 = vmul.f32 %v1817_v49, %v212_v13  ;;  %v285_v13 = vld [vmem:[%s2277_s1 + $0x8] sm:$0xff]  ;;  %v1781_v23 = vld [vmem:[%s2278_s7 + $0x38] sm:$0xff]   ;;  %v1791_v49 = vld [vmem:[%s2278_s7 + $0x10] sm:$0xff]  }
 0x125   :  { %v265_v59 = vmul.f32 %v1432_v50, %v251_v52  ;;  %v269_v60 = vmul.f32 %v1432_v50, %v255_v53  ;;  %v264_v61 = vmul.f32 %v1432_v50, %v250_v54  ;;  %v267_v3 = vmul.f32 %v1432_v50, %v253_v51  ;;  %v1792_v54 = vld [vmem:[%s2278_s7 + $0x48] sm:$0xff]  }
 0x126   :  { %v268_v63 = vmul.f32 %v1432_v50, %v254_v56  ;;  %v263_v2 = vmul.f32 %v1432_v50, %v249_v57  ;;  %v262_v4 = vmul.f32 %v1432_v50, %v248_v58  ;;  %v266_v7 = vmul.f32 %v1432_v50, %v252_v62  ;;  %v1795_v62 = vld [vmem:[%s2278_s7] sm:$0xff]  }
 0x127   :  { %v279_v0 = vadd.f32 %v1433_v55, %v265_v59  ;;  %v283_v1 = vadd.f32 %v1433_v55, %v269_v60  ;;  %v278_v5 = vadd.f32 %v1433_v55, %v264_v61  ;;  %v281_v9 = vadd.f32 %v1433_v55, %v267_v3  ;;  %v1794_v60 = vld [vmem:[%s2278_s7 + $0x40] sm:$0xff]  }
 0x128   :  { %v282_v6 = vadd.f32 %v1433_v55, %v268_v63  ;;  %v277_v8 = vadd.f32 %v1433_v55, %v263_v2  ;;  %v276_v10 = vadd.f32 %v1433_v55, %v262_v4  ;;  %v280_v11 = vadd.f32 %v1433_v55, %v266_v7  ;;  %v1793_v55 = vld [vmem:[%s2278_s7 + $0x8] sm:$0xff]  }
 0x129   :  { %1600 = vmatpush3.msra.mxu1 %v279_v0  ;;  %1635 = vmatpush3.msra.mxu0 %v283_v1 }
 0x12a   :  { %1601 = vmatprep.subr.mxu1 %v1821_v17  ;;  %1636 = vmatprep.subr.mxu0 %v1821_v17 }
 0x12b   :  { %1602 = vmatpush3.msra.mxu1 %v278_v5  ;;  %1637 = vmatpush3.msra.mxu0 %v282_v6 }
 0x12c   :  { %1603 = vmatprep.subr.mxu1 %v1821_v17  ;;  %1638 = vmatprep.subr.mxu0 %v1821_v17 }
 0x12d   :  { %1604 = vmatpush3.msra.mxu1 %v277_v8  ;;  %1639 = vmatpush3.msra.mxu0 %v281_v9 }
 0x12e   :  { %1605 = vmatprep.subr.mxu1 %v1821_v17  ;;  %1640 = vmatprep.subr.mxu0 %v1821_v17 }
 0x12f   :  { %1606 = vmatpush3.msra.mxu1 %v276_v10  ;;  %1641 = vmatpush3.msra.mxu0 %v280_v11 }
 0x130   :  { %1608 = vmatmul.mubr.msk.f32.vlgmr.msra.gmra.mxu1 %vm185_vm7, %v284_v12  ;;  %1643 = vmatmul.mubr.msk.f32.vlgmr.msra.gmra.mxu0 %vm185_vm7, %v284_v12 }
 0x131   :  { %1610 = vmatprep.mubr.msk.f32.mxu1 %vm1822_vm3, %v1821_v17  ;;  %1645 = vmatprep.mubr.msk.f32.mxu0 %vm1822_vm3, %v1821_v17 }
 0x132   :  { %1677 = vmatprep.subr.mxu0 %v1821_v17  ;;  %1531 = vmatprep.subr.bf16.mxu1 %v1780_v22 }
 0x133   :  { %1532 = vmatpush3.bf16.msra.mxu1 %v1781_v23 }
 0x134   :  { %1611 = vmatmul.mubr.msk.f32.gmra.mxu1 %vm185_vm7, %v285_v13  ;;  %1646 = vmatmul.mubr.msk.f32.gmra.mxu0 %vm185_vm7, %v285_v13 }
 0x135   :  { %1613 = vmatprep.mubr.msk.f32.mxu1 %vm1822_vm3, %v1821_v17  ;;  %1648 = vmatprep.mubr.msk.f32.mxu0 %vm1822_vm3, %v1821_v17 }
 0x136   :  { %1533 = vmatprep.subr.bf16.mxu1 %v1782_v24 }
 0x137   :  { %1534 = vmatpush3.bf16.msra.mxu1 %v1783_v25 }
 0x138   :  { %1614 = vmatmul.mubr.msk.f32.gmra.mxu1 %vm185_vm7, %v286_v14  ;;  %1649 = vmatmul.mubr.msk.f32.gmra.mxu0 %vm185_vm7, %v286_v14 }
 0x139   :  { %1616 = vmatprep.mubr.msk.f32.mxu1 %vm1822_vm3, %v1821_v17  ;;  %1651 = vmatprep.mubr.msk.f32.mxu0 %vm1822_vm3, %v1821_v17 }
 0x13a   :  { %1535 = vmatprep.subr.bf16.mxu1 %v1784_v28 }
 0x13b   :  { %1536 = vmatpush3.bf16.msra.mxu1 %v1785_v29 }
 0x13c   :  { %1617 = vmatmul.mubr.msk.f32.gmra.mxu1 %vm185_vm7, %v287_v15  ;;  %1652 = vmatmul.mubr.msk.f32.gmra.mxu0 %vm185_vm7, %v287_v15 }
 0x13d   :  { %1619 = vmatprep.mubr.msk.f32.mxu1 %vm1822_vm3, %v1821_v17  ;;  %1654 = vmatprep.mubr.msk.f32.mxu0 %vm1822_vm3, %v1821_v17 }
 0x13e   :  { %1537 = vmatprep.subr.bf16.mxu1 %v1786_v30 }
 0x13f   :  { %1538 = vmatpush3.bf16.msra.mxu1 %v1787_v33 }
 0x140   :  { %1620 = vmatmul.mubr.msk.f32.gmra.mxu1 %vm185_vm7, %v288_v16  ;;  %1655 = vmatmul.mubr.msk.f32.gmra.mxu0 %vm185_vm7, %v288_v16 }
 0x141   :  { %1622 = vmatprep.mubr.msk.f32.mxu1 %vm1822_vm3, %v1821_v17  ;;  %1657 = vmatprep.mubr.msk.f32.mxu0 %vm1822_vm3, %v1821_v17 }
 0x142   :  { %1539 = vmatprep.subr.bf16.mxu1 %v1788_v36 }
 0x143   :  { %1540 = vmatpush3.bf16.msra.mxu1 %v1789_v40 }
 0x144   :  { %1623 = vmatmul.mubr.msk.f32.gmra.mxu1 %vm185_vm7, %v289_v18  ;;  %1658 = vmatmul.mubr.msk.f32.gmra.mxu0 %vm185_vm7, %v289_v18 }
 0x145   :  { %1625 = vmatprep.mubr.msk.f32.mxu1 %vm1822_vm3, %v1821_v17  ;;  %1660 = vmatprep.mubr.msk.f32.mxu0 %vm1822_vm3, %v1821_v17 }
 0x146   :  { %1541 = vmatprep.subr.bf16.mxu1 %v1790_v48 }
 0x147   :  { %1542 = vmatpush3.bf16.msra.mxu1 %v1791_v49 }
 0x148   :  { %1626 = vmatmul.mubr.msk.f32.gmra.mxu1 %vm185_vm7, %v290_v19  ;;  %1661 = vmatmul.mubr.msk.f32.gmra.mxu0 %vm185_vm7, %v290_v19 }
 0x149   :  { %1628 = vmatprep.mubr.msk.f32.mxu1 %vm1822_vm3, %v1821_v17  ;;  %1663 = vmatprep.mubr.msk.f32.mxu0 %vm1822_vm3, %v1821_v17 }
 0x14a   :  { %1543 = vmatprep.subr.bf16.mxu1 %v1792_v54 }
 0x14b   :  { %1544 = vmatpush3.bf16.msra.mxu1 %v1793_v55 }
 0x14c   :  { %1629 = vmatmul.mubr.msk.f32.gmra.mxu1 %vm185_vm7, %v291_v20  ;;  %1664 = vmatmul.mubr.msk.f32.gmra.mxu0 %vm185_vm7, %v291_v20 }
 0x14d   :  { %1631 = vmatprep.mubr.msk.f32.mxu1 %vm1822_vm3, %v1821_v17  ;;  %1666 = vmatprep.mubr.msk.f32.mxu0 %vm1822_vm3, %v1821_v17 }
 0x14e   :  { %1545 = vmatprep.subr.bf16.mxu1 %v1794_v60 }
 0x14f   :  { %1546 = vmatpush3.bf16.msra.mxu1 %v1795_v62 }
 0x150   :  { %1632 = vmatmul.mubr.msk.f32.gmra.mxu1 %vm185_vm7, %v292_v21  ;;  %1667 = vmatmul.mubr.msk.f32.gmra.mxu0 %vm185_vm7, %v292_v21 }
 0x151   :  { %1679 = vmatprep.mubr.msk.f32.mxu0 %vm1822_vm3, %v1821_v17  ;;  %1669 = vmatprep.subr.bf16.mxu1 %v1821_v17 }
 0x1f0   :  { %v2061_v26 = vpop.f32.mrf.mxu1  ;;  %v2063_v27 = vpop.f32.mrf.mxu0 }
 0x1f2   :  { %v1609_v31 = vpop.f32.mrf.mxu1  ;;  %v1644_v32 = vpop.f32.mrf.mxu0 }
 0x1f4   :  { %v391_v34 = vpop.f32.mrf.mxu1  ;;  %v533_v35 = vpop.f32.mrf.mxu0 }
 0x1f5   :  { %v1719_v37 = vpack.i.bf16 %v533_v35, %v391_v34 }
 0x1f6   :  { %v1612_v38 = vpop.f32.mrf.mxu1  ;;  %v1647_v39 = vpop.f32.mrf.mxu0 }
 0x1f7   :  { %1720 = vrot.lane.b32.xlu0 %v1719_v37, %s1823_s29 }
 0x1f8   :  { %v396_v41 = vpop.f32.mrf.mxu1  ;;  %v538_v42 = vpop.f32.mrf.mxu0 }
 0x1f9   :  { %v1724_v43 = vpack.i.bf16 %v538_v42, %v396_v41 }
 0x1fa   :  { %v1615_v44 = vpop.f32.mrf.mxu1  ;;  %v1650_v45 = vpop.f32.mrf.mxu0 }
 0x1fb   :  { %1725 = vrot.lane.b32.xlu1 %v1724_v43, %s1824_s4 }
 0x1fc   :  { %v401_v46 = vpop.f32.mrf.mxu1  ;;  %v543_v47 = vpop.f32.mrf.mxu0 }
 0x1fd   :  { %v1744_v8 = vpack.i.bf16 %v543_v47, %v401_v46 }
 0x1fe   :  { %v1618_v50 = vpop.f32.mrf.mxu1  ;;  %v1653_v51 = vpop.f32.mrf.mxu0 }
 0x1ff   :  { %v1796_v50 = vld [vmem:[%s2278_s7 + $0x88] sm:$0xff]   ;;  %v1797_v51 = vld [vmem:[%s2278_s7 + $0x80] sm:$0xff]  }
 0x200   :  { %v406_v52 = vpop.f32.mrf.mxu1  ;;  %v548_v53 = vpop.f32.mrf.mxu0 }
 0x202   :  { %v1621_v56 = vpop.f32.mrf.mxu1  ;;  %v1656_v57 = vpop.f32.mrf.mxu0 }
 0x203   :  { %v1452_v56 = vld [vmem:[%s2279_s8] ss:$0 sm:$0xff] }
 0x204   :  { %v411_v58 = vpop.f32.mrf.mxu1  ;;  %v553_v59 = vpop.f32.mrf.mxu0 }
 0x205   :  { %v1729_v61 = vpack.i.bf16 %v553_v59, %v411_v58 }
 0x206   :  { %v1624_v63 = vpop.f32.mrf.mxu1  ;;  %v1659_v0 = vpop.f32.mrf.mxu0 }
 0x207   :  { %1730 = vrot.lane.b32.xlu0 %v1729_v61, %s1823_s29 }
 0x208   :  { %v416_v1 = vpop.f32.mrf.mxu1  ;;  %v558_v2 = vpop.f32.mrf.mxu0 }
 0x209   :  { %v1734_v3 = vpack.i.bf16 %v558_v2, %v416_v1 }
 0x20a   :  { %v1627_v4 = vpop.f32.mrf.mxu1  ;;  %v1662_v5 = vpop.f32.mrf.mxu0 }
 0x20b   :  { %1735 = vrot.lane.b32.xlu1 %v1734_v3, %s1824_s4 }
 0x20c   :  { %v421_v6 = vpop.f32.mrf.mxu1  ;;  %v563_v7 = vpop.f32.mrf.mxu0 }
 0x20d   :  { %v1739_v9 = vpack.i.bf16 %v563_v7, %v421_v6 }
 0x20e   :  { %v1630_v10 = vpop.f32.mrf.mxu1  ;;  %v1665_v11 = vpop.f32.mrf.mxu0 }
 0x20f   :  { %1745 = vrot.lane.b32.xlu1 %v1744_v8, %s1825_s23  ;;  %1740 = vrot.lane.b32.xlu0 %v1739_v9, %s1825_s23 }
 0x210   :  { %v426_v12 = vpop.f32.mrf.mxu1  ;;  %v568_v13 = vpop.f32.mrf.mxu0 }
 0x211   :  { %v604_v14 = vpack.c.bf16 %v568_v13, %v426_v12 }
 0x212   :  { %v1633_v15 = vpop.f32.mrf.mxu1  ;;  %v1668_v16 = vpop.f32.mrf.mxu0 }
 0x269   :  { %v1721_v18 = vpop.permute.xlu0 %1720 }
 0x26a   :  { %v1723_v21 = vunpack.i.h.bf16 %v1721_v18  ;;  %v1722_v22 = vunpack.i.l.bf16 %v1721_v18 }
 0x26c   :  { %v596_v32 = vsel %vm185_vm7, %v2063_v27, %v1723_v21  ;;  %v454_v33 = vsel %vm185_vm7, %v2061_v26, %v1722_v22 }
 0x26d   :  { %v1726_v19 = vpop.permute.xlu1 %1725 }
 0x26e   :  { %v1728_v28 = vunpack.i.h.bf16 %v1726_v19  ;;  %v1727_v29 = vunpack.i.l.bf16 %v1726_v19 }
 0x270   :  { %v597_v42 = vsel %vm455_vm13, %v596_v32, %v1728_v28  ;;  %v456_v43 = vsel %vm455_vm13, %v454_v33, %v1727_v29 }
 0x279   :  { %v1731_v20 = vpop.permute.xlu0 %1730 }
 0x27a   :  { %v1733_v23 = vunpack.i.h.bf16 %v1731_v20  ;;  %v1732_v24 = vunpack.i.l.bf16 %v1731_v20 }
 0x27c   :  { %v599_v34 = vsel %vm185_vm7, %v548_v53, %v1733_v23  ;;  %v459_v35 = vsel %vm185_vm7, %v406_v52, %v1732_v24 }
 0x27d   :  { %v1736_v25 = vpop.permute.xlu1 %1735 }
 0x27e   :  { %v1738_v30 = vunpack.i.h.bf16 %v1736_v25  ;;  %v1737_v31 = vunpack.i.l.bf16 %v1736_v25 }
 0x280   :  { %v600_v44 = vsel %vm455_vm13, %v599_v34, %v1738_v30  ;;  %v460_v27 = vsel %vm455_vm13, %v459_v35, %v1737_v31 }
 0x281   :  { %v1746_v36 = vpop.permute.xlu1 %1745  ;;  %v1741_v37 = vpop.permute.xlu0 %1740 }
 0x282   :  { %v1748_v38 = vunpack.i.h.bf16 %v1746_v36  ;;  %v1747_v39 = vunpack.i.l.bf16 %v1746_v36  ;;  %v1743_v40 = vunpack.i.h.bf16 %v1741_v37  ;;  %v1742_v41 = vunpack.i.l.bf16 %v1741_v37  ;;  %v1472_v36 = vld [vmem:[%s2280_s9] ss:$0 sm:$0xff] }
 0x284   :  { %v598_v26 = vsel %vm457_vm14, %v597_v42, %v1748_v38  ;;  %v458_v45 = vsel %vm457_vm14, %v456_v43, %v1747_v39  ;;  %v461_v46 = vsel %vm457_vm14, %v460_v27, %v1742_v41  ;;  %v601_v47 = vsel %vm457_vm14, %v600_v44, %v1743_v40  ;;  %v1473_v39 = vld [vmem:[%s2281_s10] ss:$0 sm:$0xff]  ;;  %v894_v27 = vld [vmem:[%s2282_s2 + $0x8] sm:$0xff] }
 0x285   :  { %v602_v48 = vpack.c.bf16 %v598_v26, %v458_v45  ;;  %v603_v49 = vpack.c.bf16 %v601_v47, %v461_v46  ;;  %v893_v44 = vld [vmem:[%s2282_s2] sm:$0xff]  ;;  %v895_v26 = vld [vmem:[%s2282_s2 + $0x10] sm:$0x3]  ;;  %v1798_v45 = vld [vmem:[%s2283_s11 + $0x78] sm:$0xff]  }
 0x286   :  { %v1799_v46 = vld [vmem:[%s2283_s11 + $0x38] sm:$0xff]   ;;  %v1800_v47 = vld [vmem:[%s2283_s11 + $0x70] sm:$0xff]  }
 0x287   :  { %791 = vmatprep.mubr.bf16.mxu1 %v603_v49  ;;  %v1802_v49 = vld [vmem:[%s2283_s11 + $0x68] sm:$0xff]  }
 0x288   :  { %792 = vmatmul.mubr.bf16.vlgmr.msra.gmra.mxu1 %v602_v48  ;;  %v1801_v48 = vld [vmem:[%s2283_s11 + $0x30] sm:$0xff]  }
 0x289   :  { %1670 = vmatpush3.bf16.msra.mxu1 %v1796_v50  ;;  %1673 = vmatprep.mubr.msk.bf16.mxu1 %vm1822_vm3, %v1821_v17  ;;  %v1803_v50 = vld [vmem:[%s2283_s11 + $0x28] sm:$0xff]  }
 0x28a   :  { %1671 = vmatprep.subr.bf16.mxu1 %v1821_v17 }
 0x28d   :  { %1672 = vmatpush3.bf16.msra.mxu1 %v1797_v51  ;;  %v1804_v51 = vld [vmem:[%s2283_s11 + $0x60] sm:$0xff]  }
 0x28e   :  { %1688 = vmatprep.subr.mxu1 %v1821_v17 }
 0x290   :  { %1674 = vmatmul.mubr.msk.bf16.vlgmr.msra.gmra.mxu1 %vm185_vm7, %v604_v14 }
 0x291   :  { %1690 = vmatprep.mubr.msk.f32.mxu1 %vm1822_vm3, %v1821_v17 }
 0x348   :  { %v1547_v52 = vpop.f32.mrf.mxu1 }
 0x34a   :  { %v1548_v53 = vpop.f32.mrf.mxu1 }
 0x34b   :  { %v1549_v54 = vadd.f32 %v1548_v53, %v1547_v52  ;;  %v1805_v52 = vld [vmem:[%s2283_s11 + $0x20] sm:$0xff]   ;;  %v1806_v53 = vld [vmem:[%s2283_s11 + $0x58] sm:$0xff]  }
 0x34c   :  { %v1550_v55 = vpop.f32.mrf.mxu1 }
 0x34d   :  { %v794_v59 = vadd.f32 %v1549_v54, %v1452_v56  ;;  %v1807_v54 = vld [vmem:[%s2283_s11 + $0x18] sm:$0xff]  }
 0x34e   :  { %v1551_v57 = vpop.f32.mrf.mxu1 }
 0x34f   :  { %v1552_v58 = vadd.f32 %v1551_v57, %v1550_v55  ;;  %v1808_v57 = vld [vmem:[%s2283_s11 + $0x50] sm:$0xff]  }
 0x350   :  { %v834_v60 = vpop.f32.mrf.mxu1 }
 0x351   :  { %v835_v61 = vadd.f32 %v834_v60, %v794_v59  ;;  %v797_v0 = vadd.f32 %v1552_v58, %v1452_v56  ;;  %v1809_v58 = vld [vmem:[%s2283_s11 + $0x10] sm:$0xff]  }
 0x352   :  { %v1675_v62 = vpop.f32.mrf.mxu1 }
 0x353   :  { %v843_v63 = vmul.f32 0.2, %v835_v61  ;;  %vm841_vm15 = vcmp.ge.f32.partialorder %v835_v61, 0.0 }
 0x354   :  { %v837_v1 = vpop.f32.mrf.mxu1 }
 0x355   :  { %v838_v2 = vadd.f32 %v837_v1, %v797_v0  ;;  %v845_v4 = vsel %vm841_vm15, %v835_v61, %v843_v63  ;;  %v1810_v63 = vld [vmem:[%s2283_s11 + $0x48] sm:$0xff]  }
 0x356   :  { %v1676_v3 = vpop.f32.mrf.mxu1  ;;  %v849_v7 = vsel %vm185_vm7, %v845_v4, 0.0 }
 0x357   :  { %vm842_vm0 = vcmp.ge.f32.partialorder %v838_v2, 0.0  ;;  %v844_v5 = vmul.f32 0.2, %v838_v2 }
 0x359   :  { %v846_v6 = vsel %vm842_vm0, %v838_v2, %v844_v5  ;;  %v1814_v5 = vld [vmem:[%s2283_s11 + $0x88] sm:$0xff]  }
 0x35a   :  { %v850_v8 = vsel %vm185_vm7, %v846_v6, 0.0 }
 0x35b   :  { %v851_v9 = vadd.f32 %v850_v8, %v849_v7 }
 0x35d   :  { %v852_v10 = vrot.slane %v851_v9, 4 }
 0x35f   :  { %v853_v11 = vadd.f32 %v852_v10, %v851_v9 }
 0x361   :  { %v854_v12 = vrot.slane %v853_v11, 2 }
 0x363   :  { %v855_v13 = vadd.f32 %v854_v12, %v853_v11 }
 0x365   :  { %v856_v14 = vrot.slane %v855_v13, 1 }
 0x367   :  { %v857_v15 = vadd.f32 %v856_v14, %v855_v13  ;;  %v1812_v13 = vld [vmem:[%s2283_s11 + $0x40] sm:$0xff]  }
 0x368   :  { %v1813_v14 = vld [vmem:[%s2283_s11] sm:$0xff]  }
 0x369   :  { %v858_v16 = vmul.f32 0.0625, %v857_v15 }
 0x36b   :  { %v859_v18 = vsub.f32 %v845_v4, %v858_v16  ;;  %v860_v19 = vsub.f32 %v846_v6, %v858_v16  ;;  %v1811_v4 = vld [vmem:[%s2283_s11 + $0x8] sm:$0xff]  }
 0x36d   :  { %v861_v20 = vmul.f32 %v859_v18, %v859_v18  ;;  %v862_v21 = vmul.f32 %v860_v19, %v860_v19 }
 0x36f   :  { %v863_v22 = vsel %vm185_vm7, %v861_v20, 0.0  ;;  %v864_v23 = vsel %vm185_vm7, %v862_v21, 0.0 }
 0x370   :  { %v865_v24 = vadd.f32 %v864_v23, %v863_v22 }
 0x372   :  { %v866_v25 = vrot.slane %v865_v24, 4 }
 0x374   :  { %v867_v28 = vadd.f32 %v866_v25, %v865_v24 }
 0x376   :  { %v868_v29 = vrot.slane %v867_v28, 2 }
 0x378   :  { %v869_v30 = vadd.f32 %v868_v29, %v867_v28 }
 0x37a   :  { %v870_v31 = vrot.slane %v869_v30, 1 }
 0x37c   :  { %v871_v32 = vadd.f32 %v870_v31, %v869_v30 }
 0x37e   :  { %v872_v33 = vmul.f32 0.0625, %v871_v32 }
 0x380   :  { %v873_v34 = vadd.f32 0.8, %v872_v33 }
 0x382   :  { %1818 = vrsqrt.f32 %v873_v34 }
 0x38f   :  { %v1819_v35 = vpop.eup %1818 }
 0x390   :  { %v876_v37 = vmul.f32 %v1819_v35, %v860_v19  ;;  %v875_v38 = vmul.f32 %v1819_v35, %v859_v18  ;;  %v1815_v19 = vld [vmem:[%s2283_s11 + $0x80] sm:$0xff]  }
 0x392   :  { %v883_v40 = vmul.f32 %v1472_v36, %v875_v38  ;;  %v884_v41 = vmul.f32 %v1472_v36, %v876_v37 }
 0x394   :  { %v891_v42 = vadd.f32 %v1473_v39, %v883_v40  ;;  %v892_v43 = vadd.f32 %v1473_v39, %v884_v41 }
 0x396   :  { %1678 = vmatpush3.msra.mxu0 %v891_v42  ;;  %1689 = vmatpush3.msra.mxu1 %v892_v43 }
 0x397   :  { %1691 = vmatmul.mubr.msk.f32.vlgmr.msra.gmra.mxu1 %vm896_vm1, %v893_v44  ;;  %1680 = vmatmul.mubr.msk.f32.vlgmr.msra.gmra.mxu0 %vm896_vm1, %v893_v44 }
 0x398   :  { %1693 = vmatprep.mubr.msk.f32.mxu1 %vm1822_vm3, %v1821_v17  ;;  %1682 = vmatprep.mubr.msk.f32.mxu0 %vm1822_vm3, %v1821_v17 }
 0x399   :  { %1699 = vmatprep.subr.bf16.mxu1 %v1821_v17  ;;  %1564 = vmatprep.subr.bf16.mxu0 %v1798_v45 }
 0x39a   :  { %1565 = vmatpush3.bf16.msra.mxu0 %v1799_v46  ;;  %1700 = vmatpush3.bf16.msra.mxu1 %v1814_v5 }
 0x39b   :  { %1694 = vmatmul.mubr.msk.f32.gmra.mxu1 %vm896_vm1, %v894_v27  ;;  %1683 = vmatmul.mubr.msk.f32.gmra.mxu0 %vm896_vm1, %v894_v27 }
 0x39c   :  { %1696 = vmatprep.mubr.msk.f32.mxu1 %vm1822_vm3, %v1821_v17  ;;  %1685 = vmatprep.mubr.msk.f32.mxu0 %vm1822_vm3, %v1821_v17 }
 0x39d   :  { %1566 = vmatprep.subr.bf16.mxu0 %v1800_v47  ;;  %1701 = vmatprep.subr.bf16.mxu1 %v1821_v17 }
 0x39e   :  { %1567 = vmatpush3.bf16.msra.mxu0 %v1801_v48  ;;  %1702 = vmatpush3.bf16.msra.mxu1 %v1815_v19 }
 0x39f   :  { %1697 = vmatmul.mubr.msk.f32.gmra.mxu1 %vm896_vm1, %v895_v26  ;;  %1686 = vmatmul.mubr.msk.f32.gmra.mxu0 %vm896_vm1, %v895_v26 }
 0x3a0   :  { %1703 = vmatprep.mubr.msk.bf16.mxu1 %vm1822_vm3, %v1821_v17  ;;  %1568 = vmatprep.subr.bf16.mxu0 %v1802_v49 }
 0x3a2   :  { %1569 = vmatpush3.bf16.msra.mxu0 %v1803_v50 }
 0x3a3   :  { %1570 = vmatprep.subr.bf16.mxu0 %v1804_v51 }
 0x3a6   :  { %1571 = vmatpush3.bf16.msra.mxu0 %v1805_v52 }
 0x3a7   :  { %1572 = vmatprep.subr.bf16.mxu0 %v1806_v53 }
 0x3aa   :  { %1573 = vmatpush3.bf16.msra.mxu0 %v1807_v54 }
 0x3ab   :  { %1574 = vmatprep.subr.bf16.mxu0 %v1808_v57 }
 0x3ae   :  { %1575 = vmatpush3.bf16.msra.mxu0 %v1809_v58 }
 0x3af   :  { %1576 = vmatprep.subr.bf16.mxu0 %v1810_v63 }
 0x3b2   :  { %1577 = vmatpush3.bf16.msra.mxu0 %v1811_v4 }
 0x3b3   :  { %1578 = vmatprep.subr.bf16.mxu0 %v1812_v13 }
 0x3b6   :  { %1579 = vmatpush3.bf16.msra.mxu0 %v1813_v14  ;;  %v1383_v14 = vld [vmem:[%s2285_s13] sm:$0x3] }
 0x457   :  { %v2198_v55 = vpop.f32.mrf.mxu1  ;;  %v2200_v56 = vpop.f32.mrf.mxu0 }
 0x458   :  { %v1099_v0 = vrot.slane %v2198_v55, 2  ;;  %v1103_v1 = vrot.slane %v2198_v55, 4  ;;  %v987_v6 = vrot.slane %v2200_v56, 2  ;;  %v1107_v16 = vrot.slane %v2198_v55, 6 }
 0x459   :  { %v1692_v59 = vpop.f32.mrf.mxu1  ;;  %v1681_v60 = vpop.f32.mrf.mxu0  ;;  %v991_v20 = vrot.slane %v2200_v56, 4  ;;  %v995_v21 = vrot.slane %v2200_v56, 6 }
 0x45b   :  { %v1089_v61 = vpop.f32.mrf.mxu1  ;;  %v2208_v62 = vpop.f32.mrf.mxu0 }
 0x45c   :  { %v1112_v2 = vrot.slane %v1089_v61, 2  ;;  %v1116_v3 = vrot.slane %v1089_v61, 4  ;;  %v1120_v9 = vrot.slane %v1089_v61, 6  ;;  %v1000_v10 = vrot.slane %v2208_v62, 2 }
 0x45d   :  { %v1695_v7 = vpop.f32.mrf.mxu1  ;;  %v1684_v8 = vpop.f32.mrf.mxu0  ;;  %v1004_v22 = vrot.slane %v2208_v62, 4  ;;  %v1008_v25 = vrot.slane %v2208_v62, 6 }
 0x45e   :  { %v1754_v11 = vpack.i.bf16 %v1103_v1, %v1116_v3  ;;  %v1749_v12 = vpack.i.bf16 %v1099_v0, %v1112_v2  ;;  %v1764_v28 = vpack.i.bf16 %v1107_v16, %v1120_v9  ;;  %v1759_v29 = vpack.i.bf16 %v987_v6, %v1000_v10  ;;  %v1480_v10 = vld [vmem:[%s2284_s12] ss:$0 sm:$0xff] }
 0x45f   :  { %v1094_v15 = vpop.f32.mrf.mxu1  ;;  %v982_v23 = vpop.f32.mrf.mxu0  ;;  %v1769_v33 = vpack.i.bf16 %v991_v20, %v1004_v22  ;;  %v1774_v34 = vpack.i.bf16 %v995_v21, %v1008_v25 }
 0x460   :  { %1755 = vrot.lane.b32.xlu1 %v1754_v11, %s1824_s4  ;;  %1750 = vrot.lane.b32.xlu0 %v1749_v12, %s1823_s29  ;;  %v1135_v18 = vrot.slane %v1094_v15, 6 }
 0x461   :  { %v1698_v24 = vpop.f32.mrf.mxu1  ;;  %v1687_v32 = vpop.f32.mrf.mxu0 }
 0x462   :  { %v1142_v30 = vsel %vm1139_vm2, %v982_v23, %v1135_v18  ;;  %v1402_v18 = vrot.slane %v1383_v14, 6 }
 0x463   :  { %v1145_v31 = vpack.c.bf16 %v1142_v30, %v1142_v30 }
 0x464   :  { %1765 = vrot.lane.b32.xlu1 %v1764_v28, %s1825_s23  ;;  %1760 = vrot.lane.b32.xlu0 %v1759_v29, %s1823_s29 }
 0x465   :  { %1704 = vmatmul.mubr.msk.bf16.vlgmr.msra.gmra.mxu1 %vm185_vm7, %v1145_v31 }
 0x468   :  { %1770 = vrot.lane.b32.xlu0 %v1769_v33, %s1824_s4  ;;  %1775 = vrot.lane.b32.xlu1 %v1774_v34, %s1825_s23 }
 0x4d2   :  { %v1756_v17 = vpop.permute.xlu1 %1755  ;;  %v1751_v35 = vpop.permute.xlu0 %1750 }
 0x4d3   :  { %v1753_v36 = vunpack.i.h.bf16 %v1751_v35  ;;  %v1752_v37 = vunpack.i.l.bf16 %v1751_v35  ;;  %v1758_v38 = vunpack.i.h.bf16 %v1756_v17  ;;  %v1757_v39 = vunpack.i.l.bf16 %v1756_v17 }
 0x4d5   :  { %v1124_v40 = vsel %vm185_vm7, %v2198_v55, %v1753_v36  ;;  %v1127_v41 = vsel %vm185_vm7, %v1089_v61, %v1752_v37 }
 0x4d6   :  { %v1766_v42 = vpop.permute.xlu1 %1765  ;;  %v1761_v43 = vpop.permute.xlu0 %1760  ;;  %v1125_v46 = vsel %vm455_vm13, %v1124_v40, %v1758_v38  ;;  %v1128_v47 = vsel %vm455_vm13, %v1127_v41, %v1757_v39  ;;  %v1384_v41 = vlaneseq }
 0x4d7   :  { %v1768_v44 = vunpack.i.h.bf16 %v1766_v42  ;;  %v1767_v27 = vunpack.i.l.bf16 %v1766_v42  ;;  %v1763_v26 = vunpack.i.h.bf16 %v1761_v43  ;;  %v1762_v45 = vunpack.i.l.bf16 %v1761_v43 }
 0x4d8   :  { %v1385_v42 = vand.u32 127, %v1384_v41 }
 0x4d9   :  { %v1126_v48 = vsel %vm457_vm14, %v1125_v46, %v1768_v44  ;;  %v1129_v49 = vsel %vm457_vm14, %v1128_v47, %v1767_v27  ;;  %v1012_v57 = vsel %vm185_vm7, %v2200_v56, %v1763_v26  ;;  %v1015_v58 = vsel %vm185_vm7, %v2208_v62, %v1762_v45 }
 0x4da   :  { %v1771_v50 = vpop.permute.xlu0 %1770  ;;  %v1776_v51 = vpop.permute.xlu1 %1775  ;;  %v1133_v59 = vrot.slane %v1126_v48, 6  ;;  %v1134_v60 = vrot.slane %v1129_v49, 6  ;;  %vm1398_vm5 = vcmp.eq.s32.totalorder %v1385_v42, 0  ;;  %vm1418_vm6 = vcmp.eq.s32.totalorder %v1385_v42, 1 }
 0x4db   :  { %v1773_v52 = vunpack.i.h.bf16 %v1771_v50  ;;  %v1772_v53 = vunpack.i.l.bf16 %v1771_v50  ;;  %v1778_v54 = vunpack.i.h.bf16 %v1776_v51  ;;  %v1777_v55 = vunpack.i.l.bf16 %v1776_v51 }
 0x4dd   :  { %v1013_v61 = vsel %vm455_vm13, %v1012_v57, %v1773_v52  ;;  %v1016_v63 = vsel %vm455_vm13, %v1015_v58, %v1772_v53 }
 0x4de   :  { %v1014_v0 = vsel %vm457_vm14, %v1013_v61, %v1778_v54  ;;  %v1017_v1 = vsel %vm457_vm14, %v1016_v63, %v1777_v55 }
 0x4df   :  { %v1140_v2 = vsel %vm1139_vm2, %v1014_v0, %v1133_v59  ;;  %v1141_v3 = vsel %vm1139_vm2, %v1017_v1, %v1134_v60 }
 0x4e0   :  { %v1143_v4 = vpack.c.bf16 %v1140_v2, %v1140_v2  ;;  %v1144_v5 = vpack.c.bf16 %v1141_v3, %v1141_v3 }
 0x4e2   :  { %1332 = vmatprep.mubr.bf16.mxu0 %v1144_v5 }
 0x4e3   :  { %1333 = vmatmul.mubr.bf16.vlgmr.msra.gmra.mxu0 %v1143_v4 }
 0x525   :  { %v1374_v56 = vpop.f32.mrf.mxu1 }
 0x527   :  { %v1705_v62 = vpop.f32.mrf.mxu1 }
 0x529   :  { %v1377_v6 = vpop.f32.mrf.mxu1 }
 0x52b   :  { %v1706_v7 = vpop.f32.mrf.mxu1 }
 0x5a3   :  { %v1580_v8 = vpop.f32.mrf.mxu0 }
 0x5a5   :  { %v1581_v9 = vpop.f32.mrf.mxu0 }
 0x5a6   :  { %v1582_v11 = vadd.f32 %v1581_v9, %v1580_v8 }
 0x5a7   :  { %v1583_v12 = vpop.f32.mrf.mxu0 }
 0x5a8   :  { %v1335_v13 = vadd.f32 %v1582_v11, %v1480_v10 }
 0x5a9   :  { %v1584_v15 = vpop.f32.mrf.mxu0 }
 0x5aa   :  { %v1375_v16 = vadd.f32 %v1374_v56, %v1335_v13 }
 0x5ac   :  { %vm1380_vm3 = vcmp.ge.f32.partialorder %v1375_v16, 0.0  ;;  %v1381_v19 = vmul.f32 0.2, %v1375_v16 }
 0x5ae   :  { %v1382_v20 = vsel %vm1380_vm3, %v1375_v16, %v1381_v19 }
 0x5af   :  { %v1386_v21 = vmul.f32 %v1383_v14, %v1382_v20  ;;  %v1404_v22 = vmul.f32 %v1402_v18, %v1382_v20 }
 0x5b1   :  { %v1388_v23 = vsel %vm1387_vm4, %v1386_v21, 0.0  ;;  %v1406_v24 = vrot.slane %v1404_v22, 2 }
 0x5b2   :  { %1389 = vadd.xlane.f32.xlu0 %v1388_v23 }
 0x5b3   :  { %v1408_v25 = vsel %vm1387_vm4, %v1406_v24, 0.0 }
 0x5b4   :  { %1409 = vadd.xlane.f32.xlu1 %v1408_v25 }
 0x63b   :  { %v1390_v28 = vpop.xlane.xlu0 %1389 }
 0x63c   :  { %v1391_v29 = vrot.slane %v1390_v28, 4 }
 0x63d   :  { %v1410_v30 = vpop.xlane.xlu1 %1409 }
 0x63e   :  { %v1392_v31 = vadd.f32 %v1391_v29, %v1390_v28  ;;  %v1411_v32 = vrot.slane %v1410_v30, 4 }
 0x640   :  { %v1393_v33 = vrot.slane %v1392_v31, 2  ;;  %v1412_v34 = vadd.f32 %v1411_v32, %v1410_v30 }
 0x642   :  { %v1413_v17 = vrot.slane %v1412_v34, 2  ;;  %v1394_v35 = vadd.f32 %v1393_v33, %v1392_v31 }
 0x644   :  { %v1414_v36 = vadd.f32 %v1413_v17, %v1412_v34  ;;  %v1395_v37 = vrot.slane %v1394_v35, 1 }
 0x646   :  { %v1396_v38 = vadd.f32 %v1395_v37, %v1394_v35  ;;  %v1415_v39 = vrot.slane %v1414_v36, 1 }
 0x648   :  { %1709 = vpush %v1396_v38  ;;  %v1416_v40 = vadd.f32 %v1415_v39, %v1414_v36 }
 0x64a   :  { %1711 = vpush %v1416_v40 }
 0x679   :  { %s1710_s12 = spop %1709 }
 0x67a   :  { %v1399_v43 = vstv %s1710_s12 }
 0x67b   :  { %v1400_v44 = vsel %vm1398_vm5, %v1399_v43, 0.0  ;;  %s1712_s13 = spop %1711 }
 0x67c   :  { %v1419_v27 = vstv %s1712_s13 }
 0x67d   :  { %v1420_v26 = vsel %vm1418_vm6, %v1419_v27, %v1400_v44 }
 0x67e   :  { %1421 = vst [vmem:[%s2286_s14] sm:$0xff] %v1420_v26 }

// kernel: squeeze.8
= control target key start
LH: loop header
LB: loop body
LE: loop exit
PB: predicated region body
PF: predicated region fallthrough
CT: control target
= control target key end

     0   :  { %s8_s6 = smov 3  ;;  %s11_s7 = smov 12  ;;  %vm13_vm0 = vcmask 1043458   ;;  %vm18_vm1 = vcmask 1045508   ;;  %vm23_vm2 = vcmask 1047558   ;;  %vm3_vm3 = vcmask 261120   ;;  %s212_s0 = inlined_call_operand.vmem [shape: f32[2,1,16,32], index: 0, kind: input, shape index: {}]   ;;  %s213_s1 = inlined_call_operand.vmem [shape: f32[2,512], index: 1, kind: output, shape index: {}]  }
   0x1   :  { %v121_v0 = vld [vmem:[%s212_s0 + $0x3] ss:$16 sm:%s8_s6]   ;;  %v122_v1 = vld [vmem:[%s212_s0 - $0x19] ss:$16 sm:%s11_s7]   ;;  %s16_s12 = smov 48  ;;  %s21_s13 = smov 192 }
   0x2   :  { %v14_v2 = vsel %vm13_vm0, %v122_v1, %v121_v0  ;;  %v123_v3 = vld [vmem:[%s212_s0 - $0x35] ss:$16 sm:%s16_s12]   ;;  %v124_v4 = vld [vmem:[%s212_s0 - $0x51] ss:$16 sm:%s21_s13]   ;;  %s36_s18 = smov 3  ;;  %s39_s21 = smov 12 }
   0x3   :  { %v19_v5 = vsel %vm18_vm1, %v123_v3, %v14_v2  ;;  %v125_v6 = vld [vmem:[%s212_s0 + $0x2] ss:$16 sm:%s36_s18]   ;;  %s44_s22 = smov 48  ;;  %v2_v7 = vld [vmem:[%s212_s0] ss:$4 sm:$0xff]   ;;  %s49_s29 = smov 192 }
   0x4   :  { %v24_v8 = vsel %vm23_vm2, %v124_v4, %v19_v5  ;;  %v126_v9 = vld [vmem:[%s212_s0 - $0x1a] ss:$16 sm:%s39_s21]   ;;  %v127_v10 = vld [vmem:[%s212_s0 - $0x36] ss:$16 sm:%s44_s22]   ;;  %s139_s30 = smov 96   ;;  %s64_s4 = smov 3 }
   0x5   :  { %25 = vrot.lane.b32.xlu0 %v24_v8, %s139_s30  ;;  %v42_v11 = vsel %vm13_vm0, %v126_v9, %v125_v6  ;;  %v128_v12 = vld [vmem:[%s212_s0 - $0x52] ss:$16 sm:%s49_s29]   ;;  %s67_s5 = smov 12  ;;  %s72_s10 = smov 48  ;;  %vm27_vm4 = vcmask 1048320   ;;  %vm55_vm5 = vcmask 785920  }
   0x6   :  { %v47_v13 = vsel %vm18_vm1, %v127_v10, %v42_v11  ;;  %v129_v14 = vld [vmem:[%s212_s0 + $0x1] ss:$16 sm:%s64_s4]   ;;  %v130_v15 = vld [vmem:[%s212_s0 - $0x1b] ss:$16 sm:%s67_s5]   ;;  %s77_s11 = smov 192  ;;  %s141_s16 = smov 32  }
   0x7   :  { %4 = vst.msk [vmem:[#allocation0] ss:$8 sm:$0xf] %vm3_vm3, %v2_v7   ;;  %6 = vst.msk [vmem:[#allocation0 - $0x1f] ss:$8 sm:$0xf0] %vm3_vm3, %v2_v7   ;;  %v52_v16 = vsel %vm23_vm2, %v128_v12, %v47_v13  ;;  %v70_v17 = vsel %vm13_vm0, %v130_v15, %v129_v14 }
   0x8   :  { %v131_v18 = vld [vmem:[%s212_s0 - $0x37] ss:$16 sm:%s72_s10]   ;;  %v132_v19 = vld [vmem:[%s212_s0 - $0x53] ss:$16 sm:%s77_s11]   ;;  %s140_s0 = smov 64   ;;  %vm83_vm6 = vcmask 523520  }
   0x9   :  { %v75_v20 = vsel %vm18_vm1, %v131_v18, %v70_v17  ;;  %53 = vrot.lane.b32.xlu0 %v52_v16, %s140_s0 }
   0xa   :  { %v80_v21 = vsel %vm23_vm2, %v132_v19, %v75_v20 }
   0xb   :  { %81 = vrot.lane.b32.xlu1 %v80_v21, %s141_s16 }
  0x77   :  { %v26_v22 = vpop.permute.xlu0 %25  }
  0x78   :  { %28 = vst.msk [vmem:[#allocation0] sm:$0x3] %vm27_vm4, %v26_v22   ;;  %30 = vst.msk [vmem:[#allocation0 + $0x6] sm:$0xc] %vm27_vm4, %v26_v22  }
  0x79   :  { %32 = vst.msk [vmem:[#allocation0 + $0xc] sm:$0x30] %vm27_vm4, %v26_v22   ;;  %34 = vst.msk [vmem:[#allocation0 + $0x12] sm:$0xc0] %vm27_vm4, %v26_v22  }
  0x7b   :  { %v54_v23 = vpop.permute.xlu0 %53  }
  0x7c   :  { %56 = vst.msk [vmem:[#allocation0] sm:$0x3] %vm55_vm5, %v54_v23   ;;  %58 = vst.msk [vmem:[#allocation0 + $0x6] sm:$0xc] %vm55_vm5, %v54_v23  }
  0x7d   :  { %60 = vst.msk [vmem:[#allocation0 + $0xc] sm:$0x30] %vm55_vm5, %v54_v23   ;;  %62 = vst.msk [vmem:[#allocation0 + $0x12] sm:$0xc0] %vm55_vm5, %v54_v23   ;;  %v82_v24 = vpop.permute.xlu1 %81  }
  0x7e   :  { %84 = vst.msk [vmem:[#allocation0] sm:$0x3] %vm83_vm6, %v82_v24   ;;  %86 = vst.msk [vmem:[#allocation0 + $0x6] sm:$0xc] %vm83_vm6, %v82_v24  }
  0x7f   :  { %88 = vst.msk [vmem:[#allocation0 + $0xc] sm:$0x30] %vm83_vm6, %v82_v24   ;;  %90 = vst.msk [vmem:[#allocation0 + $0x12] sm:$0xc0] %vm83_vm6, %v82_v24  }
  0x85   :  { %v95_v25 = vld [vmem:[#allocation0] sm:$0x3]  ;;  %v100_v26 = vld [vmem:[#allocation0 + $0x8] sm:$0x3] }
  0x86   :  { %v106_v27 = vld [vmem:[#allocation0 + $0x10] sm:$0x3]  ;;  %98 = vst [vmem:[%s213_s1] sm:$0x3] %v95_v25  ;;  %133 = vst [vmem:[%s213_s1 + $0x2] sm:$0x3] %v100_v26 }
  0x87   :  { %134 = vst [vmem:[%s213_s1 + $0x4] sm:$0x3] %v106_v27  ;;  %v113_v28 = vld [vmem:[#allocation0 + $0x18] sm:$0x3] }
  0x88   :  { %135 = vst [vmem:[%s213_s1 + $0x6] sm:$0x3] %v113_v28 }

// kernel: _unnamed_function_.3
= control target key start
LH: loop header
LB: loop body
LE: loop exit
PB: predicated region body
PF: predicated region fallthrough
CT: control target
= control target key end

     0   :  { %19 = vsyncpa [#allocation3], 0  ;;  %vm296_vm0 = vcmask 1043456   ;;  %vm297_vm1 = vcmask 1044480   ;;  %vm199_vm2 = vcmask 72704   ;;  %v4630_v3 = vmov 65535   ;;  %s6763_s0 = inlined_call_operand.vmem [shape: f32[2,512], index: 0, kind: input, shape index: {}]   ;;  %s6764_s1 = inlined_call_operand.vmem [shape: f32[2,512], index: 1, kind: input, shape index: {}]   ;;  %s6765_s2 = inlined_call_operand.vmem [shape: f32[2,128], index: 2, kind: input, shape index: {}]   ;;  %s6766_s3 = inlined_call_operand.vmem [shape: f32[2,128], index: 3, kind: input, shape index: {}]   ;;  %s6767_s4 = inlined_call_operand.vmem [shape: f32[512,9], index: 4, kind: input, shape index: {}]   ;;  %s6768_s5 = inlined_call_operand.vmem [shape: f32[288,128], index: 5, kind: input, shape index: {}]   ;;  %s6769_s6 = inlined_call_operand.vmem [shape: bf16[9,8], index: 6, kind: input, shape index: {}]   ;;  %s6770_s7 = inlined_call_operand.vmem [shape: f32[1,8], index: 7, kind: input, shape index: {}]   ;;  %s6771_s8 = inlined_call_operand.vmem [shape: bf16[72,16], index: 8, kind: input, shape index: {}]   ;;  %s6772_s9 = inlined_call_operand.vmem [shape: f32[1,16], index: 9, kind: input, shape index: {}]   ;;  %s6773_s10 = inlined_call_operand.vmem [shape: f32[1,8], index: 10, kind: input, shape index: {}]   ;;  %s6774_s11 = inlined_call_operand.vmem [shape: f32[1,16], index: 11, kind: input, shape index: {}]   ;;  %s6775_s12 = inlined_call_operand.hbm [shape: f32[1,1], index: 12, kind: output, shape index: {0}]   ;;  %s6776_s13 = inlined_call_operand.hbm [shape: f32[1,1], index: 13, kind: output, shape index: {1}]  }
   0x1   :  { %v4441_v0 = vld [vmem:[%s6769_s6] sm:$0x1f]   ;;  %v90_v2 = vld [vmem:[%s6767_s4 + $0x8] sm:$0xff]  ;;  %v298_v4 = vsel %vm296_vm0, 4294967295, %v4630_v3  ;;  %v91_v7 = vld [vmem:[%s6767_s4 + $0x10] sm:$0xff] }
   0x2   :  { %v89_v1 = vld [vmem:[%s6767_s4] sm:$0xff]  ;;  %v299_v6 = vsel %vm297_vm1, %v298_v4, 0  ;;  %v92_v8 = vld [vmem:[%s6767_s4 + $0x18] sm:$0xff]  ;;  %v94_v11 = vld [vmem:[%s6767_s4 + $0x28] sm:$0xff] }
   0x3   :  { %v153_v5 = vpack.c.bf16 %v90_v2, %v89_v1  ;;  %v301_v9 = vand.u32 %v4441_v0, %v299_v6  ;;  %v93_v10 = vld [vmem:[%s6767_s4 + $0x20] sm:$0xff]  ;;  %v154_v12 = vpack.c.bf16 %v92_v8, %v91_v7  ;;  %v95_v14 = vld [vmem:[%s6767_s4 + $0x30] sm:$0xff]  ;;  %v96_v15 = vld [vmem:[%s6767_s4 + $0x38] sm:$0xff] }
   0x4   :  { %v155_v13 = vpack.c.bf16 %v94_v11, %v93_v10  ;;  %v97_v16 = vld [vmem:[%s6767_s4 + $0x40] sm:$0xff]  ;;  %v98_v17 = vld [vmem:[%s6767_s4 + $0x48] sm:$0xff]  ;;  %v156_v18 = vpack.c.bf16 %v96_v15, %v95_v14  ;;  %v99_v20 = vld [vmem:[%s6767_s4 + $0x50] sm:$0xff] }
   0x5   :  { %3666 = vmatprep.mubr.msk.bf16.mxu0 %vm199_vm2, %v153_v5  ;;  %3664 = vmatprep.subr.bf16.mxu0 %v301_v9  ;;  %v157_v19 = vpack.c.bf16 %v98_v17, %v97_v16  ;;  %v100_v21 = vld [vmem:[%s6767_s4 + $0x58] sm:$0xff]  ;;  %v101_v22 = vld [vmem:[%s6767_s4 + $0x60] sm:$0xff]  ;;  %v102_v23 = vld [vmem:[%s6767_s4 + $0x68] sm:$0xff] }
   0x6   :  { %3665 = vmatpush3.bf16.msra.mxu0 %v301_v9  ;;  %v158_v24 = vpack.c.bf16 %v100_v21, %v99_v20  ;;  %v159_v25 = vpack.c.bf16 %v102_v23, %v101_v22 }
   0x9   :  { %3667 = vmatmul.mubr.msk.bf16.vlgmr.msra.gmra.mxu0 %vm199_vm2, %v154_v12 }
   0xa   :  { %3670 = vmatprep.mubr.msk.bf16.mxu0 %vm199_vm2, %v155_v13 }
  0x11   :  { %3671 = vmatmul.mubr.msk.bf16.gmra.mxu0 %vm199_vm2, %v156_v18 }
  0x12   :  { %3674 = vmatprep.mubr.msk.bf16.mxu0 %vm199_vm2, %v157_v19 }
  0x13   :  { %20 = vsyncpa [#allocation5], 0  ;;  %v103_v26 = vld [vmem:[%s6767_s4 + $0x70] sm:$0xff]  ;;  %v104_v27 = vld [vmem:[%s6767_s4 + $0x78] sm:$0xff]  ;;  %s4632_s23 = smov 16   ;;  %s4633_s24 = smov 24  }
  0x14   :  { %v105_v28 = vld [vmem:[%s6767_s4 + $0x80] sm:$0xff]  ;;  %v106_v29 = vld [vmem:[%s6767_s4 + $0x88] sm:$0xff]  ;;  %v160_v30 = vpack.c.bf16 %v104_v27, %v103_v26  ;;  %v107_v32 = vld [vmem:[%s6767_s4 + $0x90] sm:$0xff]  ;;  %s4634_s25 = smov 32   ;;  %s4635_s28 = smov 40   ;;  %vm1065_vm3 = vcmask 64512  }
  0x15   :  { %v161_v31 = vpack.c.bf16 %v106_v29, %v105_v28  ;;  %v108_v33 = vld [vmem:[%s6767_s4 + $0x98] sm:$0xff]  ;;  %v109_v34 = vld [vmem:[%s6767_s4 + $0xa0] sm:$0xff]  ;;  %v110_v35 = vld [vmem:[%s6767_s4 + $0xa8] sm:$0xff]  ;;  %s4637_s18 = smov 56   ;;  %vm1070_vm4 = vcmask 130048   ;;  %vm1075_vm5 = vcmask 195584  }
  0x16   :  { %v162_v36 = vpack.c.bf16 %v108_v33, %v107_v32  ;;  %v163_v37 = vpack.c.bf16 %v110_v35, %v109_v34  ;;  %v111_v38 = vld [vmem:[%s6767_s4 + $0xb0] sm:$0xff]  ;;  %v112_v39 = vld [vmem:[%s6767_s4 + $0xb8] sm:$0xff]  ;;  %v113_v40 = vld [vmem:[%s6767_s4 + $0xc0] sm:$0xff]  ;;  %vm1080_vm6 = vcmask 261120   ;;  %vm1085_vm7 = vcmask 326656   ;;  %s4640_s16 = smov [#allocation4]  }
  0x17   :  { %v114_v41 = vld [vmem:[%s6767_s4 + $0xc8] sm:$0xff]  ;;  %v164_v42 = vpack.c.bf16 %v112_v39, %v111_v38  ;;  %v115_v44 = vld [vmem:[%s6767_s4 + $0xd0] sm:$0xff]  ;;  %v116_v45 = vld [vmem:[%s6767_s4 + $0xd8] sm:$0xff]  ;;  %vm1090_vm8 = vcmask 392192   ;;  %vm1095_vm9 = vcmask 457728   ;;  %vm1100_vm10 = vcmask 523264  }
  0x18   :  { %v165_v43 = vpack.c.bf16 %v114_v41, %v113_v40  ;;  %v117_v46 = vld [vmem:[%s6767_s4 + $0xe0] sm:$0xff]  ;;  %v118_v47 = vld [vmem:[%s6767_s4 + $0xe8] sm:$0xff]  ;;  %v166_v48 = vpack.c.bf16 %v116_v45, %v115_v44  ;;  %v119_v50 = vld [vmem:[%s6767_s4 + $0xf0] sm:$0xff]  ;;  %vm2371_vm11 = vcmask 588800   ;;  %vm72_vm12 = vcmask 1041408   ;;  %s4641_s19 = smov [#allocation2]  }
  0x19   :  { %3675 = vmatmul.mubr.msk.bf16.gmra.mxu0 %vm199_vm2, %v158_v24  ;;  %v167_v49 = vpack.c.bf16 %v118_v47, %v117_v46  ;;  %v120_v51 = vld [vmem:[%s6767_s4 + $0xf8] sm:$0xff]  ;;  %v121_v52 = vld [vmem:[%s6767_s4 + $0x100] sm:$0xff]  ;;  %v122_v53 = vld [vmem:[%s6767_s4 + $0x108] sm:$0xff] }
  0x1a   :  { %3678 = vmatprep.mubr.msk.bf16.mxu0 %vm199_vm2, %v159_v25  ;;  %v168_v54 = vpack.c.bf16 %v120_v51, %v119_v50  ;;  %v169_v55 = vpack.c.bf16 %v122_v53, %v121_v52  ;;  %v123_v56 = vld [vmem:[%s6767_s4 + $0x110] sm:$0xff]  ;;  %v124_v57 = vld [vmem:[%s6767_s4 + $0x118] sm:$0xff]  ;;  %v125_v58 = vld [vmem:[%s6767_s4 + $0x120] sm:$0xff] }
  0x1b   :  { %v126_v59 = vld [vmem:[%s6767_s4 + $0x128] sm:$0xff]  ;;  %v170_v60 = vpack.c.bf16 %v124_v57, %v123_v56  ;;  %v127_v62 = vld [vmem:[%s6767_s4 + $0x130] sm:$0xff]  ;;  %v128_v63 = vld [vmem:[%s6767_s4 + $0x138] sm:$0xff] }
  0x1c   :  { %v171_v61 = vpack.c.bf16 %v126_v59, %v125_v58  ;;  %v129_v0 = vld [vmem:[%s6767_s4 + $0x140] sm:$0xff]  ;;  %v130_v1 = vld [vmem:[%s6767_s4 + $0x148] sm:$0xff]  ;;  %v172_v2 = vpack.c.bf16 %v128_v63, %v127_v62  ;;  %v131_v4 = vld [vmem:[%s6767_s4 + $0x150] sm:$0xff] }
  0x1d   :  { %v173_v3 = vpack.c.bf16 %v130_v1, %v129_v0  ;;  %v132_v5 = vld [vmem:[%s6767_s4 + $0x158] sm:$0xff]  ;;  %v133_v6 = vld [vmem:[%s6767_s4 + $0x160] sm:$0xff]  ;;  %v134_v7 = vld [vmem:[%s6767_s4 + $0x168] sm:$0xff] }
  0x1e   :  { %v174_v8 = vpack.c.bf16 %v132_v5, %v131_v4  ;;  %v175_v9 = vpack.c.bf16 %v134_v7, %v133_v6  ;;  %v135_v10 = vld [vmem:[%s6767_s4 + $0x170] sm:$0xff]  ;;  %v136_v11 = vld [vmem:[%s6767_s4 + $0x178] sm:$0xff]  ;;  %v137_v12 = vld [vmem:[%s6767_s4 + $0x180] sm:$0xff] }
  0x1f   :  { %v138_v13 = vld [vmem:[%s6767_s4 + $0x188] sm:$0xff]  ;;  %v176_v14 = vpack.c.bf16 %v136_v11, %v135_v10  ;;  %v139_v16 = vld [vmem:[%s6767_s4 + $0x190] sm:$0xff]  ;;  %v140_v17 = vld [vmem:[%s6767_s4 + $0x198] sm:$0xff] }
  0x20   :  { %v177_v15 = vpack.c.bf16 %v138_v13, %v137_v12  ;;  %v141_v18 = vld [vmem:[%s6767_s4 + $0x1a0] sm:$0xff]  ;;  %v142_v19 = vld [vmem:[%s6767_s4 + $0x1a8] sm:$0xff]  ;;  %v178_v20 = vpack.c.bf16 %v140_v17, %v139_v16  ;;  %v143_v22 = vld [vmem:[%s6767_s4 + $0x1b0] sm:$0xff] }
  0x21   :  { %3679 = vmatmul.mubr.msk.bf16.gmra.mxu0 %vm199_vm2, %v160_v30  ;;  %v179_v21 = vpack.c.bf16 %v142_v19, %v141_v18  ;;  %v144_v23 = vld [vmem:[%s6767_s4 + $0x1b8] sm:$0xff]  ;;  %v145_v24 = vld [vmem:[%s6767_s4 + $0x1c0] sm:$0xff]  ;;  %v146_v25 = vld [vmem:[%s6767_s4 + $0x1c8] sm:$0xff] }
  0x22   :  { %3682 = vmatprep.mubr.msk.bf16.mxu0 %vm199_vm2, %v161_v31  ;;  %v180_v26 = vpack.c.bf16 %v144_v23, %v143_v22  ;;  %v181_v27 = vpack.c.bf16 %v146_v25, %v145_v24  ;;  %v147_v28 = vld [vmem:[%s6767_s4 + $0x1d0] sm:$0xff]  ;;  %v148_v29 = vld [vmem:[%s6767_s4 + $0x1d8] sm:$0xff]  ;;  %v149_v30 = vld [vmem:[%s6767_s4 + $0x1e0] sm:$0xff] }
  0x23   :  { %v150_v31 = vld [vmem:[%s6767_s4 + $0x1e8] sm:$0xff]  ;;  %v182_v32 = vpack.c.bf16 %v148_v29, %v147_v28  ;;  %v151_v34 = vld [vmem:[%s6767_s4 + $0x1f0] sm:$0xff]  ;;  %v152_v35 = vld [vmem:[%s6767_s4 + $0x1f8] sm:$0xff] }
  0x24   :  { %v183_v33 = vpack.c.bf16 %v150_v31, %v149_v30  ;;  %v4958_v52 = vld [vmem:[%s6770_s7] ss:$0 sm:$0xff]  ;;  %s4636_s7 = smov 48  }
  0x29   :  { %3683 = vmatmul.mubr.msk.bf16.gmra.mxu0 %vm199_vm2, %v162_v36  ;;  %v184_v36 = vpack.c.bf16 %v152_v35, %v151_v34 }
  0x2a   :  { %3686 = vmatprep.mubr.msk.bf16.mxu0 %vm199_vm2, %v163_v37  ;;  %v4943_v37 = vld [vmem:[%s6768_s5] sm:$0xff] }
  0x2b   :  { %3762 = vmatprep.mubr.f32.mxu1 %v4943_v37 }
  0x31   :  { %3687 = vmatmul.mubr.msk.bf16.gmra.mxu0 %vm199_vm2, %v164_v42 }
  0x32   :  { %3690 = vmatprep.mubr.msk.bf16.mxu0 %vm199_vm2, %v165_v43 }
  0x39   :  { %3691 = vmatmul.mubr.msk.bf16.gmra.mxu0 %vm199_vm2, %v166_v48 }
  0x3a   :  { %3694 = vmatprep.mubr.msk.bf16.mxu0 %vm199_vm2, %v167_v49 }
  0x41   :  { %3695 = vmatmul.mubr.msk.bf16.gmra.mxu0 %vm199_vm2, %v168_v54 }
  0x42   :  { %3698 = vmatprep.mubr.msk.bf16.mxu0 %vm199_vm2, %v169_v55 }
  0x49   :  { %3699 = vmatmul.mubr.msk.bf16.gmra.mxu0 %vm199_vm2, %v170_v60 }
  0x4a   :  { %3702 = vmatprep.mubr.msk.bf16.mxu0 %vm199_vm2, %v171_v61 }
  0x51   :  { %3703 = vmatmul.mubr.msk.bf16.gmra.mxu0 %vm199_vm2, %v172_v2 }
  0x52   :  { %3706 = vmatprep.mubr.msk.bf16.mxu0 %vm199_vm2, %v173_v3 }
  0x59   :  { %3707 = vmatmul.mubr.msk.bf16.gmra.mxu0 %vm199_vm2, %v174_v8 }
  0x5a   :  { %3710 = vmatprep.mubr.msk.bf16.mxu0 %vm199_vm2, %v175_v9 }
  0x61   :  { %3711 = vmatmul.mubr.msk.bf16.gmra.mxu0 %vm199_vm2, %v176_v14 }
  0x62   :  { %3714 = vmatprep.mubr.msk.bf16.mxu0 %vm199_vm2, %v177_v15 }
  0x69   :  { %3715 = vmatmul.mubr.msk.bf16.gmra.mxu0 %vm199_vm2, %v178_v20 }
  0x6a   :  { %3718 = vmatprep.mubr.msk.bf16.mxu0 %vm199_vm2, %v179_v21 }
  0x71   :  { %3719 = vmatmul.mubr.msk.bf16.gmra.mxu0 %vm199_vm2, %v180_v26 }
  0x72   :  { %3722 = vmatprep.mubr.msk.bf16.mxu0 %vm199_vm2, %v181_v27 }
  0x79   :  { %3723 = vmatmul.mubr.msk.bf16.gmra.mxu0 %vm199_vm2, %v182_v32 }
  0x7a   :  { %3726 = vmatprep.mubr.msk.bf16.mxu0 %vm199_vm2, %v183_v33 }
  0x81   :  { %3727 = vmatmul.mubr.msk.bf16.gmra.mxu0 %vm199_vm2, %v184_v36 }
  0x82   :  { %3934 = vmatprep.mubr.f32.mxu0 %v4943_v37 }
  0xc9   :  { %v4947_v38 = vpop.f32.mrf.mxu0 }
  0xca   :  { %v346_v26 = vadd.f32 %v4947_v38, %v4958_v52 }
  0xcb   :  { %v4949_v39 = vpop.f32.mrf.mxu0 }
  0xcc   :  { %v5046_v32 = vmax.f32 %v346_v26, 0.0  ;;  %v338_v33 = vadd.f32 %v4958_v52, %v4949_v39  ;;  %v5158_v26 = vld [vmem:[%s6768_s5 + $0x40] sm:$0xff] }
  0xcd   :  { %v4951_v40 = vpop.f32.mrf.mxu0 }
  0xce   :  { %v349_v23 = vadd.f32 %v4951_v40, %v4958_v52  ;;  %6916 = vst [vmem:[#allocation21_spill] sm:$0xff] %v5046_v32  ;;  %v5057_v40 = vmax.f32 %v338_v33, 0.0  ;;  %v5176_v33 = vld [vmem:[%s6768_s5 + $0x48] sm:$0xff] }
  0xcf   :  { %v4953_v41 = vpop.f32.mrf.mxu0 }
  0xd0   :  { %v5040_v29 = vmax.f32 %v349_v23, 0.0  ;;  %v341_v30 = vadd.f32 %v4958_v52, %v4953_v41  ;;  %6918 = vst [vmem:[#allocation23_spill] sm:$0xff] %v5057_v40  ;;  %v5148_v23 = vld [vmem:[%s6768_s5 + $0x38] sm:$0xff] }
  0xd1   :  { %v3672_v42 = vpop.f32.mrf.mxu0 }
  0xd2   :  { %v362_v14 = vadd.f32 %v3672_v42, %v4958_v52  ;;  %6915 = vst [vmem:[#allocation20_spill] sm:$0xff] %v5040_v29  ;;  %v5052_v35 = vmax.f32 %v341_v30, 0.0  ;;  %v5065_v42 = vld [vmem:[%s6768_s5 + $0x8] sm:$0xff] }
  0xd3   :  { %v353_v43 = vpop.f32.mrf.mxu0 }
  0xd4   :  { %v5021_v20 = vmax.f32 %v362_v14, 0.0  ;;  %v354_v21 = vadd.f32 %v4958_v52, %v353_v43  ;;  %6917 = vst [vmem:[#allocation22_spill] sm:$0xff] %v5052_v35  ;;  %v5130_v14 = vld [vmem:[%s6768_s5 + $0x30] sm:$0xff] }
  0xd5   :  { %v3673_v44 = vpop.f32.mrf.mxu0 }
  0xd6   :  { %v365_v11 = vadd.f32 %v3673_v44, %v4958_v52  ;;  %6912 = vst [vmem:[#allocation17_spill] sm:$0xff] %v5021_v20  ;;  %v5036_v27 = vmax.f32 %v354_v21, 0.0 }
  0xd7   :  { %v356_v45 = vpop.f32.mrf.mxu0 }
  0xd8   :  { %v5016_v17 = vmax.f32 %v365_v11, 0.0  ;;  %v357_v18 = vadd.f32 %v4958_v52, %v356_v45  ;;  %6914 = vst [vmem:[#allocation19_spill] sm:$0xff] %v5036_v27 }
  0xd9   :  { %v3676_v46 = vpop.f32.mrf.mxu0 }
  0xda   :  { %v378_v2 = vadd.f32 %v3676_v46, %v4958_v52  ;;  %6911 = vst [vmem:[#allocation16_spill] sm:$0xff] %v5016_v17  ;;  %v5030_v24 = vmax.f32 %v357_v18, 0.0 }
  0xdb   :  { %v369_v47 = vpop.f32.mrf.mxu0 }
  0xdc   :  { %v4995_v8 = vmax.f32 %v378_v2, 0.0  ;;  %v370_v9 = vadd.f32 %v4958_v52, %v369_v47  ;;  %6913 = vst [vmem:[#allocation18_spill] sm:$0xff] %v5030_v24  ;;  %v5077_v47 = vld [vmem:[%s6768_s5 + $0x10] sm:$0xff] }
  0xdd   :  { %v3677_v48 = vpop.f32.mrf.mxu0 }
  0xde   :  { %v381_v63 = vadd.f32 %v3677_v48, %v4958_v52  ;;  %6908 = vst [vmem:[#allocation13_spill] sm:$0xff] %v4995_v8  ;;  %v5010_v15 = vmax.f32 %v370_v9, 0.0 }
  0xdf   :  { %v372_v49 = vpop.f32.mrf.mxu0 }
  0xe0   :  { %v4988_v5 = vmax.f32 %v381_v63, 0.0  ;;  %v373_v6 = vadd.f32 %v4958_v52, %v372_v49  ;;  %6910 = vst [vmem:[#allocation15_spill] sm:$0xff] %v5010_v15 }
  0xe1   :  { %v3680_v50 = vpop.f32.mrf.mxu0 }
  0xe2   :  { %v394_v54 = vadd.f32 %v3680_v50, %v4958_v52  ;;  %6907 = vst [vmem:[#allocation12_spill] sm:$0xff] %v4988_v5  ;;  %v5003_v12 = vmax.f32 %v373_v6, 0.0  ;;  %v5120_v6 = vld [vmem:[%s6768_s5 + $0x28] sm:$0xff] }
  0xe3   :  { %v385_v51 = vpop.f32.mrf.mxu0 }
  0xe4   :  { %v4967_v60 = vmax.f32 %v394_v54, 0.0  ;;  %v386_v61 = vadd.f32 %v4958_v52, %v385_v51  ;;  %6909 = vst [vmem:[#allocation14_spill] sm:$0xff] %v5003_v12 }
  0xe5   :  { %v3681_v53 = vpop.f32.mrf.mxu0 }
  0xe6   :  { %v397_v55 = vadd.f32 %v3681_v53, %v4958_v52  ;;  %6904 = vst [vmem:[#allocation9_spill] sm:$0xff] %v4967_v60  ;;  %v4982_v3 = vmax.f32 %v386_v61, 0.0  ;;  %v5094_v53 = vld [vmem:[%s6768_s5 + $0x18] sm:$0xff] }
  0xe7   :  { %v388_v56 = vpop.f32.mrf.mxu0 }
  0xe8   :  { %v4962_v57 = vmax.f32 %v397_v55, 0.0  ;;  %v389_v58 = vadd.f32 %v4958_v52, %v388_v56  ;;  %6906 = vst [vmem:[#allocation11_spill] sm:$0xff] %v4982_v3  ;;  %v5103_v56 = vld [vmem:[%s6768_s5 + $0x20] sm:$0xff] }
  0xe9   :  { %v4965_v59 = vpop.f32.mrf.mxu0 }
  0xea   :  { %6903 = vst [vmem:[#allocation8_spill] sm:$0xff] %v4962_v57  ;;  %3730 = vmatprep.subr.mxu1 %v4962_v57  ;;  %v4975_v0 = vmax.f32 %v389_v58, 0.0 }
  0xeb   :  { %v4971_v62 = vpop.f32.mrf.mxu0  ;;  %3731 = vmatpush3.msra.mxu1 %v4962_v57 }
  0xec   :  { %6905 = vst [vmem:[#allocation10_spill] sm:$0xff] %v4975_v0  ;;  %3732 = vmatprep.subr.mxu1 %v4967_v60 }
  0xed   :  { %v4978_v1 = vpop.f32.mrf.mxu0  ;;  %3733 = vmatpush3.msra.mxu1 %v4967_v60 }
  0xee   :  { %3734 = vmatprep.subr.mxu1 %v4975_v0 }
  0xef   :  { %v4985_v4 = vpop.f32.mrf.mxu0  ;;  %3735 = vmatpush3.msra.mxu1 %v4975_v0 }
  0xf0   :  { %3736 = vmatprep.subr.mxu1 %v4982_v3 }
  0xf1   :  { %v4992_v7 = vpop.f32.mrf.mxu0  ;;  %3737 = vmatpush3.msra.mxu1 %v4982_v3 }
  0xf2   :  { %3738 = vmatprep.subr.mxu1 %v4988_v5 }
  0xf3   :  { %v4999_v10 = vpop.f32.mrf.mxu0  ;;  %3739 = vmatpush3.msra.mxu1 %v4988_v5 }
  0xf4   :  { %3740 = vmatprep.subr.mxu1 %v4995_v8 }
  0xf5   :  { %v5006_v13 = vpop.f32.mrf.mxu0  ;;  %3741 = vmatpush3.msra.mxu1 %v4995_v8 }
  0xf6   :  { %3742 = vmatprep.subr.mxu1 %v5003_v12 }
  0xf7   :  { %v5013_v16 = vpop.f32.mrf.mxu0  ;;  %3743 = vmatpush3.msra.mxu1 %v5003_v12 }
  0xf8   :  { %3744 = vmatprep.subr.mxu1 %v5010_v15 }
  0xf9   :  { %v3692_v19 = vpop.f32.mrf.mxu0  ;;  %3745 = vmatpush3.msra.mxu1 %v5010_v15 }
  0xfa   :  { %3746 = vmatprep.subr.mxu1 %v5016_v17  ;;  %v442_v54 = vadd.f32 %v3692_v19, %v4958_v52  ;;  %v429_v19 = vadd.f32 %v5006_v13, %v4958_v52  ;;  %v426_v13 = vadd.f32 %v4992_v7, %v4958_v52 }
  0xfb   :  { %v5025_v22 = vpop.f32.mrf.mxu0  ;;  %3747 = vmatpush3.msra.mxu1 %v5016_v17 }
  0xfc   :  { %3748 = vmatprep.subr.mxu1 %v5021_v20  ;;  %v5122_v9 = vmax.f32 %v442_v54, 0.0  ;;  %v434_v11 = vadd.f32 %v4958_v52, %v5025_v22  ;;  %v5163_v30 = vmax.f32 %v429_v19, 0.0  ;;  %v410_v54 = vadd.f32 %v4965_v59, %v4958_v52 }
  0xfd   :  { %v3693_v25 = vpop.f32.mrf.mxu0  ;;  %3749 = vmatpush3.msra.mxu1 %v5021_v20  ;;  %v405_v59 = vadd.f32 %v4958_v52, %v4985_v4 }
  0xfe   :  { %3750 = vmatprep.subr.mxu1 %v5030_v24  ;;  %v445_v49 = vadd.f32 %v3693_v25, %v4958_v52  ;;  %6924 = vst [vmem:[#allocation29_spill] sm:$0xff] %v5122_v9  ;;  %v5152_v25 = vmax.f32 %v434_v11, 0.0  ;;  %6927 = vst [vmem:[#allocation32_spill] sm:$0xff] %v5163_v30  ;;  %v5224_v11 = vld [vmem:[%s6768_s5 + $0x68] sm:$0xff] }
  0xff   :  { %v436_v28 = vpop.f32.mrf.mxu0  ;;  %3751 = vmatpush3.msra.mxu1 %v5030_v24 }
 0x100   :  { %3752 = vmatprep.subr.mxu1 %v5036_v27  ;;  %v5108_v61 = vmax.f32 %v445_v49, 0.0  ;;  %v437_v63 = vadd.f32 %v4958_v52, %v436_v28  ;;  %6926 = vst [vmem:[#allocation31_spill] sm:$0xff] %v5152_v25 }
 0x101   :  { %v3696_v31 = vpop.f32.mrf.mxu0  ;;  %3753 = vmatpush3.msra.mxu1 %v5036_v27 }
 0x102   :  { %3754 = vmatprep.subr.mxu1 %v5040_v29  ;;  %v458_v36 = vadd.f32 %v3696_v31, %v4958_v52  ;;  %6923 = vst [vmem:[#allocation28_spill] sm:$0xff] %v5108_v61  ;;  %v5137_v21 = vmax.f32 %v437_v63, 0.0  ;;  %v421_v31 = vadd.f32 %v4958_v52, %v5013_v16  ;;  %v5184_v16 = vld [vmem:[%s6768_s5 + $0x50] sm:$0xff] }
 0x103   :  { %v449_v34 = vpop.f32.mrf.mxu0  ;;  %3755 = vmatpush3.msra.mxu1 %v5040_v29 }
 0x104   :  { %3756 = vmatprep.subr.mxu1 %v5046_v32  ;;  %v5067_v43 = vmax.f32 %v458_v36, 0.0  ;;  %v450_v44 = vadd.f32 %v4958_v52, %v449_v34  ;;  %6925 = vst [vmem:[#allocation30_spill] sm:$0xff] %v5137_v21  ;;  %v5178_v34 = vmax.f32 %v426_v13, 0.0  ;;  %v5234_v13 = vld [vmem:[%s6768_s5 + $0x70] sm:$0xff] }
 0x105   :  { %v3697_v38 = vpop.f32.mrf.mxu0  ;;  %3757 = vmatpush3.msra.mxu1 %v5046_v32 }
 0x106   :  { %v461_v41 = vadd.f32 %v3697_v38, %v4958_v52  ;;  %3758 = vmatprep.subr.mxu1 %v5052_v35  ;;  %6919 = vst [vmem:[#allocation24_spill] sm:$0xff] %v5067_v43  ;;  %v5097_v55 = vmax.f32 %v450_v44, 0.0  ;;  %6928 = vst [vmem:[#allocation33_spill] sm:$0xff] %v5178_v34  ;;  %v418_v38 = vadd.f32 %v4958_v52, %v4999_v10  ;;  %v5202_v44 = vld [vmem:[%s6768_s5 + $0x58] sm:$0xff] }
 0x107   :  { %v452_v39 = vpop.f32.mrf.mxu0  ;;  %3759 = vmatpush3.msra.mxu1 %v5052_v35  ;;  %v413_v10 = vadd.f32 %v4978_v1, %v4958_v52 }
 0x108   :  { %v5070_v45 = vmax.f32 %v461_v41, 0.0  ;;  %v453_v46 = vadd.f32 %v4958_v52, %v452_v39  ;;  %3760 = vmatprep.subr.mxu1 %v5057_v40  ;;  %6922 = vst [vmem:[#allocation27_spill] sm:$0xff] %v5097_v55  ;;  %v5191_v41 = vmax.f32 %v421_v31, 0.0  ;;  %v5215_v63 = vmax.f32 %v418_v38, 0.0 }
 0x109   :  { %v5079_v48 = vpop.f32.mrf.mxu0  ;;  %3761 = vmatpush3.msra.mxu1 %v5057_v40  ;;  %v5226_v19 = vmax.f32 %v413_v10, 0.0  ;;  %v5237_v38 = vmax.f32 %v410_v54, 0.0  ;;  %v5248_v10 = vld [vmem:[%s6768_s5 + $0x78] sm:$0xff] }
 0x10a   :  { %6920 = vst [vmem:[#allocation25_spill] sm:$0xff] %v5070_v45  ;;  %v5083_v50 = vmax.f32 %v453_v46, 0.0  ;;  %3763 = vmatmul.mubr.f32.vlgmr.msra.gmra.mxu1 %v5065_v42  ;;  %3816 = vmatprep.subr.mxu1 %v5070_v45  ;;  %6929 = vst [vmem:[#allocation34_spill] sm:$0xff] %v5191_v41  ;;  %v5210_v46 = vld [vmem:[%s6768_s5 + $0x60] sm:$0xff] }
 0x10b   :  { %v5087_v51 = vpop.f32.mrf.mxu0  ;;  %3817 = vmatpush3.msra.mxu1 %v5070_v45  ;;  %3765 = vmatprep.mubr.f32.mxu1 %v5077_v47  ;;  %6930 = vst [vmem:[#allocation35_spill] sm:$0xff] %v5215_v63  ;;  %6931 = vst [vmem:[#allocation36_spill] sm:$0xff] %v5226_v19  ;;  %v402_v45 = vadd.f32 %v4958_v52, %v4971_v62  ;;  %v5257_v62 = vld [vmem:[%s6768_s5 + $0x80] sm:$0xff] }
 0x10c   :  { %6921 = vst [vmem:[#allocation26_spill] sm:$0xff] %v5083_v50  ;;  %3818 = vmatprep.subr.mxu1 %v5067_v43  ;;  %6932 = vst [vmem:[#allocation37_spill] sm:$0xff] %v5237_v38  ;;  %v466_v17 = vadd.f32 %v4958_v52, %v5087_v51  ;;  %v5462_v51 = vld [vmem:[%s6768_s5 + $0x100] sm:$0xff] }
 0x10d   :  { %v5105_v58 = vpop.f32.mrf.mxu0  ;;  %3819 = vmatpush3.msra.mxu1 %v5067_v43  ;;  %v5250_v43 = vmax.f32 %v405_v59, 0.0 }
 0x10e   :  { %3766 = vmatmul.mubr.f32.gmra.mxu1 %v5094_v53  ;;  %3820 = vmatprep.subr.mxu1 %v5083_v50  ;;  %v477_v5 = vadd.f32 %v5105_v58, %v4958_v52  ;;  %v5430_v58 = vld [vmem:[%s6768_s5 + $0xe8] sm:$0xff]  ;;  %v5465_v20 = vmax.f32 %v466_v17, 0.0  ;;  %v5483_v17 = vld [vmem:[%s6768_s5 + $0x110] sm:$0xff] }
 0x10f   :  { %v5113_v2 = vpop.f32.mrf.mxu0  ;;  %3821 = vmatpush3.msra.mxu1 %v5083_v50  ;;  %3768 = vmatprep.mubr.f32.mxu1 %v5103_v56  ;;  %6933 = vst [vmem:[#allocation38_spill] sm:$0xff] %v5250_v43 }
 0x110   :  { %3822 = vmatprep.subr.mxu1 %v5097_v55  ;;  %v5432_v12 = vmax.f32 %v477_v5, 0.0  ;;  %v5454_v5 = vld [vmem:[%s6768_s5 + $0xf8] sm:$0xff]  ;;  %6950 = vst [vmem:[#allocation55_spill] sm:$0xff] %v5465_v20 }
 0x111   :  { %v5132_v18 = vpop.f32.mrf.mxu0  ;;  %3823 = vmatpush3.msra.mxu1 %v5097_v55  ;;  %v5260_v55 = vmax.f32 %v402_v45, 0.0 }
 0x112   :  { %3769 = vmatmul.mubr.f32.gmra.mxu1 %v5120_v6  ;;  %3824 = vmatprep.subr.mxu1 %v5108_v61  ;;  %6947 = vst [vmem:[#allocation52_spill] sm:$0xff] %v5432_v12 }
 0x113   :  { %v5141_v22 = vpop.f32.mrf.mxu0  ;;  %3825 = vmatpush3.msra.mxu1 %v5108_v61  ;;  %3771 = vmatprep.mubr.f32.mxu1 %v5130_v14  ;;  %6934 = vst [vmem:[#allocation39_spill] sm:$0xff] %v5260_v55 }
 0x114   :  { %3826 = vmatprep.subr.mxu1 %v5122_v9 }
 0x115   :  { %v5160_v28 = vpop.f32.mrf.mxu0  ;;  %3827 = vmatpush3.msra.mxu1 %v5122_v9 }
 0x116   :  { %3772 = vmatmul.mubr.f32.gmra.mxu1 %v5148_v23  ;;  %3828 = vmatprep.subr.mxu1 %v5137_v21 }
 0x117   :  { %v5169_v7 = vpop.f32.mrf.mxu0  ;;  %3829 = vmatpush3.msra.mxu1 %v5137_v21  ;;  %3774 = vmatprep.mubr.f32.mxu1 %v5158_v26 }
 0x118   :  { %3830 = vmatprep.subr.mxu1 %v5152_v25  ;;  %v485_v0 = vadd.f32 %v4958_v52, %v5169_v7  ;;  %v482_v7 = vadd.f32 %v4958_v52, %v5141_v22  ;;  %v5406_v22 = vld [vmem:[%s6768_s5 + $0xd8] sm:$0xff] }
 0x119   :  { %v5186_v36 = vpop.f32.mrf.mxu0  ;;  %3831 = vmatpush3.msra.mxu1 %v5152_v25  ;;  %v5282_v25 = vld [vmem:[%s6768_s5 + $0x90] sm:$0xff] }
 0x11a   :  { %3775 = vmatmul.mubr.f32.gmra.mxu1 %v5176_v33  ;;  %3832 = vmatprep.subr.mxu1 %v5163_v30 }
 0x11b   :  { %v5195_v39 = vpop.f32.mrf.mxu0  ;;  %3833 = vmatpush3.msra.mxu1 %v5163_v30  ;;  %3777 = vmatprep.mubr.f32.mxu1 %v5184_v16 }
 0x11c   :  { %3834 = vmatprep.subr.mxu1 %v5178_v34 }
 0x11d   :  { %v3709_v49 = vpop.f32.mrf.mxu0  ;;  %3835 = vmatpush3.msra.mxu1 %v5178_v34 }
 0x11e   :  { %3778 = vmatmul.mubr.f32.gmra.mxu1 %v5202_v44  ;;  %3836 = vmatprep.subr.mxu1 %v5191_v41 }
 0x11f   :  { %v500_v1 = vpop.f32.mrf.mxu0  ;;  %3837 = vmatpush3.msra.mxu1 %v5191_v41  ;;  %3780 = vmatprep.mubr.f32.mxu1 %v5210_v46 }
 0x120   :  { %3838 = vmatprep.subr.mxu1 %v5215_v63 }
 0x121   :  { %v3712_v31 = vpop.f32.mrf.mxu0  ;;  %3839 = vmatpush3.msra.mxu1 %v5215_v63 }
 0x122   :  { %3781 = vmatmul.mubr.f32.gmra.mxu1 %v5224_v11  ;;  %3840 = vmatprep.subr.mxu1 %v5226_v19  ;;  %v522_v54 = vadd.f32 %v3712_v31, %v4958_v52  ;;  %v5270_v31 = vld [vmem:[%s6768_s5 + $0x88] sm:$0xff] }
 0x123   :  { %v513_v4 = vpop.f32.mrf.mxu0  ;;  %3841 = vmatpush3.msra.mxu1 %v5226_v19  ;;  %3783 = vmatprep.mubr.f32.mxu1 %v5234_v13 }
 0x124   :  { %3842 = vmatprep.subr.mxu1 %v5237_v38  ;;  %v5272_v9 = vmax.f32 %v522_v54, 0.0  ;;  %v514_v45 = vadd.f32 %v4958_v52, %v513_v4  ;;  %v509_v54 = vadd.f32 %v3709_v49, %v4958_v52  ;;  %v506_v49 = vadd.f32 %v5186_v36, %v4958_v52  ;;  %v5324_v36 = vld [vmem:[%s6768_s5 + $0xa8] sm:$0xff] }
 0x125   :  { %v3713_v50 = vpop.f32.mrf.mxu0  ;;  %3843 = vmatpush3.msra.mxu1 %v5237_v38 }
 0x126   :  { %v525_v61 = vadd.f32 %v3713_v50, %v4958_v52  ;;  %3784 = vmatmul.mubr.f32.gmra.mxu1 %v5248_v10  ;;  %3844 = vmatprep.subr.mxu1 %v5250_v43  ;;  %6935 = vst [vmem:[#allocation40_spill] sm:$0xff] %v5272_v9  ;;  %v5314_v63 = vmax.f32 %v509_v54, 0.0  ;;  %v5328_v19 = vmax.f32 %v506_v49, 0.0  ;;  %v5336_v54 = vld [vmem:[%s6768_s5 + $0xb0] sm:$0xff] }
 0x127   :  { %v516_v59 = vpop.f32.mrf.mxu0  ;;  %3845 = vmatpush3.msra.mxu1 %v5250_v43  ;;  %3786 = vmatprep.mubr.f32.mxu1 %v5257_v62  ;;  %v501_v43 = vadd.f32 %v4958_v52, %v500_v1  ;;  %v498_v1 = vadd.f32 %v4958_v52, %v5195_v39  ;;  %v5352_v39 = vld [vmem:[%s6768_s5 + $0xb8] sm:$0xff] }
 0x128   :  { %v5275_v21 = vmax.f32 %v525_v61, 0.0  ;;  %v517_v50 = vadd.f32 %v4958_v52, %v516_v59  ;;  %3846 = vmatprep.subr.mxu1 %v5260_v55  ;;  %v5297_v61 = vld [vmem:[%s6768_s5 + $0x98] sm:$0xff]  ;;  %v5303_v59 = vmax.f32 %v514_v45, 0.0  ;;  %6939 = vst [vmem:[#allocation44_spill] sm:$0xff] %v5314_v63  ;;  %6940 = vst [vmem:[#allocation45_spill] sm:$0xff] %v5328_v19 }
 0x129   :  { %3847 = vmatpush3.msra.mxu1 %v5260_v55  ;;  %v5285_v30 = vpop.f32.mrf.mxu0  ;;  %v493_v55 = vadd.f32 %v5160_v28, %v4958_v52  ;;  %v5343_v57 = vmax.f32 %v501_v43, 0.0  ;;  %v490_v28 = vadd.f32 %v5132_v18, %v4958_v52  ;;  %v5358_v43 = vmax.f32 %v498_v1, 0.0  ;;  %v5380_v18 = vld [vmem:[%s6768_s5 + $0xc8] sm:$0xff] }
 0x12a   :  { %6936 = vst [vmem:[#allocation41_spill] sm:$0xff] %v5275_v21  ;;  %v5288_v34 = vmax.f32 %v517_v50, 0.0  ;;  %3787 = vmatmul.mubr.f32.gmra.mxu1 %v5270_v31  ;;  %3902 = vmatprep.subr.mxu0 %v5275_v21  ;;  %6938 = vst [vmem:[#allocation43_spill] sm:$0xff] %v5303_v59  ;;  %v5309_v50 = vld [vmem:[%s6768_s5 + $0xa0] sm:$0xff] }
 0x12b   :  { %3903 = vmatpush3.msra.mxu0 %v5275_v21  ;;  %3789 = vmatprep.mubr.f32.mxu1 %v5282_v25  ;;  %v5299_v4 = vpop.f32.mrf.mxu0  ;;  %6941 = vst [vmem:[#allocation46_spill] sm:$0xff] %v5343_v57  ;;  %6942 = vst [vmem:[#allocation47_spill] sm:$0xff] %v5358_v43  ;;  %v5364_v21 = vld [vmem:[%s6768_s5 + $0xc0] sm:$0xff] }
 0x12c   :  { %6937 = vst [vmem:[#allocation42_spill] sm:$0xff] %v5288_v34  ;;  %3904 = vmatprep.subr.mxu0 %v5272_v9 }
 0x12d   :  { %3905 = vmatpush3.msra.mxu0 %v5272_v9  ;;  %v5312_v41 = vpop.f32.mrf.mxu0  ;;  %v5369_v9 = vmax.f32 %v493_v55, 0.0  ;;  %v5384_v55 = vmax.f32 %v490_v28, 0.0 }
 0x12e   :  { %3790 = vmatmul.mubr.f32.gmra.mxu1 %v5297_v61  ;;  %3906 = vmatprep.subr.mxu0 %v5288_v34 }
 0x12f   :  { %3907 = vmatpush3.msra.mxu0 %v5288_v34  ;;  %3792 = vmatprep.mubr.f32.mxu1 %v5309_v50  ;;  %v5326_v45 = vpop.f32.mrf.mxu0  ;;  %6943 = vst [vmem:[#allocation48_spill] sm:$0xff] %v5369_v9  ;;  %6944 = vst [vmem:[#allocation49_spill] sm:$0xff] %v5384_v55  ;;  %v5392_v34 = vld [vmem:[%s6768_s5 + $0xd0] sm:$0xff] }
 0x130   :  { %3908 = vmatprep.subr.mxu0 %v5303_v59 }
 0x131   :  { %3909 = vmatpush3.msra.mxu0 %v5303_v59  ;;  %v5339_v38 = vpop.f32.mrf.mxu0  ;;  %v5397_v59 = vmax.f32 %v485_v0, 0.0  ;;  %v5412_v0 = vmax.f32 %v482_v7, 0.0 }
 0x132   :  { %3793 = vmatmul.mubr.f32.gmra.mxu1 %v5324_v36  ;;  %3910 = vmatprep.subr.mxu0 %v5314_v63 }
 0x133   :  { %3911 = vmatpush3.msra.mxu0 %v5314_v63  ;;  %3795 = vmatprep.mubr.f32.mxu1 %v5336_v54  ;;  %v5354_v49 = vpop.f32.mrf.mxu0  ;;  %6945 = vst [vmem:[#allocation50_spill] sm:$0xff] %v5397_v59  ;;  %6946 = vst [vmem:[#allocation51_spill] sm:$0xff] %v5412_v0  ;;  %v5418_v63 = vld [vmem:[%s6768_s5 + $0xe0] sm:$0xff] }
 0x134   :  { %3912 = vmatprep.subr.mxu0 %v5328_v19 }
 0x135   :  { %3913 = vmatpush3.msra.mxu0 %v5328_v19  ;;  %v5367_v60 = vpop.f32.mrf.mxu0  ;;  %v474_v19 = vadd.f32 %v5079_v48, %v4958_v52  ;;  %v5440_v48 = vld [vmem:[%s6768_s5 + $0xf0] sm:$0xff] }
 0x136   :  { %3796 = vmatmul.mubr.f32.gmra.mxu1 %v5352_v39  ;;  %3914 = vmatprep.subr.mxu0 %v5343_v57 }
 0x137   :  { %3915 = vmatpush3.msra.mxu0 %v5343_v57  ;;  %3798 = vmatprep.mubr.f32.mxu1 %v5364_v21  ;;  %v5382_v1 = vpop.f32.mrf.mxu0  ;;  %v469_v57 = vadd.f32 %v4958_v52, %v5113_v2 }
 0x138   :  { %3916 = vmatprep.subr.mxu0 %v5358_v43 }
 0x139   :  { %3917 = vmatpush3.msra.mxu0 %v5358_v43  ;;  %v5395_v3 = vpop.f32.mrf.mxu0  ;;  %v5443_v43 = vmax.f32 %v474_v19, 0.0 }
 0x13a   :  { %3799 = vmatmul.mubr.f32.gmra.mxu1 %v5380_v18  ;;  %3918 = vmatprep.subr.mxu0 %v5369_v9 }
 0x13b   :  { %3919 = vmatpush3.msra.mxu0 %v5369_v9  ;;  %3801 = vmatprep.mubr.f32.mxu1 %v5392_v34  ;;  %v5408_v28 = vpop.f32.mrf.mxu0  ;;  %6948 = vst [vmem:[#allocation53_spill] sm:$0xff] %v5443_v43  ;;  %v5456_v9 = vmax.f32 %v469_v57, 0.0  ;;  %v5475_v57 = vld [vmem:[%s6768_s5 + $0x108] sm:$0xff] }
 0x13c   :  { %3920 = vmatprep.subr.mxu0 %v5384_v55 }
 0x13d   :  { %3921 = vmatpush3.msra.mxu0 %v5384_v55  ;;  %v3725_v8 = vpop.f32.mrf.mxu0  ;;  %6949 = vst [vmem:[#allocation54_spill] sm:$0xff] %v5456_v9 }
 0x13e   :  { %3802 = vmatmul.mubr.f32.gmra.mxu1 %v5406_v22  ;;  %3922 = vmatprep.subr.mxu0 %v5397_v59 }
 0x13f   :  { %3923 = vmatpush3.msra.mxu0 %v5397_v59  ;;  %3804 = vmatprep.mubr.f32.mxu1 %v5418_v63  ;;  %v564_v7 = vpop.f32.mrf.mxu0 }
 0x140   :  { %3924 = vmatprep.subr.mxu0 %v5412_v0 }
 0x141   :  { %3925 = vmatpush3.msra.mxu0 %v5412_v0  ;;  %v3728_v15 = vpop.f32.mrf.mxu0 }
 0x142   :  { %3805 = vmatmul.mubr.f32.gmra.mxu1 %v5430_v58  ;;  %3926 = vmatprep.subr.mxu0 %v5432_v12  ;;  %v586_v24 = vadd.f32 %v3728_v15, %v4958_v52  ;;  %v570_v15 = vadd.f32 %v5395_v3, %v4958_v52 }
 0x143   :  { %3927 = vmatpush3.msra.mxu0 %v5432_v12  ;;  %3807 = vmatprep.mubr.f32.mxu1 %v5440_v48  ;;  %v577_v2 = vpop.f32.mrf.mxu0 }
 0x144   :  { %3928 = vmatprep.subr.mxu0 %v5443_v43  ;;  %v5502_v12 = vmax.f32 %v586_v24, 0.0  ;;  %v565_v24 = vadd.f32 %v4958_v52, %v564_v7  ;;  %v5526_v3 = vmax.f32 %v570_v15, 0.0  ;;  %v546_v15 = vadd.f32 %v4958_v52, %v5354_v49 }
 0x145   :  { %3929 = vmatpush3.msra.mxu0 %v5443_v43  ;;  %v3729_v19 = vpop.f32.mrf.mxu0  ;;  %v541_v49 = vadd.f32 %v5312_v41, %v4958_v52 }
 0x146   :  { %3808 = vmatmul.mubr.f32.gmra.mxu1 %v5454_v5  ;;  %3930 = vmatprep.subr.mxu0 %v5456_v9  ;;  %v589_v55 = vadd.f32 %v3729_v19, %v4958_v52  ;;  %6952 = vst [vmem:[#allocation57_spill] sm:$0xff] %v5502_v12  ;;  %6956 = vst [vmem:[#allocation61_spill] sm:$0xff] %v5526_v3 }
 0x147   :  { %3931 = vmatpush3.msra.mxu0 %v5456_v9  ;;  %3810 = vmatprep.mubr.f32.mxu1 %v5462_v51  ;;  %v580_v19 = vpop.f32.mrf.mxu0  ;;  %v578_v9 = vadd.f32 %v4958_v52, %v577_v2  ;;  %v549_v2 = vadd.f32 %v4958_v52, %v5382_v1  ;;  %v5586_v41 = vmax.f32 %v541_v49, 0.0 }
 0x148   :  { %3932 = vmatprep.subr.mxu0 %v5465_v20  ;;  %v5478_v59 = vmax.f32 %v589_v55, 0.0  ;;  %v5493_v55 = vld [vmem:[%s6768_s5 + $0x118] sm:$0xff]  ;;  %v581_v0 = vadd.f32 %v4958_v52, %v580_v19  ;;  %s4631_s5 = smov 8  }
 0x149   :  { %3933 = vmatpush3.msra.mxu0 %v5465_v20  ;;  %v573_v20 = vadd.f32 %v3725_v8, %v4958_v52  ;;  %v5514_v19 = vmax.f32 %v578_v9, 0.0  ;;  %v562_v9 = vadd.f32 %v4958_v52, %v5408_v28  ;;  %v554_v28 = vadd.f32 %v5339_v38, %v4958_v52  ;;  %6963 = vst [vmem:[#allocation68_spill] sm:$0xff] %v5586_v41 }
 0x14a   :  { %6951 = vst [vmem:[#allocation56_spill] sm:$0xff] %v5478_v59  ;;  %3811 = vmatmul.mubr.f32.gmra.mxu1 %v5475_v57  ;;  %3935 = vmatmul.mubr.f32.vlgmr.msra.gmra.mxu0 %v5065_v42  ;;  %v5506_v43 = vmax.f32 %v581_v0, 0.0  ;;  %v5536_v0 = vmax.f32 %v565_v24, 0.0  ;;  %v5566_v1 = vmax.f32 %v549_v2, 0.0  ;;  %v5574_v24 = vmax.f32 %v546_v15, 0.0 }
 0x14b   :  { %3813 = vmatprep.mubr.f32.mxu1 %v5483_v17  ;;  %3937 = vmatprep.mubr.f32.mxu0 %v5077_v47  ;;  %6954 = vst [vmem:[#allocation59_spill] sm:$0xff] %v5514_v19  ;;  %v5519_v8 = vmax.f32 %v573_v20, 0.0  ;;  %v557_v20 = vadd.f32 %v5367_v60, %v4958_v52  ;;  %v5544_v7 = vmax.f32 %v562_v9, 0.0  ;;  %v5558_v38 = vmax.f32 %v554_v28, 0.0 }
 0x14c   :  { %3988 = vmatprep.subr.mxu1 %v5478_v59  ;;  %6953 = vst [vmem:[#allocation58_spill] sm:$0xff] %v5506_v43  ;;  %6957 = vst [vmem:[#allocation62_spill] sm:$0xff] %v5536_v0  ;;  %v538_v9 = vadd.f32 %v5285_v30, %v4958_v52  ;;  %v530_v28 = vadd.f32 %v4958_v52, %v5299_v4 }
 0x14d   :  { %6955 = vst [vmem:[#allocation60_spill] sm:$0xff] %v5519_v8  ;;  %6958 = vst [vmem:[#allocation63_spill] sm:$0xff] %v5544_v7  ;;  %v5550_v60 = vmax.f32 %v557_v20, 0.0  ;;  %v533_v20 = vadd.f32 %v4958_v52, %v5326_v45 }
 0x14e   :  { %3814 = vmatmul.mubr.f32.gmra.mxu1 %v5493_v55  ;;  %3938 = vmatmul.mubr.f32.gmra.mxu0 %v5094_v53  ;;  %6960 = vst [vmem:[#allocation65_spill] sm:$0xff] %v5558_v38  ;;  %6961 = vst [vmem:[#allocation66_spill] sm:$0xff] %v5566_v1  ;;  %v5594_v30 = vmax.f32 %v538_v9, 0.0  ;;  %v5608_v2 = vmax.f32 %v530_v28, 0.0 }
 0x14f   :  { %3848 = vmatprep.mubr.f32.mxu1 %v4943_v37  ;;  %3940 = vmatprep.mubr.f32.mxu0 %v5103_v56  ;;  %6959 = vst [vmem:[#allocation64_spill] sm:$0xff] %v5550_v60  ;;  %6962 = vst [vmem:[#allocation67_spill] sm:$0xff] %v5574_v24  ;;  %v5602_v45 = vmax.f32 %v533_v20, 0.0  ;;  %v4444_v20 = vld [vmem:[%s6771_s8 + $0x10] sm:$0xff]  }
 0x152   :  { %3849 = vmatmul.mubr.f32.vlgmr.msra.gmra.mxu1 %v5065_v42  ;;  %3941 = vmatmul.mubr.f32.gmra.mxu0 %v5120_v6 }
 0x153   :  { %3989 = vmatpush3.msra.mxu1 %v5478_v59  ;;  %3851 = vmatprep.mubr.f32.mxu1 %v5077_v47 }
 0x154   :  { %3990 = vmatprep.subr.mxu1 %v5502_v12  ;;  %3943 = vmatprep.mubr.f32.mxu0 %v5130_v14 }
 0x155   :  { %3991 = vmatpush3.msra.mxu1 %v5502_v12 }
 0x156   :  { %3992 = vmatprep.subr.mxu1 %v5506_v43  ;;  %3852 = vmatmul.mubr.f32.gmra.mxu1 %v5094_v53 }
 0x157   :  { %3944 = vmatmul.mubr.f32.gmra.mxu0 %v5148_v23  ;;  %3993 = vmatpush3.msra.mxu1 %v5506_v43 }
 0x158   :  { %3994 = vmatprep.subr.mxu1 %v5514_v19  ;;  %3854 = vmatprep.mubr.f32.mxu1 %v5103_v56 }
 0x159   :  { %3995 = vmatpush3.msra.mxu1 %v5514_v19  ;;  %3946 = vmatprep.mubr.f32.mxu0 %v5158_v26 }
 0x15a   :  { %3996 = vmatprep.subr.mxu1 %v5519_v8  ;;  %3855 = vmatmul.mubr.f32.gmra.mxu1 %v5120_v6 }
 0x15b   :  { %3997 = vmatpush3.msra.mxu1 %v5519_v8  ;;  %3857 = vmatprep.mubr.f32.mxu1 %v5130_v14 }
 0x15c   :  { %3998 = vmatprep.subr.mxu1 %v5526_v3  ;;  %3947 = vmatmul.mubr.f32.gmra.mxu0 %v5176_v33 }
 0x15d   :  { %3999 = vmatpush3.msra.mxu1 %v5526_v3  ;;  %3949 = vmatprep.mubr.f32.mxu0 %v5184_v16 }
 0x15e   :  { %4000 = vmatprep.subr.mxu1 %v5536_v0  ;;  %3858 = vmatmul.mubr.f32.gmra.mxu1 %v5148_v23 }
 0x15f   :  { %4001 = vmatpush3.msra.mxu1 %v5536_v0  ;;  %3860 = vmatprep.mubr.f32.mxu1 %v5158_v26 }
 0x160   :  { %4002 = vmatprep.subr.mxu1 %v5544_v7  ;;  %3950 = vmatmul.mubr.f32.gmra.mxu0 %v5202_v44 }
 0x161   :  { %4003 = vmatpush3.msra.mxu1 %v5544_v7  ;;  %3952 = vmatprep.mubr.f32.mxu0 %v5210_v46  ;;  %v6971_v7 = vld [vmem:[#allocation50_spill] sm:$0xff] }
 0x162   :  { %4004 = vmatprep.subr.mxu1 %v5550_v60  ;;  %3861 = vmatmul.mubr.f32.gmra.mxu1 %v5176_v33 }
 0x163   :  { %4005 = vmatpush3.msra.mxu1 %v5550_v60  ;;  %3863 = vmatprep.mubr.f32.mxu1 %v5184_v16  ;;  %v5971_v60 = vmul.f32 %v6971_v7, %v6971_v7 }
 0x164   :  { %4006 = vmatprep.subr.mxu1 %v5558_v38  ;;  %3953 = vmatmul.mubr.f32.gmra.mxu0 %v5224_v11 }
 0x165   :  { %4007 = vmatpush3.msra.mxu1 %v5558_v38  ;;  %3955 = vmatprep.mubr.f32.mxu0 %v5234_v13 }
 0x166   :  { %4008 = vmatprep.subr.mxu1 %v5566_v1  ;;  %3864 = vmatmul.mubr.f32.gmra.mxu1 %v5202_v44 }
 0x167   :  { %4009 = vmatpush3.msra.mxu1 %v5566_v1  ;;  %3866 = vmatprep.mubr.f32.mxu1 %v5210_v46 }
 0x168   :  { %4010 = vmatprep.subr.mxu1 %v5574_v24  ;;  %3956 = vmatmul.mubr.f32.gmra.mxu0 %v5248_v10 }
 0x169   :  { %4011 = vmatpush3.msra.mxu1 %v5574_v24  ;;  %3958 = vmatprep.mubr.f32.mxu0 %v5257_v62 }
 0x16a   :  { %4012 = vmatprep.subr.mxu1 %v5586_v41  ;;  %3867 = vmatmul.mubr.f32.gmra.mxu1 %v5224_v11 }
 0x16b   :  { %4013 = vmatpush3.msra.mxu1 %v5586_v41  ;;  %3869 = vmatprep.mubr.f32.mxu1 %v5234_v13 }
 0x16c   :  { %4014 = vmatprep.subr.mxu1 %v5594_v30  ;;  %3959 = vmatmul.mubr.f32.gmra.mxu0 %v5270_v31 }
 0x16d   :  { %4015 = vmatpush3.msra.mxu1 %v5594_v30  ;;  %3961 = vmatprep.mubr.f32.mxu0 %v5282_v25 }
 0x16e   :  { %4016 = vmatprep.subr.mxu1 %v5602_v45  ;;  %3870 = vmatmul.mubr.f32.gmra.mxu1 %v5248_v10 }
 0x16f   :  { %4017 = vmatpush3.msra.mxu1 %v5602_v45  ;;  %3872 = vmatprep.mubr.f32.mxu1 %v5257_v62 }
 0x170   :  { %4018 = vmatprep.subr.mxu1 %v5608_v2  ;;  %3962 = vmatmul.mubr.f32.gmra.mxu0 %v5297_v61 }
 0x171   :  { %4019 = vmatpush3.msra.mxu1 %v5608_v2  ;;  %3964 = vmatprep.mubr.f32.mxu0 %v5309_v50 }
 0x172   :  { %3873 = vmatmul.mubr.f32.gmra.mxu1 %v5270_v31 }
 0x173   :  { %3875 = vmatprep.mubr.f32.mxu1 %v5282_v25 }
 0x174   :  { %3965 = vmatmul.mubr.f32.gmra.mxu0 %v5324_v36 }
 0x175   :  { %3967 = vmatprep.mubr.f32.mxu0 %v5336_v54 }
 0x176   :  { %3876 = vmatmul.mubr.f32.gmra.mxu1 %v5297_v61 }
 0x177   :  { %3878 = vmatprep.mubr.f32.mxu1 %v5309_v50 }
 0x178   :  { %3968 = vmatmul.mubr.f32.gmra.mxu0 %v5352_v39 }
 0x179   :  { %3970 = vmatprep.mubr.f32.mxu0 %v5364_v21 }
 0x17a   :  { %3879 = vmatmul.mubr.f32.gmra.mxu1 %v5324_v36 }
 0x17b   :  { %3881 = vmatprep.mubr.f32.mxu1 %v5336_v54 }
 0x17c   :  { %3971 = vmatmul.mubr.f32.gmra.mxu0 %v5380_v18 }
 0x17d   :  { %3973 = vmatprep.mubr.f32.mxu0 %v5392_v34 }
 0x17e   :  { %3882 = vmatmul.mubr.f32.gmra.mxu1 %v5352_v39 }
 0x17f   :  { %3884 = vmatprep.mubr.f32.mxu1 %v5364_v21 }
 0x180   :  { %3974 = vmatmul.mubr.f32.gmra.mxu0 %v5406_v22 }
 0x181   :  { %3976 = vmatprep.mubr.f32.mxu0 %v5418_v63 }
 0x182   :  { %3885 = vmatmul.mubr.f32.gmra.mxu1 %v5380_v18 }
 0x183   :  { %3887 = vmatprep.mubr.f32.mxu1 %v5392_v34 }
 0x184   :  { %3977 = vmatmul.mubr.f32.gmra.mxu0 %v5430_v58 }
 0x185   :  { %3979 = vmatprep.mubr.f32.mxu0 %v5440_v48 }
 0x186   :  { %3888 = vmatmul.mubr.f32.gmra.mxu1 %v5406_v22 }
 0x187   :  { %3890 = vmatprep.mubr.f32.mxu1 %v5418_v63 }
 0x188   :  { %3980 = vmatmul.mubr.f32.gmra.mxu0 %v5454_v5 }
 0x189   :  { %3982 = vmatprep.mubr.f32.mxu0 %v5462_v51 }
 0x18a   :  { %3891 = vmatmul.mubr.f32.gmra.mxu1 %v5430_v58 }
 0x18b   :  { %3893 = vmatprep.mubr.f32.mxu1 %v5440_v48 }
 0x18c   :  { %3983 = vmatmul.mubr.f32.gmra.mxu0 %v5475_v57 }
 0x18d   :  { %3985 = vmatprep.mubr.f32.mxu0 %v5483_v17 }
 0x18e   :  { %3894 = vmatmul.mubr.f32.gmra.mxu1 %v5454_v5 }
 0x18f   :  { %3896 = vmatprep.mubr.f32.mxu1 %v5462_v51 }
 0x190   :  { %3986 = vmatmul.mubr.f32.gmra.mxu0 %v5493_v55 }
 0x192   :  { %3897 = vmatmul.mubr.f32.gmra.mxu1 %v5475_v57 }
 0x193   :  { %3899 = vmatprep.mubr.f32.mxu1 %v5483_v17 }
 0x196   :  { %3900 = vmatmul.mubr.f32.gmra.mxu1 %v5493_v55 }
 0x197   :  { %4020 = vmatprep.mubr.f32.mxu1 %v4943_v37 }
 0x19a   :  { %4021 = vmatmul.mubr.f32.vlgmr.msra.gmra.mxu1 %v5065_v42 }
 0x19b   :  { %4023 = vmatprep.mubr.f32.mxu1 %v5077_v47 }
 0x19e   :  { %4024 = vmatmul.mubr.f32.gmra.mxu1 %v5094_v53 }
 0x19f   :  { %4026 = vmatprep.mubr.f32.mxu1 %v5103_v56 }
 0x1a2   :  { %4027 = vmatmul.mubr.f32.gmra.mxu1 %v5120_v6 }
 0x1a3   :  { %4029 = vmatprep.mubr.f32.mxu1 %v5130_v14 }
 0x1a6   :  { %4030 = vmatmul.mubr.f32.gmra.mxu1 %v5148_v23 }
 0x1a7   :  { %4032 = vmatprep.mubr.f32.mxu1 %v5158_v26 }
 0x1aa   :  { %4033 = vmatmul.mubr.f32.gmra.mxu1 %v5176_v33 }
 0x1ab   :  { %4035 = vmatprep.mubr.f32.mxu1 %v5184_v16 }
 0x1ae   :  { %4036 = vmatmul.mubr.f32.gmra.mxu1 %v5202_v44 }
 0x1af   :  { %4038 = vmatprep.mubr.f32.mxu1 %v5210_v46 }
 0x1b2   :  { %4039 = vmatmul.mubr.f32.gmra.mxu1 %v5224_v11 }
 0x1b3   :  { %4041 = vmatprep.mubr.f32.mxu1 %v5234_v13 }
 0x1b6   :  { %4042 = vmatmul.mubr.f32.gmra.mxu1 %v5248_v10 }
 0x1b7   :  { %4044 = vmatprep.mubr.f32.mxu1 %v5257_v62 }
 0x1ba   :  { %4045 = vmatmul.mubr.f32.gmra.mxu1 %v5270_v31 }
 0x1bb   :  { %4047 = vmatprep.mubr.f32.mxu1 %v5282_v25 }
 0x1be   :  { %4048 = vmatmul.mubr.f32.gmra.mxu1 %v5297_v61 }
 0x1bf   :  { %4050 = vmatprep.mubr.f32.mxu1 %v5309_v50 }
 0x1c2   :  { %4051 = vmatmul.mubr.f32.gmra.mxu1 %v5324_v36 }
 0x1c3   :  { %4053 = vmatprep.mubr.f32.mxu1 %v5336_v54 }
 0x1c6   :  { %4054 = vmatmul.mubr.f32.gmra.mxu1 %v5352_v39 }
 0x1c7   :  { %4056 = vmatprep.mubr.f32.mxu1 %v5364_v21 }
 0x1ca   :  { %v5677_v37 = vpop.f32.mrf.mxu1  ;;  %4057 = vmatmul.mubr.f32.gmra.mxu1 %v5380_v18 }
 0x1cb   :  { %4059 = vmatprep.mubr.f32.mxu1 %v5392_v34 }
 0x1cc   :  { %v5681_v52 = vpop.f32.mrf.mxu1 }
 0x1ce   :  { %v5683_v42 = vpop.f32.mrf.mxu1  ;;  %4060 = vmatmul.mubr.f32.gmra.mxu1 %v5406_v22 }
 0x1cf   :  { %4062 = vmatprep.mubr.f32.mxu1 %v5418_v63 }
 0x1d0   :  { %v5687_v47 = vpop.f32.mrf.mxu1 }
 0x1d2   :  { %v3770_v53 = vpop.f32.mrf.mxu1  ;;  %4063 = vmatmul.mubr.f32.gmra.mxu1 %v5430_v58 }
 0x1d3   :  { %4065 = vmatprep.mubr.f32.mxu1 %v5440_v48  ;;  %v4442_v48 = vld [vmem:[%s6771_s8 + $0x20] ss:$0 sps:$4 sm:$0xff]  }
 0x1d4   :  { %v778_v56 = vpop.f32.mrf.mxu1  ;;  %4100 = vmatprep.subr.msk.bf16.mxu0 %vm296_vm0, %v4442_v48 }
 0x1d5   :  { %v4121_v6 = vpack.i.bf16 %v3770_v53, %v778_v56 }
 0x1d6   :  { %v3773_v14 = vpop.f32.mrf.mxu1  ;;  %4066 = vmatmul.mubr.f32.gmra.mxu1 %v5454_v5 }
 0x1d7   :  { %4122 = vrot.lane.b32.xlu0 %v4121_v6, %s4631_s5  ;;  %4068 = vmatprep.mubr.f32.mxu1 %v5462_v51  ;;  %v2397_v51 = vsel %vm296_vm0, %v4442_v48, 0  ;;  %v4445_v6 = vld [vmem:[%s6771_s8 + $0x8] sm:$0xff]  }
 0x1d8   :  { %v788_v21 = vpop.f32.mrf.mxu1  ;;  %4075 = vmatpush3.bf16.msra.mxu0 %v2397_v51 }
 0x1d9   :  { %v4126_v23 = vpack.i.bf16 %v3773_v14, %v788_v21 }
 0x1da   :  { %v3776_v25 = vpop.f32.mrf.mxu1  ;;  %4069 = vmatmul.mubr.f32.gmra.mxu1 %v5475_v57 }
 0x1db   :  { %4127 = vrot.lane.b32.xlu0 %v4126_v23, %s4631_s5  ;;  %4071 = vmatprep.mubr.f32.mxu1 %v5483_v17 }
 0x1dc   :  { %v798_v26 = vpop.f32.mrf.mxu1 }
 0x1dd   :  { %v4131_v33 = vpack.i.bf16 %v3776_v25, %v798_v26  ;;  %v4446_v25 = vld [vmem:[%s6771_s8] sm:$0xff]  }
 0x1de   :  { %v3779_v34 = vpop.f32.mrf.mxu1  ;;  %4072 = vmatmul.mubr.f32.gmra.mxu1 %v5493_v55  ;;  %v4443_v55 = vld [vmem:[%s6771_s8 + $0x18] sm:$0xff]   ;;  %s4638_s8 = smov 64  }
 0x1df   :  { %4132 = vrot.lane.b32.xlu1 %v4131_v33, %s4632_s23  ;;  %4076 = vmatprep.subr.bf16.mxu0 %v4443_v55 }
 0x1e0   :  { %v808_v16 = vpop.f32.mrf.mxu1  ;;  %4077 = vmatpush3.bf16.msra.mxu0 %v4443_v55 }
 0x1e1   :  { %v4136_v44 = vpack.i.bf16 %v3779_v34, %v808_v16  ;;  %4078 = vmatprep.subr.bf16.mxu0 %v4444_v20 }
 0x1e2   :  { %v3782_v46 = vpop.f32.mrf.mxu1 }
 0x1e3   :  { %4137 = vrot.lane.b32.xlu1 %v4136_v44, %s4632_s23 }
 0x1e4   :  { %v818_v63 = vpop.f32.mrf.mxu1  ;;  %4079 = vmatpush3.bf16.msra.mxu0 %v4444_v20 }
 0x1e5   :  { %v4141_v11 = vpack.i.bf16 %v3782_v46, %v818_v63  ;;  %4080 = vmatprep.subr.bf16.mxu0 %v4445_v6 }
 0x1e6   :  { %v3785_v13 = vpop.f32.mrf.mxu1 }
 0x1e7   :  { %4142 = vrot.lane.b32.xlu0 %v4141_v11, %s4633_s24 }
 0x1e8   :  { %v828_v10 = vpop.f32.mrf.mxu1  ;;  %4081 = vmatpush3.bf16.msra.mxu0 %v4445_v6 }
 0x1e9   :  { %v4146_v62 = vpack.i.bf16 %v3785_v13, %v828_v10  ;;  %4082 = vmatprep.subr.bf16.mxu0 %v4446_v25 }
 0x1ea   :  { %v3788_v31 = vpop.f32.mrf.mxu1 }
 0x1eb   :  { %4147 = vrot.lane.b32.xlu1 %v4146_v62, %s4633_s24 }
 0x1ec   :  { %v838_v61 = vpop.f32.mrf.mxu1  ;;  %4083 = vmatpush3.bf16.msra.mxu0 %v4446_v25 }
 0x1ed   :  { %v4151_v4 = vpack.i.bf16 %v3788_v31, %v838_v61 }
 0x1ee   :  { %v3791_v50 = vpop.f32.mrf.mxu1 }
 0x1ef   :  { %4152 = vrot.lane.b32.xlu0 %v4151_v4, %s4634_s25 }
 0x1f0   :  { %v848_v36 = vpop.f32.mrf.mxu1 }
 0x1f1   :  { %v4156_v54 = vpack.i.bf16 %v3791_v50, %v848_v36 }
 0x1f2   :  { %v3794_v39 = vpop.f32.mrf.mxu1 }
 0x1f3   :  { %4157 = vrot.lane.b32.xlu1 %v4156_v54, %s4634_s25 }
 0x1f4   :  { %v858_v18 = vpop.f32.mrf.mxu1 }
 0x1f5   :  { %v4161_v22 = vpack.i.bf16 %v3794_v39, %v858_v18 }
 0x1f6   :  { %v3797_v58 = vpop.f32.mrf.mxu1 }
 0x1f7   :  { %4162 = vrot.lane.b32.xlu0 %v4161_v22, %s4635_s28 }
 0x1f8   :  { %v868_v5 = vpop.f32.mrf.mxu1 }
 0x1f9   :  { %v4166_v57 = vpack.i.bf16 %v3797_v58, %v868_v5 }
 0x1fa   :  { %v3800_v17 = vpop.f32.mrf.mxu1 }
 0x1fb   :  { %4167 = vrot.lane.b32.xlu1 %v4166_v57, %s4635_s28 }
 0x1fc   :  { %v878_v15 = vpop.f32.mrf.mxu1 }
 0x1fd   :  { %v4171_v49 = vpack.i.bf16 %v3800_v17, %v878_v15 }
 0x1fe   :  { %v3803_v9 = vpop.f32.mrf.mxu1 }
 0x1ff   :  { %4172 = vrot.lane.b32.xlu0 %v4171_v49, %s4636_s7 }
 0x200   :  { %v888_v28 = vpop.f32.mrf.mxu1 }
 0x201   :  { %v4176_v53 = vpack.i.bf16 %v3803_v9, %v888_v28 }
 0x202   :  { %v3806_v56 = vpop.f32.mrf.mxu1 }
 0x203   :  { %4177 = vrot.lane.b32.xlu1 %v4176_v53, %s4636_s7 }
 0x204   :  { %v898_v14 = vpop.f32.mrf.mxu1 }
 0x205   :  { %v4181_v21 = vpack.i.bf16 %v3806_v56, %v898_v14 }
 0x206   :  { %v3809_v23 = vpop.f32.mrf.mxu1 }
 0x207   :  { %4182 = vrot.lane.b32.xlu0 %v4181_v21, %s4637_s18 }
 0x208   :  { %v908_v26 = vpop.f32.mrf.mxu1 }
 0x209   :  { %v4186_v33 = vpack.i.bf16 %v3809_v23, %v908_v26 }
 0x20a   :  { %v3812_v34 = vpop.f32.mrf.mxu1  ;;  %v5726_v16 = vpop.f32.mrf.mxu0 }
 0x20b   :  { %4187 = vrot.lane.b32.xlu1 %v4186_v33, %s4637_s18 }
 0x20c   :  { %v918_v44 = vpop.f32.mrf.mxu1  ;;  %v5729_v46 = vpop.f32.mrf.mxu0 }
 0x20d   :  { %v4191_v63 = vpack.i.bf16 %v3812_v34, %v918_v44 }
 0x20e   :  { %v3815_v11 = vpop.f32.mrf.mxu1  ;;  %v5731_v13 = vpop.f32.mrf.mxu0 }
 0x20f   :  { %4192 = vrot.lane.b32.xlu0 %v4191_v63, %s4638_s8 }
 0x210   :  { %v928_v10 = vpop.f32.mrf.mxu1  ;;  %v5734_v62 = vpop.f32.mrf.mxu0 }
 0x211   :  { %v4196_v31 = vpack.i.bf16 %v3815_v11, %v928_v10 }
 0x212   :  { %v5736_v61 = vpop.f32.mrf.mxu1  ;;  %v3942_v4 = vpop.f32.mrf.mxu0 }
 0x213   :  { %4197 = vrot.lane.b32.xlu1 %v4196_v31, %s4638_s8 }
 0x214   :  { %v5739_v50 = vpop.f32.mrf.mxu1  ;;  %v1596_v36 = vpop.f32.mrf.mxu0 }
 0x215   :  { %v4201_v54 = vpack.i.bf16 %v3942_v4, %v1596_v36 }
 0x216   :  { %v5741_v39 = vpop.f32.mrf.mxu1 }
 0x217   :  { %v3945_v18 = vpop.f32.mrf.mxu0  ;;  %4202 = vrot.lane.b32.xlu0 %v4201_v54, %s4631_s5 }
 0x218   :  { %v5744_v22 = vpop.f32.mrf.mxu1 }
 0x219   :  { %v1606_v58 = vpop.f32.mrf.mxu0 }
 0x21a   :  { %v4206_v48 = vpack.i.bf16 %v3945_v18, %v1606_v58  ;;  %v3856_v5 = vpop.f32.mrf.mxu1 }
 0x21c   :  { %4207 = vrot.lane.b32.xlu1 %v4206_v48, %s4631_s5  ;;  %v1191_v51 = vpop.f32.mrf.mxu1  ;;  %v3948_v57 = vpop.f32.mrf.mxu0 }
 0x21d   :  { %v4211_v17 = vpack.i.bf16 %v3856_v5, %v1191_v51 }
 0x21e   :  { %v3859_v55 = vpop.f32.mrf.mxu1  ;;  %v1616_v15 = vpop.f32.mrf.mxu0 }
 0x21f   :  { %4212 = vrot.lane.b32.xlu0 %v4211_v17, %s4631_s5  ;;  %v4216_v49 = vpack.i.bf16 %v3948_v57, %v1616_v15 }
 0x220   :  { %v1201_v9 = vpop.f32.mrf.mxu1  ;;  %v3951_v20 = vpop.f32.mrf.mxu0 }
 0x221   :  { %v4221_v28 = vpack.i.bf16 %v3859_v55, %v1201_v9 }
 0x222   :  { %v3862_v53 = vpop.f32.mrf.mxu1  ;;  %v1626_v56 = vpop.f32.mrf.mxu0 }
 0x223   :  { %4217 = vrot.lane.b32.xlu0 %v4216_v49, %s4632_s23  ;;  %4222 = vrot.lane.b32.xlu1 %v4221_v28, %s4631_s5  ;;  %v4226_v6 = vpack.i.bf16 %v3951_v20, %v1626_v56 }
 0x224   :  { %v1211_v14 = vpop.f32.mrf.mxu1  ;;  %v3954_v21 = vpop.f32.mrf.mxu0 }
 0x225   :  { %v4231_v23 = vpack.i.bf16 %v3862_v53, %v1211_v14 }
 0x226   :  { %v3865_v25 = vpop.f32.mrf.mxu1  ;;  %v1636_v26 = vpop.f32.mrf.mxu0 }
 0x227   :  { %4227 = vrot.lane.b32.xlu1 %v4226_v6, %s4632_s23  ;;  %4232 = vrot.lane.b32.xlu0 %v4231_v23, %s4632_s23  ;;  %v4236_v33 = vpack.i.bf16 %v3954_v21, %v1636_v26 }
 0x228   :  { %v1221_v34 = vpop.f32.mrf.mxu1  ;;  %v3957_v44 = vpop.f32.mrf.mxu0 }
 0x229   :  { %v4241_v63 = vpack.i.bf16 %v3865_v25, %v1221_v34 }
 0x22a   :  { %v3868_v11 = vpop.f32.mrf.mxu1  ;;  %v1646_v10 = vpop.f32.mrf.mxu0 }
 0x22b   :  { %4237 = vrot.lane.b32.xlu0 %v4236_v33, %s4633_s24  ;;  %4242 = vrot.lane.b32.xlu1 %v4241_v63, %s4632_s23  ;;  %v4246_v31 = vpack.i.bf16 %v3957_v44, %v1646_v10 }
 0x22c   :  { %v1231_v4 = vpop.f32.mrf.mxu1  ;;  %v3960_v36 = vpop.f32.mrf.mxu0 }
 0x22d   :  { %v4251_v54 = vpack.i.bf16 %v3868_v11, %v1231_v4 }
 0x22e   :  { %v3871_v18 = vpop.f32.mrf.mxu1  ;;  %v1656_v58 = vpop.f32.mrf.mxu0 }
 0x22f   :  { %4247 = vrot.lane.b32.xlu1 %v4246_v31, %s4633_s24  ;;  %4252 = vrot.lane.b32.xlu0 %v4251_v54, %s4633_s24  ;;  %v4256_v48 = vpack.i.bf16 %v3960_v36, %v1656_v58 }
 0x230   :  { %v1241_v5 = vpop.f32.mrf.mxu1  ;;  %v3963_v51 = vpop.f32.mrf.mxu0 }
 0x231   :  { %v4261_v57 = vpack.i.bf16 %v3871_v18, %v1241_v5 }
 0x232   :  { %v3874_v17 = vpop.f32.mrf.mxu1  ;;  %v1666_v55 = vpop.f32.mrf.mxu0 }
 0x233   :  { %4257 = vrot.lane.b32.xlu0 %v4256_v48, %s4634_s25  ;;  %4262 = vrot.lane.b32.xlu1 %v4261_v57, %s4633_s24  ;;  %v4266_v15 = vpack.i.bf16 %v3963_v51, %v1666_v55 }
 0x234   :  { %v1251_v49 = vpop.f32.mrf.mxu1  ;;  %v3966_v9 = vpop.f32.mrf.mxu0 }
 0x235   :  { %v4271_v20 = vpack.i.bf16 %v3874_v17, %v1251_v49 }
 0x236   :  { %v3877_v28 = vpop.f32.mrf.mxu1  ;;  %v1676_v53 = vpop.f32.mrf.mxu0 }
 0x237   :  { %4267 = vrot.lane.b32.xlu1 %v4266_v15, %s4634_s25  ;;  %4272 = vrot.lane.b32.xlu0 %v4271_v20, %s4634_s25  ;;  %v4276_v56 = vpack.i.bf16 %v3966_v9, %v1676_v53 }
 0x238   :  { %v1261_v6 = vpop.f32.mrf.mxu1  ;;  %v3969_v14 = vpop.f32.mrf.mxu0 }
 0x239   :  { %v4281_v21 = vpack.i.bf16 %v3877_v28, %v1261_v6 }
 0x23a   :  { %v3880_v23 = vpop.f32.mrf.mxu1  ;;  %v1686_v25 = vpop.f32.mrf.mxu0 }
 0x23b   :  { %4277 = vrot.lane.b32.xlu0 %v4276_v56, %s4635_s28  ;;  %4282 = vrot.lane.b32.xlu1 %v4281_v21, %s4634_s25  ;;  %v4286_v26 = vpack.i.bf16 %v3969_v14, %v1686_v25 }
 0x23c   :  { %v1271_v33 = vpop.f32.mrf.mxu1  ;;  %v3972_v34 = vpop.f32.mrf.mxu0 }
 0x23d   :  { %v4291_v44 = vpack.i.bf16 %v3880_v23, %v1271_v33 }
 0x23e   :  { %v3883_v63 = vpop.f32.mrf.mxu1  ;;  %v1696_v11 = vpop.f32.mrf.mxu0 }
 0x23f   :  { %4287 = vrot.lane.b32.xlu1 %v4286_v26, %s4635_s28  ;;  %4292 = vrot.lane.b32.xlu0 %v4291_v44, %s4635_s28  ;;  %v4296_v10 = vpack.i.bf16 %v3972_v34, %v1696_v11 }
 0x240   :  { %v1281_v31 = vpop.f32.mrf.mxu1  ;;  %v3975_v4 = vpop.f32.mrf.mxu0 }
 0x241   :  { %v4301_v36 = vpack.i.bf16 %v3883_v63, %v1281_v31 }
 0x242   :  { %v3886_v54 = vpop.f32.mrf.mxu1  ;;  %v1706_v18 = vpop.f32.mrf.mxu0 }
 0x243   :  { %4297 = vrot.lane.b32.xlu0 %v4296_v10, %s4636_s7  ;;  %4302 = vrot.lane.b32.xlu1 %v4301_v36, %s4635_s28  ;;  %v4306_v58 = vpack.i.bf16 %v3975_v4, %v1706_v18 }
 0x244   :  { %v1291_v48 = vpop.f32.mrf.mxu1  ;;  %v3978_v5 = vpop.f32.mrf.mxu0 }
 0x245   :  { %v4311_v51 = vpack.i.bf16 %v3886_v54, %v1291_v48 }
 0x246   :  { %v3889_v57 = vpop.f32.mrf.mxu1  ;;  %v1716_v17 = vpop.f32.mrf.mxu0 }
 0x247   :  { %4307 = vrot.lane.b32.xlu1 %v4306_v58, %s4636_s7  ;;  %4312 = vrot.lane.b32.xlu0 %v4311_v51, %s4636_s7  ;;  %v4316_v55 = vpack.i.bf16 %v3978_v5, %v1716_v17 }
 0x248   :  { %v1301_v15 = vpop.f32.mrf.mxu1  ;;  %v3981_v49 = vpop.f32.mrf.mxu0 }
 0x249   :  { %v4321_v9 = vpack.i.bf16 %v3889_v57, %v1301_v15  ;;  %v4123_v51 = vpop.permute.xlu0 %4122 }
 0x24a   :  { %v3892_v20 = vpop.f32.mrf.mxu1  ;;  %v1726_v28 = vpop.f32.mrf.mxu0 }
 0x24b   :  { %4317 = vrot.lane.b32.xlu0 %v4316_v55, %s4637_s18  ;;  %4322 = vrot.lane.b32.xlu1 %v4321_v9, %s4636_s7  ;;  %v4326_v53 = vpack.i.bf16 %v3981_v49, %v1726_v28 }
 0x24c   :  { %v1311_v56 = vpop.f32.mrf.mxu1  ;;  %v3984_v6 = vpop.f32.mrf.mxu0 }
 0x24d   :  { %v4331_v14 = vpack.i.bf16 %v3892_v20, %v1311_v56  ;;  %v4128_v9 = vpop.permute.xlu0 %4127 }
 0x24e   :  { %v3895_v21 = vpop.f32.mrf.mxu1  ;;  %v1736_v23 = vpop.f32.mrf.mxu0 }
 0x24f   :  { %4327 = vrot.lane.b32.xlu1 %v4326_v53, %s4637_s18  ;;  %4332 = vrot.lane.b32.xlu0 %v4331_v14, %s4637_s18  ;;  %v4336_v25 = vpack.i.bf16 %v3984_v6, %v1736_v23 }
 0x250   :  { %v1321_v26 = vpop.f32.mrf.mxu1  ;;  %v3987_v33 = vpop.f32.mrf.mxu0 }
 0x251   :  { %v4341_v34 = vpack.i.bf16 %v3895_v21, %v1321_v26  ;;  %v4133_v55 = vpop.permute.xlu1 %4132 }
 0x252   :  { %v3898_v44 = vpop.f32.mrf.mxu1  ;;  %v1746_v63 = vpop.f32.mrf.mxu0 }
 0x253   :  { %4337 = vrot.lane.b32.xlu0 %v4336_v25, %s4638_s8  ;;  %4342 = vrot.lane.b32.xlu1 %v4341_v34, %s4637_s18  ;;  %v4346_v11 = vpack.i.bf16 %v3987_v33, %v1746_v63 }
 0x254   :  { %v1331_v10 = vpop.f32.mrf.mxu1 }
 0x255   :  { %v4351_v31 = vpack.i.bf16 %v3898_v44, %v1331_v10  ;;  %v4138_v56 = vpop.permute.xlu1 %4137 }
 0x256   :  { %v3901_v4 = vpop.f32.mrf.mxu1 }
 0x257   :  { %4347 = vrot.lane.b32.xlu1 %v4346_v11, %s4638_s8  ;;  %4352 = vrot.lane.b32.xlu0 %v4351_v31, %s4638_s8  ;;  %v4125_v11 = vunpack.i.h.bf16 %v4123_v51 }
 0x258   :  { %v1341_v36 = vpop.f32.mrf.mxu1 }
 0x259   :  { %v4356_v54 = vpack.i.bf16 %v3901_v4, %v1341_v36  ;;  %v5787_v6 = vpop.permute.xlu0 %4142  ;;  %v4124_v4 = vunpack.i.l.bf16 %v4123_v51  ;;  %v4130_v36 = vunpack.i.h.bf16 %v4128_v9  ;;  %v4139_v51 = vunpack.i.l.bf16 %v4138_v56 }
 0x25a   :  { %v5776_v18 = vpop.f32.mrf.mxu1 }
 0x25b   :  { %4357 = vrot.lane.b32.xlu1 %v4356_v54, %s4638_s8 }
 0x25c   :  { %v5779_v58 = vpop.f32.mrf.mxu1 }
 0x25d   :  { %v5789_v25 = vpop.permute.xlu1 %4147 }
 0x25e   :  { %v5781_v48 = vpop.f32.mrf.mxu1 }
 0x260   :  { %v5783_v5 = vpop.f32.mrf.mxu1 }
 0x261   :  { %6964 = vst [vmem:[#allocation69_spill] sm:$0xff] %v5783_v5  ;;  %v5792_v26 = vpop.permute.xlu0 %4152 }
 0x262   :  { %v4028_v57 = vpop.f32.mrf.mxu1 }
 0x264   :  { %v2001_v17 = vpop.f32.mrf.mxu1 }
 0x265   :  { %v4361_v15 = vpack.i.bf16 %v4028_v57, %v2001_v17  ;;  %v5794_v63 = vpop.permute.xlu1 %4157  ;;  %v4129_v17 = vunpack.i.l.bf16 %v4128_v9  ;;  %v1069_v9 = vsel %vm1065_vm3, %v5683_v42, %v4130_v36 }
 0x266   :  { %v4031_v49 = vpop.f32.mrf.mxu1 }
 0x267   :  { %4362 = vrot.lane.b32.xlu0 %v4361_v15, %s4631_s5  ;;  %v4135_v15 = vunpack.i.h.bf16 %v4133_v55 }
 0x268   :  { %v2011_v20 = vpop.f32.mrf.mxu1 }
 0x269   :  { %v4366_v28 = vpack.i.bf16 %v4031_v49, %v2011_v20  ;;  %v5797_v10 = vpop.permute.xlu0 %4162  ;;  %v4134_v49 = vunpack.i.l.bf16 %v4133_v55  ;;  %v4145_v55 = vunpack.i.h.bf16 %v5787_v6 }
 0x26a   :  { %v4034_v53 = vpop.f32.mrf.mxu1 }
 0x26b   :  { %4367 = vrot.lane.b32.xlu1 %v4366_v28, %s4631_s5  ;;  %v1067_v28 = vsel %vm1065_vm3, %v5677_v37, %v4125_v11  ;;  %v4149_v37 = vunpack.i.l.bf16 %v5789_v25 }
 0x26c   :  { %v2021_v14 = vpop.f32.mrf.mxu1 }
 0x26d   :  { %v4371_v21 = vpack.i.bf16 %v4034_v53, %v2021_v14  ;;  %v5799_v20 = vpop.permute.xlu1 %4167  ;;  %v4140_v53 = vunpack.i.h.bf16 %v4138_v56  ;;  %v4155_v56 = vunpack.i.h.bf16 %v5792_v26 }
 0x26e   :  { %v4037_v23 = vpop.f32.mrf.mxu1 }
 0x26f   :  { %4372 = vrot.lane.b32.xlu0 %v4371_v21, %s4632_s23 }
 0x270   :  { %v2031_v33 = vpop.f32.mrf.mxu1 }
 0x271   :  { %v4376_v34 = vpack.i.bf16 %v4037_v23, %v2031_v33  ;;  %v4173_v14 = vpop.permute.xlu0 %4172  ;;  %v1066_v23 = vsel %vm1065_vm3, %v5681_v52, %v4124_v4  ;;  %v1072_v52 = vsel %vm1070_vm4, %v1067_v28, %v4135_v15  ;;  %v4154_v4 = vunpack.i.l.bf16 %v5792_v26 }
 0x272   :  { %v4040_v44 = vpop.f32.mrf.mxu1  ;;  %v1071_v42 = vsel %vm1070_vm4, %v1066_v23, %v4134_v49  ;;  %v4174_v15 = vunpack.i.l.bf16 %v4173_v14 }
 0x273   :  { %4377 = vrot.lane.b32.xlu1 %v4376_v34, %s4632_s23  ;;  %v4144_v34 = vunpack.i.l.bf16 %v5787_v6  ;;  %v1074_v6 = vsel %vm1070_vm4, %v1069_v9, %v4140_v53 }
 0x274   :  { %v2041_v31 = vpop.f32.mrf.mxu1 }
 0x275   :  { %v4381_v54 = vpack.i.bf16 %v4040_v44, %v2041_v31  ;;  %v4150_v44 = vunpack.i.h.bf16 %v5789_v25  ;;  %v1068_v31 = vsel %vm1065_vm3, %v5687_v47, %v4129_v17  ;;  %v4178_v36 = vpop.permute.xlu1 %4177  ;;  %v4165_v25 = vunpack.i.h.bf16 %v5797_v10 }
 0x276   :  { %v4043_v57 = vpop.f32.mrf.mxu1  ;;  %v1077_v47 = vsel %vm1075_vm5, %v1072_v52, %v4145_v55  ;;  %v4175_v17 = vunpack.i.h.bf16 %v4173_v14  ;;  %v1076_v26 = vsel %vm1075_vm5, %v1071_v42, %v4144_v34  ;;  %v4159_v14 = vunpack.i.l.bf16 %v5794_v63 }
 0x277   :  { %4382 = vrot.lane.b32.xlu0 %v4381_v54, %s4633_s24  ;;  %v1073_v54 = vsel %vm1070_vm4, %v1068_v31, %v4139_v51  ;;  %v1079_v28 = vsel %vm1075_vm5, %v1074_v6, %v4150_v44  ;;  %v1082_v51 = vsel %vm1080_vm6, %v1077_v47, %v4155_v56  ;;  %v1081_v9 = vsel %vm1080_vm6, %v1076_v26, %v4154_v4 }
 0x278   :  { %v2051_v21 = vpop.f32.mrf.mxu1  ;;  %v1078_v53 = vsel %vm1075_vm5, %v1073_v54, %v4149_v37  ;;  %v4170_v34 = vunpack.i.h.bf16 %v5799_v20  ;;  %v4169_v56 = vunpack.i.l.bf16 %v5799_v20  ;;  %v4180_v6 = vunpack.i.h.bf16 %v4178_v36 }
 0x279   :  { %v4386_v33 = vpack.i.bf16 %v4043_v57, %v2051_v21  ;;  %v4164_v57 = vunpack.i.l.bf16 %v5797_v10  ;;  %v4183_v21 = vpop.permute.xlu0 %4182  ;;  %v4160_v10 = vunpack.i.h.bf16 %v5794_v63  ;;  %v4179_v54 = vunpack.i.l.bf16 %v4178_v36 }
 0x27a   :  { %v4046_v11 = vpop.f32.mrf.mxu1  ;;  %v4184_v31 = vunpack.i.l.bf16 %v4183_v21 }
 0x27b   :  { %4387 = vrot.lane.b32.xlu1 %v4386_v33, %s4633_s24  ;;  %v4185_v33 = vunpack.i.h.bf16 %v4183_v21  ;;  %v1086_v55 = vsel %vm1085_vm7, %v1081_v9, %v4164_v57  ;;  %v1084_v20 = vsel %vm1080_vm6, %v1079_v28, %v4160_v10 }
 0x27c   :  { %v2061_v59 = vpop.f32.mrf.mxu1  ;;  %v1091_v52 = vsel %vm1090_vm8, %v1086_v55, %v4174_v15 }
 0x27d   :  { %v4391_v49 = vpack.i.bf16 %v4046_v11, %v2061_v59  ;;  %v1087_v59 = vsel %vm1085_vm7, %v1082_v51, %v4165_v25  ;;  %v4188_v44 = vpop.permute.xlu1 %4187  ;;  %v1096_v57 = vsel %vm1095_vm9, %v1091_v52, %v4184_v31 }
 0x27e   :  { %v4049_v23 = vpop.f32.mrf.mxu1  ;;  %v1092_v11 = vsel %vm1090_vm8, %v1087_v59, %v4175_v17  ;;  %v4189_v26 = vunpack.i.l.bf16 %v4188_v44  ;;  %v1083_v17 = vsel %vm1080_vm6, %v1078_v53, %v4159_v14 }
 0x27f   :  { %4392 = vrot.lane.b32.xlu0 %v4391_v49, %s4634_s25  ;;  %v1097_v25 = vsel %vm1095_vm9, %v1092_v11, %v4185_v33  ;;  %v4190_v49 = vunpack.i.h.bf16 %v4188_v44  ;;  %v1088_v9 = vsel %vm1085_vm7, %v1083_v17, %v4169_v56 }
 0x280   :  { %v2071_v37 = vpop.f32.mrf.mxu1  ;;  %v1093_v44 = vsel %vm1090_vm8, %v1088_v9, %v4179_v54 }
 0x281   :  { %v4396_v42 = vpack.i.bf16 %v4049_v23, %v2071_v37  ;;  %v4193_v4 = vpop.permute.xlu0 %4192  ;;  %v1089_v23 = vsel %vm1085_vm7, %v1084_v20, %v4170_v34  ;;  %v1098_v14 = vsel %vm1095_vm9, %v1093_v44, %v4189_v26 }
 0x282   :  { %v4195_v21 = vunpack.i.h.bf16 %v4193_v4  ;;  %v4194_v63 = vunpack.i.l.bf16 %v4193_v4  ;;  %v4052_v47 = vpop.f32.mrf.mxu1  ;;  %v1094_v55 = vsel %vm1090_vm8, %v1089_v23, %v4180_v6 }
 0x283   :  { %4397 = vrot.lane.b32.xlu1 %v4396_v42, %s4634_s25  ;;  %v1099_v53 = vsel %vm1095_vm9, %v1094_v55, %v4190_v49 }
 0x284   :  { %v1102_v15 = vsel %vm1100_vm10, %v1097_v25, %v4195_v21  ;;  %v1101_v51 = vsel %vm1100_vm10, %v1096_v57, %v4194_v63  ;;  %v2081_v36 = vpop.f32.mrf.mxu1 }
 0x285   :  { %v4401_v33 = vpack.i.bf16 %v4052_v47, %v2081_v36  ;;  %v4198_v59 = vpop.permute.xlu1 %4197  ;;  %v2320_v31 = vpack.c.bf16 %v1102_v15, %v1101_v51 }
 0x286   :  { %v4200_v37 = vunpack.i.h.bf16 %v4198_v59  ;;  %v4199_v28 = vunpack.i.l.bf16 %v4198_v59  ;;  %v4055_v10 = vpop.f32.mrf.mxu1 }
 0x287   :  { %4084 = vmatprep.mubr.msk.bf16.mxu0 %vm2371_vm11, %v2320_v31  ;;  %4402 = vrot.lane.b32.xlu0 %v4401_v33, %s4635_s28 }
 0x288   :  { %v1104_v34 = vsel %vm1100_vm10, %v1099_v53, %v4200_v37  ;;  %v1103_v56 = vsel %vm1100_vm10, %v1098_v14, %v4199_v28  ;;  %v2091_v11 = vpop.f32.mrf.mxu1 }
 0x289   :  { %v2321_v52 = vpack.c.bf16 %v1104_v34, %v1103_v56  ;;  %v4406_v42 = vpack.i.bf16 %v4055_v10, %v2091_v11  ;;  %v5857_v54 = vpop.permute.xlu0 %4202 }
 0x28a   :  { %v4058_v4 = vpop.f32.mrf.mxu1 }
 0x28b   :  { %4085 = vmatmul.mubr.msk.bf16.vlgmr.msra.gmra.mxu0 %vm2371_vm11, %v2321_v52  ;;  %4407 = vrot.lane.b32.xlu1 %v4406_v42, %s4635_s28 }
 0x28c   :  { %v2101_v6 = vpop.f32.mrf.mxu1 }
 0x28d   :  { %v4411_v21 = vpack.i.bf16 %v4058_v4, %v2101_v6  ;;  %v2513_v6 = vmul.f32 %v5057_v40, %v5057_v40  ;;  %v6970_v40 = vld [vmem:[#allocation18_spill] sm:$0xff] }
 0x28e   :  { %v4061_v63 = vpop.f32.mrf.mxu1  ;;  %v5860_v25 = vpop.permute.xlu1 %4207 }
 0x28f   :  { %4412 = vrot.lane.b32.xlu0 %v4411_v21, %s4636_s7  ;;  %v2515_v21 = vmul.f32 %v5046_v32, %v5046_v32  ;;  %v6969_v32 = vld [vmem:[#allocation51_spill] sm:$0xff]  ;;  %v4210_v12 = vunpack.i.h.bf16 %v5860_v25 }
 0x290   :  { %v2111_v47 = vpop.f32.mrf.mxu1 }
 0x291   :  { %v4416_v57 = vpack.i.bf16 %v4061_v63, %v2111_v47  ;;  %v5862_v49 = vpop.permute.xlu0 %4212  ;;  %v2516_v63 = vmul.f32 %v5040_v29, %v5040_v29  ;;  %v6968_v29 = vld [vmem:[#allocation52_spill] sm:$0xff] }
 0x292   :  { %v4064_v26 = vpop.f32.mrf.mxu1  ;;  %v4215_v43 = vunpack.i.h.bf16 %v5862_v49 }
 0x293   :  { %4417 = vrot.lane.b32.xlu1 %v4416_v57, %s4636_s7 }
 0x294   :  { %v2121_v20 = vpop.f32.mrf.mxu1 }
 0x295   :  { %v4421_v17 = vpack.i.bf16 %v4064_v26, %v2121_v20  ;;  %v5865_v15 = vpop.permute.xlu0 %4217  ;;  %v5867_v51 = vpop.permute.xlu1 %4222  ;;  %v2514_v26 = vmul.f32 %v5052_v35, %v5052_v35  ;;  %v2517_v20 = vmul.f32 %v5036_v27, %v5036_v27 }
 0x296   :  { %v4067_v36 = vpop.f32.mrf.mxu1  ;;  %v4219_v19 = vunpack.i.l.bf16 %v5865_v15  ;;  %v4224_v0 = vunpack.i.l.bf16 %v5867_v51 }
 0x297   :  { %4422 = vrot.lane.b32.xlu0 %v4421_v17, %s4637_s18  ;;  %v6965_v17 = vld [vmem:[#allocation53_spill] sm:$0xff]  ;;  %v5935_v35 = vsel %vm1065_vm3, %v2517_v20, 0.0  ;;  %v4220_v20 = vunpack.i.h.bf16 %v5865_v15  ;;  %v4225_v15 = vunpack.i.h.bf16 %v5867_v51 }
 0x298   :  { %v2131_v23 = vpop.f32.mrf.mxu1 }
 0x299   :  { %v4426_v9 = vpack.i.bf16 %v4067_v36, %v2131_v23  ;;  %v5870_v33 = vpop.permute.xlu1 %4227  ;;  %v5872_v59 = vpop.permute.xlu0 %4232  ;;  %v2547_v36 = vmul.f32 %v6965_v17, %v6965_v17  ;;  %v5910_v23 = vsel %vm1065_vm3, %v2513_v6, 0.0  ;;  %v2548_v6 = vmul.f32 %v6968_v29, %v6968_v29 }
 0x29a   :  { %v4070_v31 = vpop.f32.mrf.mxu1  ;;  %v4205_v17 = vunpack.i.h.bf16 %v5857_v54  ;;  %v4209_v29 = vunpack.i.l.bf16 %v5860_v25 }
 0x29b   :  { %4427 = vrot.lane.b32.xlu1 %v4426_v9, %s4637_s18  ;;  %v5913_v9 = vsel %vm1065_vm3, %v2515_v21, 0.0  ;;  %v2549_v21 = vmul.f32 %v6969_v32, %v6969_v32  ;;  %v5945_v32 = vsel %vm1065_vm3, %v2547_v36, 0.0  ;;  %v5960_v25 = vsel %vm1065_vm3, %v2548_v6, 0.0 }
 0x29c   :  { %v2141_v55 = vpop.f32.mrf.mxu1  ;;  %v1885_v6 = vsel %vm1065_vm3, %v5734_v62, %v4209_v29 }
 0x29d   :  { %v4431_v44 = vpack.i.bf16 %v4070_v31, %v2141_v55  ;;  %v5875_v37 = vpop.permute.xlu0 %4237  ;;  %v5877_v28 = vpop.permute.xlu1 %4242  ;;  %v5916_v31 = vsel %vm1065_vm3, %v2516_v63, 0.0  ;;  %v5932_v63 = vsel %vm1065_vm3, %v2514_v26, 0.0  ;;  %v4214_v26 = vunpack.i.l.bf16 %v5862_v49 }
 0x29e   :  { %v4073_v10 = vpop.f32.mrf.mxu1  ;;  %v5963_v36 = vsel %vm1065_vm3, %v2549_v21, 0.0  ;;  %v1884_v49 = vsel %vm1065_vm3, %v5726_v16, %v4205_v17  ;;  %v4230_v21 = vunpack.i.h.bf16 %v5870_v33  ;;  %v1479_v16 = vsel %vm1065_vm3, %v5736_v61, %v4215_v43 }
 0x29f   :  { %4432 = vrot.lane.b32.xlu0 %v4431_v44, %s4638_s8  ;;  %v1478_v51 = vsel %vm1065_vm3, %v5739_v50, %v4214_v26  ;;  %v1888_v17 = vsel %vm1070_vm4, %v1884_v49, %v4220_v20  ;;  %v4240_v29 = vunpack.i.h.bf16 %v5875_v37  ;;  %v1481_v43 = vsel %vm1065_vm3, %v5741_v39, %v4225_v15 }
 0x2a0   :  { %v2151_v53 = vpop.f32.mrf.mxu1  ;;  %v1480_v61 = vsel %vm1065_vm3, %v5744_v22, %v4224_v0  ;;  %v4245_v50 = vunpack.i.h.bf16 %v5877_v28 }
 0x2a1   :  { %v4436_v14 = vpack.i.bf16 %v4073_v10, %v2151_v53  ;;  %v5880_v34 = vpop.permute.xlu1 %4247  ;;  %v5882_v56 = vpop.permute.xlu0 %4252  ;;  %v6966_v10 = vld [vmem:[#allocation55_spill] sm:$0xff] }
 0x2a2   :  { %v2545_v53 = vmul.f32 %v6966_v10, %v6966_v10  ;;  %v5939_v10 = vmul.f32 %v6970_v40, %v6970_v40  ;;  %v4250_v26 = vunpack.i.h.bf16 %v5880_v34  ;;  %v4249_v20 = vunpack.i.l.bf16 %v5880_v34 }
 0x2a3   :  { %4437 = vrot.lane.b32.xlu1 %v4436_v14, %s4638_s8  ;;  %v6967_v14 = vld [vmem:[#allocation54_spill] sm:$0xff]  ;;  %v4255_v49 = vunpack.i.h.bf16 %v5882_v56 }
 0x2a4   :  { %v2546_v27 = vmul.f32 %v6967_v14, %v6967_v14  ;;  %v4204_v14 = vunpack.i.l.bf16 %v5857_v54  ;;  %v2673_v54 = vsel %vm1065_vm3, %v2545_v53, 0.0  ;;  %v1886_v53 = vsel %vm1065_vm3, %v5731_v13, %v4210_v12 }
 0x2a5   :  { %v5885_v11 = vpop.permute.xlu0 %4257  ;;  %v5887_v52 = vpop.permute.xlu1 %4262  ;;  %v4234_v12 = vunpack.i.l.bf16 %v5872_v59 }
 0x2a6   :  { %v5957_v3 = vsel %vm1065_vm3, %v2546_v27, 0.0  ;;  %v1883_v27 = vsel %vm1065_vm3, %v5729_v46, %v4204_v14  ;;  %v4229_v46 = vunpack.i.l.bf16 %v5870_v33  ;;  %v4235_v14 = vunpack.i.h.bf16 %v5872_v59 }
 0x2a7   :  { %v1887_v7 = vsel %vm1070_vm4, %v1883_v27, %v4219_v19  ;;  %v4239_v19 = vunpack.i.l.bf16 %v5875_v37  ;;  %v1890_v33 = vsel %vm1070_vm4, %v1886_v53, %v4230_v21  ;;  %v4244_v59 = vunpack.i.l.bf16 %v5877_v28 }
 0x2a8   :  { %v4254_v27 = vunpack.i.l.bf16 %v5882_v56  ;;  %v4260_v39 = vunpack.i.h.bf16 %v5885_v11  ;;  %v4259_v0 = vunpack.i.l.bf16 %v5885_v11  ;;  %v1889_v22 = vsel %vm1070_vm4, %v1885_v6, %v4229_v46 }
 0x2a9   :  { %v5889_v42 = vpop.permute.xlu1 %4267  ;;  %v5891_v4 = vpop.permute.xlu0 %4272  ;;  %v1483_v37 = vsel %vm1070_vm4, %v1479_v16, %v4235_v14  ;;  %v1482_v15 = vsel %vm1070_vm4, %v1478_v51, %v4234_v12  ;;  %v1892_v28 = vsel %vm1075_vm5, %v1888_v17, %v4240_v29  ;;  %v1891_v34 = vsel %vm1075_vm5, %v1887_v7, %v4239_v19 }
 0x2aa   :  { %v1485_v56 = vsel %vm1070_vm4, %v1481_v43, %v4245_v50  ;;  %v4265_v5 = vunpack.i.h.bf16 %v5887_v52  ;;  %v4264_v11 = vunpack.i.l.bf16 %v5887_v52  ;;  %v1484_v6 = vsel %vm1070_vm4, %v1480_v61, %v4244_v59 }
 0x2ab   :  { %v6023_v16 = vsel %vm1075_vm5, %v1890_v33, %v4250_v26  ;;  %v6026_v51 = vsel %vm1075_vm5, %v1889_v22, %v4249_v20  ;;  %v4275_v17 = vunpack.i.h.bf16 %v5891_v4  ;;  %v1487_v7 = vsel %vm1075_vm5, %v1483_v37, %v4255_v49 }
 0x2ac   :  { %v1486_v46 = vsel %vm1075_vm5, %v1482_v15, %v4254_v27  ;;  %v1896_v14 = vsel %vm1080_vm6, %v1892_v28, %v4260_v39  ;;  %v1895_v52 = vsel %vm1080_vm6, %v1891_v34, %v4259_v0  ;;  %v1489_v50 = vsel %vm1075_vm5, %v1485_v56, %v4265_v5 }
 0x2ad   :  { %v5899_v47 = vpop.permute.xlu0 %4277  ;;  %v5901_v57 = vpop.permute.xlu1 %4282  ;;  %v1488_v33 = vsel %vm1075_vm5, %v1484_v6, %v4264_v11  ;;  %v4269_v20 = vunpack.i.l.bf16 %v5889_v42 }
 0x2ae   :  { %v4280_v12 = vunpack.i.h.bf16 %v5899_v47  ;;  %v4279_v29 = vunpack.i.l.bf16 %v5899_v47  ;;  %v4285_v43 = vunpack.i.h.bf16 %v5901_v57  ;;  %v4284_v59 = vunpack.i.l.bf16 %v5901_v57 }
 0x2af   :  { %v1491_v47 = vsel %vm1080_vm6, %v1487_v7, %v4275_v17 }
 0x2b0   :  { %v1899_v22 = vsel %vm1085_vm7, %v1895_v52, %v4279_v29  ;;  %v1493_v37 = vsel %vm1080_vm6, %v1489_v50, %v4285_v43 }
 0x2b1   :  { %v5918_v55 = vpop.permute.xlu1 %4287  ;;  %v5920_v44 = vpop.permute.xlu0 %4292 }
 0x2b2   :  { %v4295_v26 = vunpack.i.h.bf16 %v5920_v44  ;;  %v4294_v49 = vunpack.i.l.bf16 %v5920_v44  ;;  %v1492_v44 = vsel %vm1080_vm6, %v1488_v33, %v4284_v59  ;;  %v4290_v34 = vunpack.i.h.bf16 %v5918_v55 }
 0x2b5   :  { %v5951_v8 = vpop.permute.xlu0 %4297  ;;  %v5953_v40 = vpop.permute.xlu1 %4302 }
 0x2b6   :  { %v4300_v27 = vunpack.i.h.bf16 %v5951_v8  ;;  %v4299_v39 = vunpack.i.l.bf16 %v5951_v8  ;;  %v1495_v8 = vsel %vm1085_vm7, %v1491_v47, %v4295_v26  ;;  %v4305_v11 = vunpack.i.h.bf16 %v5953_v40 }
 0x2b7   :  { %v4304_v6 = vunpack.i.l.bf16 %v5953_v40 }
 0x2b9   :  { %v5990_v13 = vpop.permute.xlu1 %4307  ;;  %v5992_v62 = vpop.permute.xlu0 %4312 }
 0x2ba   :  { %v4315_v5 = vunpack.i.h.bf16 %v5992_v62  ;;  %v4314_v0 = vunpack.i.l.bf16 %v5992_v62 }
 0x2bd   :  { %v6012_v53 = vpop.permute.xlu0 %4317  ;;  %v6014_v21 = vpop.permute.xlu1 %4322 }
 0x2be   :  { %2578 = vadd.xlane.f32.xlu0 %v5910_v23  ;;  %v4274_v23 = vunpack.i.l.bf16 %v5891_v4  ;;  %v4270_v4 = vunpack.i.h.bf16 %v5889_v42  ;;  %v4324_v29 = vunpack.i.l.bf16 %v6014_v21 }
 0x2c0   :  { %v1490_v57 = vsel %vm1080_vm6, %v1486_v46, %v4274_v23  ;;  %v1903_v46 = vsel %vm1090_vm8, %v1899_v22, %v4299_v39  ;;  %v4320_v23 = vunpack.i.h.bf16 %v6012_v53 }
 0x2c1   :  { %v6037_v61 = vpop.permute.xlu1 %4327  ;;  %v4333_v19 = vpop.permute.xlu0 %4332  ;;  %v1494_v62 = vsel %vm1085_vm7, %v1490_v57, %v4294_v49 }
 0x2c2   :  { %2674 = vadd.xlane.f32.xlu0 %v2673_v54  ;;  %v1900_v54 = vsel %vm1085_vm7, %v1896_v14, %v4280_v12  ;;  %v4335_v56 = vunpack.i.h.bf16 %v4333_v19  ;;  %v4334_v17 = vunpack.i.l.bf16 %v4333_v19  ;;  %v1499_v14 = vsel %vm1090_vm8, %v1495_v8, %v4315_v5 }
 0x2c3   :  { %v1904_v7 = vsel %vm1090_vm8, %v1900_v54, %v4300_v27  ;;  %v1498_v52 = vsel %vm1090_vm8, %v1494_v62, %v4314_v0  ;;  %v4325_v12 = vunpack.i.h.bf16 %v6014_v21  ;;  %v1496_v21 = vsel %vm1085_vm7, %v1492_v44, %v4304_v6 }
 0x2c4   :  { %v1502_v59 = vsel %vm1095_vm9, %v1498_v52, %v4334_v17  ;;  %v1908_v5 = vsel %vm1095_vm9, %v1904_v7, %v4320_v23  ;;  %v1500_v22 = vsel %vm1090_vm8, %v1496_v21, %v4324_v29  ;;  %v4310_v62 = vunpack.i.h.bf16 %v5990_v13  ;;  %v6973_v29 = vld [vmem:[#allocation17_spill] sm:$0xff] }
 0x2c5   :  { %v4338_v15 = vpop.permute.xlu0 %4337  ;;  %v4343_v28 = vpop.permute.xlu1 %4342  ;;  %v1898_v17 = vsel %vm1080_vm6, %v6023_v16, %v4270_v4  ;;  %v4330_v7 = vunpack.i.h.bf16 %v6037_v61  ;;  %v6972_v4 = vld [vmem:[#allocation49_spill] sm:$0xff] }
 0x2c6   :  { %2677 = vadd.xlane.f32.xlu0 %v5957_v3  ;;  %v4319_v3 = vunpack.i.l.bf16 %v6012_v53  ;;  %v4340_v19 = vunpack.i.h.bf16 %v4338_v15  ;;  %v4339_v26 = vunpack.i.l.bf16 %v4338_v15  ;;  %v4345_v47 = vunpack.i.h.bf16 %v4343_v28 }
 0x2c7   :  { %2581 = vadd.xlane.f32.xlu1 %v5932_v63  ;;  %v1503_v63 = vsel %vm1095_vm9, %v1499_v14, %v4335_v56  ;;  %v4344_v49 = vunpack.i.l.bf16 %v4343_v28  ;;  %v1497_v53 = vsel %vm1085_vm7, %v1493_v37, %v4305_v11  ;;  %v4289_v28 = vunpack.i.l.bf16 %v5918_v55 }
 0x2c8   :  { %v1907_v0 = vsel %vm1095_vm9, %v1903_v46, %v4319_v3  ;;  %v4309_v11 = vunpack.i.l.bf16 %v5990_v13  ;;  %v4329_v46 = vunpack.i.l.bf16 %v6037_v61  ;;  %v1902_v3 = vsel %vm1085_vm7, %v1898_v17, %v4290_v34  ;;  %v6984_v17 = vld [vmem:[#allocation43_spill] sm:$0xff] }
 0x2c9   :  { %v4348_v40 = vpop.permute.xlu1 %4347  ;;  %v4353_v43 = vpop.permute.xlu0 %4352  ;;  %v1911_v44 = vsel %vm1100_vm10, %v1907_v0, %v4339_v26  ;;  %v1504_v56 = vsel %vm1095_vm9, %v1500_v22, %v4344_v49  ;;  %v1906_v42 = vsel %vm1090_vm8, %v1902_v3, %v4310_v62  ;;  %v2688_v55 = vsel %vm1065_vm3, %v5971_v60, 0.0  ;;  %v6976_v26 = vld [vmem:[#allocation47_spill] sm:$0xff]  ;;  %v6980_v22 = vld [vmem:[#allocation45_spill] sm:$0xff] }
 0x2ca   :  { %v4355_v50 = vunpack.i.h.bf16 %v4353_v43  ;;  %v4354_v33 = vunpack.i.l.bf16 %v4353_v43  ;;  %2680 = vadd.xlane.f32.xlu0 %v5945_v32  ;;  %v1501_v32 = vsel %vm1090_vm8, %v1497_v53, %v4325_v12  ;;  %v4350_v13 = vunpack.i.h.bf16 %v4348_v40  ;;  %v6977_v53 = vld [vmem:[#allocation15_spill] sm:$0xff] }
 0x2cb   :  { %2584 = vadd.xlane.f32.xlu1 %v5913_v9  ;;  %v1912_v9 = vsel %vm1100_vm10, %v1908_v5, %v4340_v19  ;;  %v1505_v8 = vsel %vm1095_vm9, %v1501_v32, %v4345_v47  ;;  %v4349_v52 = vunpack.i.l.bf16 %v4348_v40  ;;  %v2592_v12 = vsel %vm1065_vm3, %v5939_v10, 0.0  ;;  %v6974_v19 = vld [vmem:[#allocation48_spill] sm:$0xff]  ;;  %v6979_v32 = vld [vmem:[#allocation14_spill] sm:$0xff] }
 0x2cc   :  { %v1507_v27 = vsel %vm1100_vm10, %v1503_v63, %v4355_v50  ;;  %v1506_v39 = vsel %vm1100_vm10, %v1502_v59, %v4354_v33  ;;  %v2324_v23 = vpack.c.bf16 %v1912_v9, %v1911_v44  ;;  %v2519_v40 = vmul.f32 %v6973_v29, %v6973_v29  ;;  %v6975_v33 = vld [vmem:[#allocation16_spill] sm:$0xff] }
 0x2cd   :  { %v4358_v57 = vpop.permute.xlu1 %4357  ;;  %v2322_v54 = vpack.c.bf16 %v1507_v27, %v1506_v39  ;;  %v2552_v60 = vmul.f32 %v6974_v19, %v6974_v19  ;;  %v2520_v59 = vmul.f32 %v6975_v33, %v6975_v33  ;;  %v2553_v47 = vmul.f32 %v6976_v26, %v6976_v26  ;;  %v6978_v39 = vld [vmem:[#allocation46_spill] sm:$0xff] }
 0x2ce   :  { %v4360_v15 = vunpack.i.h.bf16 %v4358_v57  ;;  %v4359_v37 = vunpack.i.l.bf16 %v4358_v57  ;;  %2683 = vadd.xlane.f32.xlu0 %v5960_v25  ;;  %v2595_v50 = vsel %vm1065_vm3, %v2519_v40, 0.0  ;;  %v2521_v21 = vmul.f32 %v6977_v53, %v6977_v53 }
 0x2cf   :  { %4088 = vmatprep.mubr.msk.bf16.mxu0 %vm2371_vm11, %v2322_v54  ;;  %2587 = vadd.xlane.f32.xlu1 %v5916_v31  ;;  %v1897_v31 = vsel %vm1080_vm6, %v6026_v51, %v4269_v20  ;;  %v1910_v51 = vsel %vm1095_vm9, %v1906_v42, %v4330_v7  ;;  %v2551_v20 = vmul.f32 %v6972_v4, %v6972_v4  ;;  %v2694_v10 = vsel %vm1065_vm3, %v2552_v60, 0.0 }
 0x2d0   :  { %v1509_v6 = vsel %vm1100_vm10, %v1505_v8, %v4360_v15  ;;  %v1508_v25 = vsel %vm1100_vm10, %v1504_v56, %v4359_v37  ;;  %v1901_v16 = vsel %vm1085_vm7, %v1897_v31, %v4289_v28  ;;  %v1914_v34 = vsel %vm1100_vm10, %v1910_v51, %v4350_v13  ;;  %v6981_v37 = vld [vmem:[#allocation13_spill] sm:$0xff]  ;;  %v6982_v8 = vld [vmem:[#allocation44_spill] sm:$0xff] }
 0x2d1   :  { %v2323_v14 = vpack.c.bf16 %v1509_v6, %v1508_v25  ;;  %v1905_v61 = vsel %vm1090_vm8, %v1901_v16, %v4309_v11  ;;  %v2691_v43 = vsel %vm1065_vm3, %v2551_v20, 0.0  ;;  %v2598_v49 = vsel %vm1065_vm3, %v2520_v59, 0.0  ;;  %v6983_v11 = vld [vmem:[#allocation12_spill] sm:$0xff]  ;;  %v6987_v16 = vld [vmem:[#allocation10_spill] sm:$0xff] }
 0x2d2   :  { %2686 = vadd.xlane.f32.xlu0 %v5963_v36  ;;  %v1909_v36 = vsel %vm1095_vm9, %v1905_v61, %v4329_v46  ;;  %v2697_v27 = vsel %vm1065_vm3, %v2553_v47, 0.0  ;;  %v2554_v5 = vmul.f32 %v6978_v39, %v6978_v39  ;;  %v2601_v0 = vsel %vm1065_vm3, %v2521_v21, 0.0  ;;  %v6991_v59 = vld [vmem:[#allocation8_spill] sm:$0xff] }
 0x2d3   :  { %4089 = vmatmul.mubr.msk.bf16.gmra.mxu0 %vm2371_vm11, %v2323_v14  ;;  %2590 = vadd.xlane.f32.xlu1 %v5935_v35  ;;  %v1913_v35 = vsel %vm1100_vm10, %v1909_v36, %v4349_v52  ;;  %v2522_v57 = vmul.f32 %v6979_v32, %v6979_v32  ;;  %v2555_v9 = vmul.f32 %v6980_v22, %v6980_v22  ;;  %v6985_v14 = vld [vmem:[#allocation11_spill] sm:$0xff]  ;;  %v6986_v52 = vld [vmem:[#allocation42_spill] sm:$0xff]  ;;  %v6988_v36 = vld [vmem:[#allocation40_spill] sm:$0xff] }
 0x2d4   :  { %4092 = vmatprep.mubr.msk.bf16.mxu0 %vm2371_vm11, %v2324_v23  ;;  %v2325_v63 = vpack.c.bf16 %v1914_v34, %v1913_v35  ;;  %v2700_v54 = vsel %vm1065_vm3, %v2554_v5, 0.0  ;;  %v2523_v28 = vmul.f32 %v6981_v37, %v6981_v37  ;;  %v2556_v56 = vmul.f32 %v6982_v8, %v6982_v8  ;;  %v6989_v34 = vld [vmem:[#allocation9_spill] sm:$0xff] }
 0x2d5   :  { %v2604_v15 = vsel %vm1065_vm3, %v2522_v57, 0.0  ;;  %v2703_v44 = vsel %vm1065_vm3, %v2555_v9, 0.0  ;;  %v2524_v6 = vmul.f32 %v6983_v11, %v6983_v11  ;;  %v2557_v7 = vmul.f32 %v6984_v17, %v6984_v17 }
 0x2d6   :  { %2689 = vadd.xlane.f32.xlu0 %v2688_v55  ;;  %v2607_v62 = vsel %vm1065_vm3, %v2523_v28, 0.0  ;;  %v2706_v25 = vsel %vm1065_vm3, %v2556_v56, 0.0  ;;  %v2525_v31 = vmul.f32 %v6985_v14, %v6985_v14  ;;  %v2558_v23 = vmul.f32 %v6986_v52, %v6986_v52 }
 0x2d7   :  { %2593 = vadd.xlane.f32.xlu1 %v2592_v12  ;;  %v2610_v46 = vsel %vm1065_vm3, %v2524_v6, 0.0  ;;  %v2709_v13 = vsel %vm1065_vm3, %v2557_v7, 0.0  ;;  %v2526_v42 = vmul.f32 %v6987_v16, %v6987_v16  ;;  %v2559_v55 = vmul.f32 %v6988_v36, %v6988_v36 }
 0x2d8   :  { %v2613_v3 = vsel %vm1065_vm3, %v2525_v31, 0.0  ;;  %v2712_v51 = vsel %vm1065_vm3, %v2558_v23, 0.0  ;;  %v2527_v35 = vmul.f32 %v6989_v34, %v6989_v34  ;;  %v2562_v6 = vmul.f32 %v5602_v45, %v5602_v45 }
 0x2d9   :  { %v6170_v61 = vpop.permute.xlu0 %4362  ;;  %v2616_v20 = vsel %vm1065_vm3, %v2526_v42, 0.0  ;;  %v2563_v31 = vmul.f32 %v5594_v30, %v5594_v30 }
 0x2da   :  { %2692 = vadd.xlane.f32.xlu0 %v2691_v43  ;;  %v2715_v43 = vsel %vm1065_vm3, %v2559_v55, 0.0 }
 0x2db   :  { %4093 = vmatmul.mubr.msk.bf16.gmra.mxu0 %vm2371_vm11, %v2325_v63  ;;  %2596 = vadd.xlane.f32.xlu1 %v2595_v50  ;;  %v6990_v63 = vld [vmem:[#allocation41_spill] sm:$0xff]  ;;  %v2619_v50 = vsel %vm1065_vm3, %v2527_v35, 0.0 }
 0x2dc   :  { %v2560_v60 = vmul.f32 %v6990_v63, %v6990_v63 }
 0x2dd   :  { %v6178_v12 = vpop.permute.xlu1 %4367 }
 0x2de   :  { %2695 = vadd.xlane.f32.xlu0 %v2694_v10  ;;  %v2528_v10 = vmul.f32 %v6991_v59, %v6991_v59  ;;  %v2718_v21 = vsel %vm1065_vm3, %v2560_v60, 0.0  ;;  %v2565_v60 = vmul.f32 %v5574_v24, %v5574_v24 }
 0x2df   :  { %2599 = vadd.xlane.f32.xlu1 %v2598_v49 }
 0x2e0   :  { %v2622_v5 = vsel %vm1065_vm3, %v2528_v10, 0.0  ;;  %v4364_v10 = vunpack.i.l.bf16 %v6170_v61 }
 0x2e1   :  { %v6180_v40 = vpop.permute.xlu0 %4372 }
 0x2e2   :  { %2698 = vadd.xlane.f32.xlu0 %v2697_v27  ;;  %v2561_v27 = vmul.f32 %v5608_v2, %v5608_v2 }
 0x2e3   :  { %2602 = vadd.xlane.f32.xlu1 %v2601_v0  ;;  %v6992_v0 = vld [vmem:[#allocation39_spill] sm:$0xff] }
 0x2e4   :  { %v2529_v57 = vmul.f32 %v6992_v0, %v6992_v0 }
 0x2e5   :  { %v6188_v47 = vpop.permute.xlu1 %4377 }
 0x2e6   :  { %2701 = vadd.xlane.f32.xlu0 %v2700_v54 }
 0x2e7   :  { %2605 = vadd.xlane.f32.xlu1 %v2604_v15  ;;  %v6993_v15 = vld [vmem:[#allocation37_spill] sm:$0xff] }
 0x2e8   :  { %v2531_v28 = vmul.f32 %v6993_v15, %v6993_v15 }
 0x2e9   :  { %v6190_v49 = vpop.permute.xlu0 %4382 }
 0x2ea   :  { %2704 = vadd.xlane.f32.xlu0 %v2703_v44  ;;  %v6994_v44 = vld [vmem:[#allocation36_spill] sm:$0xff]  ;;  %v2631_v35 = vsel %vm1065_vm3, %v2531_v28, 0.0 }
 0x2eb   :  { %2608 = vadd.xlane.f32.xlu1 %v2607_v62  ;;  %v2532_v56 = vmul.f32 %v6994_v44, %v6994_v44  ;;  %v2721_v62 = vsel %vm1065_vm3, %v2561_v27, 0.0 }
 0x2ed   :  { %v6198_v54 = vpop.permute.xlu1 %4387 }
 0x2ee   :  { %2707 = vadd.xlane.f32.xlu0 %v2706_v25  ;;  %v6995_v25 = vld [vmem:[#allocation38_spill] sm:$0xff]  ;;  %v4389_v24 = vunpack.i.l.bf16 %v6198_v54 }
 0x2ef   :  { %2611 = vadd.xlane.f32.xlu1 %v2610_v46  ;;  %v2530_v7 = vmul.f32 %v6995_v25, %v6995_v25  ;;  %v2625_v46 = vsel %vm1065_vm3, %v2529_v57, 0.0 }
 0x2f1   :  { %v6200_v9 = vpop.permute.xlu0 %4392  ;;  %v2628_v27 = vsel %vm1065_vm3, %v2530_v7, 0.0  ;;  %v6248_v7 = vmul.f32 %v5558_v38, %v5558_v38  ;;  %v4379_v38 = vunpack.i.l.bf16 %v6188_v47 }
 0x2f2   :  { %2710 = vadd.xlane.f32.xlu0 %v2709_v13  ;;  %v6996_v13 = vld [vmem:[#allocation35_spill] sm:$0xff] }
 0x2f3   :  { %2614 = vadd.xlane.f32.xlu1 %v2613_v3  ;;  %v2533_v23 = vmul.f32 %v6996_v13, %v6996_v13  ;;  %v6997_v3 = vld [vmem:[#allocation34_spill] sm:$0xff]  ;;  %v4384_v13 = vunpack.i.l.bf16 %v6190_v49 }
 0x2f4   :  { %v2534_v42 = vmul.f32 %v6997_v3, %v6997_v3  ;;  %v6257_v3 = vmul.f32 %v5566_v1, %v5566_v1 }
 0x2f5   :  { %v6220_v55 = vpop.permute.xlu1 %4397  ;;  %v6234_v57 = vsel %vm1065_vm3, %v2533_v23, 0.0  ;;  %v4374_v23 = vunpack.i.l.bf16 %v6180_v40 }
 0x2f6   :  { %2713 = vadd.xlane.f32.xlu0 %v2712_v51  ;;  %v2564_v51 = vmul.f32 %v5586_v41, %v5586_v41  ;;  %v6237_v28 = vsel %vm1065_vm3, %v2534_v42, 0.0 }
 0x2f7   :  { %2617 = vadd.xlane.f32.xlu1 %v2616_v20 }
 0x2f9   :  { %v6222_v20 = vpop.permute.xlu0 %4402 }
 0x2fa   :  { %2716 = vadd.xlane.f32.xlu0 %v2715_v43  ;;  %v2634_v43 = vsel %vm1065_vm3, %v2532_v56, 0.0  ;;  %v6998_v56 = vld [vmem:[#allocation33_spill] sm:$0xff]  ;;  %v4405_v44 = vunpack.i.h.bf16 %v6222_v20 }
 0x2fb   :  { %2620 = vadd.xlane.f32.xlu1 %v2619_v50  ;;  %v4365_v50 = vunpack.i.h.bf16 %v6170_v61  ;;  %v4369_v61 = vunpack.i.l.bf16 %v6178_v12 }
 0x2fd   :  { %v6252_v42 = vpop.permute.xlu1 %4407 }
 0x2fe   :  { %2719 = vadd.xlane.f32.xlu0 %v2718_v21  ;;  %v2724_v21 = vsel %vm1065_vm3, %v2562_v6, 0.0  ;;  %v2730_v6 = vsel %vm1065_vm3, %v2564_v51, 0.0  ;;  %v2288_v51 = vsel %vm1065_vm3, %v5779_v58, %v4364_v10  ;;  %v4395_v58 = vunpack.i.h.bf16 %v6200_v9 }
 0x2ff   :  { %2623 = vadd.xlane.f32.xlu1 %v2622_v5  ;;  %v2727_v5 = vsel %vm1065_vm3, %v2563_v31, 0.0  ;;  %v4375_v31 = vunpack.i.h.bf16 %v6180_v40  ;;  %v4385_v40 = vunpack.i.h.bf16 %v6190_v49  ;;  %v4394_v10 = vunpack.i.l.bf16 %v6200_v9 }
 0x300   :  { %v2292_v49 = vsel %vm1070_vm4, %v2288_v51, %v4374_v23 }
 0x301   :  { %v2296_v9 = vsel %vm1075_vm5, %v2292_v49, %v4384_v13 }
 0x302   :  { %2722 = vadd.xlane.f32.xlu0 %v2721_v62  ;;  %v6241_v62 = vmul.f32 %v6998_v56, %v6998_v56  ;;  %v2733_v56 = vsel %vm1065_vm3, %v2565_v60, 0.0  ;;  %v4390_v60 = vunpack.i.h.bf16 %v6198_v54  ;;  %v4404_v54 = vunpack.i.l.bf16 %v6222_v20 }
 0x303   :  { %2626 = vadd.xlane.f32.xlu1 %v2625_v46  ;;  %v4370_v46 = vunpack.i.h.bf16 %v6178_v12  ;;  %v2289_v12 = vsel %vm1065_vm3, %v5776_v18, %v4365_v50  ;;  %v6999_v18 = vld [vmem:[#allocation69_spill] sm:$0xff]  ;;  %v2300_v20 = vsel %vm1080_vm6, %v2296_v9, %v4394_v10 }
 0x304   :  { %v2290_v50 = vsel %vm1065_vm3, %v6999_v18, %v4369_v61  ;;  %v2304_v13 = vsel %vm1085_vm7, %v2300_v20, %v4404_v54 }
 0x305   :  { %v2291_v1 = vsel %vm1065_vm3, %v5781_v48, %v4370_v46  ;;  %v2294_v46 = vsel %vm1070_vm4, %v2290_v50, %v4379_v38  ;;  %v4400_v38 = vunpack.i.h.bf16 %v6220_v55 }
 0x306   :  { %2725 = vadd.xlane.f32.xlu0 %v2724_v21  ;;  %v4413_v21 = vpop.permute.xlu0 %4412 }
 0x307   :  { %2629 = vadd.xlane.f32.xlu1 %v2628_v27  ;;  %v4380_v27 = vunpack.i.h.bf16 %v6188_v47  ;;  %v2293_v47 = vsel %vm1070_vm4, %v2289_v12, %v4375_v31  ;;  %v4415_v61 = vunpack.i.h.bf16 %v4413_v21  ;;  %v4414_v18 = vunpack.i.l.bf16 %v4413_v21 }
 0x308   :  { %v2297_v15 = vsel %vm1075_vm5, %v2293_v47, %v4385_v40  ;;  %v2298_v31 = vsel %vm1075_vm5, %v2294_v46, %v4389_v24  ;;  %v4410_v40 = vunpack.i.h.bf16 %v6252_v42  ;;  %v4409_v24 = vunpack.i.l.bf16 %v6252_v42 }
 0x309   :  { %v2295_v48 = vsel %vm1070_vm4, %v2291_v1, %v4380_v27  ;;  %v2301_v23 = vsel %vm1080_vm6, %v2297_v15, %v4395_v58  ;;  %v4399_v1 = vunpack.i.l.bf16 %v6220_v55 }
 0x30a   :  { %2728 = vadd.xlane.f32.xlu0 %v2727_v5  ;;  %v4418_v5 = vpop.permute.xlu1 %4417  ;;  %v4423_v41 = vpop.permute.xlu0 %4422  ;;  %v2305_v21 = vsel %vm1085_vm7, %v2301_v23, %v4405_v44 }
 0x30b   :  { %2632 = vadd.xlane.f32.xlu1 %v2631_v35  ;;  %v2299_v35 = vsel %vm1075_vm5, %v2295_v48, %v4390_v60  ;;  %v4425_v12 = vunpack.i.h.bf16 %v4423_v41  ;;  %v4424_v51 = vunpack.i.l.bf16 %v4423_v41  ;;  %v2309_v15 = vsel %vm1090_vm8, %v2305_v21, %v4415_v61 }
 0x30c   :  { %v4420_v41 = vunpack.i.h.bf16 %v4418_v5  ;;  %v2303_v42 = vsel %vm1080_vm6, %v2299_v35, %v4400_v38  ;;  %v2302_v49 = vsel %vm1080_vm6, %v2298_v31, %v4399_v1  ;;  %v2739_v38 = vsel %vm1065_vm3, %v6248_v7, 0.0  ;;  %v7000_v1 = vld [vmem:[#allocation64_spill] sm:$0xff] }
 0x30d   :  { %v2313_v55 = vsel %vm1095_vm9, %v2309_v15, %v4425_v12  ;;  %v2568_v21 = vmul.f32 %v7000_v1, %v7000_v1 }
 0x30e   :  { %2731 = vadd.xlane.f32.xlu0 %v2730_v6  ;;  %v4428_v27 = vpop.permute.xlu1 %4427  ;;  %v2308_v6 = vsel %vm1090_vm8, %v2304_v13, %v4414_v18  ;;  %v2736_v18 = vsel %vm1065_vm3, %v6257_v3, 0.0  ;;  %v2643_v13 = vsel %vm1065_vm3, %v6241_v62, 0.0 }
 0x30f   :  { %2635 = vadd.xlane.f32.xlu1 %v2634_v43  ;;  %v4419_v43 = vunpack.i.l.bf16 %v4418_v5  ;;  %v2312_v44 = vsel %vm1095_vm9, %v2308_v6, %v4424_v51  ;;  %v4430_v10 = vunpack.i.h.bf16 %v4428_v27  ;;  %v4429_v47 = vunpack.i.l.bf16 %v4428_v27  ;;  %v7001_v27 = vld [vmem:[#allocation32_spill] sm:$0xff]  ;;  %v7003_v6 = vld [vmem:[#allocation31_spill] sm:$0xff] }
 0x310   :  { %v2307_v5 = vsel %vm1085_vm7, %v2303_v42, %v4410_v40  ;;  %v2536_v40 = vmul.f32 %v7001_v27, %v7001_v27 }
 0x311   :  { %v4433_v60 = vpop.permute.xlu0 %4432  ;;  %v2311_v9 = vsel %vm1090_vm8, %v2307_v5, %v4420_v41  ;;  %v7004_v41 = vld [vmem:[#allocation62_spill] sm:$0xff]  ;;  %v7008_v5 = vld [vmem:[#allocation60_spill] sm:$0xff] }
 0x312   :  { %v4435_v50 = vunpack.i.h.bf16 %v4433_v60  ;;  %v4434_v58 = vunpack.i.l.bf16 %v4433_v60  ;;  %2734 = vadd.xlane.f32.xlu0 %v2733_v56  ;;  %v2306_v56 = vsel %vm1085_vm7, %v2302_v49, %v4409_v24  ;;  %v2315_v31 = vsel %vm1095_vm9, %v2311_v9, %v4430_v10  ;;  %v7002_v24 = vld [vmem:[#allocation63_spill] sm:$0xff]  ;;  %v7006_v10 = vld [vmem:[#allocation61_spill] sm:$0xff] }
 0x313   :  { %2638 = vadd.xlane.f32.xlu1 %v6234_v57  ;;  %v2310_v57 = vsel %vm1090_vm8, %v2306_v56, %v4419_v43  ;;  %v2569_v15 = vmul.f32 %v7002_v24, %v7002_v24  ;;  %v2646_v7 = vsel %vm1065_vm3, %v2536_v40, 0.0  ;;  %v2537_v60 = vmul.f32 %v7003_v6, %v7003_v6  ;;  %v7007_v49 = vld [vmem:[#allocation29_spill] sm:$0xff] }
 0x314   :  { %v2317_v54 = vsel %vm1100_vm10, %v2313_v55, %v4435_v50  ;;  %v2316_v48 = vsel %vm1100_vm10, %v2312_v44, %v4434_v58  ;;  %v2314_v20 = vsel %vm1095_vm9, %v2310_v57, %v4429_v47  ;;  %v2570_v43 = vmul.f32 %v7004_v41, %v7004_v41  ;;  %v7005_v58 = vld [vmem:[#allocation30_spill] sm:$0xff]  ;;  %v7010_v57 = vld [vmem:[#allocation59_spill] sm:$0xff] }
 0x315   :  { %v2326_v46 = vpack.c.bf16 %v2317_v54, %v2316_v48  ;;  %v4438_v61 = vpop.permute.xlu1 %4437  ;;  %v2745_v62 = vsel %vm1065_vm3, %v2569_v15, 0.0  ;;  %v2649_v50 = vsel %vm1065_vm3, %v2537_v60, 0.0  ;;  %v2538_v55 = vmul.f32 %v7005_v58, %v7005_v58  ;;  %v7015_v60 = vld [vmem:[#allocation24_spill] sm:$0xff] }
 0x316   :  { %v4440_v35 = vunpack.i.h.bf16 %v4438_v61  ;;  %v4439_v23 = vunpack.i.l.bf16 %v4438_v61  ;;  %2737 = vadd.xlane.f32.xlu0 %v2736_v18  ;;  %v2748_v44 = vsel %vm1065_vm3, %v2570_v43, 0.0  ;;  %v2571_v47 = vmul.f32 %v7006_v10, %v7006_v10  ;;  %v7009_v61 = vld [vmem:[#allocation28_spill] sm:$0xff] }
 0x317   :  { %4096 = vmatprep.mubr.msk.bf16.mxu0 %vm2371_vm11, %v2326_v46  ;;  %2641 = vadd.xlane.f32.xlu1 %v6237_v28  ;;  %v2742_v28 = vsel %vm1065_vm3, %v2568_v21, 0.0  ;;  %v2652_v42 = vsel %vm1065_vm3, %v2538_v55, 0.0  ;;  %v2539_v54 = vmul.f32 %v7007_v49, %v7007_v49  ;;  %v2572_v56 = vmul.f32 %v7008_v5, %v7008_v5  ;;  %v7013_v21 = vld [vmem:[#allocation26_spill] sm:$0xff] }
 0x318   :  { %v2319_v12 = vsel %vm1100_vm10, %v2315_v31, %v4440_v35  ;;  %v2318_v51 = vsel %vm1100_vm10, %v2314_v20, %v4439_v23  ;;  %v2751_v48 = vsel %vm1065_vm3, %v2571_v47, 0.0  ;;  %v2540_v18 = vmul.f32 %v7009_v61, %v7009_v61  ;;  %v7011_v31 = vld [vmem:[#allocation27_spill] sm:$0xff]  ;;  %v6370_v47 = vld [vmem:[%s6772_s9] ss:$0 sm:$0xff] }
 0x319   :  { %v2327_v3 = vpack.c.bf16 %v2319_v12, %v2318_v51  ;;  %v2655_v46 = vsel %vm1065_vm3, %v2539_v54, 0.0  ;;  %v2754_v9 = vsel %vm1065_vm3, %v2572_v56, 0.0  ;;  %v2573_v35 = vmul.f32 %v7010_v57, %v7010_v57  ;;  %v7012_v51 = vld [vmem:[#allocation58_spill] sm:$0xff] }
 0x31a   :  { %2740 = vadd.xlane.f32.xlu0 %v2739_v38  ;;  %v2658_v23 = vsel %vm1065_vm3, %v2540_v18, 0.0  ;;  %v2541_v20 = vmul.f32 %v7011_v31, %v7011_v31 }
 0x31b   :  { %2644 = vadd.xlane.f32.xlu1 %v2643_v13  ;;  %4097 = vmatmul.mubr.msk.bf16.gmra.mxu0 %vm2371_vm11, %v2327_v3  ;;  %v2757_v12 = vsel %vm1065_vm3, %v2573_v35, 0.0  ;;  %v2574_v3 = vmul.f32 %v7012_v51, %v7012_v51  ;;  %v2542_v13 = vmul.f32 %v7013_v21, %v7013_v21 }
 0x31c   :  { %v2661_v38 = vsel %vm1065_vm3, %v2541_v20, 0.0 }
 0x31d   :  { %v2760_v40 = vsel %vm1065_vm3, %v2574_v3, 0.0 }
 0x31e   :  { %2743 = vadd.xlane.f32.xlu0 %v2742_v28  ;;  %v7014_v28 = vld [vmem:[#allocation57_spill] sm:$0xff] }
 0x31f   :  { %2647 = vadd.xlane.f32.xlu1 %v2646_v7  ;;  %v2575_v15 = vmul.f32 %v7014_v28, %v7014_v28  ;;  %v2664_v7 = vsel %vm1065_vm3, %v2542_v13, 0.0 }
 0x321   :  { %v2763_v43 = vsel %vm1065_vm3, %v2575_v15, 0.0 }
 0x322   :  { %2746 = vadd.xlane.f32.xlu0 %v2745_v62  ;;  %v2543_v62 = vmul.f32 %v7015_v60, %v7015_v60 }
 0x323   :  { %2650 = vadd.xlane.f32.xlu1 %v2649_v50 }
 0x324   :  { %v2667_v50 = vsel %vm1065_vm3, %v2543_v62, 0.0 }
 0x326   :  { %2749 = vadd.xlane.f32.xlu0 %v2748_v44 }
 0x327   :  { %2653 = vadd.xlane.f32.xlu1 %v2652_v42 }
 0x32a   :  { %2752 = vadd.xlane.f32.xlu0 %v2751_v48 }
 0x32b   :  { %2656 = vadd.xlane.f32.xlu1 %v2655_v46 }
 0x32e   :  { %2755 = vadd.xlane.f32.xlu0 %v2754_v9 }
 0x32f   :  { %2659 = vadd.xlane.f32.xlu1 %v2658_v23 }
 0x332   :  { %2758 = vadd.xlane.f32.xlu0 %v2757_v12 }
 0x333   :  { %2662 = vadd.xlane.f32.xlu1 %v2661_v38 }
 0x336   :  { %2761 = vadd.xlane.f32.xlu0 %v2760_v40 }
 0x337   :  { %2665 = vadd.xlane.f32.xlu1 %v2664_v7 }
 0x33a   :  { %2764 = vadd.xlane.f32.xlu0 %v2763_v43 }
 0x33b   :  { %2668 = vadd.xlane.f32.xlu1 %v2667_v50 }
 0x347   :  { %v2579_v55 = vpop.xlane.xlu0 %2578 }
 0x348   :  { %v2769_v44 = vadd.f32 1e-10, %v2579_v55 }
 0x34a   :  { %4447 = vrsqrt.f32 %v2769_v44 }
 0x34b   :  { %v4086_v42 = vpop.f32.mrf.mxu0  ;;  %v2675_v54 = vpop.xlane.xlu0 %2674 }
 0x34c   :  { %v2442_v48 = vadd.f32 %v4086_v42, %v6370_v47  ;;  %v2801_v56 = vadd.f32 1e-10, %v2675_v54 }
 0x34d   :  { %v2433_v46 = vpop.f32.mrf.mxu0 }
 0x34e   :  { %v6373_v18 = vmax.f32 %v2442_v48, 0.0  ;;  %4449 = vrsqrt.f32 %v2801_v56  ;;  %v2434_v9 = vadd.f32 %v6370_v47, %v2433_v46 }
 0x34f   :  { %v4087_v35 = vpop.f32.mrf.mxu0  ;;  %v2678_v23 = vpop.xlane.xlu0 %2677 }
 0x350   :  { %7016 = vst [vmem:[#allocation49_spill] sm:$0xff] %v6373_v18  ;;  %v3141_v20 = vmul.f32 %v6373_v18, %v6373_v18  ;;  %v6378_v12 = vmax.f32 %v2434_v9, 0.0  ;;  %v2445_v3 = vadd.f32 %v4087_v35, %v6370_v47  ;;  %v2802_v38 = vadd.f32 1e-10, %v2678_v23  ;;  %v2582_v13 = vpop.xlane.xlu1 %2581 }
 0x351   :  { %v2770_v40 = vadd.f32 1e-10, %v2582_v13  ;;  %v2436_v15 = vpop.f32.mrf.mxu0 }
 0x352   :  { %7017 = vst [vmem:[#allocation17_spill] sm:$0xff] %v6378_v12  ;;  %4451 = vrsqrt.f32 %v2802_v38  ;;  %v2437_v7 = vadd.f32 %v6370_v47, %v2436_v15  ;;  %v3139_v62 = vmul.f32 %v6378_v12, %v6378_v12  ;;  %v6384_v43 = vmax.f32 %v2445_v3, 0.0 }
 0x353   :  { %4453 = vrsqrt.f32 %v2770_v40  ;;  %v2681_v50 = vpop.xlane.xlu0 %2680  ;;  %v3161_v55 = vsel %vm1070_vm4, %v3141_v20, 0.0 }
 0x354   :  { %7018 = vst [vmem:[#allocation48_spill] sm:$0xff] %v6384_v43  ;;  %v6387_v44 = vmax.f32 %v2437_v7, 0.0  ;;  %v2803_v42 = vadd.f32 1e-10, %v2681_v50  ;;  %3162 = vadd.xlane.f32.xlu1 %v3161_v55  ;;  %v2585_v54 = vpop.xlane.xlu1 %2584  ;;  %v3142_v46 = vmul.f32 %v6384_v43, %v6384_v43  ;;  %v3155_v35 = vsel %vm1070_vm4, %v3139_v62, 0.0  ;;  %v7020_v50 = vld [vmem:[#allocation23_spill] sm:$0xff] }
 0x355   :  { %v2771_v48 = vadd.f32 1e-10, %v2585_v54  ;;  %v7022_v43 = vld [vmem:[#allocation54_spill] sm:$0xff] }
 0x356   :  { %7019 = vst [vmem:[#allocation16_spill] sm:$0xff] %v6387_v44  ;;  %v3140_v56 = vmul.f32 %v6387_v44, %v6387_v44  ;;  %4455 = vrsqrt.f32 %v2803_v42  ;;  %v3164_v7 = vsel %vm1070_vm4, %v3142_v46, 0.0  ;;  %v7021_v42 = vld [vmem:[#allocation55_spill] sm:$0xff]  ;;  %v6402_v46 = vld [vmem:[%s6773_s10] ss:$0 sm:$0xff] }
 0x357   :  { %4457 = vrsqrt.f32 %v2771_v48  ;;  %v2684_v9 = vpop.xlane.xlu0 %2683  ;;  %v4448_v38 = vpop.eup %4447 }
 0x358   :  { %v2804_v23 = vadd.f32 1e-10, %v2684_v9  ;;  %3156 = vadd.xlane.f32.xlu1 %v3155_v35  ;;  %v2588_v20 = vpop.xlane.xlu1 %2587  ;;  %v3158_v3 = vsel %vm1070_vm4, %v3140_v56, 0.0  ;;  %v2897_v55 = vmul.f32 %v4448_v38, %v7020_v50  ;;  %v7023_v38 = vld [vmem:[#allocation22_spill] sm:$0xff] }
 0x359   :  { %v2772_v13 = vadd.f32 1e-10, %v2588_v20  ;;  %3159 = vadd.xlane.f32.xlu0 %v3158_v3 }
 0x35a   :  { %4459 = vrsqrt.f32 %v2804_v23 }
 0x35b   :  { %v4450_v40 = vpop.eup %4449  ;;  %4461 = vrsqrt.f32 %v2772_v13  ;;  %v2687_v15 = vpop.xlane.xlu0 %2686 }
 0x35c   :  { %v2929_v54 = vmul.f32 %v4450_v40, %v7021_v42  ;;  %v2805_v48 = vadd.f32 1e-10, %v2687_v15  ;;  %3165 = vadd.xlane.f32.xlu1 %v3164_v7  ;;  %v2591_v62 = vpop.xlane.xlu1 %2590 }
 0x35d   :  { %v2773_v9 = vadd.f32 1e-10, %v2591_v62 }
 0x35e   :  { %v2961_v35 = vsub.f32 %v2897_v55, %v2929_v54  ;;  %4463 = vrsqrt.f32 %v2805_v48  ;;  %v7024_v48 = vld [vmem:[#allocation53_spill] sm:$0xff] }
 0x35f   :  { %v4452_v56 = vpop.eup %4451  ;;  %4465 = vrsqrt.f32 %v2773_v9  ;;  %v2690_v20 = vpop.xlane.xlu0 %2689 }
 0x360   :  { %v4454_v3 = vpop.eup %4453  ;;  %v2993_v23 = vmul.f32 %v2961_v35, %v2961_v35  ;;  %v2930_v13 = vmul.f32 %v4452_v56, %v7022_v43  ;;  %v2806_v44 = vadd.f32 1e-10, %v2690_v20  ;;  %v2594_v18 = vpop.xlane.xlu1 %2593  ;;  %v7025_v56 = vld [vmem:[#allocation21_spill] sm:$0xff] }
 0x361   :  { %v2898_v40 = vmul.f32 %v4454_v3, %v7023_v38  ;;  %v2774_v15 = vadd.f32 1e-10, %v2594_v18 }
 0x362   :  { %4467 = vrsqrt.f32 %v2806_v44  ;;  %v3031_v54 = vmul.f32 %v6402_v46, %v2993_v23 }
 0x363   :  { %v4456_v7 = vpop.eup %4455  ;;  %v2962_v50 = vsub.f32 %v2898_v40, %v2930_v13  ;;  %4469 = vrsqrt.f32 %v2774_v15  ;;  %v2693_v55 = vpop.xlane.xlu0 %2692  ;;  %v7026_v40 = vld [vmem:[#allocation52_spill] sm:$0xff] }
 0x364   :  { %v4458_v42 = vpop.eup %4457  ;;  %v2931_v43 = vmul.f32 %v4456_v7, %v7024_v48  ;;  %v2807_v62 = vadd.f32 1e-10, %v2693_v55  ;;  %v2597_v9 = vpop.xlane.xlu1 %2596  ;;  %v3063_v38 = vsel %vm1065_vm3, %v3031_v54, 0.0  ;;  %v7027_v48 = vld [vmem:[#allocation20_spill] sm:$0xff]  ;;  %v7028_v54 = vld [vmem:[#allocation51_spill] sm:$0xff] }
 0x365   :  { %v2994_v35 = vmul.f32 %v2962_v50, %v2962_v50  ;;  %v2899_v20 = vmul.f32 %v4458_v42, %v7025_v56  ;;  %v2775_v12 = vadd.f32 1e-10, %v2597_v9 }
 0x366   :  { %4471 = vrsqrt.f32 %v2807_v62 }
 0x367   :  { %v4460_v28 = vpop.eup %4459  ;;  %v3032_v18 = vmul.f32 %v6402_v46, %v2994_v35  ;;  %v2963_v44 = vsub.f32 %v2899_v20, %v2931_v43  ;;  %4473 = vrsqrt.f32 %v2775_v12  ;;  %v2696_v3 = vpop.xlane.xlu0 %2695 }
 0x368   :  { %v4462_v13 = vpop.eup %4461  ;;  %v2932_v23 = vmul.f32 %v4460_v28, %v7026_v40  ;;  %v2808_v15 = vadd.f32 1e-10, %v2696_v3  ;;  %v2600_v7 = vpop.xlane.xlu1 %2599 }
 0x369   :  { %v3064_v55 = vsel %vm1065_vm3, %v3032_v18, 0.0  ;;  %v2995_v50 = vmul.f32 %v2963_v44, %v2963_v44  ;;  %v2900_v42 = vmul.f32 %v4462_v13, %v7027_v48  ;;  %v2776_v9 = vadd.f32 1e-10, %v2600_v7  ;;  %v7029_v44 = vld [vmem:[#allocation19_spill] sm:$0xff]  ;;  %v7030_v48 = vld [vmem:[#allocation50_spill] sm:$0xff] }
 0x36a   :  { %v3065_v62 = vadd.f32 %v3064_v55, %v3063_v38  ;;  %4475 = vrsqrt.f32 %v2808_v15 }
 0x36b   :  { %v4464_v56 = vpop.eup %4463  ;;  %v3033_v43 = vmul.f32 %v6402_v46, %v2995_v50  ;;  %v2964_v12 = vsub.f32 %v2900_v42, %v2932_v23  ;;  %4477 = vrsqrt.f32 %v2776_v9  ;;  %v2699_v35 = vpop.xlane.xlu0 %2698 }
 0x36c   :  { %v4466_v20 = vpop.eup %4465  ;;  %v2933_v60 = vmul.f32 %v4464_v56, %v7028_v54  ;;  %v2809_v28 = vadd.f32 1e-10, %v2699_v35  ;;  %v2603_v3 = vpop.xlane.xlu1 %2602 }
 0x36d   :  { %v3066_v40 = vsel %vm1065_vm3, %v3033_v43, 0.0  ;;  %v2996_v18 = vmul.f32 %v2964_v12, %v2964_v12  ;;  %v2901_v21 = vmul.f32 %v4466_v20, %v7029_v44  ;;  %v2777_v13 = vadd.f32 1e-10, %v2603_v3  ;;  %v7031_v12 = vld [vmem:[#allocation18_spill] sm:$0xff] }
 0x36e   :  { %v3067_v7 = vadd.f32 %v3066_v40, %v3065_v62  ;;  %4479 = vrsqrt.f32 %v2809_v28 }
 0x36f   :  { %v4468_v38 = vpop.eup %4467  ;;  %v3034_v15 = vmul.f32 %v6402_v46, %v2996_v18  ;;  %v2965_v55 = vsub.f32 %v2901_v21, %v2933_v60  ;;  %4481 = vrsqrt.f32 %v2777_v13  ;;  %v2702_v23 = vpop.xlane.xlu0 %2701 }
 0x370   :  { %v4470_v50 = vpop.eup %4469  ;;  %v2934_v42 = vmul.f32 %v4468_v38, %v7030_v48  ;;  %v2810_v9 = vadd.f32 1e-10, %v2702_v23  ;;  %v2606_v56 = vpop.xlane.xlu1 %2605 }
 0x371   :  { %v3068_v35 = vsel %vm1065_vm3, %v3034_v15, 0.0  ;;  %v2997_v43 = vmul.f32 %v2965_v55, %v2965_v55  ;;  %v2902_v54 = vmul.f32 %v4470_v50, %v7031_v12  ;;  %v2778_v20 = vadd.f32 1e-10, %v2606_v56 }
 0x372   :  { %v3069_v3 = vadd.f32 %v3068_v35, %v3067_v7  ;;  %4483 = vrsqrt.f32 %v2810_v9 }
 0x373   :  { %v4472_v62 = vpop.eup %4471  ;;  %v3035_v28 = vmul.f32 %v6402_v46, %v2997_v43  ;;  %v2966_v40 = vsub.f32 %v2902_v54, %v2934_v42  ;;  %4485 = vrsqrt.f32 %v2778_v20  ;;  %v2705_v21 = vpop.xlane.xlu0 %2704 }
 0x374   :  { %v4474_v60 = vpop.eup %4473  ;;  %v2935_v18 = vmul.f32 %v4472_v62, %v6972_v4  ;;  %v2811_v44 = vadd.f32 1e-10, %v2705_v21  ;;  %v2609_v13 = vpop.xlane.xlu1 %2608 }
 0x375   :  { %v3070_v38 = vsel %vm1065_vm3, %v3035_v28, 0.0  ;;  %v2998_v15 = vmul.f32 %v2966_v40, %v2966_v40  ;;  %v2903_v55 = vmul.f32 %v4474_v60, %v6973_v29  ;;  %v2779_v23 = vadd.f32 1e-10, %v2609_v13 }
 0x376   :  { %v3071_v50 = vadd.f32 %v3070_v38, %v3069_v3  ;;  %4487 = vrsqrt.f32 %v2811_v44 }
 0x377   :  { %v4476_v7 = vpop.eup %4475  ;;  %v3036_v48 = vmul.f32 %v6402_v46, %v2998_v15  ;;  %v2967_v9 = vsub.f32 %v2903_v55, %v2935_v18  ;;  %4489 = vrsqrt.f32 %v2779_v23  ;;  %v2708_v42 = vpop.xlane.xlu0 %2707 }
 0x378   :  { %v4478_v56 = vpop.eup %4477  ;;  %v2936_v35 = vmul.f32 %v4476_v7, %v6974_v19  ;;  %v2812_v4 = vadd.f32 1e-10, %v2708_v42  ;;  %v2612_v43 = vpop.xlane.xlu1 %2611 }
 0x379   :  { %v3072_v12 = vsel %vm1065_vm3, %v3036_v48, 0.0  ;;  %v2999_v54 = vmul.f32 %v2967_v9, %v2967_v9  ;;  %v2904_v20 = vmul.f32 %v4478_v56, %v6975_v33  ;;  %v2780_v29 = vadd.f32 1e-10, %v2612_v43 }
 0x37a   :  { %v3073_v62 = vadd.f32 %v3072_v12, %v3071_v50  ;;  %4491 = vrsqrt.f32 %v2812_v4 }
 0x37b   :  { %v4480_v3 = vpop.eup %4479  ;;  %v3037_v28 = vmul.f32 %v6402_v46, %v2999_v54  ;;  %v2968_v40 = vsub.f32 %v2904_v20, %v2936_v35  ;;  %4493 = vrsqrt.f32 %v2780_v29  ;;  %v2711_v21 = vpop.xlane.xlu0 %2710 }
 0x37c   :  { %v4482_v60 = vpop.eup %4481  ;;  %v2937_v18 = vmul.f32 %v4480_v3, %v6976_v26  ;;  %v2813_v19 = vadd.f32 1e-10, %v2711_v21  ;;  %v2615_v44 = vpop.xlane.xlu1 %2614 }
 0x37d   :  { %v3074_v13 = vsel %vm1065_vm3, %v3037_v28, 0.0  ;;  %v3000_v38 = vmul.f32 %v2968_v40, %v2968_v40  ;;  %v2905_v15 = vmul.f32 %v4482_v60, %v6977_v53  ;;  %v2781_v33 = vadd.f32 1e-10, %v2615_v44 }
 0x37e   :  { %v3075_v55 = vadd.f32 %v3074_v13, %v3073_v62  ;;  %4495 = vrsqrt.f32 %v2813_v19 }
 0x37f   :  { %v4484_v23 = vpop.eup %4483  ;;  %v3038_v50 = vmul.f32 %v6402_v46, %v3000_v38  ;;  %v2969_v7 = vsub.f32 %v2905_v15, %v2937_v18  ;;  %4497 = vrsqrt.f32 %v2781_v33  ;;  %v2714_v48 = vpop.xlane.xlu0 %2713 }
 0x380   :  { %v4486_v9 = vpop.eup %4485  ;;  %v2938_v42 = vmul.f32 %v4484_v23, %v6978_v39  ;;  %v2814_v26 = vadd.f32 1e-10, %v2714_v48  ;;  %v2618_v56 = vpop.xlane.xlu1 %2617 }
 0x381   :  { %v3076_v35 = vsel %vm1065_vm3, %v3038_v50, 0.0  ;;  %v3001_v4 = vmul.f32 %v2969_v7, %v2969_v7  ;;  %v2906_v43 = vmul.f32 %v4486_v9, %v6979_v32  ;;  %v2782_v53 = vadd.f32 1e-10, %v2618_v56 }
 0x382   :  { %v3077_v12 = vadd.f32 %v3076_v35, %v3075_v55  ;;  %4499 = vrsqrt.f32 %v2814_v26 }
 0x383   :  { %v4488_v54 = vpop.eup %4487  ;;  %v3039_v20 = vmul.f32 %v6402_v46, %v3001_v4  ;;  %v2970_v29 = vsub.f32 %v2906_v43, %v2938_v42  ;;  %4501 = vrsqrt.f32 %v2782_v53 }
 0x384   :  { %v4490_v62 = vpop.eup %4489  ;;  %v2939_v3 = vmul.f32 %v4488_v54, %v6980_v22 }
 0x385   :  { %v3078_v39 = vsel %vm1065_vm3, %v3039_v20, 0.0  ;;  %v3002_v28 = vmul.f32 %v2970_v29, %v2970_v29  ;;  %v2907_v40 = vmul.f32 %v4490_v62, %v6981_v37 }
 0x386   :  { %v3079_v21 = vadd.f32 %v3078_v39, %v3077_v12 }
 0x387   :  { %v4492_v60 = vpop.eup %4491  ;;  %v3040_v32 = vmul.f32 %v6402_v46, %v3002_v28  ;;  %v2971_v18 = vsub.f32 %v2907_v40, %v2939_v3 }
 0x388   :  { %v4494_v19 = vpop.eup %4493  ;;  %v2940_v44 = vmul.f32 %v4492_v60, %v6982_v8 }
 0x389   :  { %v3080_v13 = vsel %vm1065_vm3, %v3040_v32, 0.0  ;;  %v3003_v38 = vmul.f32 %v2971_v18, %v2971_v18  ;;  %v2908_v15 = vmul.f32 %v4494_v19, %v6983_v11 }
 0x38a   :  { %v3081_v33 = vadd.f32 %v3080_v13, %v3079_v21 }
 0x38b   :  { %v4496_v22 = vpop.eup %4495  ;;  %v3041_v55 = vmul.f32 %v6402_v46, %v3003_v38  ;;  %v2972_v23 = vsub.f32 %v2908_v15, %v2940_v44 }
 0x38c   :  { %v4498_v50 = vpop.eup %4497  ;;  %v2941_v37 = vmul.f32 %v4496_v22, %v6984_v17 }
 0x38d   :  { %v3082_v7 = vsel %vm1065_vm3, %v3041_v55, 0.0  ;;  %v3004_v48 = vmul.f32 %v2972_v23, %v2972_v23  ;;  %v2909_v9 = vmul.f32 %v4498_v50, %v6985_v14 }
 0x38e   :  { %v3083_v42 = vadd.f32 %v3082_v7, %v3081_v33 }
 0x38f   :  { %v4500_v8 = vpop.eup %4499  ;;  %v3042_v26 = vmul.f32 %v6402_v46, %v3004_v48  ;;  %v2973_v56 = vsub.f32 %v2909_v9, %v2941_v37 }
 0x390   :  { %v4502_v35 = vpop.eup %4501  ;;  %v2942_v11 = vmul.f32 %v4500_v8, %v6986_v52 }
 0x391   :  { %v3084_v4 = vsel %vm1065_vm3, %v3042_v26, 0.0  ;;  %v3005_v43 = vmul.f32 %v2973_v56, %v2973_v56  ;;  %v2910_v53 = vmul.f32 %v4502_v35, %v6987_v16 }
 0x392   :  { %v3085_v12 = vadd.f32 %v3084_v4, %v3083_v42  ;;  %v7036_v4 = vld [vmem:[#allocation56_spill] sm:$0xff] }
 0x393   :  { %v3043_v17 = vmul.f32 %v6402_v46, %v3005_v43  ;;  %v2974_v54 = vsub.f32 %v2910_v53, %v2942_v11  ;;  %v4090_v20 = vpop.f32.mrf.mxu0  ;;  %v2576_v43 = vmul.f32 %v7036_v4, %v7036_v4 }
 0x394   :  { %v2458_v23 = vadd.f32 %v4090_v20, %v6370_v47 }
 0x395   :  { %v3086_v14 = vsel %vm1065_vm3, %v3043_v17, 0.0  ;;  %v3006_v29 = vmul.f32 %v2974_v54, %v2974_v54  ;;  %v2449_v62 = vpop.f32.mrf.mxu0 }
 0x396   :  { %v3087_v3 = vadd.f32 %v3086_v14, %v3085_v12  ;;  %v2450_v39 = vadd.f32 %v6370_v47, %v2449_v62  ;;  %v6482_v8 = vmax.f32 %v2458_v23, 0.0  ;;  %v2766_v14 = vsel %vm1065_vm3, %v2576_v43, 0.0 }
 0x397   :  { %v3044_v28 = vmul.f32 %v6402_v46, %v3006_v29  ;;  %v4091_v52 = vpop.f32.mrf.mxu0 }
 0x398   :  { %v6457_v40 = vmax.f32 %v2450_v39, 0.0  ;;  %7034 = vst [vmem:[#allocation46_spill] sm:$0xff] %v6482_v8  ;;  %v3145_v12 = vmul.f32 %v6482_v8, %v6482_v8  ;;  %v2461_v17 = vadd.f32 %v4091_v52, %v6370_v47 }
 0x399   :  { %v3088_v21 = vsel %vm1065_vm3, %v3044_v28, 0.0  ;;  %v2452_v16 = vpop.f32.mrf.mxu0 }
 0x39a   :  { %7032 = vst [vmem:[#allocation47_spill] sm:$0xff] %v6457_v40  ;;  %v6460_v60 = vadd.f32 %v3088_v21, %v3087_v3  ;;  %v2453_v32 = vadd.f32 %v6370_v47, %v2452_v16  ;;  %v3143_v19 = vmul.f32 %v6457_v40, %v6457_v40  ;;  %v6500_v29 = vmax.f32 %v2461_v17, 0.0  ;;  %v7038_v3 = vld [vmem:[#allocation25_spill] sm:$0xff] }
 0x39b   :  { %v4094_v18 = vpop.f32.mrf.mxu0  ;;  %v3173_v62 = vsel %vm1070_vm4, %v3145_v12, 0.0  ;;  %v2544_v39 = vmul.f32 %v7038_v3, %v7038_v3 }
 0x39c   :  { %v2474_v44 = vadd.f32 %v4094_v18, %v6370_v47  ;;  %v6466_v38 = vmax.f32 %v2453_v32, 0.0  ;;  %v3167_v22 = vsel %vm1070_vm4, %v3143_v19, 0.0  ;;  %7037 = vst [vmem:[#allocation45_spill] sm:$0xff] %v6500_v29  ;;  %v3146_v21 = vmul.f32 %v6500_v29, %v6500_v29  ;;  %v6512_v18 = vpop.xlane.xlu1 %2620 }
 0x39d   :  { %v2465_v13 = vpop.f32.mrf.mxu0  ;;  %3168 = vadd.xlane.f32.xlu1 %v3167_v22  ;;  %v2670_v16 = vsel %vm1065_vm3, %v2544_v39, 0.0  ;;  %v6521_v22 = vpop.xlane.xlu0 %2716 }
 0x39e   :  { %7033 = vst [vmem:[#allocation15_spill] sm:$0xff] %v6466_v38  ;;  %v6468_v15 = vmax.f32 %v2474_v44, 0.0  ;;  %v2466_v33 = vadd.f32 %v6370_v47, %v2465_v13  ;;  %v3144_v50 = vmul.f32 %v6466_v38, %v6466_v38  ;;  %v3176_v19 = vsel %vm1070_vm4, %v3146_v21, 0.0 }
 0x39f   :  { %v4095_v55 = vpop.f32.mrf.mxu0 }
 0x3a0   :  { %v6475_v37 = vmax.f32 %v2466_v33, 0.0  ;;  %v3149_v7 = vmul.f32 %v6468_v15, %v6468_v15  ;;  %v2477_v48 = vadd.f32 %v4095_v55, %v6370_v47  ;;  %v3170_v26 = vsel %vm1070_vm4, %v3144_v50, 0.0  ;;  %v6515_v44 = vpop.xlane.xlu1 %2623 }
 0x3a1   :  { %v2468_v42 = vpop.f32.mrf.mxu0  ;;  %3171 = vadd.xlane.f32.xlu1 %v3170_v26  ;;  %v6525_v23 = vpop.xlane.xlu0 %2719  ;;  %v4639_v50 = vmov 1983009808  }
 0x3a2   :  { %v3147_v9 = vmul.f32 %v6475_v37, %v6475_v37  ;;  %v6485_v56 = vmax.f32 %v2477_v48, 0.0  ;;  %v2469_v35 = vadd.f32 %v6370_v47, %v2468_v42  ;;  %v3185_v11 = vsel %vm1070_vm4, %v3149_v7, 0.0  ;;  %v46_v48 = vld [vmem:[%s6763_s0] sm:$0xff] }
 0x3a3   :  { %3186 = vadd.xlane.f32.xlu0 %v3185_v11  ;;  %v53_v7 = vunpack.c.l.s4 %v4639_v50  ;;  %v55_v42 = vlaneseq }
 0x3a4   :  { %7035 = vst [vmem:[#allocation14_spill] sm:$0xff] %v6485_v56  ;;  %v3179_v53 = vsel %vm1070_vm4, %v3147_v9, 0.0  ;;  %v3150_v54 = vmul.f32 %v6485_v56, %v6485_v56  ;;  %v6497_v20 = vmax.f32 %v2469_v35, 0.0  ;;  %v6517_v13 = vpop.xlane.xlu1 %2626  ;;  %v47_v9 = vld [vmem:[%s6764_s1] sm:$0xff] }
 0x3a5   :  { %3180 = vadd.xlane.f32.xlu1 %v3179_v53  ;;  %v48_v35 = vsub.f32 %v46_v48, %v47_v9  ;;  %v2723_v11 = vpop.xlane.xlu0 %2722  ;;  %v54_v43 = vunpack.c.0.s8 %v53_v7  ;;  %v56_v53 = vshrl.u32 %v55_v42, 7 }
 0x3a6   :  { %v3148_v28 = vmul.f32 %v6497_v20, %v6497_v20  ;;  %v3188_v52 = vsel %vm1070_vm4, %v3150_v54, 0.0 }
 0x3a7   :  { %2767 = vadd.xlane.f32.xlu0 %v2766_v14  ;;  %v49_v12 = vand.u32 2147483647, %v48_v35  ;;  %v57_v17 = vsub.s32 %v54_v43, %v56_v53 }
 0x3a8   :  { %v3182_v32 = vsel %vm1070_vm4, %v3148_v28, 0.0  ;;  %v6519_v33 = vpop.xlane.xlu1 %2629 }
 0x3a9   :  { %3174 = vadd.xlane.f32.xlu1 %v3173_v62  ;;  %v51_v54 = vcombine.high %v49_v12, %v49_v12  ;;  %v58_v14 = vrot.slane %v49_v12, %v57_v17  ;;  %v2726_v28 = vpop.xlane.xlu0 %2725 }
 0x3ab   :  { %3189 = vadd.xlane.f32.xlu0 %v3188_v52  ;;  %v65_v39 = vrot.slane %v51_v54, %v57_v17  ;;  %v66_v21 = vcombine.high %v58_v14, %v58_v14 }
 0x3ac   :  { %v6523_v55 = vpop.xlane.xlu1 %2632 }
 0x3ad   :  { %2671 = vadd.xlane.f32.xlu1 %v2670_v16  ;;  %v74_v7 = vsel %vm72_vm12, %v66_v21, 0.0  ;;  %v76_v42 = vsel %vm72_vm12, %v65_v39, 0.0 }
 0x3af   :  { %3183 = vadd.xlane.f32.xlu0 %v3182_v32  ;;  %v67_v32 = vcombine.high %v65_v39, %v65_v39 }
 0x3b0   :  { %v6533_v26 = vpop.xlane.xlu1 %2635 }
 0x3b1   :  { %3177 = vadd.xlane.f32.xlu1 %v3176_v19  ;;  %v73_v19 = vsel %vm72_vm12, %v58_v14, 0.0  ;;  %v78_v54 = vsel %vm72_vm12, %v67_v32, 0.0  ;;  %v2729_v14 = vpop.xlane.xlu0 %2728 }
 0x3b2   :  { %v75_v43 = vadd.f32 %v74_v7, %v73_v19 }
 0x3b4   :  { %v6535_v62 = vpop.xlane.xlu1 %2638  ;;  %v77_v21 = vadd.f32 %v76_v42, %v75_v43 }
 0x3b5   :  { %v2732_v32 = vpop.xlane.xlu0 %2731 }
 0x3b6   :  { %v79_v7 = vadd.f32 %v78_v54, %v77_v21 }
 0x3b8   :  { %v6544_v53 = vpop.xlane.xlu1 %2641  ;;  %80 = vadd.xlane.f32.xlu1 %v79_v7  ;;  %v2783_v7 = vadd.f32 1e-10, %v6512_v18  ;;  %v2818_v18 = vadd.f32 1e-10, %v2726_v28 }
 0x3b9   :  { %v2735_v54 = vpop.xlane.xlu0 %2734 }
 0x3db   :  { %v4098_v52 = vpop.f32.mrf.mxu0 }
 0x3dc   :  { %v2490_v16 = vadd.f32 %v4098_v52, %v6370_v47 }
 0x3dd   :  { %v2481_v50 = vpop.f32.mrf.mxu0 }
 0x3de   :  { %v6540_v48 = vmax.f32 %v2490_v16, 0.0  ;;  %v2482_v9 = vadd.f32 %v6370_v47, %v2481_v50 }
 0x3df   :  { %v4099_v35 = vpop.f32.mrf.mxu0 }
 0x3e0   :  { %7039 = vst [vmem:[#allocation13_spill] sm:$0xff] %v6540_v48  ;;  %v3153_v12 = vmul.f32 %v6540_v48, %v6540_v48  ;;  %v6548_v17 = vmax.f32 %v2482_v9, 0.0  ;;  %v2493_v39 = vadd.f32 %v4099_v35, %v6370_v47  ;;  %v6558_v9 = vpop.xlane.xlu1 %2644 }
 0x3e1   :  { %v2484_v52 = vpop.f32.mrf.mxu0 }
 0x3e2   :  { %7040 = vst [vmem:[#allocation44_spill] sm:$0xff] %v6548_v17  ;;  %v2485_v16 = vadd.f32 %v6370_v47, %v2484_v52  ;;  %v3151_v50 = vmul.f32 %v6548_v17, %v6548_v17  ;;  %v3197_v19 = vsel %vm1070_vm4, %v3153_v12, 0.0  ;;  %v6560_v38 = vmax.f32 %v2493_v39, 0.0 }
 0x3e3   :  { %3198 = vadd.xlane.f32.xlu0 %v3197_v19 }
 0x3e4   :  { %v6556_v29 = vmax.f32 %v2485_v16, 0.0  ;;  %7042 = vst [vmem:[#allocation43_spill] sm:$0xff] %v6560_v38  ;;  %v3191_v43 = vsel %vm1070_vm4, %v3151_v50, 0.0  ;;  %v3154_v47 = vmul.f32 %v6560_v38, %v6560_v38  ;;  %v6568_v12 = vpop.xlane.xlu1 %2647  ;;  %v2738_v16 = vpop.xlane.xlu0 %2737  ;;  %v2815_v50 = vadd.f32 1e-10, %v6521_v22 }
 0x3e5   :  { %v2816_v38 = vadd.f32 1e-10, %v6525_v23  ;;  %v2786_v22 = vadd.f32 1e-10, %v6519_v33  ;;  %v2822_v40 = vadd.f32 1e-10, %v2738_v16 }
 0x3e6   :  { %7041 = vst [vmem:[#allocation12_spill] sm:$0xff] %v6556_v29  ;;  %v3152_v42 = vmul.f32 %v6556_v29, %v6556_v29  ;;  %v3200_v52 = vsel %vm1070_vm4, %v3154_v47, 0.0  ;;  %4503 = vrsqrt.f32 %v2815_v50  ;;  %v2817_v47 = vadd.f32 1e-10, %v2723_v11 }
 0x3e7   :  { %3192 = vadd.xlane.f32.xlu0 %v3191_v43  ;;  %4505 = vrsqrt.f32 %v2783_v7  ;;  %v2787_v11 = vadd.f32 1e-10, %v6523_v55  ;;  %v2820_v50 = vadd.f32 1e-10, %v2732_v32  ;;  %v2788_v7 = vadd.f32 1e-10, %v6533_v26 }
 0x3e8   :  { %v3194_v35 = vsel %vm1070_vm4, %v3152_v42, 0.0  ;;  %v6571_v21 = vpop.xlane.xlu1 %2650  ;;  %v2741_v19 = vpop.xlane.xlu0 %2740  ;;  %4507 = vrsqrt.f32 %v2816_v38  ;;  %v2821_v55 = vadd.f32 1e-10, %v2735_v54  ;;  %v2789_v32 = vadd.f32 1e-10, %v6535_v62 }
 0x3eb   :  { %3195 = vadd.xlane.f32.xlu0 %v3194_v35  ;;  %v2784_v35 = vadd.f32 1e-10, %v6515_v44  ;;  %v2819_v44 = vadd.f32 1e-10, %v2729_v14 }
 0x3ec   :  { %v6573_v39 = vpop.xlane.xlu1 %2653  ;;  %v2744_v42 = vpop.xlane.xlu0 %2743 }
 0x3ed   :  { %4509 = vrsqrt.f32 %v2784_v35 }
 0x3ee   :  { %4511 = vrsqrt.f32 %v2817_v47 }
 0x3ef   :  { %3201 = vadd.xlane.f32.xlu0 %v3200_v52  ;;  %v2785_v52 = vadd.f32 1e-10, %v6517_v13 }
 0x3f0   :  { %v6577_v43 = vpop.xlane.xlu1 %2656  ;;  %v2747_v8 = vpop.xlane.xlu0 %2746 }
 0x3f1   :  { %4513 = vrsqrt.f32 %v2785_v52 }
 0x3f2   :  { %4515 = vrsqrt.f32 %v2818_v18 }
 0x3f3   :  { %4517 = vrsqrt.f32 %v2786_v22  ;;  %v4504_v13 = vpop.eup %4503 }
 0x3f4   :  { %v6582_v29 = vpop.xlane.xlu1 %2659  ;;  %v6587_v23 = vpop.xlane.xlu0 %2749  ;;  %4519 = vrsqrt.f32 %v2819_v44  ;;  %v2943_v52 = vmul.f32 %v4504_v13, %v6988_v36 }
 0x3f5   :  { %v4506_v38 = vpop.eup %4505  ;;  %4521 = vrsqrt.f32 %v2787_v11 }
 0x3f6   :  { %v4508_v28 = vpop.eup %4507  ;;  %v2911_v18 = vmul.f32 %v4506_v38, %v6989_v34  ;;  %4523 = vrsqrt.f32 %v2820_v50  ;;  %v2790_v34 = vadd.f32 1e-10, %v6544_v53  ;;  %v2823_v50 = vadd.f32 1e-10, %v2741_v19 }
 0x3f7   :  { %4525 = vrsqrt.f32 %v2788_v7  ;;  %v2944_v26 = vmul.f32 %v4508_v28, %v6990_v63  ;;  %v2824_v53 = vadd.f32 1e-10, %v2744_v42 }
 0x3f8   :  { %v6585_v17 = vpop.xlane.xlu1 %2662  ;;  %v2753_v33 = vpop.xlane.xlu0 %2752  ;;  %v2975_v44 = vsub.f32 %v2911_v18, %v2943_v52  ;;  %4527 = vrsqrt.f32 %v2821_v55 }
 0x3f9   :  { %4529 = vrsqrt.f32 %v2789_v32 }
 0x3fa   :  { %v4510_v47 = vpop.eup %4509  ;;  %v3007_v62 = vmul.f32 %v2975_v44, %v2975_v44  ;;  %4531 = vrsqrt.f32 %v2822_v40  ;;  %v2826_v44 = vadd.f32 1e-10, %v6587_v23 }
 0x3fb   :  { %v4512_v22 = vpop.eup %4511  ;;  %v2912_v11 = vmul.f32 %v4510_v47, %v6991_v59  ;;  %4533 = vrsqrt.f32 %v2790_v34  ;;  %v2791_v59 = vadd.f32 1e-10, %v6558_v9  ;;  %v2792_v47 = vadd.f32 1e-10, %v6568_v12  ;;  %v7043_v12 = vld [vmem:[#allocation37_spill] sm:$0xff] }
 0x3fc   :  { %v6591_v35 = vpop.xlane.xlu1 %2665  ;;  %v2945_v56 = vmul.f32 %v4512_v22, %v5608_v2  ;;  %v2756_v13 = vpop.xlane.xlu0 %2755  ;;  %v3045_v40 = vmul.f32 %v6402_v46, %v3007_v62  ;;  %4535 = vrsqrt.f32 %v2823_v50  ;;  %v7045_v62 = vld [vmem:[#allocation36_spill] sm:$0xff]  ;;  %v2795_v50 = vadd.f32 1e-10, %v6577_v43 }
 0x3fd   :  { %v2976_v16 = vsub.f32 %v2912_v11, %v2944_v26  ;;  %4537 = vrsqrt.f32 %v2791_v59  ;;  %v2794_v11 = vadd.f32 1e-10, %v6573_v39  ;;  %v2828_v59 = vadd.f32 1e-10, %v2756_v13 }
 0x3fe   :  { %v4514_v14 = vpop.eup %4513  ;;  %4539 = vrsqrt.f32 %v2824_v53  ;;  %v3090_v26 = vsel %vm1065_vm3, %v3045_v40, 0.0  ;;  %v2797_v40 = vadd.f32 1e-10, %v6585_v17 }
 0x3ff   :  { %v2913_v36 = vmul.f32 %v4514_v14, %v6992_v0  ;;  %v4516_v38 = vpop.eup %4515  ;;  %v3008_v19 = vmul.f32 %v2976_v16, %v2976_v16  ;;  %4541 = vrsqrt.f32 %v2792_v47  ;;  %v3091_v53 = vadd.f32 %v3090_v26, %v6460_v60 }
 0x400   :  { %v6597_v48 = vpop.xlane.xlu1 %2668  ;;  %v4518_v54 = vpop.eup %4517  ;;  %v2946_v2 = vmul.f32 %v4516_v38, %v5602_v45  ;;  %v2793_v45 = vadd.f32 1e-10, %v6571_v21  ;;  %v2827_v21 = vadd.f32 1e-10, %v2753_v33  ;;  %v7044_v38 = vld [vmem:[#allocation68_spill] sm:$0xff] }
 0x401   :  { %v2977_v7 = vsub.f32 %v2913_v36, %v2945_v56  ;;  %v2914_v0 = vmul.f32 %v4518_v54, %v6995_v25  ;;  %v4520_v28 = vpop.eup %4519  ;;  %v2759_v52 = vpop.xlane.xlu0 %2758  ;;  %v2825_v56 = vadd.f32 1e-10, %v2747_v8  ;;  %v3046_v8 = vmul.f32 %v6402_v46, %v3008_v19 }
 0x402   :  { %v4522_v18 = vpop.eup %4521  ;;  %v2947_v42 = vmul.f32 %v4520_v28, %v5594_v30  ;;  %v2829_v28 = vadd.f32 1e-10, %v2759_v52 }
 0x403   :  { %v3009_v22 = vmul.f32 %v2977_v7, %v2977_v7  ;;  %v4524_v14 = vpop.eup %4523  ;;  %v2978_v55 = vsub.f32 %v2914_v0, %v2946_v2  ;;  %v2915_v32 = vmul.f32 %v4522_v18, %v7043_v12  ;;  %4543 = vrsqrt.f32 %v2825_v56  ;;  %v7046_v56 = vld [vmem:[#allocation67_spill] sm:$0xff] }
 0x404   :  { %v6603_v63 = vpop.xlane.xlu1 %3162  ;;  %v4526_v25 = vpop.eup %4525  ;;  %v2948_v54 = vmul.f32 %v4524_v14, %v7044_v38  ;;  %4545 = vrsqrt.f32 %v2793_v45  ;;  %v2796_v2 = vadd.f32 1e-10, %v6582_v29  ;;  %v3092_v18 = vsel %vm1065_vm3, %v3046_v8, 0.0 }
 0x405   :  { %v3047_v36 = vmul.f32 %v6402_v46, %v3009_v22  ;;  %v2762_v34 = vpop.xlane.xlu0 %2761  ;;  %v2916_v30 = vmul.f32 %v4526_v25, %v7045_v62  ;;  %v4528_v16 = vpop.eup %4527  ;;  %v3010_v23 = vmul.f32 %v2978_v55, %v2978_v55  ;;  %v2979_v7 = vsub.f32 %v2915_v32, %v2947_v42  ;;  %v7047_v55 = vld [vmem:[#allocation35_spill] sm:$0xff]  ;;  %v7048_v42 = vld [vmem:[#allocation66_spill] sm:$0xff] }
 0x406   :  { %4547 = vrsqrt.f32 %v2826_v44  ;;  %v4530_v39 = vpop.eup %4529  ;;  %v2949_v14 = vmul.f32 %v4528_v16, %v7046_v56  ;;  %v2830_v52 = vadd.f32 1e-10, %v2762_v34  ;;  %v7049_v32 = vld [vmem:[#allocation34_spill] sm:$0xff]  ;;  %v2798_v44 = vadd.f32 1e-10, %v6591_v35 }
 0x407   :  { %4549 = vrsqrt.f32 %v2794_v11  ;;  %v4532_v33 = vpop.eup %4531  ;;  %v2980_v43 = vsub.f32 %v2916_v30, %v2948_v54  ;;  %v3094_v13 = vsel %vm1065_vm3, %v3047_v36, 0.0  ;;  %v3048_v19 = vmul.f32 %v6402_v46, %v3010_v23 }
 0x408   :  { %v6611_v9 = vpop.xlane.xlu1 %3156  ;;  %4551 = vrsqrt.f32 %v2827_v21  ;;  %v4534_v47 = vpop.eup %4533  ;;  %v3011_v22 = vmul.f32 %v2979_v7, %v2979_v7  ;;  %v2917_v60 = vmul.f32 %v4530_v39, %v7047_v55  ;;  %v2950_v12 = vmul.f32 %v4532_v33, %v7048_v42 }
 0x409   :  { %4553 = vrsqrt.f32 %v2795_v50  ;;  %v2765_v29 = vpop.xlane.xlu0 %2764  ;;  %v4536_v25 = vpop.eup %4535  ;;  %v2918_v17 = vmul.f32 %v4534_v47, %v7049_v32  ;;  %v3093_v11 = vadd.f32 %v3092_v18, %v3091_v53  ;;  %v3012_v8 = vmul.f32 %v2980_v43, %v2980_v43 }
 0x40a   :  { %4555 = vrsqrt.f32 %v2828_v59  ;;  %v4538_v26 = vpop.eup %4537  ;;  %v2831_v36 = vadd.f32 1e-10, %v2765_v29  ;;  %v3049_v38 = vmul.f32 %v6402_v46, %v3011_v22  ;;  %v2799_v34 = vadd.f32 1e-10, %v6597_v48  ;;  %v7050_v59 = vld [vmem:[#allocation65_spill] sm:$0xff] }
 0x40b   :  { %4557 = vrsqrt.f32 %v2796_v2  ;;  %v4540_v21 = vpop.eup %4539  ;;  %v3095_v30 = vadd.f32 %v3094_v13, %v3093_v11  ;;  %v3096_v50 = vsel %vm1065_vm3, %v3048_v19, 0.0  ;;  %v2981_v16 = vsub.f32 %v2917_v60, %v2949_v14  ;;  %v7051_v2 = vld [vmem:[#allocation33_spill] sm:$0xff] }
 0x40c   :  { %v6624_v0 = vpop.xlane.xlu1 %3165  ;;  %4559 = vrsqrt.f32 %v2829_v28  ;;  %v4542_v62 = vpop.eup %4541  ;;  %v2982_v23 = vsub.f32 %v2918_v17, %v2950_v12  ;;  %v3050_v7 = vmul.f32 %v6402_v46, %v3012_v8  ;;  %v2951_v39 = vmul.f32 %v4536_v25, %v7050_v59 }
 0x40d   :  { %4561 = vrsqrt.f32 %v2797_v40  ;;  %v3160_v54 = vpop.xlane.xlu0 %3159  ;;  %v2919_v33 = vmul.f32 %v4538_v26, %v7051_v2  ;;  %v3098_v28 = vsel %vm1065_vm3, %v3049_v38, 0.0  ;;  %v2952_v47 = vmul.f32 %v4540_v21, %v7000_v1 }
 0x40e   :  { %4563 = vrsqrt.f32 %v2830_v52  ;;  %v2920_v18 = vmul.f32 %v4542_v62, %v7001_v27  ;;  %v3097_v13 = vadd.f32 %v3096_v50, %v3095_v30  ;;  %v3203_v19 = vadd.f32 1e-10, %v6611_v9  ;;  %v6656_v9 = vld [vmem:[%s6766_s3] sm:$0x3] }
 0x40f   :  { %4565 = vrsqrt.f32 %v2798_v44  ;;  %v3013_v29 = vmul.f32 %v2981_v16, %v2981_v16  ;;  %v3014_v56 = vmul.f32 %v2982_v23, %v2982_v23  ;;  %v3100_v60 = vsel %vm1065_vm3, %v3050_v7, 0.0 }
 0x410   :  { %v4544_v35 = vpop.eup %4543  ;;  %4567 = vrsqrt.f32 %v2831_v36  ;;  %v3099_v55 = vadd.f32 %v3098_v28, %v3097_v13  ;;  %v2983_v52 = vsub.f32 %v2919_v33, %v2951_v39  ;;  %v2984_v1 = vsub.f32 %v2920_v18, %v2952_v47 }
 0x411   :  { %v4546_v48 = vpop.eup %4545  ;;  %4569 = vrsqrt.f32 %v2799_v34  ;;  %v2953_v27 = vmul.f32 %v4544_v35, %v7002_v24  ;;  %v3205_v36 = vadd.f32 1e-10, %v6603_v63  ;;  %v3051_v24 = vmul.f32 %v6402_v46, %v3013_v29 }
 0x412   :  { %v2921_v32 = vmul.f32 %v4546_v48, %v7003_v6  ;;  %4571 = vrsqrt.f32 %v3203_v19  ;;  %v3052_v6 = vmul.f32 %v6402_v46, %v3014_v56  ;;  %v3101_v34 = vadd.f32 %v3100_v60, %v3099_v55 }
 0x413   :  { %v4548_v40 = vpop.eup %4547  ;;  %v3015_v62 = vmul.f32 %v2983_v52, %v2983_v52  ;;  %v3314_v50 = vmul.f32 1.442695, %v6656_v9  ;;  %v3016_v7 = vmul.f32 %v2984_v1, %v2984_v1  ;;  %v3204_v39 = vadd.f32 1e-10, %v3160_v54 }
 0x414   :  { %v4550_v22 = vpop.eup %4549  ;;  %v2954_v11 = vmul.f32 %v4548_v40, %v7004_v41  ;;  %v2985_v16 = vsub.f32 %v2921_v32, %v2953_v27  ;;  %v3102_v33 = vsel %vm1065_vm3, %v3051_v24, 0.0  ;;  %v3104_v48 = vsel %vm1065_vm3, %v3052_v6, 0.0  ;;  %v7053_v27 = vld [vmem:[#allocation24_spill] sm:$0xff] }
 0x415   :  { %v4552_v14 = vpop.eup %4551  ;;  %v2922_v8 = vmul.f32 %v4550_v22, %v7005_v58 }
 0x416   :  { %v4554_v12 = vpop.eup %4553  ;;  %v2955_v58 = vmul.f32 %v4552_v14, %v7006_v10  ;;  %v3053_v10 = vmul.f32 %v6402_v46, %v3015_v62  ;;  %v3017_v54 = vmul.f32 %v2985_v16, %v2985_v16 }
 0x417   :  { %v4556_v26 = vpop.eup %4555  ;;  %v2923_v63 = vmul.f32 %v4554_v12, %v7007_v49  ;;  %v2986_v59 = vsub.f32 %v2922_v8, %v2954_v11  ;;  %v6684_v12 = vld [vmem:[%s6773_s10] ss:$0 sm:$0xff] }
 0x418   :  { %v4558_v21 = vpop.eup %4557  ;;  %v2956_v28 = vmul.f32 %v4556_v26, %v7008_v5  ;;  %v3054_v5 = vmul.f32 %v6402_v46, %v3016_v7  ;;  %v3055_v46 = vmul.f32 %v6684_v12, %v3017_v54 }
 0x419   :  { %v4560_v38 = vpop.eup %4559  ;;  %v2924_v47 = vmul.f32 %v4558_v21, %v7009_v61  ;;  %v2987_v19 = vsub.f32 %v2923_v63, %v2955_v58  ;;  %v3018_v14 = vmul.f32 %v2986_v59, %v2986_v59  ;;  %v3311_v63 = vld [vmem:[%s6765_s2] sm:$0x3] }
 0x41a   :  { %v4562_v41 = vpop.eup %4561  ;;  %v2957_v49 = vmul.f32 %v4560_v38, %v7010_v57  ;;  %v7052_v57 = vld [vmem:[#allocation26_spill] sm:$0xff]  ;;  %v3108_v21 = vsel %vm1065_vm3, %v3054_v5, 0.0 }
 0x41b   :  { %v4564_v2 = vpop.eup %4563  ;;  %v2988_v55 = vsub.f32 %v2924_v47, %v2956_v28  ;;  %v3019_v1 = vmul.f32 %v2987_v19, %v2987_v19 }
 0x41c   :  { %v4566_v18 = vpop.eup %4565  ;;  %v2958_v60 = vmul.f32 %v4564_v2, %v7012_v51  ;;  %v7055_v2 = vld [vmem:[#allocation17_spill] sm:$0xff] }
 0x41d   :  { %v4568_v13 = vpop.eup %4567  ;;  %v2926_v52 = vmul.f32 %v4566_v18, %v7052_v57  ;;  %v3020_v8 = vmul.f32 %v2988_v55, %v2988_v55 }
 0x41e   :  { %v4570_v56 = vpop.eup %4569 }
 0x41f   :  { %v2927_v32 = vmul.f32 %v4570_v56, %v7053_v27  ;;  %v4572_v26 = vpop.eup %4571  ;;  %v2990_v11 = vsub.f32 %v2926_v52, %v2958_v60  ;;  %v3058_v59 = vmul.f32 %v6684_v12, %v3020_v8 }
 0x421   :  { %v3022_v7 = vmul.f32 %v2990_v11, %v2990_v11  ;;  %v3116_v56 = vsel %vm1065_vm3, %v3058_v59, 0.0 }
 0x426   :  { %v6633_v45 = vpop.xlane.xlu1 %3168 }
 0x42a   :  { %v6644_v53 = vpop.xlane.xlu1 %3171 }
 0x42c   :  { %v3187_v43 = vpop.xlane.xlu0 %3186 }
 0x42d   :  { %v3213_v25 = vadd.f32 1e-10, %v3187_v43  ;;  %v2925_v43 = vmul.f32 %v4562_v41, %v7011_v31  ;;  %v3103_v31 = vadd.f32 %v3102_v33, %v3101_v34  ;;  %v3110_v41 = vsel %vm1065_vm3, %v3055_v46, 0.0 }
 0x42e   :  { %v3181_v42 = vpop.xlane.xlu1 %3180  ;;  %v3235_v33 = vmul.f32 %v4572_v26, %v7055_v2  ;;  %v3207_v2 = vadd.f32 1e-10, %v6633_v45 }
 0x42f   :  { %v3211_v17 = vadd.f32 1e-10, %v3181_v42  ;;  %v2989_v42 = vsub.f32 %v2925_v43, %v2957_v49  ;;  %v3313_v49 = vmul.f32 %v3311_v63, %v3311_v63 }
 0x430   :  { %v2768_v44 = vpop.xlane.xlu0 %2767 }
 0x431   :  { %4573 = vrsqrt.f32 %v3211_v17  ;;  %v2832_v23 = vadd.f32 1e-10, %v2768_v44  ;;  %v7054_v17 = vld [vmem:[#allocation57_spill] sm:$0xff]  ;;  %v3105_v44 = vadd.f32 %v3104_v48, %v3103_v31  ;;  %v3021_v6 = vmul.f32 %v2989_v42, %v2989_v42 }
 0x432   :  { %4575 = vrsqrt.f32 %v3213_v25  ;;  %v6663_v30 = vpop.xlane.xlu1 %3174  ;;  %v3106_v25 = vsel %vm1065_vm3, %v3053_v10, 0.0  ;;  %v2959_v51 = vmul.f32 %v4568_v13, %v7054_v17 }
 0x433   :  { %4577 = vrsqrt.f32 %v3205_v36  ;;  %v3056_v36 = vmul.f32 %v6684_v12, %v3018_v14  ;;  %v3107_v38 = vadd.f32 %v3106_v25, %v3105_v44  ;;  %v3059_v28 = vmul.f32 %v6684_v12, %v3021_v6  ;;  %v7057_v25 = vld [vmem:[#allocation16_spill] sm:$0xff] }
 0x434   :  { %v6668_v35 = vpop.xlane.xlu0 %3189  ;;  %4579 = vpow2.f32 %v3314_v50  ;;  %v2991_v62 = vsub.f32 %v2927_v32, %v2959_v51  ;;  %v3057_v50 = vmul.f32 %v6684_v12, %v3019_v1 }
 0x435   :  { %4581 = vrsqrt.f32 %v2832_v23  ;;  %v3109_v58 = vadd.f32 %v3108_v21, %v3107_v38  ;;  %v3214_v59 = vadd.f32 1e-10, %v6668_v35 }
 0x436   :  { %v2672_v40 = vpop.xlane.xlu1 %2671  ;;  %4583 = vrsqrt.f32 %v3204_v39  ;;  %v3112_v39 = vsel %vm1065_vm3, %v3056_v36, 0.0  ;;  %v3114_v10 = vsel %vm1065_vm3, %v3057_v50, 0.0 }
 0x437   :  { %v2800_v22 = vadd.f32 1e-10, %v2672_v40  ;;  %v3111_v47 = vadd.f32 %v3110_v41, %v3109_v58  ;;  %v7056_v40 = vld [vmem:[#allocation49_spill] sm:$0xff] }
 0x438   :  { %v3184_v29 = vpop.xlane.xlu0 %3183 }
 0x439   :  { %v3212_v61 = vadd.f32 1e-10, %v3184_v29  ;;  %4585 = vrsqrt.f32 %v2800_v22  ;;  %v3113_v19 = vadd.f32 %v3112_v39, %v3111_v47  ;;  %v3060_v29 = vmul.f32 %v6684_v12, %v3022_v7 }
 0x43a   :  { %v3206_v39 = vadd.f32 1e-10, %v6624_v0 }
 0x43b   :  { %4587 = vrsqrt.f32 %v3212_v61  ;;  %v3115_v14 = vadd.f32 %v3114_v10, %v3113_v19  ;;  %v3118_v61 = vsel %vm1065_vm3, %v3059_v28, 0.0  ;;  %v3120_v17 = vsel %vm1065_vm3, %v3060_v29, 0.0 }
 0x43c   :  { %4589 = vrsqrt.f32 %v3214_v59 }
 0x43d   :  { %v3117_v27 = vadd.f32 %v3116_v56, %v3115_v14  ;;  %4591 = vrsqrt.f32 %v3206_v39 }
 0x43e   :  { %v4574_v24 = vpop.eup %4573 }
 0x43f   :  { %v4576_v34 = vpop.eup %4575  ;;  %v3243_v16 = vmul.f32 %v4574_v24, %v6475_v37  ;;  %v3023_v37 = vmul.f32 %v2991_v62, %v2991_v62  ;;  %v3119_v26 = vadd.f32 %v3118_v61, %v3117_v27  ;;  %v7062_v27 = vld [vmem:[#allocation44_spill] sm:$0xff] }
 0x440   :  { %v4578_v23 = vpop.eup %4577  ;;  %v3245_v48 = vmul.f32 %v4576_v34, %v6468_v15 }
 0x441   :  { %v4580_v18 = vpop.eup %4579  ;;  %v3237_v13 = vmul.f32 %v4578_v23, %v7056_v40  ;;  %v3251_v54 = vsub.f32 %v3235_v33, %v3243_v16  ;;  %v3061_v52 = vmul.f32 %v6684_v12, %v3023_v37  ;;  %v3121_v21 = vadd.f32 %v3120_v17, %v3119_v26  ;;  %v7063_v17 = vld [vmem:[#allocation46_spill] sm:$0xff] }
 0x442   :  { %v4582_v43 = vpop.eup %4581  ;;  %v3316_v31 = vadd.f32 %v4580_v18, %v3313_v49  ;;  %v3208_v49 = vadd.f32 1e-10, %v6644_v53 }
 0x443   :  { %v4584_v22 = vpop.eup %4583  ;;  %v3253_v15 = vsub.f32 %v3237_v13, %v3245_v48  ;;  %v2960_v57 = vmul.f32 %v4582_v43, %v7036_v4  ;;  %v3259_v46 = vmul.f32 %v3251_v54, %v3251_v54  ;;  %v6717_v4 = vld [vmem:[%s6774_s11] ss:$0 sm:$0xff]  ;;  %v3209_v48 = vadd.f32 1e-10, %v6663_v30 }
 0x444   :  { %v3236_v42 = vmul.f32 %v4584_v22, %v7057_v25  ;;  %v3409_v8 = vadd.f32 -1.0, %v3316_v31  ;;  %v7058_v22 = vld [vmem:[#allocation14_spill] sm:$0xff] }
 0x445   :  { %v3261_v51 = vmul.f32 %v3253_v15, %v3253_v15  ;;  %v7059_v15 = vld [vmem:[#allocation48_spill] sm:$0xff] }
 0x446   :  { %v4586_v5 = vpop.eup %4585  ;;  %v3318_v50 = vsub.f32 %v3409_v8, %v6656_v9  ;;  %v3178_v9 = vpop.xlane.xlu1 %3177 }
 0x447   :  { %v2928_v60 = vmul.f32 %v4586_v5, %v7038_v3  ;;  %v3122_v3 = vsel %vm1065_vm3, %v3061_v52, 0.0  ;;  %v3275_v34 = vmul.f32 %v6717_v4, %v3261_v51  ;;  %v3210_v45 = vadd.f32 1e-10, %v3178_v9  ;;  %v7060_v52 = vld [vmem:[#allocation13_spill] sm:$0xff] }
 0x448   :  { %v4588_v55 = vpop.eup %4587  ;;  %v3123_v6 = vadd.f32 %v3122_v3, %v3121_v21 }
 0x449   :  { %v3244_v1 = vmul.f32 %v4588_v55, %v6497_v20  ;;  %v2992_v32 = vsub.f32 %v2928_v60, %v2960_v57  ;;  %v3273_v20 = vmul.f32 %v6717_v4, %v3259_v46  ;;  %v3284_v23 = vsel %vm1070_vm4, %v3275_v34, 0.0  ;;  %v4590_v43 = vpop.eup %4589  ;;  %v7061_v46 = vld [vmem:[#allocation47_spill] sm:$0xff] }
 0x44a   :  { %v81_v47 = vpop.xlane.xlu1 %80  ;;  %v4592_v30 = vpop.eup %4591  ;;  %v3246_v29 = vmul.f32 %v4590_v43, %v7058_v22 }
 0x44b   :  { %v3252_v44 = vsub.f32 %v3236_v42, %v3244_v1  ;;  %v3024_v11 = vmul.f32 %v2992_v32, %v2992_v32  ;;  %v3281_v16 = vsel %vm1070_vm4, %v3273_v20, 0.0  ;;  %v82_v18 = vrot.slane %v81_v47, 4  ;;  %v7065_v20 = vld [vmem:[#allocation12_spill] sm:$0xff] }
 0x44c   :  { %v3238_v14 = vmul.f32 %v4592_v30, %v7059_v15 }
 0x44d   :  { %v3260_v36 = vmul.f32 %v3252_v44, %v3252_v44  ;;  %v3062_v24 = vmul.f32 %v6684_v12, %v3024_v11  ;;  %v3319_v12 = vsel %vm72_vm12, %v3318_v50, 0.0  ;;  %v83_v10 = vadd.f32 %v82_v18, %v81_v47 }
 0x44e   :  { %v3254_v61 = vsub.f32 %v3238_v14, %v3246_v29 }
 0x44f   :  { %v3274_v38 = vmul.f32 %v6717_v4, %v3260_v36  ;;  %v3124_v62 = vsel %vm1065_vm3, %v3062_v24, 0.0  ;;  %v84_v0 = vrot.slane %v83_v10, 2  ;;  %v7064_v36 = vld [vmem:[#allocation15_spill] sm:$0xff] }
 0x450   :  { %v3125_v41 = vadd.f32 %v3124_v62, %v3123_v6  ;;  %v3262_v25 = vmul.f32 %v3254_v61, %v3254_v61 }
 0x451   :  { %v3282_v58 = vsel %vm1070_vm4, %v3274_v38, 0.0  ;;  %v85_v13 = vadd.f32 %v84_v0, %v83_v10 }
 0x452   :  { %v3283_v63 = vadd.f32 %v3282_v58, %v3281_v16  ;;  %3126 = vadd.xlane.f32.xlu0 %v3125_v41  ;;  %v3276_v3 = vmul.f32 %v6717_v4, %v3262_v25 }
 0x453   :  { %v86_v19 = vrot.slane %v85_v13, 1 }
 0x454   :  { %v6728_v7 = vadd.f32 %v3284_v23, %v3283_v63  ;;  %v3286_v41 = vsel %vm1070_vm4, %v3276_v3, 0.0  ;;  %v7066_v63 = vld [vmem:[#allocation45_spill] sm:$0xff] }
 0x455   :  { %v87_v5 = vadd.f32 %v86_v19, %v85_v13 }
 0x456   :  { %3320 = vadd.xlane.f32.xlu0 %v3319_v12  ;;  %v3287_v58 = vadd.f32 %v3286_v41, %v6728_v7  ;;  %v7067_v12 = vld [vmem:[#allocation43_spill] sm:$0xff] }
 0x457   :  { %4101 = vpush %v87_v5 }
 0x46c   :  { %v3199_v33 = vpop.xlane.xlu0 %3198 }
 0x46d   :  { %v3217_v28 = vadd.f32 1e-10, %v3199_v33 }
 0x46f   :  { %4593 = vrsqrt.f32 %v3217_v28 }
 0x470   :  { %4595 = vrsqrt.f32 %v3207_v2  ;;  %v3193_v37 = vpop.xlane.xlu0 %3192 }
 0x471   :  { %4597 = vrsqrt.f32 %v3209_v48  ;;  %v3215_v35 = vadd.f32 1e-10, %v3193_v37 }
 0x473   :  { %4599 = vrsqrt.f32 %v3215_v35 }
 0x474   :  { %v3196_v40 = vpop.xlane.xlu0 %3195  ;;  %4601 = vrsqrt.f32 %v3208_v49 }
 0x475   :  { %v3216_v54 = vadd.f32 1e-10, %v3196_v40 }
 0x477   :  { %4603 = vrsqrt.f32 %v3216_v54 }
 0x478   :  { %v3202_v56 = vpop.xlane.xlu0 %3201  ;;  %4605 = vrsqrt.f32 %v3210_v45 }
 0x479   :  { %v3218_v53 = vadd.f32 1e-10, %v3202_v56 }
 0x47b   :  { %4607 = vrsqrt.f32 %v3218_v53 }
 0x47c   :  { %v4594_v55 = vpop.eup %4593 }
 0x47d   :  { %v4596_v60 = vpop.eup %4595  ;;  %v3249_v31 = vmul.f32 %v4594_v55, %v7060_v52 }
 0x47e   :  { %v4598_v57 = vpop.eup %4597  ;;  %v3239_v1 = vmul.f32 %v4596_v60, %v7061_v46 }
 0x47f   :  { %v3241_v51 = vmul.f32 %v4598_v57, %v7063_v17 }
 0x480   :  { %v4600_v42 = vpop.eup %4599 }
 0x481   :  { %v3247_v32 = vmul.f32 %v4600_v42, %v7062_v27  ;;  %v4602_v44 = vpop.eup %4601  ;;  %v3257_v11 = vsub.f32 %v3241_v51, %v3249_v31 }
 0x482   :  { %v3240_v21 = vmul.f32 %v4602_v44, %v7064_v36 }
 0x483   :  { %v3255_v26 = vsub.f32 %v3239_v1, %v3247_v32  ;;  %v3265_v62 = vmul.f32 %v3257_v11, %v3257_v11 }
 0x484   :  { %v4604_v8 = vpop.eup %4603 }
 0x485   :  { %v3248_v24 = vmul.f32 %v4604_v8, %v7065_v20  ;;  %v3263_v6 = vmul.f32 %v3255_v26, %v3255_v26  ;;  %v4606_v38 = vpop.eup %4605  ;;  %v3279_v28 = vmul.f32 %v6717_v4, %v3265_v62 }
 0x486   :  { %v3242_v23 = vmul.f32 %v4606_v38, %v7066_v63 }
 0x487   :  { %v3256_v34 = vsub.f32 %v3240_v21, %v3248_v24  ;;  %v3277_v50 = vmul.f32 %v6717_v4, %v3263_v6  ;;  %v3292_v7 = vsel %vm1070_vm4, %v3279_v28, 0.0 }
 0x488   :  { %v4608_v16 = vpop.eup %4607  ;;  %s4102_s11 = spop %4101 }
 0x489   :  { %v3250_v59 = vmul.f32 %v4608_v16, %v7067_v12  ;;  %v3264_v39 = vmul.f32 %v3256_v34, %v3256_v34  ;;  %v3288_v9 = vsel %vm1070_vm4, %v3277_v50, 0.0 }
 0x48a   :  { %v3289_v2 = vadd.f32 %v3288_v9, %v3287_v58 }
 0x48b   :  { %v3258_v33 = vsub.f32 %v3242_v23, %v3250_v59  ;;  %v3278_v48 = vmul.f32 %v6717_v4, %v3264_v39 }
 0x48d   :  { %v3266_v47 = vmul.f32 %v3258_v33, %v3258_v33  ;;  %v3290_v18 = vsel %vm1070_vm4, %v3278_v48, 0.0 }
 0x48e   :  { %v3291_v37 = vadd.f32 %v3290_v18, %v3289_v2 }
 0x48f   :  { %v3280_v10 = vmul.f32 %v6717_v4, %v3266_v47 }
 0x490   :  { %v3293_v49 = vadd.f32 %v3292_v7, %v3291_v37 }
 0x491   :  { %v3294_v35 = vsel %vm1070_vm4, %v3280_v10, 0.0 }
 0x492   :  { %v3295_v0 = vadd.f32 %v3294_v35, %v3293_v49 }
 0x494   :  { %3296 = vadd.xlane.f32.xlu1 %v3295_v0 }
 0x4db   :  { %v3127_v43 = vpop.xlane.xlu0 %3126 }
 0x4dc   :  { %v3128_v40 = vrot.slane %v3127_v43, 4 }
 0x4de   :  { %v3129_v13 = vadd.f32 %v3128_v40, %v3127_v43 }
 0x4df   :  { %v3321_v22 = vpop.xlane.xlu0 %3320 }
 0x4e0   :  { %v3130_v45 = vrot.slane %v3129_v13, 2  ;;  %v3322_v29 = vrot.slane %v3321_v22, 4 }
 0x4e2   :  { %v3131_v54 = vadd.f32 %v3130_v45, %v3129_v13  ;;  %v3323_v56 = vadd.f32 %v3322_v29, %v3321_v22 }
 0x4e4   :  { %v3132_v30 = vrot.slane %v3131_v54, 1  ;;  %v3324_v5 = vrot.slane %v3323_v56, 2 }
 0x4e6   :  { %v3133_v19 = vadd.f32 %v3132_v30, %v3131_v54  ;;  %v3325_v14 = vadd.f32 %v3324_v5, %v3323_v56 }
 0x4e8   :  { %4103 = vpush %v3133_v19  ;;  %v3326_v55 = vrot.slane %v3325_v14, 1 }
 0x4ea   :  { %v3327_v52 = vadd.f32 %v3326_v55, %v3325_v14 }
 0x519   :  { %s4104_s28 = spop %4103 }
 0x51a   :  { %s3137_s29 = smul.f32 0.0078125, %s4104_s28 }
 0x51d   :  { %v3297_v4 = vpop.xlane.xlu1 %3296 }
 0x51e   :  { %v3298_v15 = vrot.slane %v3297_v4, 4 }
 0x520   :  { %v3299_v53 = vadd.f32 %v3298_v15, %v3297_v4 }
 0x522   :  { %v3300_v61 = vrot.slane %v3299_v53, 2 }
 0x524   :  { %v3301_v60 = vadd.f32 %v3300_v61, %v3299_v53 }
 0x526   :  { %v3302_v57 = vrot.slane %v3301_v60, 1 }
 0x528   :  { %v3303_v31 = vadd.f32 %v3302_v57, %v3301_v60 }
 0x52a   :  { %4105 = vpush %v3303_v31 }
 0x52b   :  { %4107 = vpush %v3327_v52 }
 0x55b   :  { %s4106_s30 = spop %4105 }
 0x55c   :  { %s3307_s4 = smul.f32 0.03125, %s4106_s30  ;;  %s4108_s14 = spop %4107 }
 0x55d   :  { %s3329_s7 = smul.f32 0.5, %s4108_s14 }
 0x55e   :  { %s3308_s15 = sadd.f32 %s3307_s4, %s3137_s29 }
 0x55f   :  { %3333 = sst [smem:[#allocation4]] %s3329_s7 }
 0x560   :  { %s3309_s6 = smul.f32 512.0, %s3308_s15 }
 0x561   :  { %3349 = dma.smem_to_hbm %s4640_s16, 16, %s6776_s13, [#allocation5]  }
 0x562   :  { %s3310_s8 = sadd.f32 %s4102_s11, %s3309_s6 }
 0x564   :  { %3331 = sst [smem:[#allocation2]] %s3310_s8 }
 0x565   :  { %3341 = dma.smem_to_hbm %s4641_s19, 16, %s6775_s12, [#allocation3]  }
 0x566   :  { %4626 = dma.done.wait [#allocation3], 16  }
 0x567   :  { %4627 = vsyncadd [#allocation3], 4294967280 }
 0x568   :  { %4628 = dma.done.wait [#allocation5], 16  }
 0x569   :  { %4629 = vsyncadd [#allocation5], 4294967280 }
 0x56a   :  { %3356 = sfence }
 0x56b   :  { %3357 = vsyncpa [#allocation3], 1 }
 0x56c   :  { %3358 = vsyncpa [#allocation5], 1 }

</bundles_post_ra>
